<compile_context>
chip_gen: v7x
topology: tpu7x:2x2x1
jax: 0.10.0
libtpu: 0.0.40
codegen_flags: <defaults>
</compile_context>

<pallas_src>
import functools

import jax
import jax.numpy as jnp
from jax.experimental import pallas as pl
from jax.experimental.pallas import tpu as pltpu

IN_FEATURES = 4096
HIDDEN = 512
NUM_CLASSES = 10
LANE = 128                 # class dim padded to a multiple of this (dense vst)
MAX_TILE_SINGLE_TC = 512   # rows per grid step on single-TC chips (v5e, v6e)
MAX_TILE_DUAL_TC = 256     # rows per grid step on v7x unless B >= 2048


def _round_up(x, m):
    return (x + m - 1) // m * m


@functools.lru_cache(maxsize=None)
def _tensorcores_per_chip():
    """Best-effort detection of TensorCores per chip (2 on v7x, else 1)."""
    try:
        kind = jax.devices()[0].device_kind.lower()
    except Exception:
        return 1
    return 2 if ("v7" in kind or "7x" in kind) else 1


def _choose_batch_tile(batch, num_tc):
    """Multiple of 16 (bf16 sublane packing).  Single-TC chips: largest tile that
    fits (up to 512) -- extra grid steps are pure overhead there.  v7x (2 TCs):
    keep >= 2 grid steps so dimension_semantics=("parallel",) can shard the
    batch axis across both cores."""
    b16 = _round_up(batch, 16)
    if num_tc <= 1:
        return min(MAX_TILE_SINGLE_TC, b16)
    if b16 <= 32:
        return b16
    cap = MAX_TILE_SINGLE_TC if b16 >= 2048 else MAX_TILE_DUAL_TC
    return min(cap, _round_up(b16 // 2, 16))


def _mlp_kernel(x_ref, w1_ref, b1_ref, w2_ref, b2_ref, w3_ref, b3_ref, o_ref):
    # Cast the x tile to bf16 in-kernel (free vs. a separate wrapper-side HBM
    # pass); no-op if the caller already supplies bf16 activations.
    x = x_ref[...]
    if x.dtype != jnp.bfloat16:
        x = x.astype(jnp.bfloat16)
    # linear1 + ReLU  (dropout = identity at inference)
    h = jnp.dot(x, w1_ref[...], preferred_element_type=jnp.float32)
    h = jnp.maximum(h + b1_ref[...], 0.0).astype(jnp.bfloat16)
    # linear2 + ReLU
    h = jnp.dot(h, w2_ref[...], preferred_element_type=jnp.float32)
    h = jnp.maximum(h + b2_ref[...], 0.0).astype(jnp.bfloat16)
    # linear3 (class dim padded to a 128-lane multiple -> dense, unmasked stores)
    o = jnp.dot(h, w3_ref[...], preferred_element_type=jnp.float32)
    o_ref[...] = (o + b3_ref[...]).astype(o_ref.dtype)


def _resident_spec(shape, single_buffer):
    """BlockSpec for an operand whose block never changes across the grid."""
    index_map = lambda i: (0,) * len(shape)
    if single_buffer:
        # Constant index_map -> fetched once; a second buffer would be dead VMEM.
        return pl.BlockSpec(shape, index_map,
                            pipeline_mode=pl.Buffered(buffer_count=1))
    return pl.BlockSpec(shape, index_map)


@functools.partial(jax.jit, static_argnames=("num_classes", "single_buffer_weights"))
def _forward_impl(x, w1, b1, w2, b2, w3, b3, *, num_classes, single_buffer_weights):
    B = x.shape[0]
    ncp = w3.shape[1]                      # class dim already padded to LANE
    x_item = jnp.dtype(x.dtype).itemsize

    num_tc = _tensorcores_per_chip()
    tile = _choose_batch_tile(B, num_tc)
    Bp = _round_up(B, tile)
    if Bp != B:                            # skip the pad copy when already aligned
        x = jnp.pad(x, ((0, Bp - B), (0, 0)))

    # VMEM budget from the actual tile footprint (incl. materialized h
    # intermediates), capped well below v7x's 64 MiB physical VMEM per TC.
    wbuf = 1 if single_buffer_weights else 2
    w_bytes = (IN_FEATURES * HIDDEN + HIDDEN * HIDDEN + HIDDEN * ncp) * 2   # bf16
    b_bytes = (2 * HIDDEN + ncp) * 4                                        # f32
    vmem_bytes = (
        2 * tile * IN_FEATURES * x_item    # x tiles (double-buffered)
        + 2 * tile * ncp * 4               # out tiles (f32, double-buffered)
        + wbuf * (w_bytes + b_bytes)       # resident weights + biases
        + 2 * tile * HIDDEN * (4 + 2)      # h1/h2 f32 + bf16 intermediates
        + tile * ncp * 4                   # f32 logits before the store cast
    )
    vmem_limit = min(48 << 20, max(int(1.5 * vmem_bytes), 16 << 20))

    cost = pl.CostEstimate(
        flops=2 * Bp * (IN_FEATURES * HIDDEN + HIDDEN * HIDDEN + HIDDEN * ncp),
        transcendentals=0,
        bytes_accessed=Bp * IN_FEATURES * x_item + w_bytes + b_bytes + Bp * ncp * 4,
    )

    out = pl.pallas_call(
        _mlp_kernel,
        out_shape=jax.ShapeDtypeStruct((Bp, ncp), jnp.float32),
        grid_spec=pltpu.PrefetchScalarGridSpec(
            num_scalar_prefetch=0,
            grid=(Bp // tile,),
            in_specs=[
                pl.BlockSpec((tile, IN_FEATURES), lambda i: (i, 0)),            # x
                _resident_spec((IN_FEATURES, HIDDEN), single_buffer_weights),   # W1
                _resident_spec((1, HIDDEN), single_buffer_weights),             # b1
                _resident_spec((HIDDEN, HIDDEN), single_buffer_weights),        # W2
                _resident_spec((1, HIDDEN), single_buffer_weights),             # b2
                _resident_spec((HIDDEN, ncp), single_buffer_weights),           # W3
                _resident_spec((1, ncp), single_buffer_weights),                # b3
            ],
            out_specs=pl.BlockSpec((tile, ncp), lambda i: (i, 0)),
        ),
        compiler_params=pltpu.CompilerParams(
            dimension_semantics=("parallel",),
            vmem_limit_bytes=vmem_limit,
        ),
        cost_estimate=cost,
    )(x, w1, b1, w2, b2, w3, b3)

    return out[:B, :num_classes]


def prepare_params(w1, b1, w2, b2, w3, b3):
    """One-time parameter prep (keep OUT of the per-call hot path).
    Weights are expected pre-transposed to (in_features, out_features); they are
    stored as bf16, the class dim is padded to a 128-lane multiple, and biases
    become (1, out) f32."""
    num_classes = w3.shape[1]
    ncp = max(LANE, _round_up(num_classes, LANE))
    w3p = w3.astype(jnp.bfloat16)
    b3p = b3.reshape(1, -1).astype(jnp.float32)
    if ncp != num_classes:
        w3p = jnp.pad(w3p, ((0, 0), (0, ncp - num_classes)))
        b3p = jnp.pad(b3p, ((0, 0), (0, ncp - num_classes)))
    return {
        "w1": w1.astype(jnp.bfloat16), "b1": b1.reshape(1, -1).astype(jnp.float32),
        "w2": w2.astype(jnp.bfloat16), "b2": b2.reshape(1, -1).astype(jnp.float32),
        "w3": w3p, "b3": b3p, "num_classes": int(num_classes),
    }


_SINGLE_BUFFER_OK = True   # flipped off if this JAX lacks pl.Buffered(1) support


def fedma_classifier_forward(x, params):
    """x: (B, 4096) float32 or bfloat16.  Returns (B, num_classes) f32 logits."""
    global _SINGLE_BUFFER_OK
    args = (x, params["w1"], params["b1"], params["w2"], params["b2"],
            params["w3"], params["b3"])
    nc = params["num_classes"]
    if _SINGLE_BUFFER_OK:
        try:
            return _forward_impl(*args, num_classes=nc, single_buffer_weights=True)
        except Exception:
            _SINGLE_BUFFER_OK = False   # retry with default double buffering
    return _forward_impl(*args, num_classes=nc, single_buffer_weights=False)


def _init_linear(key, in_f, out_f):
    """Deterministic init matching nn.Linear's U(-1/sqrt(in), 1/sqrt(in)),
    stored pre-transposed as (in_features, out_features)."""
    kw, kb = jax.random.split(key)
    bound = 1.0 / jnp.sqrt(jnp.float32(in_f))
    w = jax.random.uniform(kw, (in_f, out_f), jnp.float32, -bound, bound)
    b = jax.random.uniform(kb, (out_f,), jnp.float32, -bound, bound)
    return w, b


if __name__ == "__main__":
    key = jax.random.PRNGKey(0)
    k_x, k1, k2, k3 = jax.random.split(key, 4)

    # Example input: batch=2, flattened VGG features of size 4096 (f32; callers
    # may pass bf16 instead to halve x HBM traffic -- the kernel casts either way).
    x = jax.random.normal(k_x, (2, IN_FEATURES), jnp.float32)

    w1, b1 = _init_linear(k1, IN_FEATURES, HIDDEN)
    w2, b2 = _init_linear(k2, HIDDEN, HIDDEN)
    w3, b3 = _init_linear(k3, HIDDEN, NUM_CLASSES)

    params = prepare_params(w1, b1, w2, b2, w3, b3)   # once, outside the hot path
    out = fedma_classifier_forward(x, params)
    out = jax.block_until_ready(out)

    # Reference in plain f32 JAX (kernel runs bf16 on the MXU -> loose tolerance).
    h = jnp.maximum(x @ w1 + b1, 0.0)
    h = jnp.maximum(h @ w2 + b2, 0.0)
    ref = h @ w3 + b3

    assert out.shape == (2, NUM_CLASSES), out.shape
    assert jnp.allclose(out, ref, atol=3e-2, rtol=3e-2), "mismatch vs reference"

    print("KERNEL_OK")
</pallas_src>

<mosaic_0001>
module attributes {stable_mosaic.version = 11 : i64} {
  func.func @_mlp_kernel(%arg0: i32, %arg1: memref<16x4096xf32, #tpu.memory_space<vmem>>, %arg2: memref<4096x512xbf16, #tpu.memory_space<vmem>>, %arg3: memref<1x512xf32, #tpu.memory_space<vmem>>, %arg4: memref<512x512xbf16, #tpu.memory_space<vmem>>, %arg5: memref<1x512xf32, #tpu.memory_space<vmem>>, %arg6: memref<512x128xbf16, #tpu.memory_space<vmem>>, %arg7: memref<1x128xf32, #tpu.memory_space<vmem>>, %arg8: memref<16x128xf32, #tpu.memory_space<vmem>>) attributes {dimension_semantics = [#tpu.dimension_semantics<parallel>], iteration_bounds = array<i64: 1>, scalar_prefetch = 0 : i64, scratch_operands = 0 : i64, tpu.core_type = #tpu.core_type<tc>, window_params = [{transform_indices = @transform_0, window_bounds = array<i64: 16, 4096>}, {pipeline_mode = #tpu.pipeline_mode<synchronous>, transform_indices = @transform_1, window_bounds = array<i64: 4096, 512>}, {pipeline_mode = #tpu.pipeline_mode<synchronous>, transform_indices = @transform_2, window_bounds = array<i64: 1, 512>}, {pipeline_mode = #tpu.pipeline_mode<synchronous>, transform_indices = @transform_3, window_bounds = array<i64: 512, 512>}, {pipeline_mode = #tpu.pipeline_mode<synchronous>, transform_indices = @transform_4, window_bounds = array<i64: 1, 512>}, {pipeline_mode = #tpu.pipeline_mode<synchronous>, transform_indices = @transform_5, window_bounds = array<i64: 512, 128>}, {pipeline_mode = #tpu.pipeline_mode<synchronous>, transform_indices = @transform_6, window_bounds = array<i64: 1, 128>}, {transform_indices = @transform_7, window_bounds = array<i64: 16, 128>}]} {
    %c0 = arith.constant 0 : index
    %c0_0 = arith.constant 0 : index
    %0 = vector.load %arg1[%c0, %c0_0] : memref<16x4096xf32, #tpu.memory_space<vmem>>, vector<16x4096xf32>
    %1 = arith.truncf %0 : vector<16x4096xf32> to vector<16x4096xbf16>
    %c0_1 = arith.constant 0 : index
    %c0_2 = arith.constant 0 : index
    %2 = vector.load %arg2[%c0_1, %c0_2] : memref<4096x512xbf16, #tpu.memory_space<vmem>>, vector<4096x512xbf16>
    %cst = arith.constant dense<0.000000e+00> : vector<16x512xf32>
    %3 = tpu.matmul %1, %2, %cst {dimension_numbers = #tpu.dot_dimension_numbers<[1], [0], [0], [1], [0, 0, 1, 1], [], []>} : vector<16x4096xbf16>, vector<4096x512xbf16>, vector<16x512xf32> -> vector<16x512xf32>
    %c0_3 = arith.constant 0 : index
    %c0_4 = arith.constant 0 : index
    %4 = vector.load %arg3[%c0_3, %c0_4] : memref<1x512xf32, #tpu.memory_space<vmem>>, vector<1x512xf32>
    %5 = vector.broadcast %4 : vector<1x512xf32> to vector<16x512xf32>
    %6 = arith.addf %3, %5 : vector<16x512xf32>
    %cst_5 = arith.constant 0.000000e+00 : f32
    %7 = vector.broadcast %cst_5 : f32 to vector<16x512xf32>
    %8 = arith.maximumf %6, %7 : vector<16x512xf32>
    %9 = arith.truncf %8 : vector<16x512xf32> to vector<16x512xbf16>
    %c0_6 = arith.constant 0 : index
    %c0_7 = arith.constant 0 : index
    %10 = vector.load %arg4[%c0_6, %c0_7] : memref<512x512xbf16, #tpu.memory_space<vmem>>, vector<512x512xbf16>
    %cst_8 = arith.constant dense<0.000000e+00> : vector<16x512xf32>
    %11 = tpu.matmul %9, %10, %cst_8 {dimension_numbers = #tpu.dot_dimension_numbers<[1], [0], [0], [1], [0, 0, 1, 1], [], []>} : vector<16x512xbf16>, vector<512x512xbf16>, vector<16x512xf32> -> vector<16x512xf32>
    %c0_9 = arith.constant 0 : index
    %c0_10 = arith.constant 0 : index
    %12 = vector.load %arg5[%c0_9, %c0_10] : memref<1x512xf32, #tpu.memory_space<vmem>>, vector<1x512xf32>
    %13 = vector.broadcast %12 : vector<1x512xf32> to vector<16x512xf32>
    %14 = arith.addf %11, %13 : vector<16x512xf32>
    %cst_11 = arith.constant 0.000000e+00 : f32
    %15 = vector.broadcast %cst_11 : f32 to vector<16x512xf32>
    %16 = arith.maximumf %14, %15 : vector<16x512xf32>
    %17 = arith.truncf %16 : vector<16x512xf32> to vector<16x512xbf16>
    %c0_12 = arith.constant 0 : index
    %c0_13 = arith.constant 0 : index
    %18 = vector.load %arg6[%c0_12, %c0_13] : memref<512x128xbf16, #tpu.memory_space<vmem>>, vector<512x128xbf16>
    %cst_14 = arith.constant dense<0.000000e+00> : vector<16x128xf32>
    %19 = tpu.matmul %17, %18, %cst_14 {dimension_numbers = #tpu.dot_dimension_numbers<[1], [0], [0], [1], [0, 0, 1, 1], [], []>} : vector<16x512xbf16>, vector<512x128xbf16>, vector<16x128xf32> -> vector<16x128xf32>
    %c0_15 = arith.constant 0 : index
    %c0_16 = arith.constant 0 : index
    %20 = vector.load %arg7[%c0_15, %c0_16] : memref<1x128xf32, #tpu.memory_space<vmem>>, vector<1x128xf32>
    %21 = vector.broadcast %20 : vector<1x128xf32> to vector<16x128xf32>
    %22 = arith.addf %19, %21 : vector<16x128xf32>
    %c0_17 = arith.constant 0 : index
    %c0_18 = arith.constant 0 : index
    %23 = vector.load %arg8[%c0_17, %c0_18] : memref<16x128xf32, #tpu.memory_space<vmem>>, vector<16x128xf32>
    tpu.vector_store %arg8[%c0_17, %c0_18], %22 {strides = array<i32>} : memref<16x128xf32, #tpu.memory_space<vmem>>, vector<16x128xf32>,
    return
  }
  func.func @transform_0(%arg0: i32) -> (i32, i32) {
    %c0_i32 = arith.constant 0 : i32
    %c0_i32_0 = arith.constant 0 : i32
    return %arg0, %c0_i32 : i32, i32
  }
  func.func @transform_1(%arg0: i32) -> (i32, i32) {
    %c0_i32 = arith.constant 0 : i32
    %c0_i32_0 = arith.constant 0 : i32
    %c0_i32_1 = arith.constant 0 : i32
    return %c0_i32, %c0_i32_0 : i32, i32
  }
  func.func @transform_2(%arg0: i32) -> (i32, i32) {
    %c0_i32 = arith.constant 0 : i32
    %c0_i32_0 = arith.constant 0 : i32
    %c0_i32_1 = arith.constant 0 : i32
    return %c0_i32, %c0_i32_0 : i32, i32
  }
  func.func @transform_3(%arg0: i32) -> (i32, i32) {
    %c0_i32 = arith.constant 0 : i32
    %c0_i32_0 = arith.constant 0 : i32
    %c0_i32_1 = arith.constant 0 : i32
    return %c0_i32, %c0_i32_0 : i32, i32
  }
  func.func @transform_4(%arg0: i32) -> (i32, i32) {
    %c0_i32 = arith.constant 0 : i32
    %c0_i32_0 = arith.constant 0 : i32
    %c0_i32_1 = arith.constant 0 : i32
    return %c0_i32, %c0_i32_0 : i32, i32
  }
  func.func @transform_5(%arg0: i32) -> (i32, i32) {
    %c0_i32 = arith.constant 0 : i32
    %c0_i32_0 = arith.constant 0 : i32
    %c0_i32_1 = arith.constant 0 : i32
    return %c0_i32, %c0_i32_0 : i32, i32
  }
  func.func @transform_6(%arg0: i32) -> (i32, i32) {
    %c0_i32 = arith.constant 0 : i32
    %c0_i32_0 = arith.constant 0 : i32
    %c0_i32_1 = arith.constant 0 : i32
    return %c0_i32, %c0_i32_0 : i32, i32
  }
  func.func @transform_7(%arg0: i32) -> (i32, i32) {
    %c0_i32 = arith.constant 0 : i32
    %c0_i32_0 = arith.constant 0 : i32
    return %arg0, %c0_i32 : i32, i32
  }
}

module attributes {stable_mosaic.version = 11 : i64} {
  func.func @_mlp_kernel(%arg0: i32, %arg1: memref<16x4096xf32, #tpu.memory_space<vmem>>, %arg2: memref<4096x512xbf16, #tpu.memory_space<vmem>>, %arg3: memref<1x512xf32, #tpu.memory_space<vmem>>, %arg4: memref<512x512xbf16, #tpu.memory_space<vmem>>, %arg5: memref<1x512xf32, #tpu.memory_space<vmem>>, %arg6: memref<512x128xbf16, #tpu.memory_space<vmem>>, %arg7: memref<1x128xf32, #tpu.memory_space<vmem>>, %arg8: memref<16x128xf32, #tpu.memory_space<vmem>>) attributes {dimension_semantics = [#tpu.dimension_semantics<parallel>], iteration_bounds = array<i64: 1>, scalar_prefetch = 0 : i64, scratch_operands = 0 : i64, tpu.core_type = #tpu.core_type<tc>, window_params = [{transform_indices = @transform_0, window_bounds = array<i64: 16, 4096>}, {pipeline_mode = #tpu.pipeline_mode<synchronous>, transform_indices = @transform_1, window_bounds = array<i64: 4096, 512>}, {pipeline_mode = #tpu.pipeline_mode<synchronous>, transform_indices = @transform_2, window_bounds = array<i64: 1, 512>}, {pipeline_mode = #tpu.pipeline_mode<synchronous>, transform_indices = @transform_3, window_bounds = array<i64: 512, 512>}, {pipeline_mode = #tpu.pipeline_mode<synchronous>, transform_indices = @transform_4, window_bounds = array<i64: 1, 512>}, {pipeline_mode = #tpu.pipeline_mode<synchronous>, transform_indices = @transform_5, window_bounds = array<i64: 512, 128>}, {pipeline_mode = #tpu.pipeline_mode<synchronous>, transform_indices = @transform_6, window_bounds = array<i64: 1, 128>}, {transform_indices = @transform_7, window_bounds = array<i64: 16, 128>}]} {
    %c0 = arith.constant 0 : index
    %c0_0 = arith.constant 0 : index
    %0 = vector.load %arg1[%c0, %c0_0] : memref<16x4096xf32, #tpu.memory_space<vmem>>, vector<16x4096xf32>
    %1 = arith.truncf %0 : vector<16x4096xf32> to vector<16x4096xbf16>
    %c0_1 = arith.constant 0 : index
    %c0_2 = arith.constant 0 : index
    %2 = vector.load %arg2[%c0_1, %c0_2] : memref<4096x512xbf16, #tpu.memory_space<vmem>>, vector<4096x512xbf16>
    %cst = arith.constant dense<0.000000e+00> : vector<16x512xf32>
    %3 = tpu.matmul %1, %2, %cst {dimension_numbers = #tpu.dot_dimension_numbers<[1], [0], [0], [1], [0, 0, 1, 1], [], []>} : vector<16x4096xbf16>, vector<4096x512xbf16>, vector<16x512xf32> -> vector<16x512xf32>
    %c0_3 = arith.constant 0 : index
    %c0_4 = arith.constant 0 : index
    %4 = vector.load %arg3[%c0_3, %c0_4] : memref<1x512xf32, #tpu.memory_space<vmem>>, vector<1x512xf32>
    %5 = vector.broadcast %4 : vector<1x512xf32> to vector<16x512xf32>
    %6 = arith.addf %3, %5 : vector<16x512xf32>
    %cst_5 = arith.constant 0.000000e+00 : f32
    %7 = vector.broadcast %cst_5 : f32 to vector<16x512xf32>
    %8 = arith.maximumf %6, %7 : vector<16x512xf32>
    %9 = arith.truncf %8 : vector<16x512xf32> to vector<16x512xbf16>
    %c0_6 = arith.constant 0 : index
    %c0_7 = arith.constant 0 : index
    %10 = vector.load %arg4[%c0_6, %c0_7] : memref<512x512xbf16, #tpu.memory_space<vmem>>, vector<512x512xbf16>
    %cst_8 = arith.constant dense<0.000000e+00> : vector<16x512xf32>
    %11 = tpu.matmul %9, %10, %cst_8 {dimension_numbers = #tpu.dot_dimension_numbers<[1], [0], [0], [1], [0, 0, 1, 1], [], []>} : vector<16x512xbf16>, vector<512x512xbf16>, vector<16x512xf32> -> vector<16x512xf32>
    %c0_9 = arith.constant 0 : index
    %c0_10 = arith.constant 0 : index
    %12 = vector.load %arg5[%c0_9, %c0_10] : memref<1x512xf32, #tpu.memory_space<vmem>>, vector<1x512xf32>
    %13 = vector.broadcast %12 : vector<1x512xf32> to vector<16x512xf32>
    %14 = arith.addf %11, %13 : vector<16x512xf32>
    %cst_11 = arith.constant 0.000000e+00 : f32
    %15 = vector.broadcast %cst_11 : f32 to vector<16x512xf32>
    %16 = arith.maximumf %14, %15 : vector<16x512xf32>
    %17 = arith.truncf %16 : vector<16x512xf32> to vector<16x512xbf16>
    %c0_12 = arith.constant 0 : index
    %c0_13 = arith.constant 0 : index
    %18 = vector.load %arg6[%c0_12, %c0_13] : memref<512x128xbf16, #tpu.memory_space<vmem>>, vector<512x128xbf16>
    %cst_14 = arith.constant dense<0.000000e+00> : vector<16x128xf32>
    %19 = tpu.matmul %17, %18, %cst_14 {dimension_numbers = #tpu.dot_dimension_numbers<[1], [0], [0], [1], [0, 0, 1, 1], [], []>} : vector<16x512xbf16>, vector<512x128xbf16>, vector<16x128xf32> -> vector<16x128xf32>
    %c0_15 = arith.constant 0 : index
    %c0_16 = arith.constant 0 : index
    %20 = vector.load %arg7[%c0_15, %c0_16] : memref<1x128xf32, #tpu.memory_space<vmem>>, vector<1x128xf32>
    %21 = vector.broadcast %20 : vector<1x128xf32> to vector<16x128xf32>
    %22 = arith.addf %19, %21 : vector<16x128xf32>
    %c0_17 = arith.constant 0 : index
    %c0_18 = arith.constant 0 : index
    %23 = vector.load %arg8[%c0_17, %c0_18] : memref<16x128xf32, #tpu.memory_space<vmem>>, vector<16x128xf32>
    tpu.vector_store %arg8[%c0_17, %c0_18], %22 {strides = array<i32>} : memref<16x128xf32, #tpu.memory_space<vmem>>, vector<16x128xf32>,
    return
  }
  func.func @transform_0(%arg0: i32) -> (i32, i32) {
    %c0_i32 = arith.constant 0 : i32
    %c0_i32_0 = arith.constant 0 : i32
    return %arg0, %c0_i32 : i32, i32
  }
  func.func @transform_1(%arg0: i32) -> (i32, i32) {
    %c0_i32 = arith.constant 0 : i32
    %c0_i32_0 = arith.constant 0 : i32
    %c0_i32_1 = arith.constant 0 : i32
    return %c0_i32, %c0_i32_0 : i32, i32
  }
  func.func @transform_2(%arg0: i32) -> (i32, i32) {
    %c0_i32 = arith.constant 0 : i32
    %c0_i32_0 = arith.constant 0 : i32
    %c0_i32_1 = arith.constant 0 : i32
    return %c0_i32, %c0_i32_0 : i32, i32
  }
  func.func @transform_3(%arg0: i32) -> (i32, i32) {
    %c0_i32 = arith.constant 0 : i32
    %c0_i32_0 = arith.constant 0 : i32
    %c0_i32_1 = arith.constant 0 : i32
    return %c0_i32, %c0_i32_0 : i32, i32
  }
  func.func @transform_4(%arg0: i32) -> (i32, i32) {
    %c0_i32 = arith.constant 0 : i32
    %c0_i32_0 = arith.constant 0 : i32
    %c0_i32_1 = arith.constant 0 : i32
    return %c0_i32, %c0_i32_0 : i32, i32
  }
  func.func @transform_5(%arg0: i32) -> (i32, i32) {
    %c0_i32 = arith.constant 0 : i32
    %c0_i32_0 = arith.constant 0 : i32
    %c0_i32_1 = arith.constant 0 : i32
    return %c0_i32, %c0_i32_0 : i32, i32
  }
  func.func @transform_6(%arg0: i32) -> (i32, i32) {
    %c0_i32 = arith.constant 0 : i32
    %c0_i32_0 = arith.constant 0 : i32
    %c0_i32_1 = arith.constant 0 : i32
    return %c0_i32, %c0_i32_0 : i32, i32
  }
  func.func @transform_7(%arg0: i32) -> (i32, i32) {
    %c0_i32 = arith.constant 0 : i32
    %c0_i32_0 = arith.constant 0 : i32
    return %arg0, %c0_i32 : i32, i32
  }
}

</mosaic_0001>

<bundles_post_ra>
// kernel: _forward_impl.1
= control target key start
LH: loop header
LB: loop body
LE: loop exit
PB: predicated region body
PF: predicated region fallthrough
CT: control target
= control target key end

     0   :  { %12 = vsyncpa [#allocation3], 0  ;;  %s12711_s0 = inlined_call_operand.vmem [shape: f32[16,4096], index: 0, kind: input, shape index: {}]   ;;  %s12712_s1 = inlined_call_operand.hbm [shape: bf16[4096,512], index: 1, kind: input, shape index: {}]   ;;  %s12713_s2 = inlined_call_operand.hbm [shape: f32[1,512], index: 2, kind: input, shape index: {}]   ;;  %s12714_s3 = inlined_call_operand.hbm [shape: bf16[512,512], index: 3, kind: input, shape index: {}]   ;;  %s12715_s4 = inlined_call_operand.hbm [shape: f32[1,512], index: 4, kind: input, shape index: {}]   ;;  %s12716_s5 = inlined_call_operand.hbm [shape: bf16[512,128], index: 5, kind: input, shape index: {}]   ;;  %s12717_s6 = inlined_call_operand.hbm [shape: f32[1,128], index: 6, kind: input, shape index: {}]   ;;  %s12718_s7 = inlined_call_operand.vmem [shape: f32[16,128], index: 7, kind: output, shape index: {}]  }
   0x1   :  { %13 = vsyncpa [#allocation5], 0 }
   0x2   :  { %14 = vsyncpa [#allocation8], 0 }
   0x3   :  { %15 = vsyncpa [#allocation11], 0  ;;  %s12365_s24 = smov [#allocation4]   ;;  %s12366_s26 = smov [#allocation7]  }
   0x4   :  { %s36_s25 = sshll.u32 %s12365_s24, 4  ;;  %s58_s27 = sshll.u32 %s12366_s26, 4  ;;  %s37_s25 = int_to_ptr.vmem [resolvable:$true] %s36_s25  ;;  %s59_s27 = int_to_ptr.vmem [resolvable:$true] %s58_s27 }
   0x5   :  { %s12225_s30 = scalar_lea.hbm %s12713_s2, 64 }
   0x6   :  { %p12226_p0 = scmp.ne.s32.totalorder %s12713_s2, %s12225_s30  ;;  %p12229_p1 = scmp.lt.u32.totalorder %s12225_s30, %s12713_s2 }
   0x8   :  { %p12231_p2 = pnand %p12229_p1, %p12226_p0 }
   0xa   :  { %12234 = shalt.err (!%p12231_p2)
}
   0xb   :  { %s12235_s12 = scalar_lea.vmem %s37_s25, 64  ;;  %p12240_p4 = scmp.lt.s32.totalorder %s37_s25, %s37_s25 }
   0xc   :  { %p12236_p3 = scmp.ne.s32.totalorder %s37_s25, %s12235_s12  ;;  %p12241_p5 = scmp.lt.s32.totalorder %s12235_s12, %s12235_s12 }
   0xe   :  { %p12242_p6 = por %p12241_p5, %p12240_p4 }
  0x10   :  { %p12243_p7 = pnand %p12242_p6, %p12236_p3 }
  0x12   :  { %12246 = shalt.err (!%p12243_p7)
}
  0x13   :  { %39 = dma.hbm_to_vmem [thread:$0]  %s12713_s2, 64, %s37_s25, [#allocation5]  }
  0x14   :  { %s12247_s17 = scalar_lea.hbm %s12715_s4, 64 }
  0x15   :  { %p12248_p8 = scmp.ne.s32.totalorder %s12715_s4, %s12247_s17  ;;  %p12251_p9 = scmp.lt.u32.totalorder %s12247_s17, %s12715_s4 }
  0x17   :  { %p12253_p10 = pnand %p12251_p9, %p12248_p8 }
  0x19   :  { %12256 = shalt.err (!%p12253_p10)
}
  0x1a   :  { %s12257_s22 = scalar_lea.vmem %s59_s27, 64  ;;  %p12262_p12 = scmp.lt.s32.totalorder %s59_s27, %s59_s27 }
  0x1b   :  { %p12258_p11 = scmp.ne.s32.totalorder %s59_s27, %s12257_s22  ;;  %p12263_p13 = scmp.lt.s32.totalorder %s12257_s22, %s12257_s22 }
  0x1d   :  { %p12264_p0 = por %p12263_p13, %p12262_p12 }
  0x1f   :  { %p12265_p1 = pnand %p12264_p0, %p12258_p11 }
  0x21   :  { %12268 = shalt.err (!%p12265_p1)
}
  0x22   :  { %61 = dma.hbm_to_vmem [thread:$0]  %s12715_s4, 64, %s59_s27, [#allocation8]  }
  0x23   :  { %s12367_s24 = smov [#allocation2]   ;;  %s12269_s29 = scalar_lea.hbm %s12712_s1, 131072 }
  0x24   :  { %s23_s25 = sshll.u32 %s12367_s24, 4  ;;  %p12270_p2 = scmp.ne.s32.totalorder %s12712_s1, %s12269_s29  ;;  %s24_s25 = int_to_ptr.vmem [resolvable:$true] %s23_s25 }
  0x25   :  { %p12273_p3 = scmp.lt.u32.totalorder %s12269_s29, %s12712_s1 }
  0x27   :  { %p12275_p4 = pnand %p12273_p3, %p12270_p2 }
  0x29   :  { %12278 = shalt.err (!%p12275_p4)
}
  0x2a   :  { %s12279_s11 = scalar_lea.vmem %s24_s25, 131072  ;;  %p12284_p6 = scmp.lt.s32.totalorder %s24_s25, %s24_s25 }
  0x2b   :  { %p12280_p5 = scmp.ne.s32.totalorder %s24_s25, %s12279_s11  ;;  %p12285_p7 = scmp.lt.s32.totalorder %s12279_s11, %s12279_s11 }
  0x2d   :  { %p12286_p8 = por %p12285_p7, %p12284_p6 }
  0x2f   :  { %p12287_p9 = pnand %p12286_p8, %p12280_p5 }
  0x31   :  { %12290 = shalt.err (!%p12287_p9)
}
  0x32   :  { %s12368_s4 = smov 256   ;;  %s12369_s27 = smov 16  }
  0x33   :  { %29 = dma.hbm_to_vmem [thread:$0]  %s12712_s1, 131072, %s24_s25, [#allocation3], %s12368_s4, %s12368_s4, %s12369_s27  }
  0x34   :  { %s12370_s14 = smov [#allocation6]   ;;  %s12371_s16 = smov [#allocation9]  }
  0x35   :  { %s45_s15 = sshll.u32 %s12370_s14, 4  ;;  %s67_s17 = sshll.u32 %s12371_s16, 4  ;;  %s46_s15 = int_to_ptr.vmem [resolvable:$true] %s45_s15  ;;  %s68_s17 = int_to_ptr.vmem [resolvable:$true] %s67_s17 }
  0x36   :  { %s12291_s20 = scalar_lea.hbm %s12714_s3, 16384 }
  0x37   :  { %p12292_p10 = scmp.ne.s32.totalorder %s12714_s3, %s12291_s20  ;;  %p12295_p11 = scmp.lt.u32.totalorder %s12291_s20, %s12714_s3 }
  0x39   :  { %p12297_p12 = pnand %p12295_p11, %p12292_p10 }
  0x3b   :  { %12300 = shalt.err (!%p12297_p12)
}
  0x3c   :  { %s12301_s1 = scalar_lea.vmem %s46_s15, 16384  ;;  %p12306_p0 = scmp.lt.s32.totalorder %s46_s15, %s46_s15 }
  0x3d   :  { %p12302_p13 = scmp.ne.s32.totalorder %s46_s15, %s12301_s1  ;;  %p12307_p1 = scmp.lt.s32.totalorder %s12301_s1, %s12301_s1 }
  0x3f   :  { %p12308_p2 = por %p12307_p1, %p12306_p0 }
  0x41   :  { %p12309_p3 = pnand %p12308_p2, %p12302_p13 }
  0x43   :  { %12312 = shalt.err (!%p12309_p3)
}
  0x44   :  { %51 = dma.hbm_to_vmem [thread:$0]  %s12714_s3, 16384, %s46_s15, [#allocation5], %s12368_s4, %s12368_s4, %s12369_s27  }
  0x45   :  { %s12313_s29 = scalar_lea.hbm %s12716_s5, 4096 }
  0x46   :  { %p12314_p4 = scmp.ne.s32.totalorder %s12716_s5, %s12313_s29  ;;  %p12317_p5 = scmp.lt.u32.totalorder %s12313_s29, %s12716_s5 }
  0x48   :  { %p12319_p6 = pnand %p12317_p5, %p12314_p4 }
  0x4a   :  { %12322 = shalt.err (!%p12319_p6)
}
  0x4b   :  { %s12323_s11 = scalar_lea.vmem %s68_s17, 4096  ;;  %p12328_p8 = scmp.lt.s32.totalorder %s68_s17, %s68_s17 }
  0x4c   :  { %p12324_p7 = scmp.ne.s32.totalorder %s68_s17, %s12323_s11  ;;  %p12329_p9 = scmp.lt.s32.totalorder %s12323_s11, %s12323_s11 }
  0x4e   :  { %p12330_p10 = por %p12329_p9, %p12328_p8 }
  0x50   :  { %p12331_p11 = pnand %p12330_p10, %p12324_p7 }
  0x52   :  { %12334 = shalt.err (!%p12331_p11)
}
  0x53   :  { %s12372_s3 = smov 64   ;;  %s12373_s4 = smov 4  }
  0x54   :  { %73 = dma.hbm_to_vmem [thread:$0]  %s12716_s5, 4096, %s68_s17, [#allocation8], %s12372_s3, %s12372_s3, %s12373_s4  }
  0x55   :  { %s12374_s13 = smov [#allocation10]   ;;  %s12335_s18 = scalar_lea.hbm %s12717_s6, 16 }
  0x56   :  { %s80_s14 = sshll.u32 %s12374_s13, 4  ;;  %p12336_p12 = scmp.ne.s32.totalorder %s12717_s6, %s12335_s18  ;;  %s81_s14 = int_to_ptr.vmem [resolvable:$true] %s80_s14 }
  0x57   :  { %p12339_p13 = scmp.lt.u32.totalorder %s12335_s18, %s12717_s6 }
  0x59   :  { %p12341_p0 = pnand %p12339_p13, %p12336_p12 }
  0x5b   :  { %12344 = shalt.err (!%p12341_p0)
}
  0x5c   :  { %s12345_s2 = scalar_lea.vmem %s81_s14, 16  ;;  %s12349_s5 = scalar_lea.vmem %s81_s14, 32 }
  0x5d   :  { %p12346_p1 = scmp.ne.s32.totalorder %s81_s14, %s12345_s2  ;;  %p12350_p2 = scmp.lt.s32.totalorder %s81_s14, %s81_s14 }
  0x5e   :  { %p12351_p3 = scmp.lt.s32.totalorder %s12349_s5, %s12345_s2 }
  0x60   :  { %p12352_p4 = por %p12351_p3, %p12350_p2 }
  0x62   :  { %p12353_p5 = pnand %p12352_p4, %p12346_p1 }
  0x64   :  { %12356 = shalt.err (!%p12353_p5)
}
  0x65   :  { %83 = dma.hbm_to_vmem [thread:$0]  %s12717_s6, 16, %s81_s14, [#allocation11]  }
  0x66   :  { %12357 = dma.done.wait [#allocation3], 131072  }
  0x67   :  { %12358 = vsyncadd [#allocation3], 4294836224 }
  0x68   :  { %12359 = dma.done.wait [#allocation5], 16448  }
  0x69   :  { %12360 = vsyncadd [#allocation5], 4294950848 }
  0x6a   :  { %12361 = dma.done.wait [#allocation8], 4160  }
  0x6b   :  { %12362 = vsyncadd [#allocation8], 4294963136 }
  0x6c   :  { %12363 = dma.done.wait [#allocation11], 16  }
  0x6d   :  { %12364 = vsyncadd [#allocation11], 4294967280  ;;  %v10465_v0 = vld [vmem:[#allocation2 + $0x4] ss:$16 sps:$4 sm:$0xff]   ;;  %v10467_v1 = vld [vmem:[#allocation2 + $0xc] ss:$16 sps:$4 sm:$0xff]  }
  0x6e   :  { %6365 = vmatprep.subr.bf16.mxu0 %v10465_v0  ;;  %v10469_v2 = vld [vmem:[#allocation2] ss:$16 sps:$4 sm:$0xff]   ;;  %v10470_v3 = vld [vmem:[#allocation2 + $0x8] ss:$16 sps:$4 sm:$0xff]   ;;  %7053 = vmatprep.subr.bf16.mxu1 %v10467_v1  ;;  %v10471_v4 = vld [vmem:[#allocation2 + $0x24] ss:$16 sps:$4 sm:$0xff]  }
  0x6f   :  { %6366 = vmatpush1.bf16.msra.mxu0 %v10469_v2  ;;  %7054 = vmatpush1.bf16.msra.mxu1 %v10470_v3  ;;  %v10473_v5 = vld [vmem:[#allocation2 + $0x2c] ss:$16 sps:$4 sm:$0xff]   ;;  %v10475_v6 = vld [vmem:[#allocation2 + $0x20] ss:$16 sps:$4 sm:$0xff]   ;;  %v10476_v7 = vld [vmem:[#allocation2 + $0x28] ss:$16 sps:$4 sm:$0xff]  }
  0x70   :  { %6367 = vmatprep.subr.bf16.mxu0 %v10471_v4  ;;  %7055 = vmatprep.subr.bf16.mxu1 %v10473_v5  ;;  %v10477_v8 = vld [vmem:[#allocation2 + $0x44] ss:$16 sps:$4 sm:$0xff]   ;;  %v10479_v9 = vld [vmem:[#allocation2 + $0x4c] ss:$16 sps:$4 sm:$0xff]   ;;  %v10481_v10 = vld [vmem:[#allocation2 + $0x40] ss:$16 sps:$4 sm:$0xff]  }
  0x71   :  { %v10482_v11 = vld [vmem:[#allocation2 + $0x48] ss:$16 sps:$4 sm:$0xff]   ;;  %v10483_v12 = vld [vmem:[#allocation2 + $0x64] ss:$16 sps:$4 sm:$0xff]   ;;  %v10485_v13 = vld [vmem:[#allocation2 + $0x6c] ss:$16 sps:$4 sm:$0xff]  }
  0x72   :  { %v10487_v14 = vld [vmem:[#allocation2 + $0x60] ss:$16 sps:$4 sm:$0xff]   ;;  %v10488_v15 = vld [vmem:[#allocation2 + $0x68] ss:$16 sps:$4 sm:$0xff]   ;;  %v10489_v16 = vld [vmem:[#allocation2 + $0x84] ss:$16 sps:$4 sm:$0xff]  }
  0x73   :  { %6368 = vmatpush1.bf16.msra.mxu0 %v10475_v6  ;;  %7056 = vmatpush1.bf16.msra.mxu1 %v10476_v7  ;;  %v10491_v17 = vld [vmem:[#allocation2 + $0x8c] ss:$16 sps:$4 sm:$0xff]   ;;  %v10493_v18 = vld [vmem:[#allocation2 + $0x80] ss:$16 sps:$4 sm:$0xff]   ;;  %v10494_v19 = vld [vmem:[#allocation2 + $0x88] ss:$16 sps:$4 sm:$0xff]  }
  0x74   :  { %6369 = vmatprep.subr.bf16.mxu0 %v10477_v8  ;;  %7057 = vmatprep.subr.bf16.mxu1 %v10479_v9  ;;  %v10495_v20 = vld [vmem:[#allocation2 + $0xa4] ss:$16 sps:$4 sm:$0xff]   ;;  %v10497_v21 = vld [vmem:[#allocation2 + $0xac] ss:$16 sps:$4 sm:$0xff]   ;;  %v10499_v22 = vld [vmem:[#allocation2 + $0xa0] ss:$16 sps:$4 sm:$0xff]  }
  0x75   :  { %v10500_v23 = vld [vmem:[#allocation2 + $0xa8] ss:$16 sps:$4 sm:$0xff]   ;;  %v10501_v24 = vld [vmem:[#allocation2 + $0xc4] ss:$16 sps:$4 sm:$0xff]   ;;  %v10503_v25 = vld [vmem:[#allocation2 + $0xcc] ss:$16 sps:$4 sm:$0xff]  }
  0x76   :  { %v10505_v26 = vld [vmem:[#allocation2 + $0xc0] ss:$16 sps:$4 sm:$0xff]   ;;  %v10506_v27 = vld [vmem:[#allocation2 + $0xc8] ss:$16 sps:$4 sm:$0xff]   ;;  %v10507_v28 = vld [vmem:[#allocation2 + $0xe4] ss:$16 sps:$4 sm:$0xff]  }
  0x77   :  { %6370 = vmatpush1.bf16.msra.mxu0 %v10481_v10  ;;  %7058 = vmatpush1.bf16.msra.mxu1 %v10482_v11  ;;  %v10509_v29 = vld [vmem:[#allocation2 + $0xec] ss:$16 sps:$4 sm:$0xff]   ;;  %v10511_v30 = vld [vmem:[#allocation2 + $0xe0] ss:$16 sps:$4 sm:$0xff]   ;;  %v10512_v31 = vld [vmem:[#allocation2 + $0xe8] ss:$16 sps:$4 sm:$0xff]  }
  0x78   :  { %6371 = vmatprep.subr.bf16.mxu0 %v10483_v12  ;;  %7059 = vmatprep.subr.bf16.mxu1 %v10485_v13  ;;  %v10513_v32 = vld [vmem:[#allocation2 + $0x104] ss:$16 sps:$4 sm:$0xff]   ;;  %v10515_v33 = vld [vmem:[#allocation2 + $0x10c] ss:$16 sps:$4 sm:$0xff]   ;;  %v10517_v34 = vld [vmem:[#allocation2 + $0x100] ss:$16 sps:$4 sm:$0xff]  }
  0x79   :  { %v10518_v35 = vld [vmem:[#allocation2 + $0x108] ss:$16 sps:$4 sm:$0xff]   ;;  %v10519_v36 = vld [vmem:[#allocation2 + $0x124] ss:$16 sps:$4 sm:$0xff]   ;;  %v10521_v37 = vld [vmem:[#allocation2 + $0x12c] ss:$16 sps:$4 sm:$0xff]  }
  0x7a   :  { %v10523_v38 = vld [vmem:[#allocation2 + $0x120] ss:$16 sps:$4 sm:$0xff]   ;;  %v10524_v39 = vld [vmem:[#allocation2 + $0x128] ss:$16 sps:$4 sm:$0xff]   ;;  %v10525_v40 = vld [vmem:[#allocation2 + $0x144] ss:$16 sps:$4 sm:$0xff]  }
  0x7b   :  { %6372 = vmatpush1.bf16.msra.mxu0 %v10487_v14  ;;  %7060 = vmatpush1.bf16.msra.mxu1 %v10488_v15  ;;  %v10527_v41 = vld [vmem:[#allocation2 + $0x14c] ss:$16 sps:$4 sm:$0xff]   ;;  %v10529_v42 = vld [vmem:[#allocation2 + $0x140] ss:$16 sps:$4 sm:$0xff]   ;;  %v10530_v43 = vld [vmem:[#allocation2 + $0x148] ss:$16 sps:$4 sm:$0xff]  }
  0x7c   :  { %6373 = vmatprep.subr.bf16.mxu0 %v10489_v16  ;;  %7061 = vmatprep.subr.bf16.mxu1 %v10491_v17  ;;  %v10531_v44 = vld [vmem:[#allocation2 + $0x164] ss:$16 sps:$4 sm:$0xff]   ;;  %v10533_v45 = vld [vmem:[#allocation2 + $0x16c] ss:$16 sps:$4 sm:$0xff]   ;;  %v10535_v48 = vld [vmem:[#allocation2 + $0x160] ss:$16 sps:$4 sm:$0xff]  }
  0x7d   :  { %v104_v46 = vld [vmem:[%s12711_s0 + $0x8] sm:$0xff]  ;;  %v10537_v51 = vld [vmem:[#allocation2 + $0x184] ss:$16 sps:$4 sm:$0xff]   ;;  %v10541_v53 = vld [vmem:[#allocation2 + $0x180] ss:$16 sps:$4 sm:$0xff]  }
  0x7e   :  { %v136_v47 = vld [vmem:[%s12711_s0 + $0x108] sm:$0xff]  ;;  %v10543_v55 = vld [vmem:[#allocation2 + $0x1a4] ss:$16 sps:$4 sm:$0xff]   ;;  %v10547_v57 = vld [vmem:[#allocation2 + $0x1a0] ss:$16 sps:$4 sm:$0xff]  }
  0x7f   :  { %6374 = vmatpush1.bf16.msra.mxu0 %v10493_v18  ;;  %7062 = vmatpush1.bf16.msra.mxu1 %v10494_v19  ;;  %v10536_v49 = vld [vmem:[#allocation2 + $0x168] ss:$16 sps:$4 sm:$0xff]   ;;  %v168_v50 = vpack.c.bf16 %v136_v47, %v104_v46  ;;  %v10539_v52 = vld [vmem:[#allocation2 + $0x18c] ss:$16 sps:$4 sm:$0xff]   ;;  %v10549_v59 = vld [vmem:[#allocation2 + $0x1c4] ss:$16 sps:$4 sm:$0xff]  }
  0x80   :  { %6375 = vmatprep.subr.bf16.mxu0 %v10495_v20  ;;  %7063 = vmatprep.subr.bf16.mxu1 %v10497_v21  ;;  %v10542_v54 = vld [vmem:[#allocation2 + $0x188] ss:$16 sps:$4 sm:$0xff]   ;;  %v10545_v56 = vld [vmem:[#allocation2 + $0x1ac] ss:$16 sps:$4 sm:$0xff]   ;;  %v10553_v61 = vld [vmem:[#allocation2 + $0x1c0] ss:$16 sps:$4 sm:$0xff]  }
  0x81   :  { %6397 = vmatprep.mubr.bf16.mxu0 %v168_v50  ;;  %7085 = vmatprep.mubr.bf16.mxu1 %v168_v50  ;;  %v10548_v58 = vld [vmem:[#allocation2 + $0x1a8] ss:$16 sps:$4 sm:$0xff]   ;;  %v10551_v60 = vld [vmem:[#allocation2 + $0x1cc] ss:$16 sps:$4 sm:$0xff]   ;;  %v10555_v63 = vld [vmem:[#allocation2 + $0x1e4] ss:$16 sps:$4 sm:$0xff]  }
  0x82   :  { %v10554_v62 = vld [vmem:[#allocation2 + $0x1c8] ss:$16 sps:$4 sm:$0xff]   ;;  %v10557_v0 = vld [vmem:[#allocation2 + $0x1ec] ss:$16 sps:$4 sm:$0xff]   ;;  %v10559_v1 = vld [vmem:[#allocation2 + $0x1e0] ss:$16 sps:$4 sm:$0xff]  }
  0x83   :  { %6376 = vmatpush1.bf16.msra.mxu0 %v10499_v22  ;;  %7064 = vmatpush1.bf16.msra.mxu1 %v10500_v23  ;;  %v10560_v2 = vld [vmem:[#allocation2 + $0x1e8] ss:$16 sps:$4 sm:$0xff]   ;;  %v10563_v3 = vld [vmem:[#allocation2 + $0x204] ss:$16 sps:$4 sm:$0xff]   ;;  %v10566_v6 = vld [vmem:[#allocation2 + $0x20c] ss:$16 sps:$4 sm:$0xff]  }
  0x84   :  { %6377 = vmatprep.subr.bf16.mxu0 %v10501_v24  ;;  %7065 = vmatprep.subr.bf16.mxu1 %v10503_v25  ;;  %v103_v4 = vld [vmem:[%s12711_s0] sm:$0xff]  ;;  %v10564_v8 = vld [vmem:[#allocation2 + $0x208] ss:$16 sps:$4 sm:$0xff]   ;;  %v10572_v11 = vld [vmem:[#allocation2 + $0x22c] ss:$16 sps:$4 sm:$0xff]  }
  0x85   :  { %v135_v5 = vld [vmem:[%s12711_s0 + $0x100] sm:$0xff]  ;;  %v10570_v13 = vld [vmem:[#allocation2 + $0x228] ss:$16 sps:$4 sm:$0xff]   ;;  %v10578_v15 = vld [vmem:[#allocation2 + $0x24c] ss:$16 sps:$4 sm:$0xff]  }
  0x86   :  { %v10561_v7 = vld [vmem:[#allocation2 + $0x200] ss:$16 sps:$4 sm:$0xff]   ;;  %v167_v9 = vpack.c.bf16 %v135_v5, %v103_v4  ;;  %v10569_v10 = vld [vmem:[#allocation2 + $0x224] ss:$16 sps:$4 sm:$0xff]   ;;  %v10576_v17 = vld [vmem:[#allocation2 + $0x248] ss:$16 sps:$4 sm:$0xff]  }
  0x87   :  { %6378 = vmatpush1.bf16.msra.mxu0 %v10505_v26  ;;  %7066 = vmatpush1.bf16.msra.mxu1 %v10506_v27  ;;  %v10567_v12 = vld [vmem:[#allocation2 + $0x220] ss:$16 sps:$4 sm:$0xff]   ;;  %v10575_v14 = vld [vmem:[#allocation2 + $0x244] ss:$16 sps:$4 sm:$0xff]   ;;  %v10584_v19 = vld [vmem:[#allocation2 + $0x26c] ss:$16 sps:$4 sm:$0xff]  }
  0x88   :  { %6379 = vmatprep.subr.bf16.mxu0 %v10507_v28  ;;  %7067 = vmatprep.subr.bf16.mxu1 %v10509_v29  ;;  %v10573_v16 = vld [vmem:[#allocation2 + $0x240] ss:$16 sps:$4 sm:$0xff]   ;;  %v10581_v18 = vld [vmem:[#allocation2 + $0x264] ss:$16 sps:$4 sm:$0xff]   ;;  %v10582_v21 = vld [vmem:[#allocation2 + $0x268] ss:$16 sps:$4 sm:$0xff]  }
  0x89   :  { %v10579_v20 = vld [vmem:[#allocation2 + $0x260] ss:$16 sps:$4 sm:$0xff]   ;;  %v10587_v22 = vld [vmem:[#allocation2 + $0x284] ss:$16 sps:$4 sm:$0xff]   ;;  %v10590_v23 = vld [vmem:[#allocation2 + $0x28c] ss:$16 sps:$4 sm:$0xff]  }
  0x8a   :  { %v10585_v24 = vld [vmem:[#allocation2 + $0x280] ss:$16 sps:$4 sm:$0xff]   ;;  %v10588_v25 = vld [vmem:[#allocation2 + $0x288] ss:$16 sps:$4 sm:$0xff]   ;;  %v10593_v26 = vld [vmem:[#allocation2 + $0x2a4] ss:$16 sps:$4 sm:$0xff]  }
  0x8b   :  { %6380 = vmatpush1.bf16.msra.mxu0 %v10511_v30  ;;  %7068 = vmatpush1.bf16.msra.mxu1 %v10512_v31  ;;  %v10596_v27 = vld [vmem:[#allocation2 + $0x2ac] ss:$16 sps:$4 sm:$0xff]   ;;  %v10591_v28 = vld [vmem:[#allocation2 + $0x2a0] ss:$16 sps:$4 sm:$0xff]   ;;  %v10594_v29 = vld [vmem:[#allocation2 + $0x2a8] ss:$16 sps:$4 sm:$0xff]  }
  0x8c   :  { %6381 = vmatprep.subr.bf16.mxu0 %v10513_v32  ;;  %7069 = vmatprep.subr.bf16.mxu1 %v10515_v33  ;;  %v10599_v30 = vld [vmem:[#allocation2 + $0x2c4] ss:$16 sps:$4 sm:$0xff]   ;;  %v10602_v31 = vld [vmem:[#allocation2 + $0x2cc] ss:$16 sps:$4 sm:$0xff]   ;;  %v10615_v47 = vld [vmem:[#allocation2 + $0x320] ss:$16 sps:$4 sm:$0xff]  }
  0x8d   :  { %v106_v32 = vld [vmem:[%s12711_s0 + $0x18] sm:$0xff]  ;;  %v10653_v5 = vld [vmem:[#allocation2 + $0x3e4] ss:$16 sps:$4 sm:$0xff]  }
  0x8e   :  { %v138_v33 = vld [vmem:[%s12711_s0 + $0x118] sm:$0xff] }
  0x8f   :  { %6382 = vmatpush1.bf16.msra.mxu0 %v10517_v34  ;;  %7070 = vmatpush1.bf16.msra.mxu1 %v10518_v35  ;;  %v10597_v34 = vld [vmem:[#allocation2 + $0x2c0] ss:$16 sps:$4 sm:$0xff]   ;;  %v10600_v35 = vld [vmem:[#allocation2 + $0x2c8] ss:$16 sps:$4 sm:$0xff]   ;;  %v10620_v46 = vld [vmem:[#allocation2 + $0x32c] ss:$16 sps:$4 sm:$0xff]  }
  0x90   :  { %6383 = vmatprep.subr.bf16.mxu0 %v10519_v36  ;;  %7071 = vmatprep.subr.bf16.mxu1 %v10521_v37  ;;  %v170_v36 = vpack.c.bf16 %v138_v33, %v106_v32  ;;  %v10605_v37 = vld [vmem:[#allocation2 + $0x2e4] ss:$16 sps:$4 sm:$0xff]   ;;  %v10626_v50 = vld [vmem:[#allocation2 + $0x34c] ss:$16 sps:$4 sm:$0xff]   ;;  %v10648_v4 = vld [vmem:[#allocation2 + $0x3c8] ss:$16 sps:$4 sm:$0xff]  }
  0x91   :  { %v10686_v32 = vld [vmem:[#allocation2 + $0x48c] ss:$16 sps:$4 sm:$0xff]   ;;  %v10681_v33 = vld [vmem:[#allocation2 + $0x480] ss:$16 sps:$4 sm:$0xff]  }
  0x93   :  { %6384 = vmatpush1.bf16.msra.mxu0 %v10523_v38  ;;  %7072 = vmatpush1.bf16.msra.mxu1 %v10524_v39  ;;  %v10608_v38 = vld [vmem:[#allocation2 + $0x2ec] ss:$16 sps:$4 sm:$0xff]   ;;  %v10603_v39 = vld [vmem:[#allocation2 + $0x2e0] ss:$16 sps:$4 sm:$0xff]  }
  0x94   :  { %6385 = vmatprep.subr.bf16.mxu0 %v10525_v40  ;;  %7073 = vmatprep.subr.bf16.mxu1 %v10527_v41  ;;  %v10606_v40 = vld [vmem:[#allocation2 + $0x2e8] ss:$16 sps:$4 sm:$0xff]   ;;  %v10611_v41 = vld [vmem:[#allocation2 + $0x304] ss:$16 sps:$4 sm:$0xff]  }
  0x97   :  { %6386 = vmatpush1.bf16.msra.mxu0 %v10529_v42  ;;  %7074 = vmatpush1.bf16.msra.mxu1 %v10530_v43  ;;  %v10614_v42 = vld [vmem:[#allocation2 + $0x30c] ss:$16 sps:$4 sm:$0xff]   ;;  %v10609_v43 = vld [vmem:[#allocation2 + $0x300] ss:$16 sps:$4 sm:$0xff]  }
  0x98   :  { %6387 = vmatprep.subr.bf16.mxu0 %v10531_v44  ;;  %7075 = vmatprep.subr.bf16.mxu1 %v10533_v45  ;;  %v10612_v44 = vld [vmem:[#allocation2 + $0x308] ss:$16 sps:$4 sm:$0xff]   ;;  %v10617_v45 = vld [vmem:[#allocation2 + $0x324] ss:$16 sps:$4 sm:$0xff]  }
  0x9b   :  { %6388 = vmatpush1.bf16.msra.mxu0 %v10535_v48  ;;  %7076 = vmatpush1.bf16.msra.mxu1 %v10536_v49  ;;  %v10618_v48 = vld [vmem:[#allocation2 + $0x328] ss:$16 sps:$4 sm:$0xff]   ;;  %v10623_v49 = vld [vmem:[#allocation2 + $0x344] ss:$16 sps:$4 sm:$0xff]  }
  0x9c   :  { %6389 = vmatprep.subr.bf16.mxu0 %v10537_v51  ;;  %7077 = vmatprep.subr.bf16.mxu1 %v10539_v52  ;;  %v10621_v51 = vld [vmem:[#allocation2 + $0x340] ss:$16 sps:$4 sm:$0xff]   ;;  %v10624_v52 = vld [vmem:[#allocation2 + $0x348] ss:$16 sps:$4 sm:$0xff]  }
  0x9f   :  { %6390 = vmatpush1.bf16.msra.mxu0 %v10541_v53  ;;  %7078 = vmatpush1.bf16.msra.mxu1 %v10542_v54  ;;  %v10629_v53 = vld [vmem:[#allocation2 + $0x364] ss:$16 sps:$4 sm:$0xff]   ;;  %v10632_v54 = vld [vmem:[#allocation2 + $0x36c] ss:$16 sps:$4 sm:$0xff]  }
  0xa0   :  { %6391 = vmatprep.subr.bf16.mxu0 %v10543_v55  ;;  %7079 = vmatprep.subr.bf16.mxu1 %v10545_v56  ;;  %v10627_v55 = vld [vmem:[#allocation2 + $0x360] ss:$16 sps:$4 sm:$0xff]   ;;  %v10630_v56 = vld [vmem:[#allocation2 + $0x368] ss:$16 sps:$4 sm:$0xff]  }
  0xa3   :  { %6392 = vmatpush1.bf16.msra.mxu0 %v10547_v57  ;;  %7080 = vmatpush1.bf16.msra.mxu1 %v10548_v58  ;;  %v10635_v57 = vld [vmem:[#allocation2 + $0x384] ss:$16 sps:$4 sm:$0xff]   ;;  %v10638_v58 = vld [vmem:[#allocation2 + $0x38c] ss:$16 sps:$4 sm:$0xff]  }
  0xa4   :  { %6393 = vmatprep.subr.bf16.mxu0 %v10549_v59  ;;  %7081 = vmatprep.subr.bf16.mxu1 %v10551_v60  ;;  %v10633_v59 = vld [vmem:[#allocation2 + $0x380] ss:$16 sps:$4 sm:$0xff]   ;;  %v10636_v60 = vld [vmem:[#allocation2 + $0x388] ss:$16 sps:$4 sm:$0xff]  }
  0xa7   :  { %6394 = vmatpush1.bf16.msra.mxu0 %v10553_v61  ;;  %7082 = vmatpush1.bf16.msra.mxu1 %v10554_v62  ;;  %v10641_v61 = vld [vmem:[#allocation2 + $0x3a4] ss:$16 sps:$4 sm:$0xff]   ;;  %v10644_v62 = vld [vmem:[#allocation2 + $0x3ac] ss:$16 sps:$4 sm:$0xff]  }
  0xa8   :  { %6395 = vmatprep.subr.bf16.mxu0 %v10555_v63  ;;  %7083 = vmatprep.subr.bf16.mxu1 %v10557_v0  ;;  %v10639_v63 = vld [vmem:[#allocation2 + $0x3a0] ss:$16 sps:$4 sm:$0xff]   ;;  %v10642_v0 = vld [vmem:[#allocation2 + $0x3a8] ss:$16 sps:$4 sm:$0xff]  }
  0xab   :  { %6396 = vmatpush1.bf16.msra.mxu0 %v10559_v1  ;;  %7084 = vmatpush1.bf16.msra.mxu1 %v10560_v2  ;;  %v10647_v1 = vld [vmem:[#allocation2 + $0x3c4] ss:$16 sps:$4 sm:$0xff]   ;;  %v10650_v2 = vld [vmem:[#allocation2 + $0x3cc] ss:$16 sps:$4 sm:$0xff]  }
  0xac   :  { %6408 = vmatprep.subr.bf16.mxu0 %v10563_v3  ;;  %7096 = vmatprep.subr.bf16.mxu1 %v10566_v6  ;;  %v10645_v3 = vld [vmem:[#allocation2 + $0x3c0] ss:$16 sps:$4 sm:$0xff]   ;;  %v10656_v6 = vld [vmem:[#allocation2 + $0x3ec] ss:$16 sps:$4 sm:$0xff]  }
  0xae   :  { %6398 = vmatmul.mubr.bf16.vlgmr.msra.gmra.mrb[0].mxu0 %v167_v9  ;;  %7086 = vmatmul.mubr.bf16.vlgmr.msra.gmra.mrb[0].mxu1 %v167_v9  ;;  %v10659_v9 = vld [vmem:[#allocation2 + $0x404] ss:$16 sps:$4 sm:$0xff]  }
  0xaf   :  { %6409 = vmatpush1.bf16.msra.mxu0 %v10561_v7  ;;  %7097 = vmatpush1.bf16.msra.mxu1 %v10564_v8  ;;  %v10651_v7 = vld [vmem:[#allocation2 + $0x3e0] ss:$16 sps:$4 sm:$0xff]   ;;  %v10654_v8 = vld [vmem:[#allocation2 + $0x3e8] ss:$16 sps:$4 sm:$0xff]  }
  0xb0   :  { %6410 = vmatprep.subr.bf16.mxu0 %v10569_v10  ;;  %7098 = vmatprep.subr.bf16.mxu1 %v10572_v11  ;;  %v105_v10 = vld [vmem:[%s12711_s0 + $0x10] sm:$0xff] }
  0xb1   :  { %6440 = vmatprep.mubr.bf16.mxu0 %v170_v36  ;;  %7128 = vmatprep.mubr.bf16.mxu1 %v170_v36  ;;  %v137_v11 = vld [vmem:[%s12711_s0 + $0x110] sm:$0xff]  ;;  %v10692_v36 = vld [vmem:[#allocation2 + $0x4ac] ss:$16 sps:$4 sm:$0xff]  }
  0xb3   :  { %6411 = vmatpush1.bf16.msra.mxu0 %v10567_v12  ;;  %7099 = vmatpush1.bf16.msra.mxu1 %v10570_v13  ;;  %v10662_v12 = vld [vmem:[#allocation2 + $0x40c] ss:$16 sps:$4 sm:$0xff]   ;;  %v10657_v13 = vld [vmem:[#allocation2 + $0x400] ss:$16 sps:$4 sm:$0xff]  }
  0xb4   :  { %6412 = vmatprep.subr.bf16.mxu0 %v10575_v14  ;;  %7100 = vmatprep.subr.bf16.mxu1 %v10578_v15  ;;  %v10660_v14 = vld [vmem:[#allocation2 + $0x408] ss:$16 sps:$4 sm:$0xff]   ;;  %v169_v15 = vpack.c.bf16 %v137_v11, %v105_v10  ;;  %v10749_v11 = vld [vmem:[#allocation2 + $0x5e4] ss:$16 sps:$4 sm:$0xff]  }
  0xb5   :  { %v10744_v10 = vld [vmem:[#allocation2 + $0x5c8] ss:$16 sps:$4 sm:$0xff]  }
  0xb7   :  { %6413 = vmatpush1.bf16.msra.mxu0 %v10573_v16  ;;  %7101 = vmatpush1.bf16.msra.mxu1 %v10576_v17  ;;  %v10665_v16 = vld [vmem:[#allocation2 + $0x424] ss:$16 sps:$4 sm:$0xff]   ;;  %v10668_v17 = vld [vmem:[#allocation2 + $0x42c] ss:$16 sps:$4 sm:$0xff]  }
  0xb8   :  { %6414 = vmatprep.subr.bf16.mxu0 %v10581_v18  ;;  %7102 = vmatprep.subr.bf16.mxu1 %v10584_v19  ;;  %v108_v18 = vld [vmem:[%s12711_s0 + $0x28] sm:$0xff] }
  0xb9   :  { %v140_v19 = vld [vmem:[%s12711_s0 + $0x128] sm:$0xff] }
  0xbb   :  { %6415 = vmatpush1.bf16.msra.mxu0 %v10579_v20  ;;  %7103 = vmatpush1.bf16.msra.mxu1 %v10582_v21  ;;  %v10663_v20 = vld [vmem:[#allocation2 + $0x420] ss:$16 sps:$4 sm:$0xff]   ;;  %v10666_v21 = vld [vmem:[#allocation2 + $0x428] ss:$16 sps:$4 sm:$0xff]  }
  0xbc   :  { %6416 = vmatprep.subr.bf16.mxu0 %v10587_v22  ;;  %7104 = vmatprep.subr.bf16.mxu1 %v10590_v23  ;;  %v172_v22 = vpack.c.bf16 %v140_v19, %v108_v18  ;;  %v10671_v23 = vld [vmem:[#allocation2 + $0x444] ss:$16 sps:$4 sm:$0xff]   ;;  %v10758_v18 = vld [vmem:[#allocation2 + $0x60c] ss:$16 sps:$4 sm:$0xff]   ;;  %v10753_v19 = vld [vmem:[#allocation2 + $0x600] ss:$16 sps:$4 sm:$0xff]  }
  0xbf   :  { %6417 = vmatpush1.bf16.msra.mxu0 %v10585_v24  ;;  %7105 = vmatpush1.bf16.msra.mxu1 %v10588_v25  ;;  %v10674_v24 = vld [vmem:[#allocation2 + $0x44c] ss:$16 sps:$4 sm:$0xff]   ;;  %v10669_v25 = vld [vmem:[#allocation2 + $0x440] ss:$16 sps:$4 sm:$0xff]  }
  0xc0   :  { %6418 = vmatprep.subr.bf16.mxu0 %v10593_v26  ;;  %7106 = vmatprep.subr.bf16.mxu1 %v10596_v27  ;;  %v10672_v26 = vld [vmem:[#allocation2 + $0x448] ss:$16 sps:$4 sm:$0xff]   ;;  %v10677_v27 = vld [vmem:[#allocation2 + $0x464] ss:$16 sps:$4 sm:$0xff]  }
  0xc3   :  { %6419 = vmatpush1.bf16.msra.mxu0 %v10591_v28  ;;  %7107 = vmatpush1.bf16.msra.mxu1 %v10594_v29  ;;  %v10680_v28 = vld [vmem:[#allocation2 + $0x46c] ss:$16 sps:$4 sm:$0xff]   ;;  %v10675_v29 = vld [vmem:[#allocation2 + $0x460] ss:$16 sps:$4 sm:$0xff]  }
  0xc4   :  { %6420 = vmatprep.subr.bf16.mxu0 %v10599_v30  ;;  %7108 = vmatprep.subr.bf16.mxu1 %v10602_v31  ;;  %v10678_v30 = vld [vmem:[#allocation2 + $0x468] ss:$16 sps:$4 sm:$0xff]   ;;  %v10683_v31 = vld [vmem:[#allocation2 + $0x484] ss:$16 sps:$4 sm:$0xff]  }
  0xc7   :  { %6421 = vmatpush1.bf16.msra.mxu0 %v10597_v34  ;;  %7109 = vmatpush1.bf16.msra.mxu1 %v10600_v35  ;;  %v10684_v34 = vld [vmem:[#allocation2 + $0x488] ss:$16 sps:$4 sm:$0xff]   ;;  %v10689_v35 = vld [vmem:[#allocation2 + $0x4a4] ss:$16 sps:$4 sm:$0xff]  }
  0xc8   :  { %6422 = vmatprep.subr.bf16.mxu0 %v10605_v37  ;;  %7110 = vmatprep.subr.bf16.mxu1 %v10608_v38  ;;  %v10687_v37 = vld [vmem:[#allocation2 + $0x4a0] ss:$16 sps:$4 sm:$0xff]   ;;  %v10690_v38 = vld [vmem:[#allocation2 + $0x4a8] ss:$16 sps:$4 sm:$0xff]  }
  0xcb   :  { %6423 = vmatpush1.bf16.msra.mxu0 %v10603_v39  ;;  %7111 = vmatpush1.bf16.msra.mxu1 %v10606_v40  ;;  %v10695_v39 = vld [vmem:[#allocation2 + $0x4c4] ss:$16 sps:$4 sm:$0xff]   ;;  %v10698_v40 = vld [vmem:[#allocation2 + $0x4cc] ss:$16 sps:$4 sm:$0xff]  }
  0xcc   :  { %6424 = vmatprep.subr.bf16.mxu0 %v10611_v41  ;;  %7112 = vmatprep.subr.bf16.mxu1 %v10614_v42  ;;  %v10693_v41 = vld [vmem:[#allocation2 + $0x4c0] ss:$16 sps:$4 sm:$0xff]   ;;  %v10696_v42 = vld [vmem:[#allocation2 + $0x4c8] ss:$16 sps:$4 sm:$0xff]  }
  0xcf   :  { %6425 = vmatpush1.bf16.msra.mxu0 %v10609_v43  ;;  %7113 = vmatpush1.bf16.msra.mxu1 %v10612_v44  ;;  %v10701_v43 = vld [vmem:[#allocation2 + $0x4e4] ss:$16 sps:$4 sm:$0xff]   ;;  %v10704_v44 = vld [vmem:[#allocation2 + $0x4ec] ss:$16 sps:$4 sm:$0xff]  }
  0xd0   :  { %6426 = vmatprep.subr.bf16.mxu0 %v10617_v45  ;;  %7114 = vmatprep.subr.bf16.mxu1 %v10620_v46  ;;  %v10699_v45 = vld [vmem:[#allocation2 + $0x4e0] ss:$16 sps:$4 sm:$0xff]   ;;  %v10702_v46 = vld [vmem:[#allocation2 + $0x4e8] ss:$16 sps:$4 sm:$0xff]  }
  0xd3   :  { %6427 = vmatpush1.bf16.msra.mxu0 %v10615_v47  ;;  %7115 = vmatpush1.bf16.msra.mxu1 %v10618_v48  ;;  %v10707_v47 = vld [vmem:[#allocation2 + $0x504] ss:$16 sps:$4 sm:$0xff]   ;;  %v10710_v48 = vld [vmem:[#allocation2 + $0x50c] ss:$16 sps:$4 sm:$0xff]  }
  0xd4   :  { %6428 = vmatprep.subr.bf16.mxu0 %v10623_v49  ;;  %7116 = vmatprep.subr.bf16.mxu1 %v10626_v50  ;;  %v10705_v49 = vld [vmem:[#allocation2 + $0x500] ss:$16 sps:$4 sm:$0xff]   ;;  %v10708_v50 = vld [vmem:[#allocation2 + $0x508] ss:$16 sps:$4 sm:$0xff]  }
  0xd7   :  { %6429 = vmatpush1.bf16.msra.mxu0 %v10621_v51  ;;  %7117 = vmatpush1.bf16.msra.mxu1 %v10624_v52  ;;  %v10713_v51 = vld [vmem:[#allocation2 + $0x524] ss:$16 sps:$4 sm:$0xff]   ;;  %v10716_v52 = vld [vmem:[#allocation2 + $0x52c] ss:$16 sps:$4 sm:$0xff]  }
  0xd8   :  { %6430 = vmatprep.subr.bf16.mxu0 %v10629_v53  ;;  %7118 = vmatprep.subr.bf16.mxu1 %v10632_v54  ;;  %v10711_v53 = vld [vmem:[#allocation2 + $0x520] ss:$16 sps:$4 sm:$0xff]   ;;  %v10714_v54 = vld [vmem:[#allocation2 + $0x528] ss:$16 sps:$4 sm:$0xff]  }
  0xdb   :  { %6431 = vmatpush1.bf16.msra.mxu0 %v10627_v55  ;;  %7119 = vmatpush1.bf16.msra.mxu1 %v10630_v56  ;;  %v10719_v55 = vld [vmem:[#allocation2 + $0x544] ss:$16 sps:$4 sm:$0xff]   ;;  %v10722_v56 = vld [vmem:[#allocation2 + $0x54c] ss:$16 sps:$4 sm:$0xff]  }
  0xdc   :  { %6432 = vmatprep.subr.bf16.mxu0 %v10635_v57  ;;  %7120 = vmatprep.subr.bf16.mxu1 %v10638_v58  ;;  %v10717_v57 = vld [vmem:[#allocation2 + $0x540] ss:$16 sps:$4 sm:$0xff]   ;;  %v10720_v58 = vld [vmem:[#allocation2 + $0x548] ss:$16 sps:$4 sm:$0xff]  }
  0xdf   :  { %6433 = vmatpush1.bf16.msra.mxu0 %v10633_v59  ;;  %7121 = vmatpush1.bf16.msra.mxu1 %v10636_v60  ;;  %v10725_v59 = vld [vmem:[#allocation2 + $0x564] ss:$16 sps:$4 sm:$0xff]   ;;  %v10728_v60 = vld [vmem:[#allocation2 + $0x56c] ss:$16 sps:$4 sm:$0xff]  }
  0xe0   :  { %6434 = vmatprep.subr.bf16.mxu0 %v10641_v61  ;;  %7122 = vmatprep.subr.bf16.mxu1 %v10644_v62  ;;  %v10723_v61 = vld [vmem:[#allocation2 + $0x560] ss:$16 sps:$4 sm:$0xff]   ;;  %v10726_v62 = vld [vmem:[#allocation2 + $0x568] ss:$16 sps:$4 sm:$0xff]  }
  0xe3   :  { %6435 = vmatpush1.bf16.msra.mxu0 %v10639_v63  ;;  %7123 = vmatpush1.bf16.msra.mxu1 %v10642_v0  ;;  %v10731_v63 = vld [vmem:[#allocation2 + $0x584] ss:$16 sps:$4 sm:$0xff]   ;;  %v10734_v0 = vld [vmem:[#allocation2 + $0x58c] ss:$16 sps:$4 sm:$0xff]  }
  0xe4   :  { %6436 = vmatprep.subr.bf16.mxu0 %v10647_v1  ;;  %7124 = vmatprep.subr.bf16.mxu1 %v10650_v2  ;;  %v10729_v1 = vld [vmem:[#allocation2 + $0x580] ss:$16 sps:$4 sm:$0xff]   ;;  %v10732_v2 = vld [vmem:[#allocation2 + $0x588] ss:$16 sps:$4 sm:$0xff]  }
  0xe7   :  { %6437 = vmatpush1.bf16.msra.mxu0 %v10645_v3  ;;  %7125 = vmatpush1.bf16.msra.mxu1 %v10648_v4  ;;  %v10737_v3 = vld [vmem:[#allocation2 + $0x5a4] ss:$16 sps:$4 sm:$0xff]   ;;  %v10740_v4 = vld [vmem:[#allocation2 + $0x5ac] ss:$16 sps:$4 sm:$0xff]  }
  0xe8   :  { %6438 = vmatprep.subr.bf16.mxu0 %v10653_v5  ;;  %7126 = vmatprep.subr.bf16.mxu1 %v10656_v6  ;;  %v10735_v5 = vld [vmem:[#allocation2 + $0x5a0] ss:$16 sps:$4 sm:$0xff]   ;;  %v10738_v6 = vld [vmem:[#allocation2 + $0x5a8] ss:$16 sps:$4 sm:$0xff]  }
  0xeb   :  { %6439 = vmatpush1.bf16.msra.mxu0 %v10651_v7  ;;  %7127 = vmatpush1.bf16.msra.mxu1 %v10654_v8  ;;  %v10743_v7 = vld [vmem:[#allocation2 + $0x5c4] ss:$16 sps:$4 sm:$0xff]   ;;  %v10746_v8 = vld [vmem:[#allocation2 + $0x5cc] ss:$16 sps:$4 sm:$0xff]  }
  0xec   :  { %6451 = vmatprep.subr.bf16.mxu0 %v10659_v9  ;;  %7139 = vmatprep.subr.bf16.mxu1 %v10662_v12  ;;  %v10741_v9 = vld [vmem:[#allocation2 + $0x5c0] ss:$16 sps:$4 sm:$0xff]   ;;  %v10752_v12 = vld [vmem:[#allocation2 + $0x5ec] ss:$16 sps:$4 sm:$0xff]  }
  0xee   :  { %6441 = vmatmul.mubr.bf16.vlgmr.msra.gmra.mrb[0].mxu0 %v169_v15  ;;  %7129 = vmatmul.mubr.bf16.vlgmr.msra.gmra.mrb[0].mxu1 %v169_v15  ;;  %v10755_v15 = vld [vmem:[#allocation2 + $0x604] ss:$16 sps:$4 sm:$0xff]  }
  0xef   :  { %6452 = vmatpush1.bf16.msra.mxu0 %v10657_v13  ;;  %7140 = vmatpush1.bf16.msra.mxu1 %v10660_v14  ;;  %v10747_v13 = vld [vmem:[#allocation2 + $0x5e0] ss:$16 sps:$4 sm:$0xff]   ;;  %v10750_v14 = vld [vmem:[#allocation2 + $0x5e8] ss:$16 sps:$4 sm:$0xff]  }
  0xf0   :  { %6453 = vmatprep.subr.bf16.mxu0 %v10665_v16  ;;  %7141 = vmatprep.subr.bf16.mxu1 %v10668_v17  ;;  %v107_v16 = vld [vmem:[%s12711_s0 + $0x20] sm:$0xff] }
  0xf1   :  { %6483 = vmatprep.mubr.bf16.mxu0 %v172_v22  ;;  %7171 = vmatprep.mubr.bf16.mxu1 %v172_v22  ;;  %v139_v17 = vld [vmem:[%s12711_s0 + $0x120] sm:$0xff]  ;;  %v110_v22 = vld [vmem:[%s12711_s0 + $0x38] sm:$0xff] }
  0xf3   :  { %6454 = vmatpush1.bf16.msra.mxu0 %v10663_v20  ;;  %7142 = vmatpush1.bf16.msra.mxu1 %v10666_v21  ;;  %v10756_v20 = vld [vmem:[#allocation2 + $0x608] ss:$16 sps:$4 sm:$0xff]   ;;  %v171_v21 = vpack.c.bf16 %v139_v17, %v107_v16  ;;  %v10845_v17 = vld [vmem:[#allocation2 + $0x7e4] ss:$16 sps:$4 sm:$0xff]  }
  0xf4   :  { %6455 = vmatprep.subr.bf16.mxu0 %v10671_v23  ;;  %7143 = vmatprep.subr.bf16.mxu1 %v10674_v24  ;;  %v142_v23 = vld [vmem:[%s12711_s0 + $0x138] sm:$0xff]  ;;  %v10761_v24 = vld [vmem:[#allocation2 + $0x624] ss:$16 sps:$4 sm:$0xff]  }
  0xf5   :  { %v10840_v16 = vld [vmem:[#allocation2 + $0x7c8] ss:$16 sps:$4 sm:$0xff]  }
  0xf7   :  { %6456 = vmatpush1.bf16.msra.mxu0 %v10669_v25  ;;  %7144 = vmatpush1.bf16.msra.mxu1 %v10672_v26  ;;  %v10764_v25 = vld [vmem:[#allocation2 + $0x62c] ss:$16 sps:$4 sm:$0xff]   ;;  %v174_v26 = vpack.c.bf16 %v142_v23, %v110_v22  ;;  %v109_v22 = vld [vmem:[%s12711_s0 + $0x30] sm:$0xff] }
  0xf8   :  { %6457 = vmatprep.subr.bf16.mxu0 %v10677_v27  ;;  %7145 = vmatprep.subr.bf16.mxu1 %v10680_v28  ;;  %v10759_v27 = vld [vmem:[#allocation2 + $0x620] ss:$16 sps:$4 sm:$0xff]   ;;  %v10762_v28 = vld [vmem:[#allocation2 + $0x628] ss:$16 sps:$4 sm:$0xff]  }
  0xf9   :  { %v141_v23 = vld [vmem:[%s12711_s0 + $0x130] sm:$0xff] }
  0xfb   :  { %6458 = vmatpush1.bf16.msra.mxu0 %v10675_v29  ;;  %7146 = vmatpush1.bf16.msra.mxu1 %v10678_v30  ;;  %v10767_v29 = vld [vmem:[#allocation2 + $0x644] ss:$16 sps:$4 sm:$0xff]   ;;  %v10770_v30 = vld [vmem:[#allocation2 + $0x64c] ss:$16 sps:$4 sm:$0xff]  }
  0xfc   :  { %6459 = vmatprep.subr.bf16.mxu0 %v10683_v31  ;;  %7147 = vmatprep.subr.bf16.mxu1 %v10686_v32  ;;  %v10765_v31 = vld [vmem:[#allocation2 + $0x640] ss:$16 sps:$4 sm:$0xff]   ;;  %v10768_v32 = vld [vmem:[#allocation2 + $0x648] ss:$16 sps:$4 sm:$0xff]  }
  0xff   :  { %6460 = vmatpush1.bf16.msra.mxu0 %v10681_v33  ;;  %7148 = vmatpush1.bf16.msra.mxu1 %v10684_v34  ;;  %v10773_v33 = vld [vmem:[#allocation2 + $0x664] ss:$16 sps:$4 sm:$0xff]   ;;  %v10776_v34 = vld [vmem:[#allocation2 + $0x66c] ss:$16 sps:$4 sm:$0xff]  }
 0x100   :  { %6461 = vmatprep.subr.bf16.mxu0 %v10689_v35  ;;  %7149 = vmatprep.subr.bf16.mxu1 %v10692_v36  ;;  %v10771_v35 = vld [vmem:[#allocation2 + $0x660] ss:$16 sps:$4 sm:$0xff]   ;;  %v10774_v36 = vld [vmem:[#allocation2 + $0x668] ss:$16 sps:$4 sm:$0xff]  }
 0x103   :  { %6462 = vmatpush1.bf16.msra.mxu0 %v10687_v37  ;;  %7150 = vmatpush1.bf16.msra.mxu1 %v10690_v38  ;;  %v10779_v37 = vld [vmem:[#allocation2 + $0x684] ss:$16 sps:$4 sm:$0xff]   ;;  %v10782_v38 = vld [vmem:[#allocation2 + $0x68c] ss:$16 sps:$4 sm:$0xff]  }
 0x104   :  { %6463 = vmatprep.subr.bf16.mxu0 %v10695_v39  ;;  %7151 = vmatprep.subr.bf16.mxu1 %v10698_v40  ;;  %v10777_v39 = vld [vmem:[#allocation2 + $0x680] ss:$16 sps:$4 sm:$0xff]   ;;  %v10780_v40 = vld [vmem:[#allocation2 + $0x688] ss:$16 sps:$4 sm:$0xff]  }
 0x107   :  { %6464 = vmatpush1.bf16.msra.mxu0 %v10693_v41  ;;  %7152 = vmatpush1.bf16.msra.mxu1 %v10696_v42  ;;  %v10785_v41 = vld [vmem:[#allocation2 + $0x6a4] ss:$16 sps:$4 sm:$0xff]   ;;  %v10788_v42 = vld [vmem:[#allocation2 + $0x6ac] ss:$16 sps:$4 sm:$0xff]  }
 0x108   :  { %6465 = vmatprep.subr.bf16.mxu0 %v10701_v43  ;;  %7153 = vmatprep.subr.bf16.mxu1 %v10704_v44  ;;  %v10783_v43 = vld [vmem:[#allocation2 + $0x6a0] ss:$16 sps:$4 sm:$0xff]   ;;  %v10786_v44 = vld [vmem:[#allocation2 + $0x6a8] ss:$16 sps:$4 sm:$0xff]  }
 0x10b   :  { %6466 = vmatpush1.bf16.msra.mxu0 %v10699_v45  ;;  %7154 = vmatpush1.bf16.msra.mxu1 %v10702_v46  ;;  %v10791_v45 = vld [vmem:[#allocation2 + $0x6c4] ss:$16 sps:$4 sm:$0xff]   ;;  %v10794_v46 = vld [vmem:[#allocation2 + $0x6cc] ss:$16 sps:$4 sm:$0xff]  }
 0x10c   :  { %6467 = vmatprep.subr.bf16.mxu0 %v10707_v47  ;;  %7155 = vmatprep.subr.bf16.mxu1 %v10710_v48  ;;  %v10789_v47 = vld [vmem:[#allocation2 + $0x6c0] ss:$16 sps:$4 sm:$0xff]   ;;  %v10792_v48 = vld [vmem:[#allocation2 + $0x6c8] ss:$16 sps:$4 sm:$0xff]  }
 0x10f   :  { %6468 = vmatpush1.bf16.msra.mxu0 %v10705_v49  ;;  %7156 = vmatpush1.bf16.msra.mxu1 %v10708_v50  ;;  %v10797_v49 = vld [vmem:[#allocation2 + $0x6e4] ss:$16 sps:$4 sm:$0xff]   ;;  %v10800_v50 = vld [vmem:[#allocation2 + $0x6ec] ss:$16 sps:$4 sm:$0xff]  }
 0x110   :  { %6469 = vmatprep.subr.bf16.mxu0 %v10713_v51  ;;  %7157 = vmatprep.subr.bf16.mxu1 %v10716_v52  ;;  %v10795_v51 = vld [vmem:[#allocation2 + $0x6e0] ss:$16 sps:$4 sm:$0xff]   ;;  %v10798_v52 = vld [vmem:[#allocation2 + $0x6e8] ss:$16 sps:$4 sm:$0xff]  }
 0x113   :  { %6470 = vmatpush1.bf16.msra.mxu0 %v10711_v53  ;;  %7158 = vmatpush1.bf16.msra.mxu1 %v10714_v54  ;;  %v10803_v53 = vld [vmem:[#allocation2 + $0x704] ss:$16 sps:$4 sm:$0xff]   ;;  %v10806_v54 = vld [vmem:[#allocation2 + $0x70c] ss:$16 sps:$4 sm:$0xff]  }
 0x114   :  { %6471 = vmatprep.subr.bf16.mxu0 %v10719_v55  ;;  %7159 = vmatprep.subr.bf16.mxu1 %v10722_v56  ;;  %v10801_v55 = vld [vmem:[#allocation2 + $0x700] ss:$16 sps:$4 sm:$0xff]   ;;  %v10804_v56 = vld [vmem:[#allocation2 + $0x708] ss:$16 sps:$4 sm:$0xff]  }
 0x117   :  { %6472 = vmatpush1.bf16.msra.mxu0 %v10717_v57  ;;  %7160 = vmatpush1.bf16.msra.mxu1 %v10720_v58  ;;  %v10809_v57 = vld [vmem:[#allocation2 + $0x724] ss:$16 sps:$4 sm:$0xff]   ;;  %v10812_v58 = vld [vmem:[#allocation2 + $0x72c] ss:$16 sps:$4 sm:$0xff]  }
 0x118   :  { %6473 = vmatprep.subr.bf16.mxu0 %v10725_v59  ;;  %7161 = vmatprep.subr.bf16.mxu1 %v10728_v60  ;;  %v10807_v59 = vld [vmem:[#allocation2 + $0x720] ss:$16 sps:$4 sm:$0xff]   ;;  %v10810_v60 = vld [vmem:[#allocation2 + $0x728] ss:$16 sps:$4 sm:$0xff]  }
 0x11b   :  { %6474 = vmatpush1.bf16.msra.mxu0 %v10723_v61  ;;  %7162 = vmatpush1.bf16.msra.mxu1 %v10726_v62  ;;  %v10815_v61 = vld [vmem:[#allocation2 + $0x744] ss:$16 sps:$4 sm:$0xff]   ;;  %v10818_v62 = vld [vmem:[#allocation2 + $0x74c] ss:$16 sps:$4 sm:$0xff]  }
 0x11c   :  { %6475 = vmatprep.subr.bf16.mxu0 %v10731_v63  ;;  %7163 = vmatprep.subr.bf16.mxu1 %v10734_v0  ;;  %v10813_v63 = vld [vmem:[#allocation2 + $0x740] ss:$16 sps:$4 sm:$0xff]   ;;  %v10816_v0 = vld [vmem:[#allocation2 + $0x748] ss:$16 sps:$4 sm:$0xff]  }
 0x11f   :  { %6476 = vmatpush1.bf16.msra.mxu0 %v10729_v1  ;;  %7164 = vmatpush1.bf16.msra.mxu1 %v10732_v2  ;;  %v10821_v1 = vld [vmem:[#allocation2 + $0x764] ss:$16 sps:$4 sm:$0xff]   ;;  %v10824_v2 = vld [vmem:[#allocation2 + $0x76c] ss:$16 sps:$4 sm:$0xff]  }
 0x120   :  { %6477 = vmatprep.subr.bf16.mxu0 %v10737_v3  ;;  %7165 = vmatprep.subr.bf16.mxu1 %v10740_v4  ;;  %v10819_v3 = vld [vmem:[#allocation2 + $0x760] ss:$16 sps:$4 sm:$0xff]   ;;  %v10822_v4 = vld [vmem:[#allocation2 + $0x768] ss:$16 sps:$4 sm:$0xff]  }
 0x123   :  { %6478 = vmatpush1.bf16.msra.mxu0 %v10735_v5  ;;  %7166 = vmatpush1.bf16.msra.mxu1 %v10738_v6  ;;  %v10827_v5 = vld [vmem:[#allocation2 + $0x784] ss:$16 sps:$4 sm:$0xff]   ;;  %v10830_v6 = vld [vmem:[#allocation2 + $0x78c] ss:$16 sps:$4 sm:$0xff]  }
 0x124   :  { %6479 = vmatprep.subr.bf16.mxu0 %v10743_v7  ;;  %7167 = vmatprep.subr.bf16.mxu1 %v10746_v8  ;;  %v10825_v7 = vld [vmem:[#allocation2 + $0x780] ss:$16 sps:$4 sm:$0xff]   ;;  %v10828_v8 = vld [vmem:[#allocation2 + $0x788] ss:$16 sps:$4 sm:$0xff]  }
 0x127   :  { %6480 = vmatpush1.bf16.msra.mxu0 %v10741_v9  ;;  %7168 = vmatpush1.bf16.msra.mxu1 %v10744_v10  ;;  %v10833_v9 = vld [vmem:[#allocation2 + $0x7a4] ss:$16 sps:$4 sm:$0xff]   ;;  %v10836_v10 = vld [vmem:[#allocation2 + $0x7ac] ss:$16 sps:$4 sm:$0xff]  }
 0x128   :  { %6481 = vmatprep.subr.bf16.mxu0 %v10749_v11  ;;  %7169 = vmatprep.subr.bf16.mxu1 %v10752_v12  ;;  %v10831_v11 = vld [vmem:[#allocation2 + $0x7a0] ss:$16 sps:$4 sm:$0xff]   ;;  %v10834_v12 = vld [vmem:[#allocation2 + $0x7a8] ss:$16 sps:$4 sm:$0xff]  }
 0x12b   :  { %6482 = vmatpush1.bf16.msra.mxu0 %v10747_v13  ;;  %7170 = vmatpush1.bf16.msra.mxu1 %v10750_v14  ;;  %v10839_v13 = vld [vmem:[#allocation2 + $0x7c4] ss:$16 sps:$4 sm:$0xff]   ;;  %v10842_v14 = vld [vmem:[#allocation2 + $0x7cc] ss:$16 sps:$4 sm:$0xff]  }
 0x12c   :  { %6494 = vmatprep.subr.bf16.mxu0 %v10755_v15  ;;  %7182 = vmatprep.subr.bf16.mxu1 %v10758_v18  ;;  %v10837_v15 = vld [vmem:[#allocation2 + $0x7c0] ss:$16 sps:$4 sm:$0xff]   ;;  %v10848_v18 = vld [vmem:[#allocation2 + $0x7ec] ss:$16 sps:$4 sm:$0xff]  }
 0x12e   :  { %6484 = vmatmul.mubr.bf16.vlgmr.msra.gmra.mrb[0].mxu0 %v171_v21  ;;  %7172 = vmatmul.mubr.bf16.vlgmr.msra.gmra.mrb[0].mxu1 %v171_v21  ;;  %v10851_v21 = vld [vmem:[#allocation2 + $0x804] ss:$16 sps:$4 sm:$0xff]  }
 0x12f   :  { %6495 = vmatpush1.bf16.msra.mxu0 %v10753_v19  ;;  %7183 = vmatpush1.bf16.msra.mxu1 %v10756_v20  ;;  %v10843_v19 = vld [vmem:[#allocation2 + $0x7e0] ss:$16 sps:$4 sm:$0xff]   ;;  %v10846_v20 = vld [vmem:[#allocation2 + $0x7e8] ss:$16 sps:$4 sm:$0xff]  }
 0x130   :  { %6496 = vmatprep.subr.bf16.mxu0 %v10761_v24  ;;  %7184 = vmatprep.subr.bf16.mxu1 %v10764_v25  ;;  %v10854_v24 = vld [vmem:[#allocation2 + $0x80c] ss:$16 sps:$4 sm:$0xff]   ;;  %v10849_v25 = vld [vmem:[#allocation2 + $0x800] ss:$16 sps:$4 sm:$0xff]  }
 0x131   :  { %6526 = vmatprep.mubr.bf16.mxu0 %v174_v26  ;;  %7214 = vmatprep.mubr.bf16.mxu1 %v174_v26  ;;  %v10852_v26 = vld [vmem:[#allocation2 + $0x808] ss:$16 sps:$4 sm:$0xff]  }
 0x133   :  { %6497 = vmatpush1.bf16.msra.mxu0 %v10759_v27  ;;  %7185 = vmatpush1.bf16.msra.mxu1 %v10762_v28  ;;  %v173_v27 = vpack.c.bf16 %v141_v23, %v109_v22  ;;  %v112_v28 = vld [vmem:[%s12711_s0 + $0x48] sm:$0xff]  ;;  %v10941_v23 = vld [vmem:[#allocation2 + $0x9e4] ss:$16 sps:$4 sm:$0xff]  }
 0x134   :  { %6498 = vmatprep.subr.bf16.mxu0 %v10767_v29  ;;  %7186 = vmatprep.subr.bf16.mxu1 %v10770_v30  ;;  %v144_v29 = vld [vmem:[%s12711_s0 + $0x148] sm:$0xff]  ;;  %v10857_v30 = vld [vmem:[#allocation2 + $0x824] ss:$16 sps:$4 sm:$0xff]  }
 0x135   :  { %v10936_v22 = vld [vmem:[#allocation2 + $0x9c8] ss:$16 sps:$4 sm:$0xff]  }
 0x137   :  { %6499 = vmatpush1.bf16.msra.mxu0 %v10765_v31  ;;  %7187 = vmatpush1.bf16.msra.mxu1 %v10768_v32  ;;  %v10860_v31 = vld [vmem:[#allocation2 + $0x82c] ss:$16 sps:$4 sm:$0xff]   ;;  %v176_v32 = vpack.c.bf16 %v144_v29, %v112_v28  ;;  %v111_v29 = vld [vmem:[%s12711_s0 + $0x40] sm:$0xff] }
 0x138   :  { %6500 = vmatprep.subr.bf16.mxu0 %v10773_v33  ;;  %7188 = vmatprep.subr.bf16.mxu1 %v10776_v34  ;;  %v10855_v33 = vld [vmem:[#allocation2 + $0x820] ss:$16 sps:$4 sm:$0xff]   ;;  %v10858_v34 = vld [vmem:[#allocation2 + $0x828] ss:$16 sps:$4 sm:$0xff]   ;;  %v10950_v28 = vld [vmem:[#allocation2 + $0xa0c] ss:$16 sps:$4 sm:$0xff]  }
 0x13b   :  { %6501 = vmatpush1.bf16.msra.mxu0 %v10771_v35  ;;  %7189 = vmatpush1.bf16.msra.mxu1 %v10774_v36  ;;  %v10863_v35 = vld [vmem:[#allocation2 + $0x844] ss:$16 sps:$4 sm:$0xff]   ;;  %v10866_v36 = vld [vmem:[#allocation2 + $0x84c] ss:$16 sps:$4 sm:$0xff]  }
 0x13c   :  { %6502 = vmatprep.subr.bf16.mxu0 %v10779_v37  ;;  %7190 = vmatprep.subr.bf16.mxu1 %v10782_v38  ;;  %v10861_v37 = vld [vmem:[#allocation2 + $0x840] ss:$16 sps:$4 sm:$0xff]   ;;  %v10864_v38 = vld [vmem:[#allocation2 + $0x848] ss:$16 sps:$4 sm:$0xff]  }
 0x13f   :  { %6503 = vmatpush1.bf16.msra.mxu0 %v10777_v39  ;;  %7191 = vmatpush1.bf16.msra.mxu1 %v10780_v40  ;;  %v10869_v39 = vld [vmem:[#allocation2 + $0x864] ss:$16 sps:$4 sm:$0xff]   ;;  %v10872_v40 = vld [vmem:[#allocation2 + $0x86c] ss:$16 sps:$4 sm:$0xff]  }
 0x140   :  { %6504 = vmatprep.subr.bf16.mxu0 %v10785_v41  ;;  %7192 = vmatprep.subr.bf16.mxu1 %v10788_v42  ;;  %v10867_v41 = vld [vmem:[#allocation2 + $0x860] ss:$16 sps:$4 sm:$0xff]   ;;  %v10870_v42 = vld [vmem:[#allocation2 + $0x868] ss:$16 sps:$4 sm:$0xff]  }
 0x143   :  { %6505 = vmatpush1.bf16.msra.mxu0 %v10783_v43  ;;  %7193 = vmatpush1.bf16.msra.mxu1 %v10786_v44  ;;  %v10875_v43 = vld [vmem:[#allocation2 + $0x884] ss:$16 sps:$4 sm:$0xff]   ;;  %v10878_v44 = vld [vmem:[#allocation2 + $0x88c] ss:$16 sps:$4 sm:$0xff]  }
 0x144   :  { %6506 = vmatprep.subr.bf16.mxu0 %v10791_v45  ;;  %7194 = vmatprep.subr.bf16.mxu1 %v10794_v46  ;;  %v10873_v45 = vld [vmem:[#allocation2 + $0x880] ss:$16 sps:$4 sm:$0xff]   ;;  %v10876_v46 = vld [vmem:[#allocation2 + $0x888] ss:$16 sps:$4 sm:$0xff]  }
 0x147   :  { %6507 = vmatpush1.bf16.msra.mxu0 %v10789_v47  ;;  %7195 = vmatpush1.bf16.msra.mxu1 %v10792_v48  ;;  %v10881_v47 = vld [vmem:[#allocation2 + $0x8a4] ss:$16 sps:$4 sm:$0xff]   ;;  %v10884_v48 = vld [vmem:[#allocation2 + $0x8ac] ss:$16 sps:$4 sm:$0xff]  }
 0x148   :  { %6508 = vmatprep.subr.bf16.mxu0 %v10797_v49  ;;  %7196 = vmatprep.subr.bf16.mxu1 %v10800_v50  ;;  %v10879_v49 = vld [vmem:[#allocation2 + $0x8a0] ss:$16 sps:$4 sm:$0xff]   ;;  %v10882_v50 = vld [vmem:[#allocation2 + $0x8a8] ss:$16 sps:$4 sm:$0xff]  }
 0x14b   :  { %6509 = vmatpush1.bf16.msra.mxu0 %v10795_v51  ;;  %7197 = vmatpush1.bf16.msra.mxu1 %v10798_v52  ;;  %v10887_v51 = vld [vmem:[#allocation2 + $0x8c4] ss:$16 sps:$4 sm:$0xff]   ;;  %v10890_v52 = vld [vmem:[#allocation2 + $0x8cc] ss:$16 sps:$4 sm:$0xff]  }
 0x14c   :  { %6510 = vmatprep.subr.bf16.mxu0 %v10803_v53  ;;  %7198 = vmatprep.subr.bf16.mxu1 %v10806_v54  ;;  %v10885_v53 = vld [vmem:[#allocation2 + $0x8c0] ss:$16 sps:$4 sm:$0xff]   ;;  %v10888_v54 = vld [vmem:[#allocation2 + $0x8c8] ss:$16 sps:$4 sm:$0xff]  }
 0x14f   :  { %6511 = vmatpush1.bf16.msra.mxu0 %v10801_v55  ;;  %7199 = vmatpush1.bf16.msra.mxu1 %v10804_v56  ;;  %v10893_v55 = vld [vmem:[#allocation2 + $0x8e4] ss:$16 sps:$4 sm:$0xff]   ;;  %v10896_v56 = vld [vmem:[#allocation2 + $0x8ec] ss:$16 sps:$4 sm:$0xff]  }
 0x150   :  { %6512 = vmatprep.subr.bf16.mxu0 %v10809_v57  ;;  %7200 = vmatprep.subr.bf16.mxu1 %v10812_v58  ;;  %v10891_v57 = vld [vmem:[#allocation2 + $0x8e0] ss:$16 sps:$4 sm:$0xff]   ;;  %v10894_v58 = vld [vmem:[#allocation2 + $0x8e8] ss:$16 sps:$4 sm:$0xff]  }
 0x153   :  { %6513 = vmatpush1.bf16.msra.mxu0 %v10807_v59  ;;  %7201 = vmatpush1.bf16.msra.mxu1 %v10810_v60  ;;  %v10899_v59 = vld [vmem:[#allocation2 + $0x904] ss:$16 sps:$4 sm:$0xff]   ;;  %v10902_v60 = vld [vmem:[#allocation2 + $0x90c] ss:$16 sps:$4 sm:$0xff]  }
 0x154   :  { %6514 = vmatprep.subr.bf16.mxu0 %v10815_v61  ;;  %7202 = vmatprep.subr.bf16.mxu1 %v10818_v62  ;;  %v10897_v61 = vld [vmem:[#allocation2 + $0x900] ss:$16 sps:$4 sm:$0xff]   ;;  %v10900_v62 = vld [vmem:[#allocation2 + $0x908] ss:$16 sps:$4 sm:$0xff]  }
 0x157   :  { %6515 = vmatpush1.bf16.msra.mxu0 %v10813_v63  ;;  %7203 = vmatpush1.bf16.msra.mxu1 %v10816_v0  ;;  %v10905_v63 = vld [vmem:[#allocation2 + $0x924] ss:$16 sps:$4 sm:$0xff]   ;;  %v10908_v0 = vld [vmem:[#allocation2 + $0x92c] ss:$16 sps:$4 sm:$0xff]  }
 0x158   :  { %6516 = vmatprep.subr.bf16.mxu0 %v10821_v1  ;;  %7204 = vmatprep.subr.bf16.mxu1 %v10824_v2  ;;  %v10903_v1 = vld [vmem:[#allocation2 + $0x920] ss:$16 sps:$4 sm:$0xff]   ;;  %v10906_v2 = vld [vmem:[#allocation2 + $0x928] ss:$16 sps:$4 sm:$0xff]  }
 0x15b   :  { %6517 = vmatpush1.bf16.msra.mxu0 %v10819_v3  ;;  %7205 = vmatpush1.bf16.msra.mxu1 %v10822_v4  ;;  %v10911_v3 = vld [vmem:[#allocation2 + $0x944] ss:$16 sps:$4 sm:$0xff]   ;;  %v10914_v4 = vld [vmem:[#allocation2 + $0x94c] ss:$16 sps:$4 sm:$0xff]  }
 0x15c   :  { %6518 = vmatprep.subr.bf16.mxu0 %v10827_v5  ;;  %7206 = vmatprep.subr.bf16.mxu1 %v10830_v6  ;;  %v10909_v5 = vld [vmem:[#allocation2 + $0x940] ss:$16 sps:$4 sm:$0xff]   ;;  %v10912_v6 = vld [vmem:[#allocation2 + $0x948] ss:$16 sps:$4 sm:$0xff]  }
 0x15f   :  { %6519 = vmatpush1.bf16.msra.mxu0 %v10825_v7  ;;  %7207 = vmatpush1.bf16.msra.mxu1 %v10828_v8  ;;  %v10917_v7 = vld [vmem:[#allocation2 + $0x964] ss:$16 sps:$4 sm:$0xff]   ;;  %v10920_v8 = vld [vmem:[#allocation2 + $0x96c] ss:$16 sps:$4 sm:$0xff]  }
 0x160   :  { %6520 = vmatprep.subr.bf16.mxu0 %v10833_v9  ;;  %7208 = vmatprep.subr.bf16.mxu1 %v10836_v10  ;;  %v10915_v9 = vld [vmem:[#allocation2 + $0x960] ss:$16 sps:$4 sm:$0xff]   ;;  %v10918_v10 = vld [vmem:[#allocation2 + $0x968] ss:$16 sps:$4 sm:$0xff]  }
 0x163   :  { %6521 = vmatpush1.bf16.msra.mxu0 %v10831_v11  ;;  %7209 = vmatpush1.bf16.msra.mxu1 %v10834_v12  ;;  %v10923_v11 = vld [vmem:[#allocation2 + $0x984] ss:$16 sps:$4 sm:$0xff]   ;;  %v10926_v12 = vld [vmem:[#allocation2 + $0x98c] ss:$16 sps:$4 sm:$0xff]  }
 0x164   :  { %6522 = vmatprep.subr.bf16.mxu0 %v10839_v13  ;;  %7210 = vmatprep.subr.bf16.mxu1 %v10842_v14  ;;  %v10921_v13 = vld [vmem:[#allocation2 + $0x980] ss:$16 sps:$4 sm:$0xff]   ;;  %v10924_v14 = vld [vmem:[#allocation2 + $0x988] ss:$16 sps:$4 sm:$0xff]  }
 0x167   :  { %6523 = vmatpush1.bf16.msra.mxu0 %v10837_v15  ;;  %7211 = vmatpush1.bf16.msra.mxu1 %v10840_v16  ;;  %v10929_v15 = vld [vmem:[#allocation2 + $0x9a4] ss:$16 sps:$4 sm:$0xff]   ;;  %v10932_v16 = vld [vmem:[#allocation2 + $0x9ac] ss:$16 sps:$4 sm:$0xff]  }
 0x168   :  { %6524 = vmatprep.subr.bf16.mxu0 %v10845_v17  ;;  %7212 = vmatprep.subr.bf16.mxu1 %v10848_v18  ;;  %v10927_v17 = vld [vmem:[#allocation2 + $0x9a0] ss:$16 sps:$4 sm:$0xff]   ;;  %v10930_v18 = vld [vmem:[#allocation2 + $0x9a8] ss:$16 sps:$4 sm:$0xff]  }
 0x16b   :  { %6525 = vmatpush1.bf16.msra.mxu0 %v10843_v19  ;;  %7213 = vmatpush1.bf16.msra.mxu1 %v10846_v20  ;;  %v10935_v19 = vld [vmem:[#allocation2 + $0x9c4] ss:$16 sps:$4 sm:$0xff]   ;;  %v10938_v20 = vld [vmem:[#allocation2 + $0x9cc] ss:$16 sps:$4 sm:$0xff]  }
 0x16c   :  { %6537 = vmatprep.subr.bf16.mxu0 %v10851_v21  ;;  %7225 = vmatprep.subr.bf16.mxu1 %v10854_v24  ;;  %v10933_v21 = vld [vmem:[#allocation2 + $0x9c0] ss:$16 sps:$4 sm:$0xff]   ;;  %v10944_v24 = vld [vmem:[#allocation2 + $0x9ec] ss:$16 sps:$4 sm:$0xff]  }
 0x16e   :  { %6527 = vmatmul.mubr.bf16.vlgmr.msra.gmra.mrb[0].mxu0 %v173_v27  ;;  %7215 = vmatmul.mubr.bf16.vlgmr.msra.gmra.mrb[0].mxu1 %v173_v27  ;;  %v10947_v27 = vld [vmem:[#allocation2 + $0xa04] ss:$16 sps:$4 sm:$0xff]  }
 0x16f   :  { %6538 = vmatpush1.bf16.msra.mxu0 %v10849_v25  ;;  %7226 = vmatpush1.bf16.msra.mxu1 %v10852_v26  ;;  %v10939_v25 = vld [vmem:[#allocation2 + $0x9e0] ss:$16 sps:$4 sm:$0xff]   ;;  %v10942_v26 = vld [vmem:[#allocation2 + $0x9e8] ss:$16 sps:$4 sm:$0xff]  }
 0x170   :  { %6539 = vmatprep.subr.bf16.mxu0 %v10857_v30  ;;  %7227 = vmatprep.subr.bf16.mxu1 %v10860_v31  ;;  %v143_v30 = vld [vmem:[%s12711_s0 + $0x140] sm:$0xff]  ;;  %v114_v31 = vld [vmem:[%s12711_s0 + $0x58] sm:$0xff] }
 0x171   :  { %6569 = vmatprep.mubr.bf16.mxu0 %v176_v32  ;;  %7257 = vmatprep.mubr.bf16.mxu1 %v176_v32  ;;  %v146_v32 = vld [vmem:[%s12711_s0 + $0x158] sm:$0xff] }
 0x173   :  { %6540 = vmatpush1.bf16.msra.mxu0 %v10855_v33  ;;  %7228 = vmatpush1.bf16.msra.mxu1 %v10858_v34  ;;  %v175_v33 = vpack.c.bf16 %v143_v30, %v111_v29  ;;  %v10945_v34 = vld [vmem:[#allocation2 + $0xa00] ss:$16 sps:$4 sm:$0xff]   ;;  %v11037_v29 = vld [vmem:[#allocation2 + $0xbe4] ss:$16 sps:$4 sm:$0xff]   ;;  %v11040_v30 = vld [vmem:[#allocation2 + $0xbec] ss:$16 sps:$4 sm:$0xff]  }
 0x174   :  { %6541 = vmatprep.subr.bf16.mxu0 %v10863_v35  ;;  %7229 = vmatprep.subr.bf16.mxu1 %v10866_v36  ;;  %v10948_v35 = vld [vmem:[#allocation2 + $0xa08] ss:$16 sps:$4 sm:$0xff]   ;;  %v10953_v36 = vld [vmem:[#allocation2 + $0xa24] ss:$16 sps:$4 sm:$0xff]  }
 0x177   :  { %6542 = vmatpush1.bf16.msra.mxu0 %v10861_v37  ;;  %7230 = vmatpush1.bf16.msra.mxu1 %v10864_v38  ;;  %v10956_v37 = vld [vmem:[#allocation2 + $0xa2c] ss:$16 sps:$4 sm:$0xff]   ;;  %v178_v38 = vpack.c.bf16 %v146_v32, %v114_v31  ;;  %v11035_v31 = vld [vmem:[#allocation2 + $0xbe0] ss:$16 sps:$4 sm:$0xff]   ;;  %v11038_v32 = vld [vmem:[#allocation2 + $0xbe8] ss:$16 sps:$4 sm:$0xff]  }
 0x178   :  { %6543 = vmatprep.subr.bf16.mxu0 %v10869_v39  ;;  %7231 = vmatprep.subr.bf16.mxu1 %v10872_v40  ;;  %v10951_v39 = vld [vmem:[#allocation2 + $0xa20] ss:$16 sps:$4 sm:$0xff]   ;;  %v10954_v40 = vld [vmem:[#allocation2 + $0xa28] ss:$16 sps:$4 sm:$0xff]  }
 0x17b   :  { %6544 = vmatpush1.bf16.msra.mxu0 %v10867_v41  ;;  %7232 = vmatpush1.bf16.msra.mxu1 %v10870_v42  ;;  %v10959_v41 = vld [vmem:[#allocation2 + $0xa44] ss:$16 sps:$4 sm:$0xff]   ;;  %v10962_v42 = vld [vmem:[#allocation2 + $0xa4c] ss:$16 sps:$4 sm:$0xff]  }
 0x17c   :  { %6545 = vmatprep.subr.bf16.mxu0 %v10875_v43  ;;  %7233 = vmatprep.subr.bf16.mxu1 %v10878_v44  ;;  %v10957_v43 = vld [vmem:[#allocation2 + $0xa40] ss:$16 sps:$4 sm:$0xff]   ;;  %v10960_v44 = vld [vmem:[#allocation2 + $0xa48] ss:$16 sps:$4 sm:$0xff]  }
 0x17f   :  { %6546 = vmatpush1.bf16.msra.mxu0 %v10873_v45  ;;  %7234 = vmatpush1.bf16.msra.mxu1 %v10876_v46  ;;  %v10965_v45 = vld [vmem:[#allocation2 + $0xa64] ss:$16 sps:$4 sm:$0xff]   ;;  %v10968_v46 = vld [vmem:[#allocation2 + $0xa6c] ss:$16 sps:$4 sm:$0xff]  }
 0x180   :  { %6547 = vmatprep.subr.bf16.mxu0 %v10881_v47  ;;  %7235 = vmatprep.subr.bf16.mxu1 %v10884_v48  ;;  %v10963_v47 = vld [vmem:[#allocation2 + $0xa60] ss:$16 sps:$4 sm:$0xff]   ;;  %v10966_v48 = vld [vmem:[#allocation2 + $0xa68] ss:$16 sps:$4 sm:$0xff]  }
 0x183   :  { %6548 = vmatpush1.bf16.msra.mxu0 %v10879_v49  ;;  %7236 = vmatpush1.bf16.msra.mxu1 %v10882_v50  ;;  %v10971_v49 = vld [vmem:[#allocation2 + $0xa84] ss:$16 sps:$4 sm:$0xff]   ;;  %v10974_v50 = vld [vmem:[#allocation2 + $0xa8c] ss:$16 sps:$4 sm:$0xff]  }
 0x184   :  { %6549 = vmatprep.subr.bf16.mxu0 %v10887_v51  ;;  %7237 = vmatprep.subr.bf16.mxu1 %v10890_v52  ;;  %v10969_v51 = vld [vmem:[#allocation2 + $0xa80] ss:$16 sps:$4 sm:$0xff]   ;;  %v10972_v52 = vld [vmem:[#allocation2 + $0xa88] ss:$16 sps:$4 sm:$0xff]  }
 0x187   :  { %6550 = vmatpush1.bf16.msra.mxu0 %v10885_v53  ;;  %7238 = vmatpush1.bf16.msra.mxu1 %v10888_v54  ;;  %v10977_v53 = vld [vmem:[#allocation2 + $0xaa4] ss:$16 sps:$4 sm:$0xff]   ;;  %v10980_v54 = vld [vmem:[#allocation2 + $0xaac] ss:$16 sps:$4 sm:$0xff]  }
 0x188   :  { %6551 = vmatprep.subr.bf16.mxu0 %v10893_v55  ;;  %7239 = vmatprep.subr.bf16.mxu1 %v10896_v56  ;;  %v10975_v55 = vld [vmem:[#allocation2 + $0xaa0] ss:$16 sps:$4 sm:$0xff]   ;;  %v10978_v56 = vld [vmem:[#allocation2 + $0xaa8] ss:$16 sps:$4 sm:$0xff]  }
 0x18b   :  { %6552 = vmatpush1.bf16.msra.mxu0 %v10891_v57  ;;  %7240 = vmatpush1.bf16.msra.mxu1 %v10894_v58  ;;  %v10983_v57 = vld [vmem:[#allocation2 + $0xac4] ss:$16 sps:$4 sm:$0xff]   ;;  %v10986_v58 = vld [vmem:[#allocation2 + $0xacc] ss:$16 sps:$4 sm:$0xff]  }
 0x18c   :  { %6553 = vmatprep.subr.bf16.mxu0 %v10899_v59  ;;  %7241 = vmatprep.subr.bf16.mxu1 %v10902_v60  ;;  %v10981_v59 = vld [vmem:[#allocation2 + $0xac0] ss:$16 sps:$4 sm:$0xff]   ;;  %v10984_v60 = vld [vmem:[#allocation2 + $0xac8] ss:$16 sps:$4 sm:$0xff]  }
 0x18f   :  { %6554 = vmatpush1.bf16.msra.mxu0 %v10897_v61  ;;  %7242 = vmatpush1.bf16.msra.mxu1 %v10900_v62  ;;  %v10989_v61 = vld [vmem:[#allocation2 + $0xae4] ss:$16 sps:$4 sm:$0xff]   ;;  %v10992_v62 = vld [vmem:[#allocation2 + $0xaec] ss:$16 sps:$4 sm:$0xff]  }
 0x190   :  { %6555 = vmatprep.subr.bf16.mxu0 %v10905_v63  ;;  %7243 = vmatprep.subr.bf16.mxu1 %v10908_v0  ;;  %v10987_v63 = vld [vmem:[#allocation2 + $0xae0] ss:$16 sps:$4 sm:$0xff]   ;;  %v10990_v0 = vld [vmem:[#allocation2 + $0xae8] ss:$16 sps:$4 sm:$0xff]  }
 0x193   :  { %6556 = vmatpush1.bf16.msra.mxu0 %v10903_v1  ;;  %7244 = vmatpush1.bf16.msra.mxu1 %v10906_v2  ;;  %v10995_v1 = vld [vmem:[#allocation2 + $0xb04] ss:$16 sps:$4 sm:$0xff]   ;;  %v10998_v2 = vld [vmem:[#allocation2 + $0xb0c] ss:$16 sps:$4 sm:$0xff]  }
 0x194   :  { %6557 = vmatprep.subr.bf16.mxu0 %v10911_v3  ;;  %7245 = vmatprep.subr.bf16.mxu1 %v10914_v4  ;;  %v10993_v3 = vld [vmem:[#allocation2 + $0xb00] ss:$16 sps:$4 sm:$0xff]   ;;  %v10996_v4 = vld [vmem:[#allocation2 + $0xb08] ss:$16 sps:$4 sm:$0xff]  }
 0x197   :  { %6558 = vmatpush1.bf16.msra.mxu0 %v10909_v5  ;;  %7246 = vmatpush1.bf16.msra.mxu1 %v10912_v6  ;;  %v11001_v5 = vld [vmem:[#allocation2 + $0xb24] ss:$16 sps:$4 sm:$0xff]   ;;  %v11004_v6 = vld [vmem:[#allocation2 + $0xb2c] ss:$16 sps:$4 sm:$0xff]  }
 0x198   :  { %6559 = vmatprep.subr.bf16.mxu0 %v10917_v7  ;;  %7247 = vmatprep.subr.bf16.mxu1 %v10920_v8  ;;  %v10999_v7 = vld [vmem:[#allocation2 + $0xb20] ss:$16 sps:$4 sm:$0xff]   ;;  %v11002_v8 = vld [vmem:[#allocation2 + $0xb28] ss:$16 sps:$4 sm:$0xff]  }
 0x19b   :  { %6560 = vmatpush1.bf16.msra.mxu0 %v10915_v9  ;;  %7248 = vmatpush1.bf16.msra.mxu1 %v10918_v10  ;;  %v11007_v9 = vld [vmem:[#allocation2 + $0xb44] ss:$16 sps:$4 sm:$0xff]   ;;  %v11010_v10 = vld [vmem:[#allocation2 + $0xb4c] ss:$16 sps:$4 sm:$0xff]  }
 0x19c   :  { %6561 = vmatprep.subr.bf16.mxu0 %v10923_v11  ;;  %7249 = vmatprep.subr.bf16.mxu1 %v10926_v12  ;;  %v11005_v11 = vld [vmem:[#allocation2 + $0xb40] ss:$16 sps:$4 sm:$0xff]   ;;  %v11008_v12 = vld [vmem:[#allocation2 + $0xb48] ss:$16 sps:$4 sm:$0xff]  }
 0x19f   :  { %6562 = vmatpush1.bf16.msra.mxu0 %v10921_v13  ;;  %7250 = vmatpush1.bf16.msra.mxu1 %v10924_v14  ;;  %v11013_v13 = vld [vmem:[#allocation2 + $0xb64] ss:$16 sps:$4 sm:$0xff]   ;;  %v11016_v14 = vld [vmem:[#allocation2 + $0xb6c] ss:$16 sps:$4 sm:$0xff]  }
 0x1a0   :  { %6563 = vmatprep.subr.bf16.mxu0 %v10929_v15  ;;  %7251 = vmatprep.subr.bf16.mxu1 %v10932_v16  ;;  %v11011_v15 = vld [vmem:[#allocation2 + $0xb60] ss:$16 sps:$4 sm:$0xff]   ;;  %v11014_v16 = vld [vmem:[#allocation2 + $0xb68] ss:$16 sps:$4 sm:$0xff]  }
 0x1a3   :  { %6564 = vmatpush1.bf16.msra.mxu0 %v10927_v17  ;;  %7252 = vmatpush1.bf16.msra.mxu1 %v10930_v18  ;;  %v11019_v17 = vld [vmem:[#allocation2 + $0xb84] ss:$16 sps:$4 sm:$0xff]   ;;  %v11022_v18 = vld [vmem:[#allocation2 + $0xb8c] ss:$16 sps:$4 sm:$0xff]  }
 0x1a4   :  { %6565 = vmatprep.subr.bf16.mxu0 %v10935_v19  ;;  %7253 = vmatprep.subr.bf16.mxu1 %v10938_v20  ;;  %v11017_v19 = vld [vmem:[#allocation2 + $0xb80] ss:$16 sps:$4 sm:$0xff]   ;;  %v11020_v20 = vld [vmem:[#allocation2 + $0xb88] ss:$16 sps:$4 sm:$0xff]  }
 0x1a7   :  { %6566 = vmatpush1.bf16.msra.mxu0 %v10933_v21  ;;  %7254 = vmatpush1.bf16.msra.mxu1 %v10936_v22  ;;  %v11025_v21 = vld [vmem:[#allocation2 + $0xba4] ss:$16 sps:$4 sm:$0xff]   ;;  %v11028_v22 = vld [vmem:[#allocation2 + $0xbac] ss:$16 sps:$4 sm:$0xff]  }
 0x1a8   :  { %6567 = vmatprep.subr.bf16.mxu0 %v10941_v23  ;;  %7255 = vmatprep.subr.bf16.mxu1 %v10944_v24  ;;  %v11023_v23 = vld [vmem:[#allocation2 + $0xba0] ss:$16 sps:$4 sm:$0xff]   ;;  %v11026_v24 = vld [vmem:[#allocation2 + $0xba8] ss:$16 sps:$4 sm:$0xff]  }
 0x1ab   :  { %6568 = vmatpush1.bf16.msra.mxu0 %v10939_v25  ;;  %7256 = vmatpush1.bf16.msra.mxu1 %v10942_v26  ;;  %v11031_v25 = vld [vmem:[#allocation2 + $0xbc4] ss:$16 sps:$4 sm:$0xff]   ;;  %v11034_v26 = vld [vmem:[#allocation2 + $0xbcc] ss:$16 sps:$4 sm:$0xff]  }
 0x1ac   :  { %6580 = vmatprep.subr.bf16.mxu0 %v10947_v27  ;;  %7268 = vmatprep.subr.bf16.mxu1 %v10950_v28  ;;  %v11029_v27 = vld [vmem:[#allocation2 + $0xbc0] ss:$16 sps:$4 sm:$0xff]   ;;  %v11032_v28 = vld [vmem:[#allocation2 + $0xbc8] ss:$16 sps:$4 sm:$0xff]  }
 0x1ae   :  { %6570 = vmatmul.mubr.bf16.vlgmr.msra.gmra.mrb[0].mxu0 %v175_v33  ;;  %7258 = vmatmul.mubr.bf16.vlgmr.msra.gmra.mrb[0].mxu1 %v175_v33  ;;  %v11043_v33 = vld [vmem:[#allocation2 + $0xc04] ss:$16 sps:$4 sm:$0xff]  }
 0x1af   :  { %6581 = vmatpush1.bf16.msra.mxu0 %v10945_v34  ;;  %7269 = vmatpush1.bf16.msra.mxu1 %v10948_v35  ;;  %v11046_v34 = vld [vmem:[#allocation2 + $0xc0c] ss:$16 sps:$4 sm:$0xff]   ;;  %v113_v35 = vld [vmem:[%s12711_s0 + $0x50] sm:$0xff] }
 0x1b0   :  { %6582 = vmatprep.subr.bf16.mxu0 %v10953_v36  ;;  %7270 = vmatprep.subr.bf16.mxu1 %v10956_v37  ;;  %v145_v36 = vld [vmem:[%s12711_s0 + $0x150] sm:$0xff]  ;;  %v116_v37 = vld [vmem:[%s12711_s0 + $0x68] sm:$0xff] }
 0x1b1   :  { %6612 = vmatprep.mubr.bf16.mxu0 %v178_v38  ;;  %7300 = vmatprep.mubr.bf16.mxu1 %v178_v38  ;;  %v148_v38 = vld [vmem:[%s12711_s0 + $0x168] sm:$0xff] }
 0x1b3   :  { %6583 = vmatpush1.bf16.msra.mxu0 %v10951_v39  ;;  %7271 = vmatpush1.bf16.msra.mxu1 %v10954_v40  ;;  %v177_v39 = vpack.c.bf16 %v145_v36, %v113_v35  ;;  %v11041_v40 = vld [vmem:[#allocation2 + $0xc00] ss:$16 sps:$4 sm:$0xff]   ;;  %v11133_v35 = vld [vmem:[#allocation2 + $0xde4] ss:$16 sps:$4 sm:$0xff]   ;;  %v11136_v36 = vld [vmem:[#allocation2 + $0xdec] ss:$16 sps:$4 sm:$0xff]  }
 0x1b4   :  { %6584 = vmatprep.subr.bf16.mxu0 %v10959_v41  ;;  %7272 = vmatprep.subr.bf16.mxu1 %v10962_v42  ;;  %v11044_v41 = vld [vmem:[#allocation2 + $0xc08] ss:$16 sps:$4 sm:$0xff]   ;;  %v11049_v42 = vld [vmem:[#allocation2 + $0xc24] ss:$16 sps:$4 sm:$0xff]  }
 0x1b7   :  { %6585 = vmatpush1.bf16.msra.mxu0 %v10957_v43  ;;  %7273 = vmatpush1.bf16.msra.mxu1 %v10960_v44  ;;  %v11052_v43 = vld [vmem:[#allocation2 + $0xc2c] ss:$16 sps:$4 sm:$0xff]   ;;  %v180_v44 = vpack.c.bf16 %v148_v38, %v116_v37  ;;  %v11131_v37 = vld [vmem:[#allocation2 + $0xde0] ss:$16 sps:$4 sm:$0xff]   ;;  %v11134_v38 = vld [vmem:[#allocation2 + $0xde8] ss:$16 sps:$4 sm:$0xff]  }
 0x1b8   :  { %6586 = vmatprep.subr.bf16.mxu0 %v10965_v45  ;;  %7274 = vmatprep.subr.bf16.mxu1 %v10968_v46  ;;  %v11047_v45 = vld [vmem:[#allocation2 + $0xc20] ss:$16 sps:$4 sm:$0xff]   ;;  %v11050_v46 = vld [vmem:[#allocation2 + $0xc28] ss:$16 sps:$4 sm:$0xff]  }
 0x1bb   :  { %6587 = vmatpush1.bf16.msra.mxu0 %v10963_v47  ;;  %7275 = vmatpush1.bf16.msra.mxu1 %v10966_v48  ;;  %v11055_v47 = vld [vmem:[#allocation2 + $0xc44] ss:$16 sps:$4 sm:$0xff]   ;;  %v11058_v48 = vld [vmem:[#allocation2 + $0xc4c] ss:$16 sps:$4 sm:$0xff]  }
 0x1bc   :  { %6588 = vmatprep.subr.bf16.mxu0 %v10971_v49  ;;  %7276 = vmatprep.subr.bf16.mxu1 %v10974_v50  ;;  %v11053_v49 = vld [vmem:[#allocation2 + $0xc40] ss:$16 sps:$4 sm:$0xff]   ;;  %v11056_v50 = vld [vmem:[#allocation2 + $0xc48] ss:$16 sps:$4 sm:$0xff]  }
 0x1bf   :  { %6589 = vmatpush1.bf16.msra.mxu0 %v10969_v51  ;;  %7277 = vmatpush1.bf16.msra.mxu1 %v10972_v52  ;;  %v11061_v51 = vld [vmem:[#allocation2 + $0xc64] ss:$16 sps:$4 sm:$0xff]   ;;  %v11064_v52 = vld [vmem:[#allocation2 + $0xc6c] ss:$16 sps:$4 sm:$0xff]  }
 0x1c0   :  { %6590 = vmatprep.subr.bf16.mxu0 %v10977_v53  ;;  %7278 = vmatprep.subr.bf16.mxu1 %v10980_v54  ;;  %v11059_v53 = vld [vmem:[#allocation2 + $0xc60] ss:$16 sps:$4 sm:$0xff]   ;;  %v11062_v54 = vld [vmem:[#allocation2 + $0xc68] ss:$16 sps:$4 sm:$0xff]  }
 0x1c3   :  { %6591 = vmatpush1.bf16.msra.mxu0 %v10975_v55  ;;  %7279 = vmatpush1.bf16.msra.mxu1 %v10978_v56  ;;  %v11067_v55 = vld [vmem:[#allocation2 + $0xc84] ss:$16 sps:$4 sm:$0xff]   ;;  %v11070_v56 = vld [vmem:[#allocation2 + $0xc8c] ss:$16 sps:$4 sm:$0xff]  }
 0x1c4   :  { %6592 = vmatprep.subr.bf16.mxu0 %v10983_v57  ;;  %7280 = vmatprep.subr.bf16.mxu1 %v10986_v58  ;;  %v11065_v57 = vld [vmem:[#allocation2 + $0xc80] ss:$16 sps:$4 sm:$0xff]   ;;  %v11068_v58 = vld [vmem:[#allocation2 + $0xc88] ss:$16 sps:$4 sm:$0xff]  }
 0x1c7   :  { %6593 = vmatpush1.bf16.msra.mxu0 %v10981_v59  ;;  %7281 = vmatpush1.bf16.msra.mxu1 %v10984_v60  ;;  %v11073_v59 = vld [vmem:[#allocation2 + $0xca4] ss:$16 sps:$4 sm:$0xff]   ;;  %v11076_v60 = vld [vmem:[#allocation2 + $0xcac] ss:$16 sps:$4 sm:$0xff]  }
 0x1c8   :  { %6594 = vmatprep.subr.bf16.mxu0 %v10989_v61  ;;  %7282 = vmatprep.subr.bf16.mxu1 %v10992_v62  ;;  %v11071_v61 = vld [vmem:[#allocation2 + $0xca0] ss:$16 sps:$4 sm:$0xff]   ;;  %v11074_v62 = vld [vmem:[#allocation2 + $0xca8] ss:$16 sps:$4 sm:$0xff]  }
 0x1cb   :  { %6595 = vmatpush1.bf16.msra.mxu0 %v10987_v63  ;;  %7283 = vmatpush1.bf16.msra.mxu1 %v10990_v0  ;;  %v11079_v63 = vld [vmem:[#allocation2 + $0xcc4] ss:$16 sps:$4 sm:$0xff]   ;;  %v11082_v0 = vld [vmem:[#allocation2 + $0xccc] ss:$16 sps:$4 sm:$0xff]  }
 0x1cc   :  { %6596 = vmatprep.subr.bf16.mxu0 %v10995_v1  ;;  %7284 = vmatprep.subr.bf16.mxu1 %v10998_v2  ;;  %v11077_v1 = vld [vmem:[#allocation2 + $0xcc0] ss:$16 sps:$4 sm:$0xff]   ;;  %v11080_v2 = vld [vmem:[#allocation2 + $0xcc8] ss:$16 sps:$4 sm:$0xff]  }
 0x1cf   :  { %6597 = vmatpush1.bf16.msra.mxu0 %v10993_v3  ;;  %7285 = vmatpush1.bf16.msra.mxu1 %v10996_v4  ;;  %v11085_v3 = vld [vmem:[#allocation2 + $0xce4] ss:$16 sps:$4 sm:$0xff]   ;;  %v11088_v4 = vld [vmem:[#allocation2 + $0xcec] ss:$16 sps:$4 sm:$0xff]  }
 0x1d0   :  { %6598 = vmatprep.subr.bf16.mxu0 %v11001_v5  ;;  %7286 = vmatprep.subr.bf16.mxu1 %v11004_v6  ;;  %v11083_v5 = vld [vmem:[#allocation2 + $0xce0] ss:$16 sps:$4 sm:$0xff]   ;;  %v11086_v6 = vld [vmem:[#allocation2 + $0xce8] ss:$16 sps:$4 sm:$0xff]  }
 0x1d3   :  { %6599 = vmatpush1.bf16.msra.mxu0 %v10999_v7  ;;  %7287 = vmatpush1.bf16.msra.mxu1 %v11002_v8  ;;  %v11091_v7 = vld [vmem:[#allocation2 + $0xd04] ss:$16 sps:$4 sm:$0xff]   ;;  %v11094_v8 = vld [vmem:[#allocation2 + $0xd0c] ss:$16 sps:$4 sm:$0xff]  }
 0x1d4   :  { %6600 = vmatprep.subr.bf16.mxu0 %v11007_v9  ;;  %7288 = vmatprep.subr.bf16.mxu1 %v11010_v10  ;;  %v11089_v9 = vld [vmem:[#allocation2 + $0xd00] ss:$16 sps:$4 sm:$0xff]   ;;  %v11092_v10 = vld [vmem:[#allocation2 + $0xd08] ss:$16 sps:$4 sm:$0xff]  }
 0x1d7   :  { %6601 = vmatpush1.bf16.msra.mxu0 %v11005_v11  ;;  %7289 = vmatpush1.bf16.msra.mxu1 %v11008_v12  ;;  %v11097_v11 = vld [vmem:[#allocation2 + $0xd24] ss:$16 sps:$4 sm:$0xff]   ;;  %v11100_v12 = vld [vmem:[#allocation2 + $0xd2c] ss:$16 sps:$4 sm:$0xff]  }
 0x1d8   :  { %6602 = vmatprep.subr.bf16.mxu0 %v11013_v13  ;;  %7290 = vmatprep.subr.bf16.mxu1 %v11016_v14  ;;  %v11095_v13 = vld [vmem:[#allocation2 + $0xd20] ss:$16 sps:$4 sm:$0xff]   ;;  %v11098_v14 = vld [vmem:[#allocation2 + $0xd28] ss:$16 sps:$4 sm:$0xff]  }
 0x1db   :  { %6603 = vmatpush1.bf16.msra.mxu0 %v11011_v15  ;;  %7291 = vmatpush1.bf16.msra.mxu1 %v11014_v16  ;;  %v11103_v15 = vld [vmem:[#allocation2 + $0xd44] ss:$16 sps:$4 sm:$0xff]   ;;  %v11106_v16 = vld [vmem:[#allocation2 + $0xd4c] ss:$16 sps:$4 sm:$0xff]  }
 0x1dc   :  { %6604 = vmatprep.subr.bf16.mxu0 %v11019_v17  ;;  %7292 = vmatprep.subr.bf16.mxu1 %v11022_v18  ;;  %v11101_v17 = vld [vmem:[#allocation2 + $0xd40] ss:$16 sps:$4 sm:$0xff]   ;;  %v11104_v18 = vld [vmem:[#allocation2 + $0xd48] ss:$16 sps:$4 sm:$0xff]  }
 0x1df   :  { %6605 = vmatpush1.bf16.msra.mxu0 %v11017_v19  ;;  %7293 = vmatpush1.bf16.msra.mxu1 %v11020_v20  ;;  %v11109_v19 = vld [vmem:[#allocation2 + $0xd64] ss:$16 sps:$4 sm:$0xff]   ;;  %v11112_v20 = vld [vmem:[#allocation2 + $0xd6c] ss:$16 sps:$4 sm:$0xff]  }
 0x1e0   :  { %6606 = vmatprep.subr.bf16.mxu0 %v11025_v21  ;;  %7294 = vmatprep.subr.bf16.mxu1 %v11028_v22  ;;  %v11107_v21 = vld [vmem:[#allocation2 + $0xd60] ss:$16 sps:$4 sm:$0xff]   ;;  %v11110_v22 = vld [vmem:[#allocation2 + $0xd68] ss:$16 sps:$4 sm:$0xff]  }
 0x1e3   :  { %6607 = vmatpush1.bf16.msra.mxu0 %v11023_v23  ;;  %7295 = vmatpush1.bf16.msra.mxu1 %v11026_v24  ;;  %v11115_v23 = vld [vmem:[#allocation2 + $0xd84] ss:$16 sps:$4 sm:$0xff]   ;;  %v11118_v24 = vld [vmem:[#allocation2 + $0xd8c] ss:$16 sps:$4 sm:$0xff]  }
 0x1e4   :  { %6608 = vmatprep.subr.bf16.mxu0 %v11031_v25  ;;  %7296 = vmatprep.subr.bf16.mxu1 %v11034_v26  ;;  %v11113_v25 = vld [vmem:[#allocation2 + $0xd80] ss:$16 sps:$4 sm:$0xff]   ;;  %v11116_v26 = vld [vmem:[#allocation2 + $0xd88] ss:$16 sps:$4 sm:$0xff]  }
 0x1e7   :  { %6609 = vmatpush1.bf16.msra.mxu0 %v11029_v27  ;;  %7297 = vmatpush1.bf16.msra.mxu1 %v11032_v28  ;;  %v11121_v27 = vld [vmem:[#allocation2 + $0xda4] ss:$16 sps:$4 sm:$0xff]   ;;  %v11124_v28 = vld [vmem:[#allocation2 + $0xdac] ss:$16 sps:$4 sm:$0xff]  }
 0x1e8   :  { %6610 = vmatprep.subr.bf16.mxu0 %v11037_v29  ;;  %7298 = vmatprep.subr.bf16.mxu1 %v11040_v30  ;;  %v11119_v29 = vld [vmem:[#allocation2 + $0xda0] ss:$16 sps:$4 sm:$0xff]   ;;  %v11122_v30 = vld [vmem:[#allocation2 + $0xda8] ss:$16 sps:$4 sm:$0xff]  }
 0x1eb   :  { %6611 = vmatpush1.bf16.msra.mxu0 %v11035_v31  ;;  %7299 = vmatpush1.bf16.msra.mxu1 %v11038_v32  ;;  %v11127_v31 = vld [vmem:[#allocation2 + $0xdc4] ss:$16 sps:$4 sm:$0xff]   ;;  %v11130_v32 = vld [vmem:[#allocation2 + $0xdcc] ss:$16 sps:$4 sm:$0xff]  }
 0x1ec   :  { %6623 = vmatprep.subr.bf16.mxu0 %v11043_v33  ;;  %7311 = vmatprep.subr.bf16.mxu1 %v11046_v34  ;;  %v11125_v33 = vld [vmem:[#allocation2 + $0xdc0] ss:$16 sps:$4 sm:$0xff]   ;;  %v11128_v34 = vld [vmem:[#allocation2 + $0xdc8] ss:$16 sps:$4 sm:$0xff]  }
 0x1ee   :  { %6613 = vmatmul.mubr.bf16.vlgmr.msra.gmra.mrb[0].mxu0 %v177_v39  ;;  %7301 = vmatmul.mubr.bf16.vlgmr.msra.gmra.mrb[0].mxu1 %v177_v39  ;;  %v11139_v39 = vld [vmem:[#allocation2 + $0xe04] ss:$16 sps:$4 sm:$0xff]  }
 0x1ef   :  { %6624 = vmatpush1.bf16.msra.mxu0 %v11041_v40  ;;  %7312 = vmatpush1.bf16.msra.mxu1 %v11044_v41  ;;  %v11142_v40 = vld [vmem:[#allocation2 + $0xe0c] ss:$16 sps:$4 sm:$0xff]   ;;  %v115_v41 = vld [vmem:[%s12711_s0 + $0x60] sm:$0xff] }
 0x1f0   :  { %6625 = vmatprep.subr.bf16.mxu0 %v11049_v42  ;;  %7313 = vmatprep.subr.bf16.mxu1 %v11052_v43  ;;  %v147_v42 = vld [vmem:[%s12711_s0 + $0x160] sm:$0xff]  ;;  %v118_v43 = vld [vmem:[%s12711_s0 + $0x78] sm:$0xff] }
 0x1f1   :  { %6655 = vmatprep.mubr.bf16.mxu0 %v180_v44  ;;  %7343 = vmatprep.mubr.bf16.mxu1 %v180_v44  ;;  %v150_v44 = vld [vmem:[%s12711_s0 + $0x178] sm:$0xff] }
 0x1f3   :  { %6626 = vmatpush1.bf16.msra.mxu0 %v11047_v45  ;;  %7314 = vmatpush1.bf16.msra.mxu1 %v11050_v46  ;;  %v179_v45 = vpack.c.bf16 %v147_v42, %v115_v41  ;;  %v11137_v46 = vld [vmem:[#allocation2 + $0xe00] ss:$16 sps:$4 sm:$0xff]   ;;  %v11229_v41 = vld [vmem:[#allocation2 + $0xfe4] ss:$16 sps:$4 sm:$0xff]   ;;  %v11232_v42 = vld [vmem:[#allocation2 + $0xfec] ss:$16 sps:$4 sm:$0xff]  }
 0x1f4   :  { %6627 = vmatprep.subr.bf16.mxu0 %v11055_v47  ;;  %7315 = vmatprep.subr.bf16.mxu1 %v11058_v48  ;;  %v11140_v47 = vld [vmem:[#allocation2 + $0xe08] ss:$16 sps:$4 sm:$0xff]   ;;  %v11145_v48 = vld [vmem:[#allocation2 + $0xe24] ss:$16 sps:$4 sm:$0xff]  }
 0x1f7   :  { %6628 = vmatpush1.bf16.msra.mxu0 %v11053_v49  ;;  %7316 = vmatpush1.bf16.msra.mxu1 %v11056_v50  ;;  %v11148_v49 = vld [vmem:[#allocation2 + $0xe2c] ss:$16 sps:$4 sm:$0xff]   ;;  %v182_v50 = vpack.c.bf16 %v150_v44, %v118_v43  ;;  %v11227_v43 = vld [vmem:[#allocation2 + $0xfe0] ss:$16 sps:$4 sm:$0xff]   ;;  %v11230_v44 = vld [vmem:[#allocation2 + $0xfe8] ss:$16 sps:$4 sm:$0xff]  }
 0x1f8   :  { %6629 = vmatprep.subr.bf16.mxu0 %v11061_v51  ;;  %7317 = vmatprep.subr.bf16.mxu1 %v11064_v52  ;;  %v11143_v51 = vld [vmem:[#allocation2 + $0xe20] ss:$16 sps:$4 sm:$0xff]   ;;  %v11146_v52 = vld [vmem:[#allocation2 + $0xe28] ss:$16 sps:$4 sm:$0xff]  }
 0x1fb   :  { %6630 = vmatpush1.bf16.msra.mxu0 %v11059_v53  ;;  %7318 = vmatpush1.bf16.msra.mxu1 %v11062_v54  ;;  %v11151_v53 = vld [vmem:[#allocation2 + $0xe44] ss:$16 sps:$4 sm:$0xff]   ;;  %v11154_v54 = vld [vmem:[#allocation2 + $0xe4c] ss:$16 sps:$4 sm:$0xff]  }
 0x1fc   :  { %6631 = vmatprep.subr.bf16.mxu0 %v11067_v55  ;;  %7319 = vmatprep.subr.bf16.mxu1 %v11070_v56  ;;  %v11149_v55 = vld [vmem:[#allocation2 + $0xe40] ss:$16 sps:$4 sm:$0xff]   ;;  %v11152_v56 = vld [vmem:[#allocation2 + $0xe48] ss:$16 sps:$4 sm:$0xff]  }
 0x1ff   :  { %6632 = vmatpush1.bf16.msra.mxu0 %v11065_v57  ;;  %7320 = vmatpush1.bf16.msra.mxu1 %v11068_v58  ;;  %v11157_v57 = vld [vmem:[#allocation2 + $0xe64] ss:$16 sps:$4 sm:$0xff]   ;;  %v11160_v58 = vld [vmem:[#allocation2 + $0xe6c] ss:$16 sps:$4 sm:$0xff]  }
 0x200   :  { %6633 = vmatprep.subr.bf16.mxu0 %v11073_v59  ;;  %7321 = vmatprep.subr.bf16.mxu1 %v11076_v60  ;;  %v11155_v59 = vld [vmem:[#allocation2 + $0xe60] ss:$16 sps:$4 sm:$0xff]   ;;  %v11158_v60 = vld [vmem:[#allocation2 + $0xe68] ss:$16 sps:$4 sm:$0xff]  }
 0x203   :  { %6634 = vmatpush1.bf16.msra.mxu0 %v11071_v61  ;;  %7322 = vmatpush1.bf16.msra.mxu1 %v11074_v62  ;;  %v11163_v61 = vld [vmem:[#allocation2 + $0xe84] ss:$16 sps:$4 sm:$0xff]   ;;  %v11166_v62 = vld [vmem:[#allocation2 + $0xe8c] ss:$16 sps:$4 sm:$0xff]  }
 0x204   :  { %6635 = vmatprep.subr.bf16.mxu0 %v11079_v63  ;;  %7323 = vmatprep.subr.bf16.mxu1 %v11082_v0  ;;  %v11161_v63 = vld [vmem:[#allocation2 + $0xe80] ss:$16 sps:$4 sm:$0xff]   ;;  %v11164_v0 = vld [vmem:[#allocation2 + $0xe88] ss:$16 sps:$4 sm:$0xff]  }
 0x207   :  { %6636 = vmatpush1.bf16.msra.mxu0 %v11077_v1  ;;  %7324 = vmatpush1.bf16.msra.mxu1 %v11080_v2  ;;  %v11169_v1 = vld [vmem:[#allocation2 + $0xea4] ss:$16 sps:$4 sm:$0xff]   ;;  %v11172_v2 = vld [vmem:[#allocation2 + $0xeac] ss:$16 sps:$4 sm:$0xff]  }
 0x208   :  { %6637 = vmatprep.subr.bf16.mxu0 %v11085_v3  ;;  %7325 = vmatprep.subr.bf16.mxu1 %v11088_v4  ;;  %v11167_v3 = vld [vmem:[#allocation2 + $0xea0] ss:$16 sps:$4 sm:$0xff]   ;;  %v11170_v4 = vld [vmem:[#allocation2 + $0xea8] ss:$16 sps:$4 sm:$0xff]  }
 0x20b   :  { %6638 = vmatpush1.bf16.msra.mxu0 %v11083_v5  ;;  %7326 = vmatpush1.bf16.msra.mxu1 %v11086_v6  ;;  %v11175_v5 = vld [vmem:[#allocation2 + $0xec4] ss:$16 sps:$4 sm:$0xff]   ;;  %v11178_v6 = vld [vmem:[#allocation2 + $0xecc] ss:$16 sps:$4 sm:$0xff]  }
 0x20c   :  { %6639 = vmatprep.subr.bf16.mxu0 %v11091_v7  ;;  %7327 = vmatprep.subr.bf16.mxu1 %v11094_v8  ;;  %v11173_v7 = vld [vmem:[#allocation2 + $0xec0] ss:$16 sps:$4 sm:$0xff]   ;;  %v11176_v8 = vld [vmem:[#allocation2 + $0xec8] ss:$16 sps:$4 sm:$0xff]  }
 0x20f   :  { %6640 = vmatpush1.bf16.msra.mxu0 %v11089_v9  ;;  %7328 = vmatpush1.bf16.msra.mxu1 %v11092_v10  ;;  %v11181_v9 = vld [vmem:[#allocation2 + $0xee4] ss:$16 sps:$4 sm:$0xff]   ;;  %v11184_v10 = vld [vmem:[#allocation2 + $0xeec] ss:$16 sps:$4 sm:$0xff]  }
 0x210   :  { %6641 = vmatprep.subr.bf16.mxu0 %v11097_v11  ;;  %7329 = vmatprep.subr.bf16.mxu1 %v11100_v12  ;;  %v11179_v11 = vld [vmem:[#allocation2 + $0xee0] ss:$16 sps:$4 sm:$0xff]   ;;  %v11182_v12 = vld [vmem:[#allocation2 + $0xee8] ss:$16 sps:$4 sm:$0xff]  }
 0x213   :  { %6642 = vmatpush1.bf16.msra.mxu0 %v11095_v13  ;;  %7330 = vmatpush1.bf16.msra.mxu1 %v11098_v14  ;;  %v11187_v13 = vld [vmem:[#allocation2 + $0xf04] ss:$16 sps:$4 sm:$0xff]   ;;  %v11190_v14 = vld [vmem:[#allocation2 + $0xf0c] ss:$16 sps:$4 sm:$0xff]  }
 0x214   :  { %6643 = vmatprep.subr.bf16.mxu0 %v11103_v15  ;;  %7331 = vmatprep.subr.bf16.mxu1 %v11106_v16  ;;  %v11185_v15 = vld [vmem:[#allocation2 + $0xf00] ss:$16 sps:$4 sm:$0xff]   ;;  %v11188_v16 = vld [vmem:[#allocation2 + $0xf08] ss:$16 sps:$4 sm:$0xff]  }
 0x217   :  { %6644 = vmatpush1.bf16.msra.mxu0 %v11101_v17  ;;  %7332 = vmatpush1.bf16.msra.mxu1 %v11104_v18  ;;  %v11193_v17 = vld [vmem:[#allocation2 + $0xf24] ss:$16 sps:$4 sm:$0xff]   ;;  %v11196_v18 = vld [vmem:[#allocation2 + $0xf2c] ss:$16 sps:$4 sm:$0xff]  }
 0x218   :  { %6645 = vmatprep.subr.bf16.mxu0 %v11109_v19  ;;  %7333 = vmatprep.subr.bf16.mxu1 %v11112_v20  ;;  %v11191_v19 = vld [vmem:[#allocation2 + $0xf20] ss:$16 sps:$4 sm:$0xff]   ;;  %v11194_v20 = vld [vmem:[#allocation2 + $0xf28] ss:$16 sps:$4 sm:$0xff]  }
 0x21b   :  { %6646 = vmatpush1.bf16.msra.mxu0 %v11107_v21  ;;  %7334 = vmatpush1.bf16.msra.mxu1 %v11110_v22  ;;  %v11199_v21 = vld [vmem:[#allocation2 + $0xf44] ss:$16 sps:$4 sm:$0xff]   ;;  %v11202_v22 = vld [vmem:[#allocation2 + $0xf4c] ss:$16 sps:$4 sm:$0xff]  }
 0x21c   :  { %6647 = vmatprep.subr.bf16.mxu0 %v11115_v23  ;;  %7335 = vmatprep.subr.bf16.mxu1 %v11118_v24  ;;  %v11197_v23 = vld [vmem:[#allocation2 + $0xf40] ss:$16 sps:$4 sm:$0xff]   ;;  %v11200_v24 = vld [vmem:[#allocation2 + $0xf48] ss:$16 sps:$4 sm:$0xff]  }
 0x21f   :  { %6648 = vmatpush1.bf16.msra.mxu0 %v11113_v25  ;;  %7336 = vmatpush1.bf16.msra.mxu1 %v11116_v26  ;;  %v11205_v25 = vld [vmem:[#allocation2 + $0xf64] ss:$16 sps:$4 sm:$0xff]   ;;  %v11208_v26 = vld [vmem:[#allocation2 + $0xf6c] ss:$16 sps:$4 sm:$0xff]  }
 0x220   :  { %6649 = vmatprep.subr.bf16.mxu0 %v11121_v27  ;;  %7337 = vmatprep.subr.bf16.mxu1 %v11124_v28  ;;  %v11203_v27 = vld [vmem:[#allocation2 + $0xf60] ss:$16 sps:$4 sm:$0xff]   ;;  %v11206_v28 = vld [vmem:[#allocation2 + $0xf68] ss:$16 sps:$4 sm:$0xff]  }
 0x223   :  { %6650 = vmatpush1.bf16.msra.mxu0 %v11119_v29  ;;  %7338 = vmatpush1.bf16.msra.mxu1 %v11122_v30  ;;  %v11211_v29 = vld [vmem:[#allocation2 + $0xf84] ss:$16 sps:$4 sm:$0xff]   ;;  %v11214_v30 = vld [vmem:[#allocation2 + $0xf8c] ss:$16 sps:$4 sm:$0xff]  }
 0x224   :  { %6651 = vmatprep.subr.bf16.mxu0 %v11127_v31  ;;  %7339 = vmatprep.subr.bf16.mxu1 %v11130_v32  ;;  %v11209_v31 = vld [vmem:[#allocation2 + $0xf80] ss:$16 sps:$4 sm:$0xff]   ;;  %v11212_v32 = vld [vmem:[#allocation2 + $0xf88] ss:$16 sps:$4 sm:$0xff]  }
 0x227   :  { %6652 = vmatpush1.bf16.msra.mxu0 %v11125_v33  ;;  %7340 = vmatpush1.bf16.msra.mxu1 %v11128_v34  ;;  %v11217_v33 = vld [vmem:[#allocation2 + $0xfa4] ss:$16 sps:$4 sm:$0xff]   ;;  %v11220_v34 = vld [vmem:[#allocation2 + $0xfac] ss:$16 sps:$4 sm:$0xff]  }
 0x228   :  { %6653 = vmatprep.subr.bf16.mxu0 %v11133_v35  ;;  %7341 = vmatprep.subr.bf16.mxu1 %v11136_v36  ;;  %v11215_v35 = vld [vmem:[#allocation2 + $0xfa0] ss:$16 sps:$4 sm:$0xff]   ;;  %v11218_v36 = vld [vmem:[#allocation2 + $0xfa8] ss:$16 sps:$4 sm:$0xff]  }
 0x22b   :  { %6654 = vmatpush1.bf16.msra.mxu0 %v11131_v37  ;;  %7342 = vmatpush1.bf16.msra.mxu1 %v11134_v38  ;;  %v11223_v37 = vld [vmem:[#allocation2 + $0xfc4] ss:$16 sps:$4 sm:$0xff]   ;;  %v11226_v38 = vld [vmem:[#allocation2 + $0xfcc] ss:$16 sps:$4 sm:$0xff]  }
 0x22c   :  { %6666 = vmatprep.subr.bf16.mxu0 %v11139_v39  ;;  %7354 = vmatprep.subr.bf16.mxu1 %v11142_v40  ;;  %v11221_v39 = vld [vmem:[#allocation2 + $0xfc0] ss:$16 sps:$4 sm:$0xff]   ;;  %v11224_v40 = vld [vmem:[#allocation2 + $0xfc8] ss:$16 sps:$4 sm:$0xff]  }
 0x22e   :  { %6656 = vmatmul.mubr.bf16.vlgmr.msra.gmra.mrb[0].mxu0 %v179_v45  ;;  %7344 = vmatmul.mubr.bf16.vlgmr.msra.gmra.mrb[0].mxu1 %v179_v45  ;;  %v11235_v45 = vld [vmem:[#allocation2 + $0x1004] ss:$16 sps:$4 sm:$0xff]  }
 0x22f   :  { %6667 = vmatpush1.bf16.msra.mxu0 %v11137_v46  ;;  %7355 = vmatpush1.bf16.msra.mxu1 %v11140_v47  ;;  %v11238_v46 = vld [vmem:[#allocation2 + $0x100c] ss:$16 sps:$4 sm:$0xff]   ;;  %v117_v47 = vld [vmem:[%s12711_s0 + $0x70] sm:$0xff] }
 0x230   :  { %6668 = vmatprep.subr.bf16.mxu0 %v11145_v48  ;;  %7356 = vmatprep.subr.bf16.mxu1 %v11148_v49  ;;  %v149_v48 = vld [vmem:[%s12711_s0 + $0x170] sm:$0xff]  ;;  %v120_v49 = vld [vmem:[%s12711_s0 + $0x88] sm:$0xff] }
 0x231   :  { %6698 = vmatprep.mubr.bf16.mxu0 %v182_v50  ;;  %7386 = vmatprep.mubr.bf16.mxu1 %v182_v50  ;;  %v152_v50 = vld [vmem:[%s12711_s0 + $0x188] sm:$0xff] }
 0x233   :  { %6669 = vmatpush1.bf16.msra.mxu0 %v11143_v51  ;;  %7357 = vmatpush1.bf16.msra.mxu1 %v11146_v52  ;;  %v181_v51 = vpack.c.bf16 %v149_v48, %v117_v47  ;;  %v11233_v52 = vld [vmem:[#allocation2 + $0x1000] ss:$16 sps:$4 sm:$0xff]   ;;  %v11325_v47 = vld [vmem:[#allocation2 + $0x11e4] ss:$16 sps:$4 sm:$0xff]   ;;  %v11328_v48 = vld [vmem:[#allocation2 + $0x11ec] ss:$16 sps:$4 sm:$0xff]  }
 0x234   :  { %6670 = vmatprep.subr.bf16.mxu0 %v11151_v53  ;;  %7358 = vmatprep.subr.bf16.mxu1 %v11154_v54  ;;  %v11236_v53 = vld [vmem:[#allocation2 + $0x1008] ss:$16 sps:$4 sm:$0xff]   ;;  %v11241_v54 = vld [vmem:[#allocation2 + $0x1024] ss:$16 sps:$4 sm:$0xff]  }
 0x237   :  { %6671 = vmatpush1.bf16.msra.mxu0 %v11149_v55  ;;  %7359 = vmatpush1.bf16.msra.mxu1 %v11152_v56  ;;  %v11244_v55 = vld [vmem:[#allocation2 + $0x102c] ss:$16 sps:$4 sm:$0xff]   ;;  %v184_v56 = vpack.c.bf16 %v152_v50, %v120_v49  ;;  %v11323_v49 = vld [vmem:[#allocation2 + $0x11e0] ss:$16 sps:$4 sm:$0xff]   ;;  %v11326_v50 = vld [vmem:[#allocation2 + $0x11e8] ss:$16 sps:$4 sm:$0xff]  }
 0x238   :  { %6672 = vmatprep.subr.bf16.mxu0 %v11157_v57  ;;  %7360 = vmatprep.subr.bf16.mxu1 %v11160_v58  ;;  %v11239_v57 = vld [vmem:[#allocation2 + $0x1020] ss:$16 sps:$4 sm:$0xff]   ;;  %v11242_v58 = vld [vmem:[#allocation2 + $0x1028] ss:$16 sps:$4 sm:$0xff]  }
 0x23b   :  { %6673 = vmatpush1.bf16.msra.mxu0 %v11155_v59  ;;  %7361 = vmatpush1.bf16.msra.mxu1 %v11158_v60  ;;  %v11247_v59 = vld [vmem:[#allocation2 + $0x1044] ss:$16 sps:$4 sm:$0xff]   ;;  %v11250_v60 = vld [vmem:[#allocation2 + $0x104c] ss:$16 sps:$4 sm:$0xff]  }
 0x23c   :  { %6674 = vmatprep.subr.bf16.mxu0 %v11163_v61  ;;  %7362 = vmatprep.subr.bf16.mxu1 %v11166_v62  ;;  %v11245_v61 = vld [vmem:[#allocation2 + $0x1040] ss:$16 sps:$4 sm:$0xff]   ;;  %v11248_v62 = vld [vmem:[#allocation2 + $0x1048] ss:$16 sps:$4 sm:$0xff]  }
 0x23f   :  { %6675 = vmatpush1.bf16.msra.mxu0 %v11161_v63  ;;  %7363 = vmatpush1.bf16.msra.mxu1 %v11164_v0  ;;  %v11253_v63 = vld [vmem:[#allocation2 + $0x1064] ss:$16 sps:$4 sm:$0xff]   ;;  %v11256_v0 = vld [vmem:[#allocation2 + $0x106c] ss:$16 sps:$4 sm:$0xff]  }
 0x240   :  { %6676 = vmatprep.subr.bf16.mxu0 %v11169_v1  ;;  %7364 = vmatprep.subr.bf16.mxu1 %v11172_v2  ;;  %v11251_v1 = vld [vmem:[#allocation2 + $0x1060] ss:$16 sps:$4 sm:$0xff]   ;;  %v11254_v2 = vld [vmem:[#allocation2 + $0x1068] ss:$16 sps:$4 sm:$0xff]  }
 0x243   :  { %6677 = vmatpush1.bf16.msra.mxu0 %v11167_v3  ;;  %7365 = vmatpush1.bf16.msra.mxu1 %v11170_v4  ;;  %v11259_v3 = vld [vmem:[#allocation2 + $0x1084] ss:$16 sps:$4 sm:$0xff]   ;;  %v11262_v4 = vld [vmem:[#allocation2 + $0x108c] ss:$16 sps:$4 sm:$0xff]  }
 0x244   :  { %6678 = vmatprep.subr.bf16.mxu0 %v11175_v5  ;;  %7366 = vmatprep.subr.bf16.mxu1 %v11178_v6  ;;  %v11257_v5 = vld [vmem:[#allocation2 + $0x1080] ss:$16 sps:$4 sm:$0xff]   ;;  %v11260_v6 = vld [vmem:[#allocation2 + $0x1088] ss:$16 sps:$4 sm:$0xff]  }
 0x247   :  { %6679 = vmatpush1.bf16.msra.mxu0 %v11173_v7  ;;  %7367 = vmatpush1.bf16.msra.mxu1 %v11176_v8  ;;  %v11265_v7 = vld [vmem:[#allocation2 + $0x10a4] ss:$16 sps:$4 sm:$0xff]   ;;  %v11268_v8 = vld [vmem:[#allocation2 + $0x10ac] ss:$16 sps:$4 sm:$0xff]  }
 0x248   :  { %6680 = vmatprep.subr.bf16.mxu0 %v11181_v9  ;;  %7368 = vmatprep.subr.bf16.mxu1 %v11184_v10  ;;  %v11263_v9 = vld [vmem:[#allocation2 + $0x10a0] ss:$16 sps:$4 sm:$0xff]   ;;  %v11266_v10 = vld [vmem:[#allocation2 + $0x10a8] ss:$16 sps:$4 sm:$0xff]  }
 0x24b   :  { %6681 = vmatpush1.bf16.msra.mxu0 %v11179_v11  ;;  %7369 = vmatpush1.bf16.msra.mxu1 %v11182_v12  ;;  %v11271_v11 = vld [vmem:[#allocation2 + $0x10c4] ss:$16 sps:$4 sm:$0xff]   ;;  %v11274_v12 = vld [vmem:[#allocation2 + $0x10cc] ss:$16 sps:$4 sm:$0xff]  }
 0x24c   :  { %6682 = vmatprep.subr.bf16.mxu0 %v11187_v13  ;;  %7370 = vmatprep.subr.bf16.mxu1 %v11190_v14  ;;  %v11269_v13 = vld [vmem:[#allocation2 + $0x10c0] ss:$16 sps:$4 sm:$0xff]   ;;  %v11272_v14 = vld [vmem:[#allocation2 + $0x10c8] ss:$16 sps:$4 sm:$0xff]  }
 0x24f   :  { %6683 = vmatpush1.bf16.msra.mxu0 %v11185_v15  ;;  %7371 = vmatpush1.bf16.msra.mxu1 %v11188_v16  ;;  %v11277_v15 = vld [vmem:[#allocation2 + $0x10e4] ss:$16 sps:$4 sm:$0xff]   ;;  %v11280_v16 = vld [vmem:[#allocation2 + $0x10ec] ss:$16 sps:$4 sm:$0xff]  }
 0x250   :  { %6684 = vmatprep.subr.bf16.mxu0 %v11193_v17  ;;  %7372 = vmatprep.subr.bf16.mxu1 %v11196_v18  ;;  %v11275_v17 = vld [vmem:[#allocation2 + $0x10e0] ss:$16 sps:$4 sm:$0xff]   ;;  %v11278_v18 = vld [vmem:[#allocation2 + $0x10e8] ss:$16 sps:$4 sm:$0xff]  }
 0x253   :  { %6685 = vmatpush1.bf16.msra.mxu0 %v11191_v19  ;;  %7373 = vmatpush1.bf16.msra.mxu1 %v11194_v20  ;;  %v11283_v19 = vld [vmem:[#allocation2 + $0x1104] ss:$16 sps:$4 sm:$0xff]   ;;  %v11286_v20 = vld [vmem:[#allocation2 + $0x110c] ss:$16 sps:$4 sm:$0xff]  }
 0x254   :  { %6686 = vmatprep.subr.bf16.mxu0 %v11199_v21  ;;  %7374 = vmatprep.subr.bf16.mxu1 %v11202_v22  ;;  %v11281_v21 = vld [vmem:[#allocation2 + $0x1100] ss:$16 sps:$4 sm:$0xff]   ;;  %v11284_v22 = vld [vmem:[#allocation2 + $0x1108] ss:$16 sps:$4 sm:$0xff]  }
 0x257   :  { %6687 = vmatpush1.bf16.msra.mxu0 %v11197_v23  ;;  %7375 = vmatpush1.bf16.msra.mxu1 %v11200_v24  ;;  %v11289_v23 = vld [vmem:[#allocation2 + $0x1124] ss:$16 sps:$4 sm:$0xff]   ;;  %v11292_v24 = vld [vmem:[#allocation2 + $0x112c] ss:$16 sps:$4 sm:$0xff]  }
 0x258   :  { %6688 = vmatprep.subr.bf16.mxu0 %v11205_v25  ;;  %7376 = vmatprep.subr.bf16.mxu1 %v11208_v26  ;;  %v11287_v25 = vld [vmem:[#allocation2 + $0x1120] ss:$16 sps:$4 sm:$0xff]   ;;  %v11290_v26 = vld [vmem:[#allocation2 + $0x1128] ss:$16 sps:$4 sm:$0xff]  }
 0x25b   :  { %6689 = vmatpush1.bf16.msra.mxu0 %v11203_v27  ;;  %7377 = vmatpush1.bf16.msra.mxu1 %v11206_v28  ;;  %v11295_v27 = vld [vmem:[#allocation2 + $0x1144] ss:$16 sps:$4 sm:$0xff]   ;;  %v11298_v28 = vld [vmem:[#allocation2 + $0x114c] ss:$16 sps:$4 sm:$0xff]  }
 0x25c   :  { %6690 = vmatprep.subr.bf16.mxu0 %v11211_v29  ;;  %7378 = vmatprep.subr.bf16.mxu1 %v11214_v30  ;;  %v11293_v29 = vld [vmem:[#allocation2 + $0x1140] ss:$16 sps:$4 sm:$0xff]   ;;  %v11296_v30 = vld [vmem:[#allocation2 + $0x1148] ss:$16 sps:$4 sm:$0xff]  }
 0x25f   :  { %6691 = vmatpush1.bf16.msra.mxu0 %v11209_v31  ;;  %7379 = vmatpush1.bf16.msra.mxu1 %v11212_v32  ;;  %v11301_v31 = vld [vmem:[#allocation2 + $0x1164] ss:$16 sps:$4 sm:$0xff]   ;;  %v11304_v32 = vld [vmem:[#allocation2 + $0x116c] ss:$16 sps:$4 sm:$0xff]  }
 0x260   :  { %6692 = vmatprep.subr.bf16.mxu0 %v11217_v33  ;;  %7380 = vmatprep.subr.bf16.mxu1 %v11220_v34  ;;  %v11299_v33 = vld [vmem:[#allocation2 + $0x1160] ss:$16 sps:$4 sm:$0xff]   ;;  %v11302_v34 = vld [vmem:[#allocation2 + $0x1168] ss:$16 sps:$4 sm:$0xff]  }
 0x263   :  { %6693 = vmatpush1.bf16.msra.mxu0 %v11215_v35  ;;  %7381 = vmatpush1.bf16.msra.mxu1 %v11218_v36  ;;  %v11307_v35 = vld [vmem:[#allocation2 + $0x1184] ss:$16 sps:$4 sm:$0xff]   ;;  %v11310_v36 = vld [vmem:[#allocation2 + $0x118c] ss:$16 sps:$4 sm:$0xff]  }
 0x264   :  { %6694 = vmatprep.subr.bf16.mxu0 %v11223_v37  ;;  %7382 = vmatprep.subr.bf16.mxu1 %v11226_v38  ;;  %v11305_v37 = vld [vmem:[#allocation2 + $0x1180] ss:$16 sps:$4 sm:$0xff]   ;;  %v11308_v38 = vld [vmem:[#allocation2 + $0x1188] ss:$16 sps:$4 sm:$0xff]  }
 0x267   :  { %6695 = vmatpush1.bf16.msra.mxu0 %v11221_v39  ;;  %7383 = vmatpush1.bf16.msra.mxu1 %v11224_v40  ;;  %v11313_v39 = vld [vmem:[#allocation2 + $0x11a4] ss:$16 sps:$4 sm:$0xff]   ;;  %v11316_v40 = vld [vmem:[#allocation2 + $0x11ac] ss:$16 sps:$4 sm:$0xff]  }
 0x268   :  { %6696 = vmatprep.subr.bf16.mxu0 %v11229_v41  ;;  %7384 = vmatprep.subr.bf16.mxu1 %v11232_v42  ;;  %v11311_v41 = vld [vmem:[#allocation2 + $0x11a0] ss:$16 sps:$4 sm:$0xff]   ;;  %v11314_v42 = vld [vmem:[#allocation2 + $0x11a8] ss:$16 sps:$4 sm:$0xff]  }
 0x26b   :  { %6697 = vmatpush1.bf16.msra.mxu0 %v11227_v43  ;;  %7385 = vmatpush1.bf16.msra.mxu1 %v11230_v44  ;;  %v11319_v43 = vld [vmem:[#allocation2 + $0x11c4] ss:$16 sps:$4 sm:$0xff]   ;;  %v11322_v44 = vld [vmem:[#allocation2 + $0x11cc] ss:$16 sps:$4 sm:$0xff]  }
 0x26c   :  { %6709 = vmatprep.subr.bf16.mxu0 %v11235_v45  ;;  %7397 = vmatprep.subr.bf16.mxu1 %v11238_v46  ;;  %v11317_v45 = vld [vmem:[#allocation2 + $0x11c0] ss:$16 sps:$4 sm:$0xff]   ;;  %v11320_v46 = vld [vmem:[#allocation2 + $0x11c8] ss:$16 sps:$4 sm:$0xff]  }
 0x26e   :  { %6699 = vmatmul.mubr.bf16.vlgmr.msra.gmra.mrb[0].mxu0 %v181_v51  ;;  %7387 = vmatmul.mubr.bf16.vlgmr.msra.gmra.mrb[0].mxu1 %v181_v51  ;;  %v11331_v51 = vld [vmem:[#allocation2 + $0x1204] ss:$16 sps:$4 sm:$0xff]  }
 0x26f   :  { %6710 = vmatpush1.bf16.msra.mxu0 %v11233_v52  ;;  %7398 = vmatpush1.bf16.msra.mxu1 %v11236_v53  ;;  %v11334_v52 = vld [vmem:[#allocation2 + $0x120c] ss:$16 sps:$4 sm:$0xff]   ;;  %v119_v53 = vld [vmem:[%s12711_s0 + $0x80] sm:$0xff] }
 0x270   :  { %6711 = vmatprep.subr.bf16.mxu0 %v11241_v54  ;;  %7399 = vmatprep.subr.bf16.mxu1 %v11244_v55  ;;  %v151_v54 = vld [vmem:[%s12711_s0 + $0x180] sm:$0xff]  ;;  %v122_v55 = vld [vmem:[%s12711_s0 + $0x98] sm:$0xff] }
 0x271   :  { %6741 = vmatprep.mubr.bf16.mxu0 %v184_v56  ;;  %7429 = vmatprep.mubr.bf16.mxu1 %v184_v56  ;;  %v154_v56 = vld [vmem:[%s12711_s0 + $0x198] sm:$0xff] }
 0x273   :  { %6712 = vmatpush1.bf16.msra.mxu0 %v11239_v57  ;;  %7400 = vmatpush1.bf16.msra.mxu1 %v11242_v58  ;;  %v183_v57 = vpack.c.bf16 %v151_v54, %v119_v53  ;;  %v11329_v58 = vld [vmem:[#allocation2 + $0x1200] ss:$16 sps:$4 sm:$0xff]   ;;  %v11421_v53 = vld [vmem:[#allocation2 + $0x13e4] ss:$16 sps:$4 sm:$0xff]   ;;  %v11424_v54 = vld [vmem:[#allocation2 + $0x13ec] ss:$16 sps:$4 sm:$0xff]  }
 0x274   :  { %6713 = vmatprep.subr.bf16.mxu0 %v11247_v59  ;;  %7401 = vmatprep.subr.bf16.mxu1 %v11250_v60  ;;  %v11332_v59 = vld [vmem:[#allocation2 + $0x1208] ss:$16 sps:$4 sm:$0xff]   ;;  %v11337_v60 = vld [vmem:[#allocation2 + $0x1224] ss:$16 sps:$4 sm:$0xff]  }
 0x277   :  { %6714 = vmatpush1.bf16.msra.mxu0 %v11245_v61  ;;  %7402 = vmatpush1.bf16.msra.mxu1 %v11248_v62  ;;  %v11340_v61 = vld [vmem:[#allocation2 + $0x122c] ss:$16 sps:$4 sm:$0xff]   ;;  %v186_v62 = vpack.c.bf16 %v154_v56, %v122_v55  ;;  %v11419_v55 = vld [vmem:[#allocation2 + $0x13e0] ss:$16 sps:$4 sm:$0xff]   ;;  %v11422_v56 = vld [vmem:[#allocation2 + $0x13e8] ss:$16 sps:$4 sm:$0xff]  }
 0x278   :  { %6715 = vmatprep.subr.bf16.mxu0 %v11253_v63  ;;  %7403 = vmatprep.subr.bf16.mxu1 %v11256_v0  ;;  %v11335_v63 = vld [vmem:[#allocation2 + $0x1220] ss:$16 sps:$4 sm:$0xff]   ;;  %v11338_v0 = vld [vmem:[#allocation2 + $0x1228] ss:$16 sps:$4 sm:$0xff]  }
 0x27b   :  { %6716 = vmatpush1.bf16.msra.mxu0 %v11251_v1  ;;  %7404 = vmatpush1.bf16.msra.mxu1 %v11254_v2  ;;  %v11343_v1 = vld [vmem:[#allocation2 + $0x1244] ss:$16 sps:$4 sm:$0xff]   ;;  %v11346_v2 = vld [vmem:[#allocation2 + $0x124c] ss:$16 sps:$4 sm:$0xff]  }
 0x27c   :  { %6717 = vmatprep.subr.bf16.mxu0 %v11259_v3  ;;  %7405 = vmatprep.subr.bf16.mxu1 %v11262_v4  ;;  %v11341_v3 = vld [vmem:[#allocation2 + $0x1240] ss:$16 sps:$4 sm:$0xff]   ;;  %v11344_v4 = vld [vmem:[#allocation2 + $0x1248] ss:$16 sps:$4 sm:$0xff]  }
 0x27f   :  { %6718 = vmatpush1.bf16.msra.mxu0 %v11257_v5  ;;  %7406 = vmatpush1.bf16.msra.mxu1 %v11260_v6  ;;  %v11349_v5 = vld [vmem:[#allocation2 + $0x1264] ss:$16 sps:$4 sm:$0xff]   ;;  %v11352_v6 = vld [vmem:[#allocation2 + $0x126c] ss:$16 sps:$4 sm:$0xff]  }
 0x280   :  { %6719 = vmatprep.subr.bf16.mxu0 %v11265_v7  ;;  %7407 = vmatprep.subr.bf16.mxu1 %v11268_v8  ;;  %v11347_v7 = vld [vmem:[#allocation2 + $0x1260] ss:$16 sps:$4 sm:$0xff]   ;;  %v11350_v8 = vld [vmem:[#allocation2 + $0x1268] ss:$16 sps:$4 sm:$0xff]  }
 0x283   :  { %6720 = vmatpush1.bf16.msra.mxu0 %v11263_v9  ;;  %7408 = vmatpush1.bf16.msra.mxu1 %v11266_v10  ;;  %v11355_v9 = vld [vmem:[#allocation2 + $0x1284] ss:$16 sps:$4 sm:$0xff]   ;;  %v11358_v10 = vld [vmem:[#allocation2 + $0x128c] ss:$16 sps:$4 sm:$0xff]  }
 0x284   :  { %6721 = vmatprep.subr.bf16.mxu0 %v11271_v11  ;;  %7409 = vmatprep.subr.bf16.mxu1 %v11274_v12  ;;  %v11353_v11 = vld [vmem:[#allocation2 + $0x1280] ss:$16 sps:$4 sm:$0xff]   ;;  %v11356_v12 = vld [vmem:[#allocation2 + $0x1288] ss:$16 sps:$4 sm:$0xff]  }
 0x287   :  { %6722 = vmatpush1.bf16.msra.mxu0 %v11269_v13  ;;  %7410 = vmatpush1.bf16.msra.mxu1 %v11272_v14  ;;  %v11361_v13 = vld [vmem:[#allocation2 + $0x12a4] ss:$16 sps:$4 sm:$0xff]   ;;  %v11364_v14 = vld [vmem:[#allocation2 + $0x12ac] ss:$16 sps:$4 sm:$0xff]  }
 0x288   :  { %6723 = vmatprep.subr.bf16.mxu0 %v11277_v15  ;;  %7411 = vmatprep.subr.bf16.mxu1 %v11280_v16  ;;  %v11359_v15 = vld [vmem:[#allocation2 + $0x12a0] ss:$16 sps:$4 sm:$0xff]   ;;  %v11362_v16 = vld [vmem:[#allocation2 + $0x12a8] ss:$16 sps:$4 sm:$0xff]  }
 0x28b   :  { %6724 = vmatpush1.bf16.msra.mxu0 %v11275_v17  ;;  %7412 = vmatpush1.bf16.msra.mxu1 %v11278_v18  ;;  %v11367_v17 = vld [vmem:[#allocation2 + $0x12c4] ss:$16 sps:$4 sm:$0xff]   ;;  %v11370_v18 = vld [vmem:[#allocation2 + $0x12cc] ss:$16 sps:$4 sm:$0xff]  }
 0x28c   :  { %6725 = vmatprep.subr.bf16.mxu0 %v11283_v19  ;;  %7413 = vmatprep.subr.bf16.mxu1 %v11286_v20  ;;  %v11365_v19 = vld [vmem:[#allocation2 + $0x12c0] ss:$16 sps:$4 sm:$0xff]   ;;  %v11368_v20 = vld [vmem:[#allocation2 + $0x12c8] ss:$16 sps:$4 sm:$0xff]  }
 0x28f   :  { %6726 = vmatpush1.bf16.msra.mxu0 %v11281_v21  ;;  %7414 = vmatpush1.bf16.msra.mxu1 %v11284_v22  ;;  %v11373_v21 = vld [vmem:[#allocation2 + $0x12e4] ss:$16 sps:$4 sm:$0xff]   ;;  %v11376_v22 = vld [vmem:[#allocation2 + $0x12ec] ss:$16 sps:$4 sm:$0xff]  }
 0x290   :  { %6727 = vmatprep.subr.bf16.mxu0 %v11289_v23  ;;  %7415 = vmatprep.subr.bf16.mxu1 %v11292_v24  ;;  %v11371_v23 = vld [vmem:[#allocation2 + $0x12e0] ss:$16 sps:$4 sm:$0xff]   ;;  %v11374_v24 = vld [vmem:[#allocation2 + $0x12e8] ss:$16 sps:$4 sm:$0xff]  }
 0x293   :  { %6728 = vmatpush1.bf16.msra.mxu0 %v11287_v25  ;;  %7416 = vmatpush1.bf16.msra.mxu1 %v11290_v26  ;;  %v11379_v25 = vld [vmem:[#allocation2 + $0x1304] ss:$16 sps:$4 sm:$0xff]   ;;  %v11382_v26 = vld [vmem:[#allocation2 + $0x130c] ss:$16 sps:$4 sm:$0xff]  }
 0x294   :  { %6729 = vmatprep.subr.bf16.mxu0 %v11295_v27  ;;  %7417 = vmatprep.subr.bf16.mxu1 %v11298_v28  ;;  %v11377_v27 = vld [vmem:[#allocation2 + $0x1300] ss:$16 sps:$4 sm:$0xff]   ;;  %v11380_v28 = vld [vmem:[#allocation2 + $0x1308] ss:$16 sps:$4 sm:$0xff]  }
 0x297   :  { %6730 = vmatpush1.bf16.msra.mxu0 %v11293_v29  ;;  %7418 = vmatpush1.bf16.msra.mxu1 %v11296_v30  ;;  %v11385_v29 = vld [vmem:[#allocation2 + $0x1324] ss:$16 sps:$4 sm:$0xff]   ;;  %v11388_v30 = vld [vmem:[#allocation2 + $0x132c] ss:$16 sps:$4 sm:$0xff]  }
 0x298   :  { %6731 = vmatprep.subr.bf16.mxu0 %v11301_v31  ;;  %7419 = vmatprep.subr.bf16.mxu1 %v11304_v32  ;;  %v11383_v31 = vld [vmem:[#allocation2 + $0x1320] ss:$16 sps:$4 sm:$0xff]   ;;  %v11386_v32 = vld [vmem:[#allocation2 + $0x1328] ss:$16 sps:$4 sm:$0xff]  }
 0x29b   :  { %6732 = vmatpush1.bf16.msra.mxu0 %v11299_v33  ;;  %7420 = vmatpush1.bf16.msra.mxu1 %v11302_v34  ;;  %v11391_v33 = vld [vmem:[#allocation2 + $0x1344] ss:$16 sps:$4 sm:$0xff]   ;;  %v11394_v34 = vld [vmem:[#allocation2 + $0x134c] ss:$16 sps:$4 sm:$0xff]  }
 0x29c   :  { %6733 = vmatprep.subr.bf16.mxu0 %v11307_v35  ;;  %7421 = vmatprep.subr.bf16.mxu1 %v11310_v36  ;;  %v11389_v35 = vld [vmem:[#allocation2 + $0x1340] ss:$16 sps:$4 sm:$0xff]   ;;  %v11392_v36 = vld [vmem:[#allocation2 + $0x1348] ss:$16 sps:$4 sm:$0xff]  }
 0x29f   :  { %6734 = vmatpush1.bf16.msra.mxu0 %v11305_v37  ;;  %7422 = vmatpush1.bf16.msra.mxu1 %v11308_v38  ;;  %v11397_v37 = vld [vmem:[#allocation2 + $0x1364] ss:$16 sps:$4 sm:$0xff]   ;;  %v11400_v38 = vld [vmem:[#allocation2 + $0x136c] ss:$16 sps:$4 sm:$0xff]  }
 0x2a0   :  { %6735 = vmatprep.subr.bf16.mxu0 %v11313_v39  ;;  %7423 = vmatprep.subr.bf16.mxu1 %v11316_v40  ;;  %v11395_v39 = vld [vmem:[#allocation2 + $0x1360] ss:$16 sps:$4 sm:$0xff]   ;;  %v11398_v40 = vld [vmem:[#allocation2 + $0x1368] ss:$16 sps:$4 sm:$0xff]  }
 0x2a3   :  { %6736 = vmatpush1.bf16.msra.mxu0 %v11311_v41  ;;  %7424 = vmatpush1.bf16.msra.mxu1 %v11314_v42  ;;  %v11403_v41 = vld [vmem:[#allocation2 + $0x1384] ss:$16 sps:$4 sm:$0xff]   ;;  %v11406_v42 = vld [vmem:[#allocation2 + $0x138c] ss:$16 sps:$4 sm:$0xff]  }
 0x2a4   :  { %6737 = vmatprep.subr.bf16.mxu0 %v11319_v43  ;;  %7425 = vmatprep.subr.bf16.mxu1 %v11322_v44  ;;  %v11401_v43 = vld [vmem:[#allocation2 + $0x1380] ss:$16 sps:$4 sm:$0xff]   ;;  %v11404_v44 = vld [vmem:[#allocation2 + $0x1388] ss:$16 sps:$4 sm:$0xff]  }
 0x2a7   :  { %6738 = vmatpush1.bf16.msra.mxu0 %v11317_v45  ;;  %7426 = vmatpush1.bf16.msra.mxu1 %v11320_v46  ;;  %v11409_v45 = vld [vmem:[#allocation2 + $0x13a4] ss:$16 sps:$4 sm:$0xff]   ;;  %v11412_v46 = vld [vmem:[#allocation2 + $0x13ac] ss:$16 sps:$4 sm:$0xff]  }
 0x2a8   :  { %6739 = vmatprep.subr.bf16.mxu0 %v11325_v47  ;;  %7427 = vmatprep.subr.bf16.mxu1 %v11328_v48  ;;  %v11407_v47 = vld [vmem:[#allocation2 + $0x13a0] ss:$16 sps:$4 sm:$0xff]   ;;  %v11410_v48 = vld [vmem:[#allocation2 + $0x13a8] ss:$16 sps:$4 sm:$0xff]  }
 0x2ab   :  { %6740 = vmatpush1.bf16.msra.mxu0 %v11323_v49  ;;  %7428 = vmatpush1.bf16.msra.mxu1 %v11326_v50  ;;  %v11415_v49 = vld [vmem:[#allocation2 + $0x13c4] ss:$16 sps:$4 sm:$0xff]   ;;  %v11418_v50 = vld [vmem:[#allocation2 + $0x13cc] ss:$16 sps:$4 sm:$0xff]  }
 0x2ac   :  { %6752 = vmatprep.subr.bf16.mxu0 %v11331_v51  ;;  %7440 = vmatprep.subr.bf16.mxu1 %v11334_v52  ;;  %v11413_v51 = vld [vmem:[#allocation2 + $0x13c0] ss:$16 sps:$4 sm:$0xff]   ;;  %v11416_v52 = vld [vmem:[#allocation2 + $0x13c8] ss:$16 sps:$4 sm:$0xff]  }
 0x2ae   :  { %6742 = vmatmul.mubr.bf16.vlgmr.msra.gmra.mrb[0].mxu0 %v183_v57  ;;  %7430 = vmatmul.mubr.bf16.vlgmr.msra.gmra.mrb[0].mxu1 %v183_v57  ;;  %v11427_v57 = vld [vmem:[#allocation2 + $0x1404] ss:$16 sps:$4 sm:$0xff]  }
 0x2af   :  { %6753 = vmatpush1.bf16.msra.mxu0 %v11329_v58  ;;  %7441 = vmatpush1.bf16.msra.mxu1 %v11332_v59  ;;  %v11430_v58 = vld [vmem:[#allocation2 + $0x140c] ss:$16 sps:$4 sm:$0xff]   ;;  %v121_v59 = vld [vmem:[%s12711_s0 + $0x90] sm:$0xff] }
 0x2b0   :  { %6754 = vmatprep.subr.bf16.mxu0 %v11337_v60  ;;  %7442 = vmatprep.subr.bf16.mxu1 %v11340_v61  ;;  %v153_v60 = vld [vmem:[%s12711_s0 + $0x190] sm:$0xff]  ;;  %v124_v61 = vld [vmem:[%s12711_s0 + $0xa8] sm:$0xff] }
 0x2b1   :  { %6784 = vmatprep.mubr.bf16.mxu0 %v186_v62  ;;  %7472 = vmatprep.mubr.bf16.mxu1 %v186_v62  ;;  %v156_v62 = vld [vmem:[%s12711_s0 + $0x1a8] sm:$0xff] }
 0x2b3   :  { %6755 = vmatpush1.bf16.msra.mxu0 %v11335_v63  ;;  %7443 = vmatpush1.bf16.msra.mxu1 %v11338_v0  ;;  %v185_v63 = vpack.c.bf16 %v153_v60, %v121_v59  ;;  %v11425_v0 = vld [vmem:[#allocation2 + $0x1400] ss:$16 sps:$4 sm:$0xff]   ;;  %v11517_v59 = vld [vmem:[#allocation2 + $0x15e4] ss:$16 sps:$4 sm:$0xff]   ;;  %v11520_v60 = vld [vmem:[#allocation2 + $0x15ec] ss:$16 sps:$4 sm:$0xff]  }
 0x2b4   :  { %6756 = vmatprep.subr.bf16.mxu0 %v11343_v1  ;;  %7444 = vmatprep.subr.bf16.mxu1 %v11346_v2  ;;  %v11428_v1 = vld [vmem:[#allocation2 + $0x1408] ss:$16 sps:$4 sm:$0xff]   ;;  %v11433_v2 = vld [vmem:[#allocation2 + $0x1424] ss:$16 sps:$4 sm:$0xff]  }
 0x2b7   :  { %6757 = vmatpush1.bf16.msra.mxu0 %v11341_v3  ;;  %7445 = vmatpush1.bf16.msra.mxu1 %v11344_v4  ;;  %v11436_v3 = vld [vmem:[#allocation2 + $0x142c] ss:$16 sps:$4 sm:$0xff]   ;;  %v188_v4 = vpack.c.bf16 %v156_v62, %v124_v61  ;;  %v11515_v61 = vld [vmem:[#allocation2 + $0x15e0] ss:$16 sps:$4 sm:$0xff]   ;;  %v11518_v62 = vld [vmem:[#allocation2 + $0x15e8] ss:$16 sps:$4 sm:$0xff]  }
 0x2b8   :  { %6758 = vmatprep.subr.bf16.mxu0 %v11349_v5  ;;  %7446 = vmatprep.subr.bf16.mxu1 %v11352_v6  ;;  %v11431_v5 = vld [vmem:[#allocation2 + $0x1420] ss:$16 sps:$4 sm:$0xff]   ;;  %v11434_v6 = vld [vmem:[#allocation2 + $0x1428] ss:$16 sps:$4 sm:$0xff]  }
 0x2bb   :  { %6759 = vmatpush1.bf16.msra.mxu0 %v11347_v7  ;;  %7447 = vmatpush1.bf16.msra.mxu1 %v11350_v8  ;;  %v11439_v7 = vld [vmem:[#allocation2 + $0x1444] ss:$16 sps:$4 sm:$0xff]   ;;  %v11442_v8 = vld [vmem:[#allocation2 + $0x144c] ss:$16 sps:$4 sm:$0xff]  }
 0x2bc   :  { %6760 = vmatprep.subr.bf16.mxu0 %v11355_v9  ;;  %7448 = vmatprep.subr.bf16.mxu1 %v11358_v10  ;;  %v11437_v9 = vld [vmem:[#allocation2 + $0x1440] ss:$16 sps:$4 sm:$0xff]   ;;  %v11440_v10 = vld [vmem:[#allocation2 + $0x1448] ss:$16 sps:$4 sm:$0xff]  }
 0x2bf   :  { %6761 = vmatpush1.bf16.msra.mxu0 %v11353_v11  ;;  %7449 = vmatpush1.bf16.msra.mxu1 %v11356_v12  ;;  %v11445_v11 = vld [vmem:[#allocation2 + $0x1464] ss:$16 sps:$4 sm:$0xff]   ;;  %v11448_v12 = vld [vmem:[#allocation2 + $0x146c] ss:$16 sps:$4 sm:$0xff]  }
 0x2c0   :  { %6762 = vmatprep.subr.bf16.mxu0 %v11361_v13  ;;  %7450 = vmatprep.subr.bf16.mxu1 %v11364_v14  ;;  %v11443_v13 = vld [vmem:[#allocation2 + $0x1460] ss:$16 sps:$4 sm:$0xff]   ;;  %v11446_v14 = vld [vmem:[#allocation2 + $0x1468] ss:$16 sps:$4 sm:$0xff]  }
 0x2c3   :  { %6763 = vmatpush1.bf16.msra.mxu0 %v11359_v15  ;;  %7451 = vmatpush1.bf16.msra.mxu1 %v11362_v16  ;;  %v11451_v15 = vld [vmem:[#allocation2 + $0x1484] ss:$16 sps:$4 sm:$0xff]   ;;  %v11454_v16 = vld [vmem:[#allocation2 + $0x148c] ss:$16 sps:$4 sm:$0xff]  }
 0x2c4   :  { %6764 = vmatprep.subr.bf16.mxu0 %v11367_v17  ;;  %7452 = vmatprep.subr.bf16.mxu1 %v11370_v18  ;;  %v11449_v17 = vld [vmem:[#allocation2 + $0x1480] ss:$16 sps:$4 sm:$0xff]   ;;  %v11452_v18 = vld [vmem:[#allocation2 + $0x1488] ss:$16 sps:$4 sm:$0xff]  }
 0x2c7   :  { %6765 = vmatpush1.bf16.msra.mxu0 %v11365_v19  ;;  %7453 = vmatpush1.bf16.msra.mxu1 %v11368_v20  ;;  %v11457_v19 = vld [vmem:[#allocation2 + $0x14a4] ss:$16 sps:$4 sm:$0xff]   ;;  %v11460_v20 = vld [vmem:[#allocation2 + $0x14ac] ss:$16 sps:$4 sm:$0xff]  }
 0x2c8   :  { %6766 = vmatprep.subr.bf16.mxu0 %v11373_v21  ;;  %7454 = vmatprep.subr.bf16.mxu1 %v11376_v22  ;;  %v11455_v21 = vld [vmem:[#allocation2 + $0x14a0] ss:$16 sps:$4 sm:$0xff]   ;;  %v11458_v22 = vld [vmem:[#allocation2 + $0x14a8] ss:$16 sps:$4 sm:$0xff]  }
 0x2cb   :  { %6767 = vmatpush1.bf16.msra.mxu0 %v11371_v23  ;;  %7455 = vmatpush1.bf16.msra.mxu1 %v11374_v24  ;;  %v11463_v23 = vld [vmem:[#allocation2 + $0x14c4] ss:$16 sps:$4 sm:$0xff]   ;;  %v11466_v24 = vld [vmem:[#allocation2 + $0x14cc] ss:$16 sps:$4 sm:$0xff]  }
 0x2cc   :  { %6768 = vmatprep.subr.bf16.mxu0 %v11379_v25  ;;  %7456 = vmatprep.subr.bf16.mxu1 %v11382_v26  ;;  %v11461_v25 = vld [vmem:[#allocation2 + $0x14c0] ss:$16 sps:$4 sm:$0xff]   ;;  %v11464_v26 = vld [vmem:[#allocation2 + $0x14c8] ss:$16 sps:$4 sm:$0xff]  }
 0x2cf   :  { %6769 = vmatpush1.bf16.msra.mxu0 %v11377_v27  ;;  %7457 = vmatpush1.bf16.msra.mxu1 %v11380_v28  ;;  %v11469_v27 = vld [vmem:[#allocation2 + $0x14e4] ss:$16 sps:$4 sm:$0xff]   ;;  %v11472_v28 = vld [vmem:[#allocation2 + $0x14ec] ss:$16 sps:$4 sm:$0xff]  }
 0x2d0   :  { %6770 = vmatprep.subr.bf16.mxu0 %v11385_v29  ;;  %7458 = vmatprep.subr.bf16.mxu1 %v11388_v30  ;;  %v11467_v29 = vld [vmem:[#allocation2 + $0x14e0] ss:$16 sps:$4 sm:$0xff]   ;;  %v11470_v30 = vld [vmem:[#allocation2 + $0x14e8] ss:$16 sps:$4 sm:$0xff]  }
 0x2d3   :  { %6771 = vmatpush1.bf16.msra.mxu0 %v11383_v31  ;;  %7459 = vmatpush1.bf16.msra.mxu1 %v11386_v32  ;;  %v11475_v31 = vld [vmem:[#allocation2 + $0x1504] ss:$16 sps:$4 sm:$0xff]   ;;  %v11478_v32 = vld [vmem:[#allocation2 + $0x150c] ss:$16 sps:$4 sm:$0xff]  }
 0x2d4   :  { %6772 = vmatprep.subr.bf16.mxu0 %v11391_v33  ;;  %7460 = vmatprep.subr.bf16.mxu1 %v11394_v34  ;;  %v11473_v33 = vld [vmem:[#allocation2 + $0x1500] ss:$16 sps:$4 sm:$0xff]   ;;  %v11476_v34 = vld [vmem:[#allocation2 + $0x1508] ss:$16 sps:$4 sm:$0xff]  }
 0x2d7   :  { %6773 = vmatpush1.bf16.msra.mxu0 %v11389_v35  ;;  %7461 = vmatpush1.bf16.msra.mxu1 %v11392_v36  ;;  %v11481_v35 = vld [vmem:[#allocation2 + $0x1524] ss:$16 sps:$4 sm:$0xff]   ;;  %v11484_v36 = vld [vmem:[#allocation2 + $0x152c] ss:$16 sps:$4 sm:$0xff]  }
 0x2d8   :  { %6774 = vmatprep.subr.bf16.mxu0 %v11397_v37  ;;  %7462 = vmatprep.subr.bf16.mxu1 %v11400_v38  ;;  %v11479_v37 = vld [vmem:[#allocation2 + $0x1520] ss:$16 sps:$4 sm:$0xff]   ;;  %v11482_v38 = vld [vmem:[#allocation2 + $0x1528] ss:$16 sps:$4 sm:$0xff]  }
 0x2db   :  { %6775 = vmatpush1.bf16.msra.mxu0 %v11395_v39  ;;  %7463 = vmatpush1.bf16.msra.mxu1 %v11398_v40  ;;  %v11487_v39 = vld [vmem:[#allocation2 + $0x1544] ss:$16 sps:$4 sm:$0xff]   ;;  %v11490_v40 = vld [vmem:[#allocation2 + $0x154c] ss:$16 sps:$4 sm:$0xff]  }
 0x2dc   :  { %6776 = vmatprep.subr.bf16.mxu0 %v11403_v41  ;;  %7464 = vmatprep.subr.bf16.mxu1 %v11406_v42  ;;  %v11485_v41 = vld [vmem:[#allocation2 + $0x1540] ss:$16 sps:$4 sm:$0xff]   ;;  %v11488_v42 = vld [vmem:[#allocation2 + $0x1548] ss:$16 sps:$4 sm:$0xff]  }
 0x2df   :  { %6777 = vmatpush1.bf16.msra.mxu0 %v11401_v43  ;;  %7465 = vmatpush1.bf16.msra.mxu1 %v11404_v44  ;;  %v11493_v43 = vld [vmem:[#allocation2 + $0x1564] ss:$16 sps:$4 sm:$0xff]   ;;  %v11496_v44 = vld [vmem:[#allocation2 + $0x156c] ss:$16 sps:$4 sm:$0xff]  }
 0x2e0   :  { %6778 = vmatprep.subr.bf16.mxu0 %v11409_v45  ;;  %7466 = vmatprep.subr.bf16.mxu1 %v11412_v46  ;;  %v11491_v45 = vld [vmem:[#allocation2 + $0x1560] ss:$16 sps:$4 sm:$0xff]   ;;  %v11494_v46 = vld [vmem:[#allocation2 + $0x1568] ss:$16 sps:$4 sm:$0xff]  }
 0x2e3   :  { %6779 = vmatpush1.bf16.msra.mxu0 %v11407_v47  ;;  %7467 = vmatpush1.bf16.msra.mxu1 %v11410_v48  ;;  %v11499_v47 = vld [vmem:[#allocation2 + $0x1584] ss:$16 sps:$4 sm:$0xff]   ;;  %v11502_v48 = vld [vmem:[#allocation2 + $0x158c] ss:$16 sps:$4 sm:$0xff]  }
 0x2e4   :  { %6780 = vmatprep.subr.bf16.mxu0 %v11415_v49  ;;  %7468 = vmatprep.subr.bf16.mxu1 %v11418_v50  ;;  %v11497_v49 = vld [vmem:[#allocation2 + $0x1580] ss:$16 sps:$4 sm:$0xff]   ;;  %v11500_v50 = vld [vmem:[#allocation2 + $0x1588] ss:$16 sps:$4 sm:$0xff]  }
 0x2e7   :  { %6781 = vmatpush1.bf16.msra.mxu0 %v11413_v51  ;;  %7469 = vmatpush1.bf16.msra.mxu1 %v11416_v52  ;;  %v11505_v51 = vld [vmem:[#allocation2 + $0x15a4] ss:$16 sps:$4 sm:$0xff]   ;;  %v11508_v52 = vld [vmem:[#allocation2 + $0x15ac] ss:$16 sps:$4 sm:$0xff]  }
 0x2e8   :  { %6782 = vmatprep.subr.bf16.mxu0 %v11421_v53  ;;  %7470 = vmatprep.subr.bf16.mxu1 %v11424_v54  ;;  %v11503_v53 = vld [vmem:[#allocation2 + $0x15a0] ss:$16 sps:$4 sm:$0xff]   ;;  %v11506_v54 = vld [vmem:[#allocation2 + $0x15a8] ss:$16 sps:$4 sm:$0xff]  }
 0x2eb   :  { %6783 = vmatpush1.bf16.msra.mxu0 %v11419_v55  ;;  %7471 = vmatpush1.bf16.msra.mxu1 %v11422_v56  ;;  %v11511_v55 = vld [vmem:[#allocation2 + $0x15c4] ss:$16 sps:$4 sm:$0xff]   ;;  %v11514_v56 = vld [vmem:[#allocation2 + $0x15cc] ss:$16 sps:$4 sm:$0xff]  }
 0x2ec   :  { %6795 = vmatprep.subr.bf16.mxu0 %v11427_v57  ;;  %7483 = vmatprep.subr.bf16.mxu1 %v11430_v58  ;;  %v11509_v57 = vld [vmem:[#allocation2 + $0x15c0] ss:$16 sps:$4 sm:$0xff]   ;;  %v11512_v58 = vld [vmem:[#allocation2 + $0x15c8] ss:$16 sps:$4 sm:$0xff]  }
 0x2ee   :  { %6785 = vmatmul.mubr.bf16.vlgmr.msra.gmra.mrb[0].mxu0 %v185_v63  ;;  %7473 = vmatmul.mubr.bf16.vlgmr.msra.gmra.mrb[0].mxu1 %v185_v63  ;;  %v123_v63 = vld [vmem:[%s12711_s0 + $0xa0] sm:$0xff] }
 0x2ef   :  { %6796 = vmatpush1.bf16.msra.mxu0 %v11425_v0  ;;  %7484 = vmatpush1.bf16.msra.mxu1 %v11428_v1  ;;  %v155_v0 = vld [vmem:[%s12711_s0 + $0x1a0] sm:$0xff] }
 0x2f0   :  { %6797 = vmatprep.subr.bf16.mxu0 %v11433_v2  ;;  %7485 = vmatprep.subr.bf16.mxu1 %v11436_v3  ;;  %v11523_v1 = vld [vmem:[#allocation2 + $0x1604] ss:$16 sps:$4 sm:$0xff]   ;;  %v11526_v2 = vld [vmem:[#allocation2 + $0x160c] ss:$16 sps:$4 sm:$0xff]   ;;  %v187_v3 = vpack.c.bf16 %v155_v0, %v123_v63  ;;  %v11605_v63 = vld [vmem:[#allocation2 + $0x17c0] ss:$16 sps:$4 sm:$0xff]  }
 0x2f1   :  { %6827 = vmatprep.mubr.bf16.mxu0 %v188_v4  ;;  %7515 = vmatprep.mubr.bf16.mxu1 %v188_v4  ;;  %v126_v4 = vld [vmem:[%s12711_s0 + $0xb8] sm:$0xff] }
 0x2f2   :  { %v11608_v0 = vld [vmem:[#allocation2 + $0x17c8] ss:$16 sps:$4 sm:$0xff]  }
 0x2f3   :  { %6798 = vmatpush1.bf16.msra.mxu0 %v11431_v5  ;;  %7486 = vmatpush1.bf16.msra.mxu1 %v11434_v6  ;;  %v158_v5 = vld [vmem:[%s12711_s0 + $0x1b8] sm:$0xff]  ;;  %v11521_v6 = vld [vmem:[#allocation2 + $0x1600] ss:$16 sps:$4 sm:$0xff]  }
 0x2f4   :  { %6799 = vmatprep.subr.bf16.mxu0 %v11439_v7  ;;  %7487 = vmatprep.subr.bf16.mxu1 %v11442_v8  ;;  %v11524_v7 = vld [vmem:[#allocation2 + $0x1608] ss:$16 sps:$4 sm:$0xff]   ;;  %v11529_v8 = vld [vmem:[#allocation2 + $0x1624] ss:$16 sps:$4 sm:$0xff]  }
 0x2f7   :  { %6800 = vmatpush1.bf16.msra.mxu0 %v11437_v9  ;;  %7488 = vmatpush1.bf16.msra.mxu1 %v11440_v10  ;;  %v11532_v9 = vld [vmem:[#allocation2 + $0x162c] ss:$16 sps:$4 sm:$0xff]   ;;  %v190_v10 = vpack.c.bf16 %v158_v5, %v126_v4  ;;  %v11614_v4 = vld [vmem:[#allocation2 + $0x17e8] ss:$16 sps:$4 sm:$0xff]   ;;  %v125_v5 = vld [vmem:[%s12711_s0 + $0xb0] sm:$0xff] }
 0x2f8   :  { %6801 = vmatprep.subr.bf16.mxu0 %v11445_v11  ;;  %7489 = vmatprep.subr.bf16.mxu1 %v11448_v12  ;;  %v11527_v11 = vld [vmem:[#allocation2 + $0x1620] ss:$16 sps:$4 sm:$0xff]   ;;  %v11530_v12 = vld [vmem:[#allocation2 + $0x1628] ss:$16 sps:$4 sm:$0xff]  }
 0x2fb   :  { %6802 = vmatpush1.bf16.msra.mxu0 %v11443_v13  ;;  %7490 = vmatpush1.bf16.msra.mxu1 %v11446_v14  ;;  %v11535_v13 = vld [vmem:[#allocation2 + $0x1644] ss:$16 sps:$4 sm:$0xff]   ;;  %v11538_v14 = vld [vmem:[#allocation2 + $0x164c] ss:$16 sps:$4 sm:$0xff]  }
 0x2fc   :  { %6803 = vmatprep.subr.bf16.mxu0 %v11451_v15  ;;  %7491 = vmatprep.subr.bf16.mxu1 %v11454_v16  ;;  %v11533_v15 = vld [vmem:[#allocation2 + $0x1640] ss:$16 sps:$4 sm:$0xff]   ;;  %v11536_v16 = vld [vmem:[#allocation2 + $0x1648] ss:$16 sps:$4 sm:$0xff]  }
 0x2ff   :  { %6804 = vmatpush1.bf16.msra.mxu0 %v11449_v17  ;;  %7492 = vmatpush1.bf16.msra.mxu1 %v11452_v18  ;;  %v11541_v17 = vld [vmem:[#allocation2 + $0x1664] ss:$16 sps:$4 sm:$0xff]   ;;  %v11544_v18 = vld [vmem:[#allocation2 + $0x166c] ss:$16 sps:$4 sm:$0xff]  }
 0x300   :  { %6805 = vmatprep.subr.bf16.mxu0 %v11457_v19  ;;  %7493 = vmatprep.subr.bf16.mxu1 %v11460_v20  ;;  %v11539_v19 = vld [vmem:[#allocation2 + $0x1660] ss:$16 sps:$4 sm:$0xff]   ;;  %v11542_v20 = vld [vmem:[#allocation2 + $0x1668] ss:$16 sps:$4 sm:$0xff]  }
 0x303   :  { %6806 = vmatpush1.bf16.msra.mxu0 %v11455_v21  ;;  %7494 = vmatpush1.bf16.msra.mxu1 %v11458_v22  ;;  %v11547_v21 = vld [vmem:[#allocation2 + $0x1684] ss:$16 sps:$4 sm:$0xff]   ;;  %v11550_v22 = vld [vmem:[#allocation2 + $0x168c] ss:$16 sps:$4 sm:$0xff]  }
 0x304   :  { %6807 = vmatprep.subr.bf16.mxu0 %v11463_v23  ;;  %7495 = vmatprep.subr.bf16.mxu1 %v11466_v24  ;;  %v11545_v23 = vld [vmem:[#allocation2 + $0x1680] ss:$16 sps:$4 sm:$0xff]   ;;  %v11548_v24 = vld [vmem:[#allocation2 + $0x1688] ss:$16 sps:$4 sm:$0xff]  }
 0x307   :  { %6808 = vmatpush1.bf16.msra.mxu0 %v11461_v25  ;;  %7496 = vmatpush1.bf16.msra.mxu1 %v11464_v26  ;;  %v11553_v25 = vld [vmem:[#allocation2 + $0x16a4] ss:$16 sps:$4 sm:$0xff]   ;;  %v11556_v26 = vld [vmem:[#allocation2 + $0x16ac] ss:$16 sps:$4 sm:$0xff]  }
 0x308   :  { %6809 = vmatprep.subr.bf16.mxu0 %v11469_v27  ;;  %7497 = vmatprep.subr.bf16.mxu1 %v11472_v28  ;;  %v11551_v27 = vld [vmem:[#allocation2 + $0x16a0] ss:$16 sps:$4 sm:$0xff]   ;;  %v11554_v28 = vld [vmem:[#allocation2 + $0x16a8] ss:$16 sps:$4 sm:$0xff]  }
 0x30b   :  { %6810 = vmatpush1.bf16.msra.mxu0 %v11467_v29  ;;  %7498 = vmatpush1.bf16.msra.mxu1 %v11470_v30  ;;  %v11559_v29 = vld [vmem:[#allocation2 + $0x16c4] ss:$16 sps:$4 sm:$0xff]   ;;  %v11562_v30 = vld [vmem:[#allocation2 + $0x16cc] ss:$16 sps:$4 sm:$0xff]  }
 0x30c   :  { %6811 = vmatprep.subr.bf16.mxu0 %v11475_v31  ;;  %7499 = vmatprep.subr.bf16.mxu1 %v11478_v32  ;;  %v11557_v31 = vld [vmem:[#allocation2 + $0x16c0] ss:$16 sps:$4 sm:$0xff]   ;;  %v11560_v32 = vld [vmem:[#allocation2 + $0x16c8] ss:$16 sps:$4 sm:$0xff]  }
 0x30f   :  { %6812 = vmatpush1.bf16.msra.mxu0 %v11473_v33  ;;  %7500 = vmatpush1.bf16.msra.mxu1 %v11476_v34  ;;  %v11565_v33 = vld [vmem:[#allocation2 + $0x16e4] ss:$16 sps:$4 sm:$0xff]   ;;  %v11568_v34 = vld [vmem:[#allocation2 + $0x16ec] ss:$16 sps:$4 sm:$0xff]  }
 0x310   :  { %6813 = vmatprep.subr.bf16.mxu0 %v11481_v35  ;;  %7501 = vmatprep.subr.bf16.mxu1 %v11484_v36  ;;  %v11563_v35 = vld [vmem:[#allocation2 + $0x16e0] ss:$16 sps:$4 sm:$0xff]   ;;  %v11566_v36 = vld [vmem:[#allocation2 + $0x16e8] ss:$16 sps:$4 sm:$0xff]  }
 0x313   :  { %6814 = vmatpush1.bf16.msra.mxu0 %v11479_v37  ;;  %7502 = vmatpush1.bf16.msra.mxu1 %v11482_v38  ;;  %v11571_v37 = vld [vmem:[#allocation2 + $0x1704] ss:$16 sps:$4 sm:$0xff]   ;;  %v11574_v38 = vld [vmem:[#allocation2 + $0x170c] ss:$16 sps:$4 sm:$0xff]  }
 0x314   :  { %6815 = vmatprep.subr.bf16.mxu0 %v11487_v39  ;;  %7503 = vmatprep.subr.bf16.mxu1 %v11490_v40  ;;  %v11569_v39 = vld [vmem:[#allocation2 + $0x1700] ss:$16 sps:$4 sm:$0xff]   ;;  %v11572_v40 = vld [vmem:[#allocation2 + $0x1708] ss:$16 sps:$4 sm:$0xff]  }
 0x317   :  { %6816 = vmatpush1.bf16.msra.mxu0 %v11485_v41  ;;  %7504 = vmatpush1.bf16.msra.mxu1 %v11488_v42  ;;  %v11577_v41 = vld [vmem:[#allocation2 + $0x1724] ss:$16 sps:$4 sm:$0xff]   ;;  %v11580_v42 = vld [vmem:[#allocation2 + $0x172c] ss:$16 sps:$4 sm:$0xff]  }
 0x318   :  { %6817 = vmatprep.subr.bf16.mxu0 %v11493_v43  ;;  %7505 = vmatprep.subr.bf16.mxu1 %v11496_v44  ;;  %v11575_v43 = vld [vmem:[#allocation2 + $0x1720] ss:$16 sps:$4 sm:$0xff]   ;;  %v11578_v44 = vld [vmem:[#allocation2 + $0x1728] ss:$16 sps:$4 sm:$0xff]  }
 0x31b   :  { %6818 = vmatpush1.bf16.msra.mxu0 %v11491_v45  ;;  %7506 = vmatpush1.bf16.msra.mxu1 %v11494_v46  ;;  %v11583_v45 = vld [vmem:[#allocation2 + $0x1744] ss:$16 sps:$4 sm:$0xff]   ;;  %v11586_v46 = vld [vmem:[#allocation2 + $0x174c] ss:$16 sps:$4 sm:$0xff]  }
 0x31c   :  { %6819 = vmatprep.subr.bf16.mxu0 %v11499_v47  ;;  %7507 = vmatprep.subr.bf16.mxu1 %v11502_v48  ;;  %v11581_v47 = vld [vmem:[#allocation2 + $0x1740] ss:$16 sps:$4 sm:$0xff]   ;;  %v11584_v48 = vld [vmem:[#allocation2 + $0x1748] ss:$16 sps:$4 sm:$0xff]  }
 0x31f   :  { %6820 = vmatpush1.bf16.msra.mxu0 %v11497_v49  ;;  %7508 = vmatpush1.bf16.msra.mxu1 %v11500_v50  ;;  %v11589_v49 = vld [vmem:[#allocation2 + $0x1764] ss:$16 sps:$4 sm:$0xff]   ;;  %v11592_v50 = vld [vmem:[#allocation2 + $0x176c] ss:$16 sps:$4 sm:$0xff]  }
 0x320   :  { %6821 = vmatprep.subr.bf16.mxu0 %v11505_v51  ;;  %7509 = vmatprep.subr.bf16.mxu1 %v11508_v52  ;;  %v11587_v51 = vld [vmem:[#allocation2 + $0x1760] ss:$16 sps:$4 sm:$0xff]   ;;  %v11590_v52 = vld [vmem:[#allocation2 + $0x1768] ss:$16 sps:$4 sm:$0xff]  }
 0x323   :  { %6822 = vmatpush1.bf16.msra.mxu0 %v11503_v53  ;;  %7510 = vmatpush1.bf16.msra.mxu1 %v11506_v54  ;;  %v11595_v53 = vld [vmem:[#allocation2 + $0x1784] ss:$16 sps:$4 sm:$0xff]   ;;  %v11598_v54 = vld [vmem:[#allocation2 + $0x178c] ss:$16 sps:$4 sm:$0xff]  }
 0x324   :  { %6823 = vmatprep.subr.bf16.mxu0 %v11511_v55  ;;  %7511 = vmatprep.subr.bf16.mxu1 %v11514_v56  ;;  %v11593_v55 = vld [vmem:[#allocation2 + $0x1780] ss:$16 sps:$4 sm:$0xff]   ;;  %v11596_v56 = vld [vmem:[#allocation2 + $0x1788] ss:$16 sps:$4 sm:$0xff]  }
 0x327   :  { %6824 = vmatpush1.bf16.msra.mxu0 %v11509_v57  ;;  %7512 = vmatpush1.bf16.msra.mxu1 %v11512_v58  ;;  %v11601_v57 = vld [vmem:[#allocation2 + $0x17a4] ss:$16 sps:$4 sm:$0xff]   ;;  %v11604_v58 = vld [vmem:[#allocation2 + $0x17ac] ss:$16 sps:$4 sm:$0xff]  }
 0x328   :  { %6825 = vmatprep.subr.bf16.mxu0 %v11517_v59  ;;  %7513 = vmatprep.subr.bf16.mxu1 %v11520_v60  ;;  %v11599_v59 = vld [vmem:[#allocation2 + $0x17a0] ss:$16 sps:$4 sm:$0xff]   ;;  %v11602_v60 = vld [vmem:[#allocation2 + $0x17a8] ss:$16 sps:$4 sm:$0xff]  }
 0x32b   :  { %6826 = vmatpush1.bf16.msra.mxu0 %v11515_v61  ;;  %7514 = vmatpush1.bf16.msra.mxu1 %v11518_v62  ;;  %v11607_v61 = vld [vmem:[#allocation2 + $0x17c4] ss:$16 sps:$4 sm:$0xff]   ;;  %v11610_v62 = vld [vmem:[#allocation2 + $0x17cc] ss:$16 sps:$4 sm:$0xff]  }
 0x32c   :  { %6838 = vmatprep.subr.bf16.mxu0 %v11523_v1  ;;  %7526 = vmatprep.subr.bf16.mxu1 %v11526_v2  ;;  %v11613_v1 = vld [vmem:[#allocation2 + $0x17e4] ss:$16 sps:$4 sm:$0xff]   ;;  %v11616_v2 = vld [vmem:[#allocation2 + $0x17ec] ss:$16 sps:$4 sm:$0xff]  }
 0x32e   :  { %6828 = vmatmul.mubr.bf16.vlgmr.msra.gmra.mrb[0].mxu0 %v187_v3  ;;  %7516 = vmatmul.mubr.bf16.vlgmr.msra.gmra.mrb[0].mxu1 %v187_v3  ;;  %v11611_v3 = vld [vmem:[#allocation2 + $0x17e0] ss:$16 sps:$4 sm:$0xff]  }
 0x32f   :  { %6839 = vmatpush1.bf16.msra.mxu0 %v11521_v6  ;;  %7527 = vmatpush1.bf16.msra.mxu1 %v11524_v7  ;;  %v157_v6 = vld [vmem:[%s12711_s0 + $0x1b0] sm:$0xff] }
 0x330   :  { %6840 = vmatprep.subr.bf16.mxu0 %v11529_v8  ;;  %7528 = vmatprep.subr.bf16.mxu1 %v11532_v9  ;;  %v11619_v7 = vld [vmem:[#allocation2 + $0x1804] ss:$16 sps:$4 sm:$0xff]   ;;  %v11622_v8 = vld [vmem:[#allocation2 + $0x180c] ss:$16 sps:$4 sm:$0xff]   ;;  %v189_v9 = vpack.c.bf16 %v157_v6, %v125_v5  ;;  %v11701_v5 = vld [vmem:[#allocation2 + $0x19c0] ss:$16 sps:$4 sm:$0xff]  }
 0x331   :  { %6870 = vmatprep.mubr.bf16.mxu0 %v190_v10  ;;  %7558 = vmatprep.mubr.bf16.mxu1 %v190_v10  ;;  %v128_v10 = vld [vmem:[%s12711_s0 + $0xc8] sm:$0xff] }
 0x332   :  { %v11704_v6 = vld [vmem:[#allocation2 + $0x19c8] ss:$16 sps:$4 sm:$0xff]  }
 0x333   :  { %6841 = vmatpush1.bf16.msra.mxu0 %v11527_v11  ;;  %7529 = vmatpush1.bf16.msra.mxu1 %v11530_v12  ;;  %v160_v11 = vld [vmem:[%s12711_s0 + $0x1c8] sm:$0xff]  ;;  %v11617_v12 = vld [vmem:[#allocation2 + $0x1800] ss:$16 sps:$4 sm:$0xff]  }
 0x334   :  { %6842 = vmatprep.subr.bf16.mxu0 %v11535_v13  ;;  %7530 = vmatprep.subr.bf16.mxu1 %v11538_v14  ;;  %v11620_v13 = vld [vmem:[#allocation2 + $0x1808] ss:$16 sps:$4 sm:$0xff]   ;;  %v11625_v14 = vld [vmem:[#allocation2 + $0x1824] ss:$16 sps:$4 sm:$0xff]  }
 0x337   :  { %6843 = vmatpush1.bf16.msra.mxu0 %v11533_v15  ;;  %7531 = vmatpush1.bf16.msra.mxu1 %v11536_v16  ;;  %v11628_v15 = vld [vmem:[#allocation2 + $0x182c] ss:$16 sps:$4 sm:$0xff]   ;;  %v192_v16 = vpack.c.bf16 %v160_v11, %v128_v10  ;;  %v11710_v10 = vld [vmem:[#allocation2 + $0x19e8] ss:$16 sps:$4 sm:$0xff]   ;;  %v127_v11 = vld [vmem:[%s12711_s0 + $0xc0] sm:$0xff] }
 0x338   :  { %6844 = vmatprep.subr.bf16.mxu0 %v11541_v17  ;;  %7532 = vmatprep.subr.bf16.mxu1 %v11544_v18  ;;  %v11623_v17 = vld [vmem:[#allocation2 + $0x1820] ss:$16 sps:$4 sm:$0xff]   ;;  %v11626_v18 = vld [vmem:[#allocation2 + $0x1828] ss:$16 sps:$4 sm:$0xff]  }
 0x33b   :  { %6845 = vmatpush1.bf16.msra.mxu0 %v11539_v19  ;;  %7533 = vmatpush1.bf16.msra.mxu1 %v11542_v20  ;;  %v11631_v19 = vld [vmem:[#allocation2 + $0x1844] ss:$16 sps:$4 sm:$0xff]   ;;  %v11634_v20 = vld [vmem:[#allocation2 + $0x184c] ss:$16 sps:$4 sm:$0xff]  }
 0x33c   :  { %6846 = vmatprep.subr.bf16.mxu0 %v11547_v21  ;;  %7534 = vmatprep.subr.bf16.mxu1 %v11550_v22  ;;  %v11629_v21 = vld [vmem:[#allocation2 + $0x1840] ss:$16 sps:$4 sm:$0xff]   ;;  %v11632_v22 = vld [vmem:[#allocation2 + $0x1848] ss:$16 sps:$4 sm:$0xff]  }
 0x33f   :  { %6847 = vmatpush1.bf16.msra.mxu0 %v11545_v23  ;;  %7535 = vmatpush1.bf16.msra.mxu1 %v11548_v24  ;;  %v11637_v23 = vld [vmem:[#allocation2 + $0x1864] ss:$16 sps:$4 sm:$0xff]   ;;  %v11640_v24 = vld [vmem:[#allocation2 + $0x186c] ss:$16 sps:$4 sm:$0xff]  }
 0x340   :  { %6848 = vmatprep.subr.bf16.mxu0 %v11553_v25  ;;  %7536 = vmatprep.subr.bf16.mxu1 %v11556_v26  ;;  %v11635_v25 = vld [vmem:[#allocation2 + $0x1860] ss:$16 sps:$4 sm:$0xff]   ;;  %v11638_v26 = vld [vmem:[#allocation2 + $0x1868] ss:$16 sps:$4 sm:$0xff]  }
 0x343   :  { %6849 = vmatpush1.bf16.msra.mxu0 %v11551_v27  ;;  %7537 = vmatpush1.bf16.msra.mxu1 %v11554_v28  ;;  %v11643_v27 = vld [vmem:[#allocation2 + $0x1884] ss:$16 sps:$4 sm:$0xff]   ;;  %v11646_v28 = vld [vmem:[#allocation2 + $0x188c] ss:$16 sps:$4 sm:$0xff]  }
 0x344   :  { %6850 = vmatprep.subr.bf16.mxu0 %v11559_v29  ;;  %7538 = vmatprep.subr.bf16.mxu1 %v11562_v30  ;;  %v11641_v29 = vld [vmem:[#allocation2 + $0x1880] ss:$16 sps:$4 sm:$0xff]   ;;  %v11644_v30 = vld [vmem:[#allocation2 + $0x1888] ss:$16 sps:$4 sm:$0xff]  }
 0x347   :  { %6851 = vmatpush1.bf16.msra.mxu0 %v11557_v31  ;;  %7539 = vmatpush1.bf16.msra.mxu1 %v11560_v32  ;;  %v11649_v31 = vld [vmem:[#allocation2 + $0x18a4] ss:$16 sps:$4 sm:$0xff]   ;;  %v11652_v32 = vld [vmem:[#allocation2 + $0x18ac] ss:$16 sps:$4 sm:$0xff]  }
 0x348   :  { %6852 = vmatprep.subr.bf16.mxu0 %v11565_v33  ;;  %7540 = vmatprep.subr.bf16.mxu1 %v11568_v34  ;;  %v11647_v33 = vld [vmem:[#allocation2 + $0x18a0] ss:$16 sps:$4 sm:$0xff]   ;;  %v11650_v34 = vld [vmem:[#allocation2 + $0x18a8] ss:$16 sps:$4 sm:$0xff]  }
 0x34b   :  { %6853 = vmatpush1.bf16.msra.mxu0 %v11563_v35  ;;  %7541 = vmatpush1.bf16.msra.mxu1 %v11566_v36  ;;  %v11655_v35 = vld [vmem:[#allocation2 + $0x18c4] ss:$16 sps:$4 sm:$0xff]   ;;  %v11658_v36 = vld [vmem:[#allocation2 + $0x18cc] ss:$16 sps:$4 sm:$0xff]  }
 0x34c   :  { %6854 = vmatprep.subr.bf16.mxu0 %v11571_v37  ;;  %7542 = vmatprep.subr.bf16.mxu1 %v11574_v38  ;;  %v11653_v37 = vld [vmem:[#allocation2 + $0x18c0] ss:$16 sps:$4 sm:$0xff]   ;;  %v11656_v38 = vld [vmem:[#allocation2 + $0x18c8] ss:$16 sps:$4 sm:$0xff]  }
 0x34f   :  { %6855 = vmatpush1.bf16.msra.mxu0 %v11569_v39  ;;  %7543 = vmatpush1.bf16.msra.mxu1 %v11572_v40  ;;  %v11661_v39 = vld [vmem:[#allocation2 + $0x18e4] ss:$16 sps:$4 sm:$0xff]   ;;  %v11664_v40 = vld [vmem:[#allocation2 + $0x18ec] ss:$16 sps:$4 sm:$0xff]  }
 0x350   :  { %6856 = vmatprep.subr.bf16.mxu0 %v11577_v41  ;;  %7544 = vmatprep.subr.bf16.mxu1 %v11580_v42  ;;  %v11659_v41 = vld [vmem:[#allocation2 + $0x18e0] ss:$16 sps:$4 sm:$0xff]   ;;  %v11662_v42 = vld [vmem:[#allocation2 + $0x18e8] ss:$16 sps:$4 sm:$0xff]  }
 0x353   :  { %6857 = vmatpush1.bf16.msra.mxu0 %v11575_v43  ;;  %7545 = vmatpush1.bf16.msra.mxu1 %v11578_v44  ;;  %v11667_v43 = vld [vmem:[#allocation2 + $0x1904] ss:$16 sps:$4 sm:$0xff]   ;;  %v11670_v44 = vld [vmem:[#allocation2 + $0x190c] ss:$16 sps:$4 sm:$0xff]  }
 0x354   :  { %6858 = vmatprep.subr.bf16.mxu0 %v11583_v45  ;;  %7546 = vmatprep.subr.bf16.mxu1 %v11586_v46  ;;  %v11665_v45 = vld [vmem:[#allocation2 + $0x1900] ss:$16 sps:$4 sm:$0xff]   ;;  %v11668_v46 = vld [vmem:[#allocation2 + $0x1908] ss:$16 sps:$4 sm:$0xff]  }
 0x357   :  { %6859 = vmatpush1.bf16.msra.mxu0 %v11581_v47  ;;  %7547 = vmatpush1.bf16.msra.mxu1 %v11584_v48  ;;  %v11673_v47 = vld [vmem:[#allocation2 + $0x1924] ss:$16 sps:$4 sm:$0xff]   ;;  %v11676_v48 = vld [vmem:[#allocation2 + $0x192c] ss:$16 sps:$4 sm:$0xff]  }
 0x358   :  { %6860 = vmatprep.subr.bf16.mxu0 %v11589_v49  ;;  %7548 = vmatprep.subr.bf16.mxu1 %v11592_v50  ;;  %v11671_v49 = vld [vmem:[#allocation2 + $0x1920] ss:$16 sps:$4 sm:$0xff]   ;;  %v11674_v50 = vld [vmem:[#allocation2 + $0x1928] ss:$16 sps:$4 sm:$0xff]  }
 0x35b   :  { %6861 = vmatpush1.bf16.msra.mxu0 %v11587_v51  ;;  %7549 = vmatpush1.bf16.msra.mxu1 %v11590_v52  ;;  %v11679_v51 = vld [vmem:[#allocation2 + $0x1944] ss:$16 sps:$4 sm:$0xff]   ;;  %v11682_v52 = vld [vmem:[#allocation2 + $0x194c] ss:$16 sps:$4 sm:$0xff]  }
 0x35c   :  { %6862 = vmatprep.subr.bf16.mxu0 %v11595_v53  ;;  %7550 = vmatprep.subr.bf16.mxu1 %v11598_v54  ;;  %v11677_v53 = vld [vmem:[#allocation2 + $0x1940] ss:$16 sps:$4 sm:$0xff]   ;;  %v11680_v54 = vld [vmem:[#allocation2 + $0x1948] ss:$16 sps:$4 sm:$0xff]  }
 0x35f   :  { %6863 = vmatpush1.bf16.msra.mxu0 %v11593_v55  ;;  %7551 = vmatpush1.bf16.msra.mxu1 %v11596_v56  ;;  %v11685_v55 = vld [vmem:[#allocation2 + $0x1964] ss:$16 sps:$4 sm:$0xff]   ;;  %v11688_v56 = vld [vmem:[#allocation2 + $0x196c] ss:$16 sps:$4 sm:$0xff]  }
 0x360   :  { %6864 = vmatprep.subr.bf16.mxu0 %v11601_v57  ;;  %7552 = vmatprep.subr.bf16.mxu1 %v11604_v58  ;;  %v11683_v57 = vld [vmem:[#allocation2 + $0x1960] ss:$16 sps:$4 sm:$0xff]   ;;  %v11686_v58 = vld [vmem:[#allocation2 + $0x1968] ss:$16 sps:$4 sm:$0xff]  }
 0x363   :  { %6865 = vmatpush1.bf16.msra.mxu0 %v11599_v59  ;;  %7553 = vmatpush1.bf16.msra.mxu1 %v11602_v60  ;;  %v11691_v59 = vld [vmem:[#allocation2 + $0x1984] ss:$16 sps:$4 sm:$0xff]   ;;  %v11694_v60 = vld [vmem:[#allocation2 + $0x198c] ss:$16 sps:$4 sm:$0xff]  }
 0x364   :  { %6866 = vmatprep.subr.bf16.mxu0 %v11607_v61  ;;  %7554 = vmatprep.subr.bf16.mxu1 %v11610_v62  ;;  %v11689_v61 = vld [vmem:[#allocation2 + $0x1980] ss:$16 sps:$4 sm:$0xff]   ;;  %v11692_v62 = vld [vmem:[#allocation2 + $0x1988] ss:$16 sps:$4 sm:$0xff]  }
 0x367   :  { %6867 = vmatpush1.bf16.msra.mxu0 %v11605_v63  ;;  %7555 = vmatpush1.bf16.msra.mxu1 %v11608_v0  ;;  %v11697_v63 = vld [vmem:[#allocation2 + $0x19a4] ss:$16 sps:$4 sm:$0xff]   ;;  %v11700_v0 = vld [vmem:[#allocation2 + $0x19ac] ss:$16 sps:$4 sm:$0xff]  }
 0x368   :  { %6868 = vmatprep.subr.bf16.mxu0 %v11613_v1  ;;  %7556 = vmatprep.subr.bf16.mxu1 %v11616_v2  ;;  %v11695_v1 = vld [vmem:[#allocation2 + $0x19a0] ss:$16 sps:$4 sm:$0xff]   ;;  %v11698_v2 = vld [vmem:[#allocation2 + $0x19a8] ss:$16 sps:$4 sm:$0xff]  }
 0x36b   :  { %6869 = vmatpush1.bf16.msra.mxu0 %v11611_v3  ;;  %7557 = vmatpush1.bf16.msra.mxu1 %v11614_v4  ;;  %v11703_v3 = vld [vmem:[#allocation2 + $0x19c4] ss:$16 sps:$4 sm:$0xff]   ;;  %v11706_v4 = vld [vmem:[#allocation2 + $0x19cc] ss:$16 sps:$4 sm:$0xff]  }
 0x36c   :  { %6881 = vmatprep.subr.bf16.mxu0 %v11619_v7  ;;  %7569 = vmatprep.subr.bf16.mxu1 %v11622_v8  ;;  %v11709_v7 = vld [vmem:[#allocation2 + $0x19e4] ss:$16 sps:$4 sm:$0xff]   ;;  %v11712_v8 = vld [vmem:[#allocation2 + $0x19ec] ss:$16 sps:$4 sm:$0xff]  }
 0x36e   :  { %6871 = vmatmul.mubr.bf16.vlgmr.msra.gmra.mrb[0].mxu0 %v189_v9  ;;  %7559 = vmatmul.mubr.bf16.vlgmr.msra.gmra.mrb[0].mxu1 %v189_v9  ;;  %v11707_v9 = vld [vmem:[#allocation2 + $0x19e0] ss:$16 sps:$4 sm:$0xff]  }
 0x36f   :  { %6882 = vmatpush1.bf16.msra.mxu0 %v11617_v12  ;;  %7570 = vmatpush1.bf16.msra.mxu1 %v11620_v13  ;;  %v159_v12 = vld [vmem:[%s12711_s0 + $0x1c0] sm:$0xff] }
 0x370   :  { %6883 = vmatprep.subr.bf16.mxu0 %v11625_v14  ;;  %7571 = vmatprep.subr.bf16.mxu1 %v11628_v15  ;;  %v11715_v13 = vld [vmem:[#allocation2 + $0x1a04] ss:$16 sps:$4 sm:$0xff]   ;;  %v11718_v14 = vld [vmem:[#allocation2 + $0x1a0c] ss:$16 sps:$4 sm:$0xff]   ;;  %v191_v15 = vpack.c.bf16 %v159_v12, %v127_v11  ;;  %v11797_v11 = vld [vmem:[#allocation2 + $0x1bc0] ss:$16 sps:$4 sm:$0xff]  }
 0x371   :  { %6913 = vmatprep.mubr.bf16.mxu0 %v192_v16  ;;  %7601 = vmatprep.mubr.bf16.mxu1 %v192_v16  ;;  %v130_v16 = vld [vmem:[%s12711_s0 + $0xd8] sm:$0xff] }
 0x372   :  { %v11800_v12 = vld [vmem:[#allocation2 + $0x1bc8] ss:$16 sps:$4 sm:$0xff]  }
 0x373   :  { %6884 = vmatpush1.bf16.msra.mxu0 %v11623_v17  ;;  %7572 = vmatpush1.bf16.msra.mxu1 %v11626_v18  ;;  %v162_v17 = vld [vmem:[%s12711_s0 + $0x1d8] sm:$0xff]  ;;  %v11713_v18 = vld [vmem:[#allocation2 + $0x1a00] ss:$16 sps:$4 sm:$0xff]  }
 0x374   :  { %6885 = vmatprep.subr.bf16.mxu0 %v11631_v19  ;;  %7573 = vmatprep.subr.bf16.mxu1 %v11634_v20  ;;  %v11716_v19 = vld [vmem:[#allocation2 + $0x1a08] ss:$16 sps:$4 sm:$0xff]   ;;  %v11721_v20 = vld [vmem:[#allocation2 + $0x1a24] ss:$16 sps:$4 sm:$0xff]  }
 0x377   :  { %6886 = vmatpush1.bf16.msra.mxu0 %v11629_v21  ;;  %7574 = vmatpush1.bf16.msra.mxu1 %v11632_v22  ;;  %v11724_v21 = vld [vmem:[#allocation2 + $0x1a2c] ss:$16 sps:$4 sm:$0xff]   ;;  %v194_v22 = vpack.c.bf16 %v162_v17, %v130_v16  ;;  %v11806_v16 = vld [vmem:[#allocation2 + $0x1be8] ss:$16 sps:$4 sm:$0xff]   ;;  %v129_v17 = vld [vmem:[%s12711_s0 + $0xd0] sm:$0xff] }
 0x378   :  { %6887 = vmatprep.subr.bf16.mxu0 %v11637_v23  ;;  %7575 = vmatprep.subr.bf16.mxu1 %v11640_v24  ;;  %v11719_v23 = vld [vmem:[#allocation2 + $0x1a20] ss:$16 sps:$4 sm:$0xff]   ;;  %v11722_v24 = vld [vmem:[#allocation2 + $0x1a28] ss:$16 sps:$4 sm:$0xff]  }
 0x37b   :  { %6888 = vmatpush1.bf16.msra.mxu0 %v11635_v25  ;;  %7576 = vmatpush1.bf16.msra.mxu1 %v11638_v26  ;;  %v11727_v25 = vld [vmem:[#allocation2 + $0x1a44] ss:$16 sps:$4 sm:$0xff]   ;;  %v11730_v26 = vld [vmem:[#allocation2 + $0x1a4c] ss:$16 sps:$4 sm:$0xff]  }
 0x37c   :  { %6889 = vmatprep.subr.bf16.mxu0 %v11643_v27  ;;  %7577 = vmatprep.subr.bf16.mxu1 %v11646_v28  ;;  %v11725_v27 = vld [vmem:[#allocation2 + $0x1a40] ss:$16 sps:$4 sm:$0xff]   ;;  %v11728_v28 = vld [vmem:[#allocation2 + $0x1a48] ss:$16 sps:$4 sm:$0xff]  }
 0x37f   :  { %6890 = vmatpush1.bf16.msra.mxu0 %v11641_v29  ;;  %7578 = vmatpush1.bf16.msra.mxu1 %v11644_v30  ;;  %v11733_v29 = vld [vmem:[#allocation2 + $0x1a64] ss:$16 sps:$4 sm:$0xff]   ;;  %v11736_v30 = vld [vmem:[#allocation2 + $0x1a6c] ss:$16 sps:$4 sm:$0xff]  }
 0x380   :  { %6891 = vmatprep.subr.bf16.mxu0 %v11649_v31  ;;  %7579 = vmatprep.subr.bf16.mxu1 %v11652_v32  ;;  %v11731_v31 = vld [vmem:[#allocation2 + $0x1a60] ss:$16 sps:$4 sm:$0xff]   ;;  %v11734_v32 = vld [vmem:[#allocation2 + $0x1a68] ss:$16 sps:$4 sm:$0xff]  }
 0x383   :  { %6892 = vmatpush1.bf16.msra.mxu0 %v11647_v33  ;;  %7580 = vmatpush1.bf16.msra.mxu1 %v11650_v34  ;;  %v11739_v33 = vld [vmem:[#allocation2 + $0x1a84] ss:$16 sps:$4 sm:$0xff]   ;;  %v11742_v34 = vld [vmem:[#allocation2 + $0x1a8c] ss:$16 sps:$4 sm:$0xff]  }
 0x384   :  { %6893 = vmatprep.subr.bf16.mxu0 %v11655_v35  ;;  %7581 = vmatprep.subr.bf16.mxu1 %v11658_v36  ;;  %v11737_v35 = vld [vmem:[#allocation2 + $0x1a80] ss:$16 sps:$4 sm:$0xff]   ;;  %v11740_v36 = vld [vmem:[#allocation2 + $0x1a88] ss:$16 sps:$4 sm:$0xff]  }
 0x387   :  { %6894 = vmatpush1.bf16.msra.mxu0 %v11653_v37  ;;  %7582 = vmatpush1.bf16.msra.mxu1 %v11656_v38  ;;  %v11745_v37 = vld [vmem:[#allocation2 + $0x1aa4] ss:$16 sps:$4 sm:$0xff]   ;;  %v11748_v38 = vld [vmem:[#allocation2 + $0x1aac] ss:$16 sps:$4 sm:$0xff]  }
 0x388   :  { %6895 = vmatprep.subr.bf16.mxu0 %v11661_v39  ;;  %7583 = vmatprep.subr.bf16.mxu1 %v11664_v40  ;;  %v11743_v39 = vld [vmem:[#allocation2 + $0x1aa0] ss:$16 sps:$4 sm:$0xff]   ;;  %v11746_v40 = vld [vmem:[#allocation2 + $0x1aa8] ss:$16 sps:$4 sm:$0xff]  }
 0x38b   :  { %6896 = vmatpush1.bf16.msra.mxu0 %v11659_v41  ;;  %7584 = vmatpush1.bf16.msra.mxu1 %v11662_v42  ;;  %v11751_v41 = vld [vmem:[#allocation2 + $0x1ac4] ss:$16 sps:$4 sm:$0xff]   ;;  %v11754_v42 = vld [vmem:[#allocation2 + $0x1acc] ss:$16 sps:$4 sm:$0xff]  }
 0x38c   :  { %6897 = vmatprep.subr.bf16.mxu0 %v11667_v43  ;;  %7585 = vmatprep.subr.bf16.mxu1 %v11670_v44  ;;  %v11749_v43 = vld [vmem:[#allocation2 + $0x1ac0] ss:$16 sps:$4 sm:$0xff]   ;;  %v11752_v44 = vld [vmem:[#allocation2 + $0x1ac8] ss:$16 sps:$4 sm:$0xff]  }
 0x38f   :  { %6898 = vmatpush1.bf16.msra.mxu0 %v11665_v45  ;;  %7586 = vmatpush1.bf16.msra.mxu1 %v11668_v46  ;;  %v11757_v45 = vld [vmem:[#allocation2 + $0x1ae4] ss:$16 sps:$4 sm:$0xff]   ;;  %v11760_v46 = vld [vmem:[#allocation2 + $0x1aec] ss:$16 sps:$4 sm:$0xff]  }
 0x390   :  { %6899 = vmatprep.subr.bf16.mxu0 %v11673_v47  ;;  %7587 = vmatprep.subr.bf16.mxu1 %v11676_v48  ;;  %v11755_v47 = vld [vmem:[#allocation2 + $0x1ae0] ss:$16 sps:$4 sm:$0xff]   ;;  %v11758_v48 = vld [vmem:[#allocation2 + $0x1ae8] ss:$16 sps:$4 sm:$0xff]  }
 0x393   :  { %6900 = vmatpush1.bf16.msra.mxu0 %v11671_v49  ;;  %7588 = vmatpush1.bf16.msra.mxu1 %v11674_v50  ;;  %v11763_v49 = vld [vmem:[#allocation2 + $0x1b04] ss:$16 sps:$4 sm:$0xff]   ;;  %v11766_v50 = vld [vmem:[#allocation2 + $0x1b0c] ss:$16 sps:$4 sm:$0xff]  }
 0x394   :  { %6901 = vmatprep.subr.bf16.mxu0 %v11679_v51  ;;  %7589 = vmatprep.subr.bf16.mxu1 %v11682_v52  ;;  %v11761_v51 = vld [vmem:[#allocation2 + $0x1b00] ss:$16 sps:$4 sm:$0xff]   ;;  %v11764_v52 = vld [vmem:[#allocation2 + $0x1b08] ss:$16 sps:$4 sm:$0xff]  }
 0x397   :  { %6902 = vmatpush1.bf16.msra.mxu0 %v11677_v53  ;;  %7590 = vmatpush1.bf16.msra.mxu1 %v11680_v54  ;;  %v11769_v53 = vld [vmem:[#allocation2 + $0x1b24] ss:$16 sps:$4 sm:$0xff]   ;;  %v11772_v54 = vld [vmem:[#allocation2 + $0x1b2c] ss:$16 sps:$4 sm:$0xff]  }
 0x398   :  { %6903 = vmatprep.subr.bf16.mxu0 %v11685_v55  ;;  %7591 = vmatprep.subr.bf16.mxu1 %v11688_v56  ;;  %v11767_v55 = vld [vmem:[#allocation2 + $0x1b20] ss:$16 sps:$4 sm:$0xff]   ;;  %v11770_v56 = vld [vmem:[#allocation2 + $0x1b28] ss:$16 sps:$4 sm:$0xff]  }
 0x39b   :  { %6904 = vmatpush1.bf16.msra.mxu0 %v11683_v57  ;;  %7592 = vmatpush1.bf16.msra.mxu1 %v11686_v58  ;;  %v11775_v57 = vld [vmem:[#allocation2 + $0x1b44] ss:$16 sps:$4 sm:$0xff]   ;;  %v11778_v58 = vld [vmem:[#allocation2 + $0x1b4c] ss:$16 sps:$4 sm:$0xff]  }
 0x39c   :  { %6905 = vmatprep.subr.bf16.mxu0 %v11691_v59  ;;  %7593 = vmatprep.subr.bf16.mxu1 %v11694_v60  ;;  %v11773_v59 = vld [vmem:[#allocation2 + $0x1b40] ss:$16 sps:$4 sm:$0xff]   ;;  %v11776_v60 = vld [vmem:[#allocation2 + $0x1b48] ss:$16 sps:$4 sm:$0xff]  }
 0x39f   :  { %6906 = vmatpush1.bf16.msra.mxu0 %v11689_v61  ;;  %7594 = vmatpush1.bf16.msra.mxu1 %v11692_v62  ;;  %v11781_v61 = vld [vmem:[#allocation2 + $0x1b64] ss:$16 sps:$4 sm:$0xff]   ;;  %v11784_v62 = vld [vmem:[#allocation2 + $0x1b6c] ss:$16 sps:$4 sm:$0xff]  }
 0x3a0   :  { %6907 = vmatprep.subr.bf16.mxu0 %v11697_v63  ;;  %7595 = vmatprep.subr.bf16.mxu1 %v11700_v0  ;;  %v11779_v63 = vld [vmem:[#allocation2 + $0x1b60] ss:$16 sps:$4 sm:$0xff]   ;;  %v11782_v0 = vld [vmem:[#allocation2 + $0x1b68] ss:$16 sps:$4 sm:$0xff]  }
 0x3a3   :  { %6908 = vmatpush1.bf16.msra.mxu0 %v11695_v1  ;;  %7596 = vmatpush1.bf16.msra.mxu1 %v11698_v2  ;;  %v11787_v1 = vld [vmem:[#allocation2 + $0x1b84] ss:$16 sps:$4 sm:$0xff]   ;;  %v11790_v2 = vld [vmem:[#allocation2 + $0x1b8c] ss:$16 sps:$4 sm:$0xff]  }
 0x3a4   :  { %6909 = vmatprep.subr.bf16.mxu0 %v11703_v3  ;;  %7597 = vmatprep.subr.bf16.mxu1 %v11706_v4  ;;  %v11785_v3 = vld [vmem:[#allocation2 + $0x1b80] ss:$16 sps:$4 sm:$0xff]   ;;  %v11788_v4 = vld [vmem:[#allocation2 + $0x1b88] ss:$16 sps:$4 sm:$0xff]  }
 0x3a7   :  { %6910 = vmatpush1.bf16.msra.mxu0 %v11701_v5  ;;  %7598 = vmatpush1.bf16.msra.mxu1 %v11704_v6  ;;  %v11793_v5 = vld [vmem:[#allocation2 + $0x1ba4] ss:$16 sps:$4 sm:$0xff]   ;;  %v11796_v6 = vld [vmem:[#allocation2 + $0x1bac] ss:$16 sps:$4 sm:$0xff]  }
 0x3a8   :  { %6911 = vmatprep.subr.bf16.mxu0 %v11709_v7  ;;  %7599 = vmatprep.subr.bf16.mxu1 %v11712_v8  ;;  %v11791_v7 = vld [vmem:[#allocation2 + $0x1ba0] ss:$16 sps:$4 sm:$0xff]   ;;  %v11794_v8 = vld [vmem:[#allocation2 + $0x1ba8] ss:$16 sps:$4 sm:$0xff]  }
 0x3ab   :  { %6912 = vmatpush1.bf16.msra.mxu0 %v11707_v9  ;;  %7600 = vmatpush1.bf16.msra.mxu1 %v11710_v10  ;;  %v11799_v9 = vld [vmem:[#allocation2 + $0x1bc4] ss:$16 sps:$4 sm:$0xff]   ;;  %v11802_v10 = vld [vmem:[#allocation2 + $0x1bcc] ss:$16 sps:$4 sm:$0xff]  }
 0x3ac   :  { %6924 = vmatprep.subr.bf16.mxu0 %v11715_v13  ;;  %7612 = vmatprep.subr.bf16.mxu1 %v11718_v14  ;;  %v11805_v13 = vld [vmem:[#allocation2 + $0x1be4] ss:$16 sps:$4 sm:$0xff]   ;;  %v11808_v14 = vld [vmem:[#allocation2 + $0x1bec] ss:$16 sps:$4 sm:$0xff]  }
 0x3ae   :  { %6914 = vmatmul.mubr.bf16.vlgmr.msra.gmra.mrb[0].mxu0 %v191_v15  ;;  %7602 = vmatmul.mubr.bf16.vlgmr.msra.gmra.mrb[0].mxu1 %v191_v15  ;;  %v11803_v15 = vld [vmem:[#allocation2 + $0x1be0] ss:$16 sps:$4 sm:$0xff]  }
 0x3af   :  { %6925 = vmatpush1.bf16.msra.mxu0 %v11713_v18  ;;  %7613 = vmatpush1.bf16.msra.mxu1 %v11716_v19  ;;  %v161_v18 = vld [vmem:[%s12711_s0 + $0x1d0] sm:$0xff] }
 0x3b0   :  { %6926 = vmatprep.subr.bf16.mxu0 %v11721_v20  ;;  %7614 = vmatprep.subr.bf16.mxu1 %v11724_v21  ;;  %v11811_v19 = vld [vmem:[#allocation2 + $0x1c04] ss:$16 sps:$4 sm:$0xff]   ;;  %v11814_v20 = vld [vmem:[#allocation2 + $0x1c0c] ss:$16 sps:$4 sm:$0xff]   ;;  %v193_v21 = vpack.c.bf16 %v161_v18, %v129_v17  ;;  %v11893_v17 = vld [vmem:[#allocation2 + $0x1dc0] ss:$16 sps:$4 sm:$0xff]  }
 0x3b1   :  { %6956 = vmatprep.mubr.bf16.mxu0 %v194_v22  ;;  %7644 = vmatprep.mubr.bf16.mxu1 %v194_v22  ;;  %v132_v22 = vld [vmem:[%s12711_s0 + $0xe8] sm:$0xff] }
 0x3b2   :  { %v11896_v18 = vld [vmem:[#allocation2 + $0x1dc8] ss:$16 sps:$4 sm:$0xff]  }
 0x3b3   :  { %6927 = vmatpush1.bf16.msra.mxu0 %v11719_v23  ;;  %7615 = vmatpush1.bf16.msra.mxu1 %v11722_v24  ;;  %v164_v23 = vld [vmem:[%s12711_s0 + $0x1e8] sm:$0xff]  ;;  %v11809_v24 = vld [vmem:[#allocation2 + $0x1c00] ss:$16 sps:$4 sm:$0xff]  }
 0x3b4   :  { %6928 = vmatprep.subr.bf16.mxu0 %v11727_v25  ;;  %7616 = vmatprep.subr.bf16.mxu1 %v11730_v26  ;;  %v11812_v25 = vld [vmem:[#allocation2 + $0x1c08] ss:$16 sps:$4 sm:$0xff]   ;;  %v11817_v26 = vld [vmem:[#allocation2 + $0x1c24] ss:$16 sps:$4 sm:$0xff]  }
 0x3b7   :  { %6929 = vmatpush1.bf16.msra.mxu0 %v11725_v27  ;;  %7617 = vmatpush1.bf16.msra.mxu1 %v11728_v28  ;;  %v11820_v27 = vld [vmem:[#allocation2 + $0x1c2c] ss:$16 sps:$4 sm:$0xff]   ;;  %v196_v28 = vpack.c.bf16 %v164_v23, %v132_v22  ;;  %v11902_v22 = vld [vmem:[#allocation2 + $0x1de8] ss:$16 sps:$4 sm:$0xff]   ;;  %v131_v23 = vld [vmem:[%s12711_s0 + $0xe0] sm:$0xff] }
 0x3b8   :  { %6930 = vmatprep.subr.bf16.mxu0 %v11733_v29  ;;  %7618 = vmatprep.subr.bf16.mxu1 %v11736_v30  ;;  %v11815_v29 = vld [vmem:[#allocation2 + $0x1c20] ss:$16 sps:$4 sm:$0xff]   ;;  %v11818_v30 = vld [vmem:[#allocation2 + $0x1c28] ss:$16 sps:$4 sm:$0xff]  }
 0x3bb   :  { %6931 = vmatpush1.bf16.msra.mxu0 %v11731_v31  ;;  %7619 = vmatpush1.bf16.msra.mxu1 %v11734_v32  ;;  %v11823_v31 = vld [vmem:[#allocation2 + $0x1c44] ss:$16 sps:$4 sm:$0xff]   ;;  %v11826_v32 = vld [vmem:[#allocation2 + $0x1c4c] ss:$16 sps:$4 sm:$0xff]  }
 0x3bc   :  { %6932 = vmatprep.subr.bf16.mxu0 %v11739_v33  ;;  %7620 = vmatprep.subr.bf16.mxu1 %v11742_v34  ;;  %v11821_v33 = vld [vmem:[#allocation2 + $0x1c40] ss:$16 sps:$4 sm:$0xff]   ;;  %v11824_v34 = vld [vmem:[#allocation2 + $0x1c48] ss:$16 sps:$4 sm:$0xff]  }
 0x3bf   :  { %6933 = vmatpush1.bf16.msra.mxu0 %v11737_v35  ;;  %7621 = vmatpush1.bf16.msra.mxu1 %v11740_v36  ;;  %v11829_v35 = vld [vmem:[#allocation2 + $0x1c64] ss:$16 sps:$4 sm:$0xff]   ;;  %v11832_v36 = vld [vmem:[#allocation2 + $0x1c6c] ss:$16 sps:$4 sm:$0xff]  }
 0x3c0   :  { %6934 = vmatprep.subr.bf16.mxu0 %v11745_v37  ;;  %7622 = vmatprep.subr.bf16.mxu1 %v11748_v38  ;;  %v11827_v37 = vld [vmem:[#allocation2 + $0x1c60] ss:$16 sps:$4 sm:$0xff]   ;;  %v11830_v38 = vld [vmem:[#allocation2 + $0x1c68] ss:$16 sps:$4 sm:$0xff]  }
 0x3c3   :  { %6935 = vmatpush1.bf16.msra.mxu0 %v11743_v39  ;;  %7623 = vmatpush1.bf16.msra.mxu1 %v11746_v40  ;;  %v11835_v39 = vld [vmem:[#allocation2 + $0x1c84] ss:$16 sps:$4 sm:$0xff]   ;;  %v11838_v40 = vld [vmem:[#allocation2 + $0x1c8c] ss:$16 sps:$4 sm:$0xff]  }
 0x3c4   :  { %6936 = vmatprep.subr.bf16.mxu0 %v11751_v41  ;;  %7624 = vmatprep.subr.bf16.mxu1 %v11754_v42  ;;  %v11833_v41 = vld [vmem:[#allocation2 + $0x1c80] ss:$16 sps:$4 sm:$0xff]   ;;  %v11836_v42 = vld [vmem:[#allocation2 + $0x1c88] ss:$16 sps:$4 sm:$0xff]  }
 0x3c7   :  { %6937 = vmatpush1.bf16.msra.mxu0 %v11749_v43  ;;  %7625 = vmatpush1.bf16.msra.mxu1 %v11752_v44  ;;  %v11841_v43 = vld [vmem:[#allocation2 + $0x1ca4] ss:$16 sps:$4 sm:$0xff]   ;;  %v11844_v44 = vld [vmem:[#allocation2 + $0x1cac] ss:$16 sps:$4 sm:$0xff]  }
 0x3c8   :  { %6938 = vmatprep.subr.bf16.mxu0 %v11757_v45  ;;  %7626 = vmatprep.subr.bf16.mxu1 %v11760_v46  ;;  %v11839_v45 = vld [vmem:[#allocation2 + $0x1ca0] ss:$16 sps:$4 sm:$0xff]   ;;  %v11842_v46 = vld [vmem:[#allocation2 + $0x1ca8] ss:$16 sps:$4 sm:$0xff]  }
 0x3cb   :  { %6939 = vmatpush1.bf16.msra.mxu0 %v11755_v47  ;;  %7627 = vmatpush1.bf16.msra.mxu1 %v11758_v48  ;;  %v11847_v47 = vld [vmem:[#allocation2 + $0x1cc4] ss:$16 sps:$4 sm:$0xff]   ;;  %v11850_v48 = vld [vmem:[#allocation2 + $0x1ccc] ss:$16 sps:$4 sm:$0xff]  }
 0x3cc   :  { %6940 = vmatprep.subr.bf16.mxu0 %v11763_v49  ;;  %7628 = vmatprep.subr.bf16.mxu1 %v11766_v50  ;;  %v11845_v49 = vld [vmem:[#allocation2 + $0x1cc0] ss:$16 sps:$4 sm:$0xff]   ;;  %v11848_v50 = vld [vmem:[#allocation2 + $0x1cc8] ss:$16 sps:$4 sm:$0xff]  }
 0x3cf   :  { %6941 = vmatpush1.bf16.msra.mxu0 %v11761_v51  ;;  %7629 = vmatpush1.bf16.msra.mxu1 %v11764_v52  ;;  %v11853_v51 = vld [vmem:[#allocation2 + $0x1ce4] ss:$16 sps:$4 sm:$0xff]   ;;  %v11856_v52 = vld [vmem:[#allocation2 + $0x1cec] ss:$16 sps:$4 sm:$0xff]  }
 0x3d0   :  { %6942 = vmatprep.subr.bf16.mxu0 %v11769_v53  ;;  %7630 = vmatprep.subr.bf16.mxu1 %v11772_v54  ;;  %v11851_v53 = vld [vmem:[#allocation2 + $0x1ce0] ss:$16 sps:$4 sm:$0xff]   ;;  %v11854_v54 = vld [vmem:[#allocation2 + $0x1ce8] ss:$16 sps:$4 sm:$0xff]  }
 0x3d3   :  { %6943 = vmatpush1.bf16.msra.mxu0 %v11767_v55  ;;  %7631 = vmatpush1.bf16.msra.mxu1 %v11770_v56  ;;  %v11859_v55 = vld [vmem:[#allocation2 + $0x1d04] ss:$16 sps:$4 sm:$0xff]   ;;  %v11862_v56 = vld [vmem:[#allocation2 + $0x1d0c] ss:$16 sps:$4 sm:$0xff]  }
 0x3d4   :  { %6944 = vmatprep.subr.bf16.mxu0 %v11775_v57  ;;  %7632 = vmatprep.subr.bf16.mxu1 %v11778_v58  ;;  %v11857_v57 = vld [vmem:[#allocation2 + $0x1d00] ss:$16 sps:$4 sm:$0xff]   ;;  %v11860_v58 = vld [vmem:[#allocation2 + $0x1d08] ss:$16 sps:$4 sm:$0xff]  }
 0x3d7   :  { %6945 = vmatpush1.bf16.msra.mxu0 %v11773_v59  ;;  %7633 = vmatpush1.bf16.msra.mxu1 %v11776_v60  ;;  %v11865_v59 = vld [vmem:[#allocation2 + $0x1d24] ss:$16 sps:$4 sm:$0xff]   ;;  %v11868_v60 = vld [vmem:[#allocation2 + $0x1d2c] ss:$16 sps:$4 sm:$0xff]  }
 0x3d8   :  { %6946 = vmatprep.subr.bf16.mxu0 %v11781_v61  ;;  %7634 = vmatprep.subr.bf16.mxu1 %v11784_v62  ;;  %v11863_v61 = vld [vmem:[#allocation2 + $0x1d20] ss:$16 sps:$4 sm:$0xff]   ;;  %v11866_v62 = vld [vmem:[#allocation2 + $0x1d28] ss:$16 sps:$4 sm:$0xff]  }
 0x3db   :  { %6947 = vmatpush1.bf16.msra.mxu0 %v11779_v63  ;;  %7635 = vmatpush1.bf16.msra.mxu1 %v11782_v0  ;;  %v11871_v63 = vld [vmem:[#allocation2 + $0x1d44] ss:$16 sps:$4 sm:$0xff]   ;;  %v11874_v0 = vld [vmem:[#allocation2 + $0x1d4c] ss:$16 sps:$4 sm:$0xff]  }
 0x3dc   :  { %6948 = vmatprep.subr.bf16.mxu0 %v11787_v1  ;;  %7636 = vmatprep.subr.bf16.mxu1 %v11790_v2  ;;  %v11869_v1 = vld [vmem:[#allocation2 + $0x1d40] ss:$16 sps:$4 sm:$0xff]   ;;  %v11872_v2 = vld [vmem:[#allocation2 + $0x1d48] ss:$16 sps:$4 sm:$0xff]  }
 0x3df   :  { %6949 = vmatpush1.bf16.msra.mxu0 %v11785_v3  ;;  %7637 = vmatpush1.bf16.msra.mxu1 %v11788_v4  ;;  %v11877_v3 = vld [vmem:[#allocation2 + $0x1d64] ss:$16 sps:$4 sm:$0xff]   ;;  %v11880_v4 = vld [vmem:[#allocation2 + $0x1d6c] ss:$16 sps:$4 sm:$0xff]  }
 0x3e0   :  { %6950 = vmatprep.subr.bf16.mxu0 %v11793_v5  ;;  %7638 = vmatprep.subr.bf16.mxu1 %v11796_v6  ;;  %v11875_v5 = vld [vmem:[#allocation2 + $0x1d60] ss:$16 sps:$4 sm:$0xff]   ;;  %v11878_v6 = vld [vmem:[#allocation2 + $0x1d68] ss:$16 sps:$4 sm:$0xff]  }
 0x3e3   :  { %6951 = vmatpush1.bf16.msra.mxu0 %v11791_v7  ;;  %7639 = vmatpush1.bf16.msra.mxu1 %v11794_v8  ;;  %v11883_v7 = vld [vmem:[#allocation2 + $0x1d84] ss:$16 sps:$4 sm:$0xff]   ;;  %v11886_v8 = vld [vmem:[#allocation2 + $0x1d8c] ss:$16 sps:$4 sm:$0xff]  }
 0x3e4   :  { %6952 = vmatprep.subr.bf16.mxu0 %v11799_v9  ;;  %7640 = vmatprep.subr.bf16.mxu1 %v11802_v10  ;;  %v11881_v9 = vld [vmem:[#allocation2 + $0x1d80] ss:$16 sps:$4 sm:$0xff]   ;;  %v11884_v10 = vld [vmem:[#allocation2 + $0x1d88] ss:$16 sps:$4 sm:$0xff]  }
 0x3e7   :  { %6953 = vmatpush1.bf16.msra.mxu0 %v11797_v11  ;;  %7641 = vmatpush1.bf16.msra.mxu1 %v11800_v12  ;;  %v11889_v11 = vld [vmem:[#allocation2 + $0x1da4] ss:$16 sps:$4 sm:$0xff]   ;;  %v11892_v12 = vld [vmem:[#allocation2 + $0x1dac] ss:$16 sps:$4 sm:$0xff]  }
 0x3e8   :  { %6954 = vmatprep.subr.bf16.mxu0 %v11805_v13  ;;  %7642 = vmatprep.subr.bf16.mxu1 %v11808_v14  ;;  %v11887_v13 = vld [vmem:[#allocation2 + $0x1da0] ss:$16 sps:$4 sm:$0xff]   ;;  %v11890_v14 = vld [vmem:[#allocation2 + $0x1da8] ss:$16 sps:$4 sm:$0xff]  }
 0x3eb   :  { %6955 = vmatpush1.bf16.msra.mxu0 %v11803_v15  ;;  %7643 = vmatpush1.bf16.msra.mxu1 %v11806_v16  ;;  %v11895_v15 = vld [vmem:[#allocation2 + $0x1dc4] ss:$16 sps:$4 sm:$0xff]   ;;  %v11898_v16 = vld [vmem:[#allocation2 + $0x1dcc] ss:$16 sps:$4 sm:$0xff]  }
 0x3ec   :  { %6967 = vmatprep.subr.bf16.mxu0 %v11811_v19  ;;  %7655 = vmatprep.subr.bf16.mxu1 %v11814_v20  ;;  %v11901_v19 = vld [vmem:[#allocation2 + $0x1de4] ss:$16 sps:$4 sm:$0xff]   ;;  %v11904_v20 = vld [vmem:[#allocation2 + $0x1dec] ss:$16 sps:$4 sm:$0xff]  }
 0x3ee   :  { %6957 = vmatmul.mubr.bf16.vlgmr.msra.gmra.mrb[0].mxu0 %v193_v21  ;;  %7645 = vmatmul.mubr.bf16.vlgmr.msra.gmra.mrb[0].mxu1 %v193_v21  ;;  %v11899_v21 = vld [vmem:[#allocation2 + $0x1de0] ss:$16 sps:$4 sm:$0xff]  }
 0x3ef   :  { %6968 = vmatpush1.bf16.msra.mxu0 %v11809_v24  ;;  %7656 = vmatpush1.bf16.msra.mxu1 %v11812_v25  ;;  %v163_v24 = vld [vmem:[%s12711_s0 + $0x1e0] sm:$0xff] }
 0x3f0   :  { %6969 = vmatprep.subr.bf16.mxu0 %v11817_v26  ;;  %7657 = vmatprep.subr.bf16.mxu1 %v11820_v27  ;;  %v11907_v25 = vld [vmem:[#allocation2 + $0x1e04] ss:$16 sps:$4 sm:$0xff]   ;;  %v11910_v26 = vld [vmem:[#allocation2 + $0x1e0c] ss:$16 sps:$4 sm:$0xff]   ;;  %v195_v27 = vpack.c.bf16 %v163_v24, %v131_v23  ;;  %v11989_v23 = vld [vmem:[#allocation2 + $0x1fc0] ss:$16 sps:$4 sm:$0xff]  }
 0x3f1   :  { %6999 = vmatprep.mubr.bf16.mxu0 %v196_v28  ;;  %7687 = vmatprep.mubr.bf16.mxu1 %v196_v28  ;;  %v134_v28 = vld [vmem:[%s12711_s0 + $0xf8] sm:$0xff] }
 0x3f2   :  { %v11992_v24 = vld [vmem:[#allocation2 + $0x1fc8] ss:$16 sps:$4 sm:$0xff]  }
 0x3f3   :  { %6970 = vmatpush1.bf16.msra.mxu0 %v11815_v29  ;;  %7658 = vmatpush1.bf16.msra.mxu1 %v11818_v30  ;;  %v166_v29 = vld [vmem:[%s12711_s0 + $0x1f8] sm:$0xff]  ;;  %v11905_v30 = vld [vmem:[#allocation2 + $0x1e00] ss:$16 sps:$4 sm:$0xff]  }
 0x3f4   :  { %6971 = vmatprep.subr.bf16.mxu0 %v11823_v31  ;;  %7659 = vmatprep.subr.bf16.mxu1 %v11826_v32  ;;  %v11908_v31 = vld [vmem:[#allocation2 + $0x1e08] ss:$16 sps:$4 sm:$0xff]   ;;  %v11913_v32 = vld [vmem:[#allocation2 + $0x1e24] ss:$16 sps:$4 sm:$0xff]  }
 0x3f7   :  { %6972 = vmatpush1.bf16.msra.mxu0 %v11821_v33  ;;  %7660 = vmatpush1.bf16.msra.mxu1 %v11824_v34  ;;  %v11916_v33 = vld [vmem:[#allocation2 + $0x1e2c] ss:$16 sps:$4 sm:$0xff]   ;;  %v198_v34 = vpack.c.bf16 %v166_v29, %v134_v28  ;;  %v11998_v28 = vld [vmem:[#allocation2 + $0x1fe8] ss:$16 sps:$4 sm:$0xff]   ;;  %v133_v29 = vld [vmem:[%s12711_s0 + $0xf0] sm:$0xff] }
 0x3f8   :  { %6973 = vmatprep.subr.bf16.mxu0 %v11829_v35  ;;  %7661 = vmatprep.subr.bf16.mxu1 %v11832_v36  ;;  %v11911_v35 = vld [vmem:[#allocation2 + $0x1e20] ss:$16 sps:$4 sm:$0xff]   ;;  %v11914_v36 = vld [vmem:[#allocation2 + $0x1e28] ss:$16 sps:$4 sm:$0xff]  }
 0x3fb   :  { %6974 = vmatpush1.bf16.msra.mxu0 %v11827_v37  ;;  %7662 = vmatpush1.bf16.msra.mxu1 %v11830_v38  ;;  %v11919_v37 = vld [vmem:[#allocation2 + $0x1e44] ss:$16 sps:$4 sm:$0xff]   ;;  %v11922_v38 = vld [vmem:[#allocation2 + $0x1e4c] ss:$16 sps:$4 sm:$0xff]  }
 0x3fc   :  { %6975 = vmatprep.subr.bf16.mxu0 %v11835_v39  ;;  %7663 = vmatprep.subr.bf16.mxu1 %v11838_v40  ;;  %v11917_v39 = vld [vmem:[#allocation2 + $0x1e40] ss:$16 sps:$4 sm:$0xff]   ;;  %v11920_v40 = vld [vmem:[#allocation2 + $0x1e48] ss:$16 sps:$4 sm:$0xff]  }
 0x3ff   :  { %6976 = vmatpush1.bf16.msra.mxu0 %v11833_v41  ;;  %7664 = vmatpush1.bf16.msra.mxu1 %v11836_v42  ;;  %v11925_v41 = vld [vmem:[#allocation2 + $0x1e64] ss:$16 sps:$4 sm:$0xff]   ;;  %v11928_v42 = vld [vmem:[#allocation2 + $0x1e6c] ss:$16 sps:$4 sm:$0xff]  }
 0x400   :  { %6977 = vmatprep.subr.bf16.mxu0 %v11841_v43  ;;  %7665 = vmatprep.subr.bf16.mxu1 %v11844_v44  ;;  %v11923_v43 = vld [vmem:[#allocation2 + $0x1e60] ss:$16 sps:$4 sm:$0xff]   ;;  %v11926_v44 = vld [vmem:[#allocation2 + $0x1e68] ss:$16 sps:$4 sm:$0xff]  }
 0x403   :  { %6978 = vmatpush1.bf16.msra.mxu0 %v11839_v45  ;;  %7666 = vmatpush1.bf16.msra.mxu1 %v11842_v46  ;;  %v11931_v45 = vld [vmem:[#allocation2 + $0x1e84] ss:$16 sps:$4 sm:$0xff]   ;;  %v11934_v46 = vld [vmem:[#allocation2 + $0x1e8c] ss:$16 sps:$4 sm:$0xff]  }
 0x404   :  { %6979 = vmatprep.subr.bf16.mxu0 %v11847_v47  ;;  %7667 = vmatprep.subr.bf16.mxu1 %v11850_v48  ;;  %v11929_v47 = vld [vmem:[#allocation2 + $0x1e80] ss:$16 sps:$4 sm:$0xff]   ;;  %v11932_v48 = vld [vmem:[#allocation2 + $0x1e88] ss:$16 sps:$4 sm:$0xff]  }
 0x407   :  { %6980 = vmatpush1.bf16.msra.mxu0 %v11845_v49  ;;  %7668 = vmatpush1.bf16.msra.mxu1 %v11848_v50  ;;  %v11937_v49 = vld [vmem:[#allocation2 + $0x1ea4] ss:$16 sps:$4 sm:$0xff]   ;;  %v11940_v50 = vld [vmem:[#allocation2 + $0x1eac] ss:$16 sps:$4 sm:$0xff]  }
 0x408   :  { %6981 = vmatprep.subr.bf16.mxu0 %v11853_v51  ;;  %7669 = vmatprep.subr.bf16.mxu1 %v11856_v52  ;;  %v11935_v51 = vld [vmem:[#allocation2 + $0x1ea0] ss:$16 sps:$4 sm:$0xff]   ;;  %v11938_v52 = vld [vmem:[#allocation2 + $0x1ea8] ss:$16 sps:$4 sm:$0xff]  }
 0x40b   :  { %6982 = vmatpush1.bf16.msra.mxu0 %v11851_v53  ;;  %7670 = vmatpush1.bf16.msra.mxu1 %v11854_v54  ;;  %v11943_v53 = vld [vmem:[#allocation2 + $0x1ec4] ss:$16 sps:$4 sm:$0xff]   ;;  %v11946_v54 = vld [vmem:[#allocation2 + $0x1ecc] ss:$16 sps:$4 sm:$0xff]  }
 0x40c   :  { %6983 = vmatprep.subr.bf16.mxu0 %v11859_v55  ;;  %7671 = vmatprep.subr.bf16.mxu1 %v11862_v56  ;;  %v11941_v55 = vld [vmem:[#allocation2 + $0x1ec0] ss:$16 sps:$4 sm:$0xff]   ;;  %v11944_v56 = vld [vmem:[#allocation2 + $0x1ec8] ss:$16 sps:$4 sm:$0xff]  }
 0x40f   :  { %6984 = vmatpush1.bf16.msra.mxu0 %v11857_v57  ;;  %7672 = vmatpush1.bf16.msra.mxu1 %v11860_v58  ;;  %v11949_v57 = vld [vmem:[#allocation2 + $0x1ee4] ss:$16 sps:$4 sm:$0xff]   ;;  %v11952_v58 = vld [vmem:[#allocation2 + $0x1eec] ss:$16 sps:$4 sm:$0xff]  }
 0x410   :  { %6985 = vmatprep.subr.bf16.mxu0 %v11865_v59  ;;  %7673 = vmatprep.subr.bf16.mxu1 %v11868_v60  ;;  %v11947_v59 = vld [vmem:[#allocation2 + $0x1ee0] ss:$16 sps:$4 sm:$0xff]   ;;  %v11950_v60 = vld [vmem:[#allocation2 + $0x1ee8] ss:$16 sps:$4 sm:$0xff]  }
 0x413   :  { %6986 = vmatpush1.bf16.msra.mxu0 %v11863_v61  ;;  %7674 = vmatpush1.bf16.msra.mxu1 %v11866_v62  ;;  %v11955_v61 = vld [vmem:[#allocation2 + $0x1f04] ss:$16 sps:$4 sm:$0xff]   ;;  %v11958_v62 = vld [vmem:[#allocation2 + $0x1f0c] ss:$16 sps:$4 sm:$0xff]  }
 0x414   :  { %6987 = vmatprep.subr.bf16.mxu0 %v11871_v63  ;;  %7675 = vmatprep.subr.bf16.mxu1 %v11874_v0  ;;  %v11953_v63 = vld [vmem:[#allocation2 + $0x1f00] ss:$16 sps:$4 sm:$0xff]   ;;  %v11956_v0 = vld [vmem:[#allocation2 + $0x1f08] ss:$16 sps:$4 sm:$0xff]  }
 0x417   :  { %6988 = vmatpush1.bf16.msra.mxu0 %v11869_v1  ;;  %7676 = vmatpush1.bf16.msra.mxu1 %v11872_v2  ;;  %v11961_v1 = vld [vmem:[#allocation2 + $0x1f24] ss:$16 sps:$4 sm:$0xff]   ;;  %v11964_v2 = vld [vmem:[#allocation2 + $0x1f2c] ss:$16 sps:$4 sm:$0xff]  }
 0x418   :  { %6989 = vmatprep.subr.bf16.mxu0 %v11877_v3  ;;  %7677 = vmatprep.subr.bf16.mxu1 %v11880_v4  ;;  %v11959_v3 = vld [vmem:[#allocation2 + $0x1f20] ss:$16 sps:$4 sm:$0xff]   ;;  %v11962_v4 = vld [vmem:[#allocation2 + $0x1f28] ss:$16 sps:$4 sm:$0xff]  }
 0x41b   :  { %6990 = vmatpush1.bf16.msra.mxu0 %v11875_v5  ;;  %7678 = vmatpush1.bf16.msra.mxu1 %v11878_v6  ;;  %v11967_v5 = vld [vmem:[#allocation2 + $0x1f44] ss:$16 sps:$4 sm:$0xff]   ;;  %v11970_v6 = vld [vmem:[#allocation2 + $0x1f4c] ss:$16 sps:$4 sm:$0xff]  }
 0x41c   :  { %6991 = vmatprep.subr.bf16.mxu0 %v11883_v7  ;;  %7679 = vmatprep.subr.bf16.mxu1 %v11886_v8  ;;  %v11965_v7 = vld [vmem:[#allocation2 + $0x1f40] ss:$16 sps:$4 sm:$0xff]   ;;  %v11968_v8 = vld [vmem:[#allocation2 + $0x1f48] ss:$16 sps:$4 sm:$0xff]  }
 0x41f   :  { %6992 = vmatpush1.bf16.msra.mxu0 %v11881_v9  ;;  %7680 = vmatpush1.bf16.msra.mxu1 %v11884_v10  ;;  %v11973_v9 = vld [vmem:[#allocation2 + $0x1f64] ss:$16 sps:$4 sm:$0xff]   ;;  %v11976_v10 = vld [vmem:[#allocation2 + $0x1f6c] ss:$16 sps:$4 sm:$0xff]  }
 0x420   :  { %6993 = vmatprep.subr.bf16.mxu0 %v11889_v11  ;;  %7681 = vmatprep.subr.bf16.mxu1 %v11892_v12  ;;  %v11971_v11 = vld [vmem:[#allocation2 + $0x1f60] ss:$16 sps:$4 sm:$0xff]   ;;  %v11974_v12 = vld [vmem:[#allocation2 + $0x1f68] ss:$16 sps:$4 sm:$0xff]  }
 0x423   :  { %6994 = vmatpush1.bf16.msra.mxu0 %v11887_v13  ;;  %7682 = vmatpush1.bf16.msra.mxu1 %v11890_v14  ;;  %v11979_v13 = vld [vmem:[#allocation2 + $0x1f84] ss:$16 sps:$4 sm:$0xff]   ;;  %v11982_v14 = vld [vmem:[#allocation2 + $0x1f8c] ss:$16 sps:$4 sm:$0xff]  }
 0x424   :  { %6995 = vmatprep.subr.bf16.mxu0 %v11895_v15  ;;  %7683 = vmatprep.subr.bf16.mxu1 %v11898_v16  ;;  %v11977_v15 = vld [vmem:[#allocation2 + $0x1f80] ss:$16 sps:$4 sm:$0xff]   ;;  %v11980_v16 = vld [vmem:[#allocation2 + $0x1f88] ss:$16 sps:$4 sm:$0xff]  }
 0x427   :  { %6996 = vmatpush1.bf16.msra.mxu0 %v11893_v17  ;;  %7684 = vmatpush1.bf16.msra.mxu1 %v11896_v18  ;;  %v11985_v17 = vld [vmem:[#allocation2 + $0x1fa4] ss:$16 sps:$4 sm:$0xff]   ;;  %v11988_v18 = vld [vmem:[#allocation2 + $0x1fac] ss:$16 sps:$4 sm:$0xff]  }
 0x428   :  { %6997 = vmatprep.subr.bf16.mxu0 %v11901_v19  ;;  %7685 = vmatprep.subr.bf16.mxu1 %v11904_v20  ;;  %v11983_v19 = vld [vmem:[#allocation2 + $0x1fa0] ss:$16 sps:$4 sm:$0xff]   ;;  %v11986_v20 = vld [vmem:[#allocation2 + $0x1fa8] ss:$16 sps:$4 sm:$0xff]  }
 0x42b   :  { %6998 = vmatpush1.bf16.msra.mxu0 %v11899_v21  ;;  %7686 = vmatpush1.bf16.msra.mxu1 %v11902_v22  ;;  %v11991_v21 = vld [vmem:[#allocation2 + $0x1fc4] ss:$16 sps:$4 sm:$0xff]   ;;  %v11994_v22 = vld [vmem:[#allocation2 + $0x1fcc] ss:$16 sps:$4 sm:$0xff]  }
 0x42c   :  { %7010 = vmatprep.subr.bf16.mxu0 %v11907_v25  ;;  %7698 = vmatprep.subr.bf16.mxu1 %v11910_v26  ;;  %v11997_v25 = vld [vmem:[#allocation2 + $0x1fe4] ss:$16 sps:$4 sm:$0xff]   ;;  %v12000_v26 = vld [vmem:[#allocation2 + $0x1fec] ss:$16 sps:$4 sm:$0xff]  }
 0x42e   :  { %7000 = vmatmul.mubr.bf16.vlgmr.msra.gmra.mrb[0].mxu0 %v195_v27  ;;  %7688 = vmatmul.mubr.bf16.vlgmr.msra.gmra.mrb[0].mxu1 %v195_v27  ;;  %v11995_v27 = vld [vmem:[#allocation2 + $0x1fe0] ss:$16 sps:$4 sm:$0xff]  }
 0x42f   :  { %7011 = vmatpush1.bf16.msra.mxu0 %v11905_v30  ;;  %7699 = vmatpush1.bf16.msra.mxu1 %v11908_v31  ;;  %v165_v30 = vld [vmem:[%s12711_s0 + $0x1f0] sm:$0xff]  ;;  %v12003_v31 = vld [vmem:[#allocation6 + $0x4] ss:$16 sps:$4 sm:$0xff]  }
 0x430   :  { %7012 = vmatprep.subr.bf16.mxu0 %v11913_v32  ;;  %7700 = vmatprep.subr.bf16.mxu1 %v11916_v33  ;;  %v12006_v32 = vld [vmem:[#allocation6 + $0xc] ss:$16 sps:$4 sm:$0xff]   ;;  %v197_v33 = vpack.c.bf16 %v165_v30, %v133_v29  ;;  %v12091_v30 = vld [vmem:[#allocation6 + $0x1e0] ss:$16 sps:$4 sm:$0xff]  }
 0x431   :  { %7042 = vmatprep.mubr.bf16.mxu0 %v198_v34  ;;  %7730 = vmatprep.mubr.bf16.mxu1 %v198_v34  ;;  %v12001_v34 = vld [vmem:[#allocation6] ss:$16 sps:$4 sm:$0xff]   ;;  %v12096_v29 = vld [vmem:[#allocation6 + $0x1ec] ss:$16 sps:$4 sm:$0xff]  }
 0x433   :  { %7013 = vmatpush1.bf16.msra.mxu0 %v11911_v35  ;;  %7701 = vmatpush1.bf16.msra.mxu1 %v11914_v36  ;;  %v12004_v35 = vld [vmem:[#allocation6 + $0x8] ss:$16 sps:$4 sm:$0xff]   ;;  %v12009_v36 = vld [vmem:[#allocation6 + $0x24] ss:$16 sps:$4 sm:$0xff]  }
 0x434   :  { %7014 = vmatprep.subr.bf16.mxu0 %v11919_v37  ;;  %7702 = vmatprep.subr.bf16.mxu1 %v11922_v38  ;;  %v12012_v37 = vld [vmem:[#allocation6 + $0x2c] ss:$16 sps:$4 sm:$0xff]   ;;  %v12007_v38 = vld [vmem:[#allocation6 + $0x20] ss:$16 sps:$4 sm:$0xff]  }
 0x437   :  { %7015 = vmatpush1.bf16.msra.mxu0 %v11917_v39  ;;  %7703 = vmatpush1.bf16.msra.mxu1 %v11920_v40  ;;  %v12010_v39 = vld [vmem:[#allocation6 + $0x28] ss:$16 sps:$4 sm:$0xff]   ;;  %v12015_v40 = vld [vmem:[#allocation6 + $0x44] ss:$16 sps:$4 sm:$0xff]  }
 0x438   :  { %7016 = vmatprep.subr.bf16.mxu0 %v11925_v41  ;;  %7704 = vmatprep.subr.bf16.mxu1 %v11928_v42  ;;  %v12018_v41 = vld [vmem:[#allocation6 + $0x4c] ss:$16 sps:$4 sm:$0xff]   ;;  %v12013_v42 = vld [vmem:[#allocation6 + $0x40] ss:$16 sps:$4 sm:$0xff]  }
 0x43b   :  { %7017 = vmatpush1.bf16.msra.mxu0 %v11923_v43  ;;  %7705 = vmatpush1.bf16.msra.mxu1 %v11926_v44  ;;  %v12016_v43 = vld [vmem:[#allocation6 + $0x48] ss:$16 sps:$4 sm:$0xff]   ;;  %v12021_v44 = vld [vmem:[#allocation6 + $0x64] ss:$16 sps:$4 sm:$0xff]  }
 0x43c   :  { %7018 = vmatprep.subr.bf16.mxu0 %v11931_v45  ;;  %7706 = vmatprep.subr.bf16.mxu1 %v11934_v46  ;;  %v12024_v45 = vld [vmem:[#allocation6 + $0x6c] ss:$16 sps:$4 sm:$0xff]   ;;  %v12019_v46 = vld [vmem:[#allocation6 + $0x60] ss:$16 sps:$4 sm:$0xff]  }
 0x43f   :  { %7019 = vmatpush1.bf16.msra.mxu0 %v11929_v47  ;;  %7707 = vmatpush1.bf16.msra.mxu1 %v11932_v48  ;;  %v12022_v47 = vld [vmem:[#allocation6 + $0x68] ss:$16 sps:$4 sm:$0xff]   ;;  %v12027_v48 = vld [vmem:[#allocation6 + $0x84] ss:$16 sps:$4 sm:$0xff]  }
 0x440   :  { %7020 = vmatprep.subr.bf16.mxu0 %v11937_v49  ;;  %7708 = vmatprep.subr.bf16.mxu1 %v11940_v50  ;;  %v12030_v49 = vld [vmem:[#allocation6 + $0x8c] ss:$16 sps:$4 sm:$0xff]   ;;  %v12025_v50 = vld [vmem:[#allocation6 + $0x80] ss:$16 sps:$4 sm:$0xff]  }
 0x443   :  { %7021 = vmatpush1.bf16.msra.mxu0 %v11935_v51  ;;  %7709 = vmatpush1.bf16.msra.mxu1 %v11938_v52  ;;  %v12028_v51 = vld [vmem:[#allocation6 + $0x88] ss:$16 sps:$4 sm:$0xff]   ;;  %v12033_v52 = vld [vmem:[#allocation6 + $0xa4] ss:$16 sps:$4 sm:$0xff]  }
 0x444   :  { %7022 = vmatprep.subr.bf16.mxu0 %v11943_v53  ;;  %7710 = vmatprep.subr.bf16.mxu1 %v11946_v54  ;;  %v12036_v53 = vld [vmem:[#allocation6 + $0xac] ss:$16 sps:$4 sm:$0xff]   ;;  %v12031_v54 = vld [vmem:[#allocation6 + $0xa0] ss:$16 sps:$4 sm:$0xff]  }
 0x447   :  { %7023 = vmatpush1.bf16.msra.mxu0 %v11941_v55  ;;  %7711 = vmatpush1.bf16.msra.mxu1 %v11944_v56  ;;  %v12034_v55 = vld [vmem:[#allocation6 + $0xa8] ss:$16 sps:$4 sm:$0xff]   ;;  %v12039_v56 = vld [vmem:[#allocation6 + $0xc4] ss:$16 sps:$4 sm:$0xff]  }
 0x448   :  { %7024 = vmatprep.subr.bf16.mxu0 %v11949_v57  ;;  %7712 = vmatprep.subr.bf16.mxu1 %v11952_v58  ;;  %v12042_v57 = vld [vmem:[#allocation6 + $0xcc] ss:$16 sps:$4 sm:$0xff]   ;;  %v12037_v58 = vld [vmem:[#allocation6 + $0xc0] ss:$16 sps:$4 sm:$0xff]  }
 0x44b   :  { %7025 = vmatpush1.bf16.msra.mxu0 %v11947_v59  ;;  %7713 = vmatpush1.bf16.msra.mxu1 %v11950_v60  ;;  %v12040_v59 = vld [vmem:[#allocation6 + $0xc8] ss:$16 sps:$4 sm:$0xff]   ;;  %v12045_v60 = vld [vmem:[#allocation6 + $0xe4] ss:$16 sps:$4 sm:$0xff]  }
 0x44c   :  { %7026 = vmatprep.subr.bf16.mxu0 %v11955_v61  ;;  %7714 = vmatprep.subr.bf16.mxu1 %v11958_v62  ;;  %v12048_v61 = vld [vmem:[#allocation6 + $0xec] ss:$16 sps:$4 sm:$0xff]   ;;  %v12043_v62 = vld [vmem:[#allocation6 + $0xe0] ss:$16 sps:$4 sm:$0xff]  }
 0x44f   :  { %7027 = vmatpush1.bf16.msra.mxu0 %v11953_v63  ;;  %7715 = vmatpush1.bf16.msra.mxu1 %v11956_v0  ;;  %v12046_v63 = vld [vmem:[#allocation6 + $0xe8] ss:$16 sps:$4 sm:$0xff]   ;;  %v12051_v0 = vld [vmem:[#allocation6 + $0x104] ss:$16 sps:$4 sm:$0xff]  }
 0x450   :  { %7028 = vmatprep.subr.bf16.mxu0 %v11961_v1  ;;  %7716 = vmatprep.subr.bf16.mxu1 %v11964_v2  ;;  %v12054_v1 = vld [vmem:[#allocation6 + $0x10c] ss:$16 sps:$4 sm:$0xff]   ;;  %v12049_v2 = vld [vmem:[#allocation6 + $0x100] ss:$16 sps:$4 sm:$0xff]  }
 0x453   :  { %7029 = vmatpush1.bf16.msra.mxu0 %v11959_v3  ;;  %7717 = vmatpush1.bf16.msra.mxu1 %v11962_v4  ;;  %v12052_v3 = vld [vmem:[#allocation6 + $0x108] ss:$16 sps:$4 sm:$0xff]   ;;  %v12057_v4 = vld [vmem:[#allocation6 + $0x124] ss:$16 sps:$4 sm:$0xff]  }
 0x454   :  { %7030 = vmatprep.subr.bf16.mxu0 %v11967_v5  ;;  %7718 = vmatprep.subr.bf16.mxu1 %v11970_v6  ;;  %v12060_v5 = vld [vmem:[#allocation6 + $0x12c] ss:$16 sps:$4 sm:$0xff]   ;;  %v12055_v6 = vld [vmem:[#allocation6 + $0x120] ss:$16 sps:$4 sm:$0xff]  }
 0x457   :  { %7031 = vmatpush1.bf16.msra.mxu0 %v11965_v7  ;;  %7719 = vmatpush1.bf16.msra.mxu1 %v11968_v8  ;;  %v12058_v7 = vld [vmem:[#allocation6 + $0x128] ss:$16 sps:$4 sm:$0xff]   ;;  %v12063_v8 = vld [vmem:[#allocation6 + $0x144] ss:$16 sps:$4 sm:$0xff]  }
 0x458   :  { %7032 = vmatprep.subr.bf16.mxu0 %v11973_v9  ;;  %7720 = vmatprep.subr.bf16.mxu1 %v11976_v10  ;;  %v12066_v9 = vld [vmem:[#allocation6 + $0x14c] ss:$16 sps:$4 sm:$0xff]   ;;  %v12061_v10 = vld [vmem:[#allocation6 + $0x140] ss:$16 sps:$4 sm:$0xff]  }
 0x45b   :  { %7033 = vmatpush1.bf16.msra.mxu0 %v11971_v11  ;;  %7721 = vmatpush1.bf16.msra.mxu1 %v11974_v12  ;;  %v12064_v11 = vld [vmem:[#allocation6 + $0x148] ss:$16 sps:$4 sm:$0xff]   ;;  %v12069_v12 = vld [vmem:[#allocation6 + $0x164] ss:$16 sps:$4 sm:$0xff]  }
 0x45c   :  { %7034 = vmatprep.subr.bf16.mxu0 %v11979_v13  ;;  %7722 = vmatprep.subr.bf16.mxu1 %v11982_v14  ;;  %v12072_v13 = vld [vmem:[#allocation6 + $0x16c] ss:$16 sps:$4 sm:$0xff]   ;;  %v12067_v14 = vld [vmem:[#allocation6 + $0x160] ss:$16 sps:$4 sm:$0xff]  }
 0x45f   :  { %7035 = vmatpush1.bf16.msra.mxu0 %v11977_v15  ;;  %7723 = vmatpush1.bf16.msra.mxu1 %v11980_v16  ;;  %v12070_v15 = vld [vmem:[#allocation6 + $0x168] ss:$16 sps:$4 sm:$0xff]   ;;  %v12075_v16 = vld [vmem:[#allocation6 + $0x184] ss:$16 sps:$4 sm:$0xff]  }
 0x460   :  { %7036 = vmatprep.subr.bf16.mxu0 %v11985_v17  ;;  %7724 = vmatprep.subr.bf16.mxu1 %v11988_v18  ;;  %v12078_v17 = vld [vmem:[#allocation6 + $0x18c] ss:$16 sps:$4 sm:$0xff]   ;;  %v12073_v18 = vld [vmem:[#allocation6 + $0x180] ss:$16 sps:$4 sm:$0xff]  }
 0x463   :  { %7037 = vmatpush1.bf16.msra.mxu0 %v11983_v19  ;;  %7725 = vmatpush1.bf16.msra.mxu1 %v11986_v20  ;;  %v12076_v19 = vld [vmem:[#allocation6 + $0x188] ss:$16 sps:$4 sm:$0xff]   ;;  %v12081_v20 = vld [vmem:[#allocation6 + $0x1a4] ss:$16 sps:$4 sm:$0xff]  }
 0x464   :  { %7038 = vmatprep.subr.bf16.mxu0 %v11991_v21  ;;  %7726 = vmatprep.subr.bf16.mxu1 %v11994_v22  ;;  %v12084_v21 = vld [vmem:[#allocation6 + $0x1ac] ss:$16 sps:$4 sm:$0xff]   ;;  %v12079_v22 = vld [vmem:[#allocation6 + $0x1a0] ss:$16 sps:$4 sm:$0xff]  }
 0x467   :  { %7039 = vmatpush1.bf16.msra.mxu0 %v11989_v23  ;;  %7727 = vmatpush1.bf16.msra.mxu1 %v11992_v24  ;;  %v12082_v23 = vld [vmem:[#allocation6 + $0x1a8] ss:$16 sps:$4 sm:$0xff]   ;;  %v12087_v24 = vld [vmem:[#allocation6 + $0x1c4] ss:$16 sps:$4 sm:$0xff]  }
 0x468   :  { %7040 = vmatprep.subr.bf16.mxu0 %v11997_v25  ;;  %7728 = vmatprep.subr.bf16.mxu1 %v12000_v26  ;;  %v12090_v25 = vld [vmem:[#allocation6 + $0x1cc] ss:$16 sps:$4 sm:$0xff]   ;;  %v12085_v26 = vld [vmem:[#allocation6 + $0x1c0] ss:$16 sps:$4 sm:$0xff]  }
 0x46b   :  { %7041 = vmatpush1.bf16.msra.mxu0 %v11995_v27  ;;  %7729 = vmatpush1.bf16.msra.mxu1 %v11998_v28  ;;  %v12088_v27 = vld [vmem:[#allocation6 + $0x1c8] ss:$16 sps:$4 sm:$0xff]   ;;  %v12093_v28 = vld [vmem:[#allocation6 + $0x1e4] ss:$16 sps:$4 sm:$0xff]  }
 0x46c   :  { %8543 = vmatprep.subr.bf16.mxu0 %v12003_v31  ;;  %8629 = vmatprep.subr.bf16.mxu1 %v12006_v32  ;;  %v12094_v31 = vld [vmem:[#allocation6 + $0x1e8] ss:$16 sps:$4 sm:$0xff]   ;;  %v12099_v32 = vld [vmem:[#allocation6 + $0x204] ss:$16 sps:$4 sm:$0xff]  }
 0x46e   :  { %7043 = vmatmul.mubr.bf16.vlgmr.msra.gmra.mrb[0].mxu0 %v197_v33  ;;  %7731 = vmatmul.mubr.bf16.vlgmr.msra.gmra.mrb[0].mxu1 %v197_v33  ;;  %v12102_v33 = vld [vmem:[#allocation6 + $0x20c] ss:$16 sps:$4 sm:$0xff]  }
 0x46f   :  { %8544 = vmatpush1.bf16.msra.mxu0 %v12001_v34  ;;  %8630 = vmatpush1.bf16.msra.mxu1 %v12004_v35  ;;  %v1225_v34 = vlaneseq }
 0x470   :  { %8545 = vmatprep.subr.bf16.mxu0 %v12009_v36  ;;  %8631 = vmatprep.subr.bf16.mxu1 %v12012_v37 }
 0x471   :  { %v12679_v35 = vshrl.u32 %v1225_v34, 7  ;;  %v12136_v34 = vld [vmem:[#allocation6 + $0x2c8] ss:$16 sps:$4 sm:$0xff]  }
 0x473   :  { %8546 = vmatpush1.bf16.msra.mxu0 %v12007_v38  ;;  %8632 = vmatpush1.bf16.msra.mxu1 %v12010_v39  ;;  %v1227_v36 = vsub.s32 0, %v12679_v35  ;;  %v1235_v37 = vsub.s32 2, %v12679_v35  ;;  %v1223_v38 = vld [vmem:[#allocation4] sm:$0xf]  ;;  %v1231_v39 = vsub.s32 1, %v12679_v35 }
 0x474   :  { %8547 = vmatprep.subr.bf16.mxu0 %v12015_v40  ;;  %8633 = vmatprep.subr.bf16.mxu1 %v12018_v41  ;;  %v1239_v40 = vsub.s32 3, %v12679_v35 }
 0x475   :  { %v1228_v41 = vrot.slane %v1223_v38, %v1227_v36 }
 0x477   :  { %8548 = vmatpush1.bf16.msra.mxu0 %v12013_v42  ;;  %8634 = vmatpush1.bf16.msra.mxu1 %v12016_v43  ;;  %v1236_v42 = vrot.slane %v1223_v38, %v1235_v37  ;;  %v1232_v43 = vrot.slane %v1223_v38, %v1231_v39 }
 0x478   :  { %8549 = vmatprep.subr.bf16.mxu0 %v12021_v44  ;;  %8635 = vmatprep.subr.bf16.mxu1 %v12024_v45  ;;  %v1240_v44 = vrot.slane %v1223_v38, %v1239_v40  ;;  %v12141_v38 = vld [vmem:[#allocation6 + $0x2e4] ss:$16 sps:$4 sm:$0xff]  }
 0x47b   :  { %8550 = vmatpush1.bf16.msra.mxu0 %v12019_v46  ;;  %8636 = vmatpush1.bf16.msra.mxu1 %v12022_v47 }
 0x47c   :  { %8551 = vmatprep.subr.bf16.mxu0 %v12027_v48  ;;  %8637 = vmatprep.subr.bf16.mxu1 %v12030_v49 }
 0x47f   :  { %8552 = vmatpush1.bf16.msra.mxu0 %v12025_v50  ;;  %8638 = vmatpush1.bf16.msra.mxu1 %v12028_v51 }
 0x480   :  { %8553 = vmatprep.subr.bf16.mxu0 %v12033_v52  ;;  %8639 = vmatprep.subr.bf16.mxu1 %v12036_v53 }
 0x483   :  { %8554 = vmatpush1.bf16.msra.mxu0 %v12031_v54  ;;  %8640 = vmatpush1.bf16.msra.mxu1 %v12034_v55 }
 0x484   :  { %8555 = vmatprep.subr.bf16.mxu0 %v12039_v56  ;;  %8641 = vmatprep.subr.bf16.mxu1 %v12042_v57 }
 0x487   :  { %8556 = vmatpush1.bf16.msra.mxu0 %v12037_v58  ;;  %8642 = vmatpush1.bf16.msra.mxu1 %v12040_v59 }
 0x488   :  { %8557 = vmatprep.subr.bf16.mxu0 %v12045_v60  ;;  %8643 = vmatprep.subr.bf16.mxu1 %v12048_v61 }
 0x48b   :  { %8558 = vmatpush1.bf16.msra.mxu0 %v12043_v62  ;;  %8644 = vmatpush1.bf16.msra.mxu1 %v12046_v63 }
 0x48c   :  { %8559 = vmatprep.subr.bf16.mxu0 %v12051_v0  ;;  %8645 = vmatprep.subr.bf16.mxu1 %v12054_v1 }
 0x48f   :  { %8560 = vmatpush1.bf16.msra.mxu0 %v12049_v2  ;;  %8646 = vmatpush1.bf16.msra.mxu1 %v12052_v3 }
 0x490   :  { %8561 = vmatprep.subr.bf16.mxu0 %v12057_v4  ;;  %8647 = vmatprep.subr.bf16.mxu1 %v12060_v5 }
 0x493   :  { %8562 = vmatpush1.bf16.msra.mxu0 %v12055_v6  ;;  %8648 = vmatpush1.bf16.msra.mxu1 %v12058_v7 }
 0x494   :  { %8563 = vmatprep.subr.bf16.mxu0 %v12063_v8  ;;  %8649 = vmatprep.subr.bf16.mxu1 %v12066_v9  ;;  %v12097_v9 = vld [vmem:[#allocation6 + $0x200] ss:$16 sps:$4 sm:$0xff]  }
 0x497   :  { %8564 = vmatpush1.bf16.msra.mxu0 %v12061_v10  ;;  %8650 = vmatpush1.bf16.msra.mxu1 %v12064_v11  ;;  %v12100_v10 = vld [vmem:[#allocation6 + $0x208] ss:$16 sps:$4 sm:$0xff]   ;;  %v12105_v11 = vld [vmem:[#allocation6 + $0x224] ss:$16 sps:$4 sm:$0xff]  }
 0x498   :  { %8565 = vmatprep.subr.bf16.mxu0 %v12069_v12  ;;  %8651 = vmatprep.subr.bf16.mxu1 %v12072_v13  ;;  %v12108_v12 = vld [vmem:[#allocation6 + $0x22c] ss:$16 sps:$4 sm:$0xff]   ;;  %v12103_v13 = vld [vmem:[#allocation6 + $0x220] ss:$16 sps:$4 sm:$0xff]  }
 0x49b   :  { %8566 = vmatpush1.bf16.msra.mxu0 %v12067_v14  ;;  %8652 = vmatpush1.bf16.msra.mxu1 %v12070_v15  ;;  %v12106_v14 = vld [vmem:[#allocation6 + $0x228] ss:$16 sps:$4 sm:$0xff]   ;;  %v12111_v15 = vld [vmem:[#allocation6 + $0x244] ss:$16 sps:$4 sm:$0xff]  }
 0x49c   :  { %8567 = vmatprep.subr.bf16.mxu0 %v12075_v16  ;;  %8653 = vmatprep.subr.bf16.mxu1 %v12078_v17  ;;  %v12114_v16 = vld [vmem:[#allocation6 + $0x24c] ss:$16 sps:$4 sm:$0xff]   ;;  %v12109_v17 = vld [vmem:[#allocation6 + $0x240] ss:$16 sps:$4 sm:$0xff]  }
 0x49f   :  { %8568 = vmatpush1.bf16.msra.mxu0 %v12073_v18  ;;  %8654 = vmatpush1.bf16.msra.mxu1 %v12076_v19  ;;  %v12112_v18 = vld [vmem:[#allocation6 + $0x248] ss:$16 sps:$4 sm:$0xff]   ;;  %v12117_v19 = vld [vmem:[#allocation6 + $0x264] ss:$16 sps:$4 sm:$0xff]  }
 0x4a0   :  { %8569 = vmatprep.subr.bf16.mxu0 %v12081_v20  ;;  %8655 = vmatprep.subr.bf16.mxu1 %v12084_v21  ;;  %v12120_v20 = vld [vmem:[#allocation6 + $0x26c] ss:$16 sps:$4 sm:$0xff]   ;;  %v12115_v21 = vld [vmem:[#allocation6 + $0x260] ss:$16 sps:$4 sm:$0xff]  }
 0x4a3   :  { %8570 = vmatpush1.bf16.msra.mxu0 %v12079_v22  ;;  %8656 = vmatpush1.bf16.msra.mxu1 %v12082_v23  ;;  %v12118_v22 = vld [vmem:[#allocation6 + $0x268] ss:$16 sps:$4 sm:$0xff]   ;;  %v12123_v23 = vld [vmem:[#allocation6 + $0x284] ss:$16 sps:$4 sm:$0xff]  }
 0x4a4   :  { %8571 = vmatprep.subr.bf16.mxu0 %v12087_v24  ;;  %8657 = vmatprep.subr.bf16.mxu1 %v12090_v25  ;;  %v12126_v24 = vld [vmem:[#allocation6 + $0x28c] ss:$16 sps:$4 sm:$0xff]   ;;  %v12121_v25 = vld [vmem:[#allocation6 + $0x280] ss:$16 sps:$4 sm:$0xff]  }
 0x4a7   :  { %8572 = vmatpush1.bf16.msra.mxu0 %v12085_v26  ;;  %8658 = vmatpush1.bf16.msra.mxu1 %v12088_v27  ;;  %v12124_v26 = vld [vmem:[#allocation6 + $0x288] ss:$16 sps:$4 sm:$0xff]   ;;  %v12129_v27 = vld [vmem:[#allocation6 + $0x2a4] ss:$16 sps:$4 sm:$0xff]  }
 0x4a8   :  { %8573 = vmatprep.subr.bf16.mxu0 %v12093_v28  ;;  %8659 = vmatprep.subr.bf16.mxu1 %v12096_v29  ;;  %v12132_v28 = vld [vmem:[#allocation6 + $0x2ac] ss:$16 sps:$4 sm:$0xff]   ;;  %v12127_v29 = vld [vmem:[#allocation6 + $0x2a0] ss:$16 sps:$4 sm:$0xff]  }
 0x4ab   :  { %8574 = vmatpush1.bf16.msra.mxu0 %v12091_v30  ;;  %8660 = vmatpush1.bf16.msra.mxu1 %v12094_v31  ;;  %v12130_v30 = vld [vmem:[#allocation6 + $0x2a8] ss:$16 sps:$4 sm:$0xff]   ;;  %v12135_v31 = vld [vmem:[#allocation6 + $0x2c4] ss:$16 sps:$4 sm:$0xff]  }
 0x4ac   :  { %8586 = vmatprep.subr.bf16.mxu0 %v12099_v32  ;;  %8672 = vmatprep.subr.bf16.mxu1 %v12102_v33  ;;  %v12138_v32 = vld [vmem:[#allocation6 + $0x2cc] ss:$16 sps:$4 sm:$0xff]   ;;  %v12133_v33 = vld [vmem:[#allocation6 + $0x2c0] ss:$16 sps:$4 sm:$0xff]  }
 0x541   :  { %v7044_v45 = vpop.f32.mrb[0].mxu0  ;;  %v7732_v46 = vpop.f32.mrb[0].mxu1 }
 0x542   :  { %v10311_v47 = vadd.f32 %v7044_v45, %v1228_v41  ;;  %v10315_v48 = vadd.f32 %v7732_v46, %v1236_v42  ;;  %v7046_v49 = vpop.f32.mrb[1].mxu0  ;;  %v7734_v50 = vpop.f32.mrb[1].mxu1  ;;  %v12150_v45 = vld [vmem:[#allocation6 + $0x30c] ss:$16 sps:$4 sm:$0xff]   ;;  %v12145_v46 = vld [vmem:[#allocation6 + $0x300] ss:$16 sps:$4 sm:$0xff]  }
 0x543   :  { %v10312_v51 = vadd.f32 %v7046_v49, %v1232_v43  ;;  %v10316_v52 = vadd.f32 %v7734_v50, %v1240_v44  ;;  %v7048_v53 = vpop.f32.mrb[2].mxu0  ;;  %v7736_v54 = vpop.f32.mrb[2].mxu1  ;;  %v12156_v49 = vld [vmem:[#allocation6 + $0x32c] ss:$16 sps:$4 sm:$0xff]   ;;  %v12151_v50 = vld [vmem:[#allocation6 + $0x320] ss:$16 sps:$4 sm:$0xff]  }
 0x544   :  { %v10313_v55 = vadd.f32 %v7048_v53, %v1228_v41  ;;  %v10317_v56 = vadd.f32 %v7736_v54, %v1236_v42  ;;  %v7050_v57 = vpop.f32.mrb[3].mxu0  ;;  %v7738_v58 = vpop.f32.mrb[3].mxu1  ;;  %v7741_v61 = vmax.f32 %v10311_v47, 0.0  ;;  %v7743_v62 = vmax.f32 %v10315_v48, 0.0  ;;  %v12144_v41 = vld [vmem:[#allocation6 + $0x2ec] ss:$16 sps:$4 sm:$0xff]  }
 0x545   :  { %v10314_v59 = vadd.f32 %v7050_v57, %v1232_v43  ;;  %v10318_v60 = vadd.f32 %v7738_v58, %v1240_v44  ;;  %v7742_v1 = vmax.f32 %v10312_v51, 0.0  ;;  %v7744_v2 = vmax.f32 %v10316_v52, 0.0  ;;  %v12139_v42 = vld [vmem:[#allocation6 + $0x2e0] ss:$16 sps:$4 sm:$0xff]   ;;  %v12142_v43 = vld [vmem:[#allocation6 + $0x2e8] ss:$16 sps:$4 sm:$0xff]  }
 0x546   :  { %v7745_v63 = vmax.f32 %v10313_v55, 0.0  ;;  %v7747_v0 = vmax.f32 %v10317_v56, 0.0  ;;  %v12147_v44 = vld [vmem:[#allocation6 + $0x304] ss:$16 sps:$4 sm:$0xff]   ;;  %v12148_v47 = vld [vmem:[#allocation6 + $0x308] ss:$16 sps:$4 sm:$0xff]  }
 0x547   :  { %v7746_v3 = vmax.f32 %v10314_v59, 0.0  ;;  %v7748_v4 = vmax.f32 %v10318_v60, 0.0  ;;  %v12153_v48 = vld [vmem:[#allocation6 + $0x324] ss:$16 sps:$4 sm:$0xff]   ;;  %v12154_v51 = vld [vmem:[#allocation6 + $0x328] ss:$16 sps:$4 sm:$0xff]  }
 0x548   :  { %v7749_v5 = vpack.c.bf16 %v7745_v63, %v7741_v61  ;;  %v12693_v6 = vpack.c.bf16 %v7747_v0, %v7743_v62  ;;  %v12159_v52 = vld [vmem:[#allocation6 + $0x344] ss:$16 sps:$4 sm:$0xff]   ;;  %v12162_v53 = vld [vmem:[#allocation6 + $0x34c] ss:$16 sps:$4 sm:$0xff]   ;;  %v12157_v54 = vld [vmem:[#allocation6 + $0x340] ss:$16 sps:$4 sm:$0xff]  }
 0x549   :  { %v7750_v7 = vpack.c.bf16 %v7746_v3, %v7742_v1  ;;  %v7752_v8 = vpack.c.bf16 %v7748_v4, %v7744_v2  ;;  %v12160_v55 = vld [vmem:[#allocation6 + $0x348] ss:$16 sps:$4 sm:$0xff]   ;;  %v12165_v56 = vld [vmem:[#allocation6 + $0x364] ss:$16 sps:$4 sm:$0xff]   ;;  %v12168_v57 = vld [vmem:[#allocation6 + $0x36c] ss:$16 sps:$4 sm:$0xff]  }
 0x54a   :  { %v12163_v58 = vld [vmem:[#allocation6 + $0x360] ss:$16 sps:$4 sm:$0xff]   ;;  %v12166_v59 = vld [vmem:[#allocation6 + $0x368] ss:$16 sps:$4 sm:$0xff]   ;;  %v12171_v60 = vld [vmem:[#allocation6 + $0x384] ss:$16 sps:$4 sm:$0xff]  }
 0x54b   :  { %8575 = vmatprep.mubr.bf16.mxu0 %v7750_v7  ;;  %8661 = vmatprep.mubr.bf16.mxu1 %v7750_v7  ;;  %v12174_v61 = vld [vmem:[#allocation6 + $0x38c] ss:$16 sps:$4 sm:$0xff]   ;;  %v12169_v62 = vld [vmem:[#allocation6 + $0x380] ss:$16 sps:$4 sm:$0xff]   ;;  %v12172_v63 = vld [vmem:[#allocation6 + $0x388] ss:$16 sps:$4 sm:$0xff]  }
 0x54c   :  { %8576 = vmatmul.mubr.bf16.vlgmr.msra.gmra.mrb[4].mxu0 %v7749_v5  ;;  %8662 = vmatmul.mubr.bf16.vlgmr.msra.gmra.mrb[4].mxu1 %v7749_v5  ;;  %v12177_v0 = vld [vmem:[#allocation6 + $0x3a4] ss:$16 sps:$4 sm:$0xff]   ;;  %v12180_v1 = vld [vmem:[#allocation6 + $0x3ac] ss:$16 sps:$4 sm:$0xff]   ;;  %v12175_v2 = vld [vmem:[#allocation6 + $0x3a0] ss:$16 sps:$4 sm:$0xff]  }
 0x54d   :  { %8587 = vmatpush1.bf16.msra.mxu0 %v12097_v9  ;;  %8673 = vmatpush1.bf16.msra.mxu1 %v12100_v10  ;;  %v12178_v3 = vld [vmem:[#allocation6 + $0x3a8] ss:$16 sps:$4 sm:$0xff]   ;;  %v12183_v4 = vld [vmem:[#allocation6 + $0x3c4] ss:$16 sps:$4 sm:$0xff]   ;;  %v12186_v5 = vld [vmem:[#allocation6 + $0x3cc] ss:$16 sps:$4 sm:$0xff]  }
 0x54e   :  { %8618 = vmatprep.mubr.bf16.mxu0 %v7752_v8  ;;  %8704 = vmatprep.mubr.bf16.mxu1 %v7752_v8  ;;  %v12181_v7 = vld [vmem:[#allocation6 + $0x3c0] ss:$16 sps:$4 sm:$0xff]   ;;  %v12184_v8 = vld [vmem:[#allocation6 + $0x3c8] ss:$16 sps:$4 sm:$0xff]   ;;  %v12189_v9 = vld [vmem:[#allocation6 + $0x3e4] ss:$16 sps:$4 sm:$0xff]  }
 0x54f   :  { %8588 = vmatprep.subr.bf16.mxu0 %v12105_v11  ;;  %8674 = vmatprep.subr.bf16.mxu1 %v12108_v12  ;;  %v12192_v10 = vld [vmem:[#allocation6 + $0x3ec] ss:$16 sps:$4 sm:$0xff]   ;;  %v12187_v11 = vld [vmem:[#allocation6 + $0x3e0] ss:$16 sps:$4 sm:$0xff]   ;;  %v12190_v12 = vld [vmem:[#allocation6 + $0x3e8] ss:$16 sps:$4 sm:$0xff]  }
 0x551   :  { %8589 = vmatpush1.bf16.msra.mxu0 %v12103_v13  ;;  %8675 = vmatpush1.bf16.msra.mxu1 %v12106_v14  ;;  %v12193_v13 = vld [vmem:[#allocation9 + $0x40] sm:$0xff]  }
 0x552   :  { %8590 = vmatprep.subr.bf16.mxu0 %v12111_v15  ;;  %8676 = vmatprep.subr.bf16.mxu1 %v12114_v16  ;;  %v12194_v14 = vld [vmem:[#allocation9 + $0xc0] sm:$0xff]  }
 0x553   :  { %v12195_v15 = vld [vmem:[#allocation9] sm:$0xff]  }
 0x554   :  { %v12196_v16 = vld [vmem:[#allocation9 + $0x80] sm:$0xff]  }
 0x555   :  { %8591 = vmatpush1.bf16.msra.mxu0 %v12109_v17  ;;  %8677 = vmatpush1.bf16.msra.mxu1 %v12112_v18  ;;  %v12197_v17 = vld [vmem:[#allocation9 + $0x48] sm:$0xff]  }
 0x556   :  { %8592 = vmatprep.subr.bf16.mxu0 %v12117_v19  ;;  %8678 = vmatprep.subr.bf16.mxu1 %v12120_v20  ;;  %v12198_v18 = vld [vmem:[#allocation9 + $0xc8] sm:$0xff]  }
 0x557   :  { %v12199_v19 = vld [vmem:[#allocation9 + $0x8] sm:$0xff]  }
 0x558   :  { %v12200_v20 = vld [vmem:[#allocation9 + $0x88] sm:$0xff]  }
 0x559   :  { %8593 = vmatpush1.bf16.msra.mxu0 %v12115_v21  ;;  %8679 = vmatpush1.bf16.msra.mxu1 %v12118_v22  ;;  %v12201_v21 = vld [vmem:[#allocation9 + $0x50] sm:$0xff]  }
 0x55a   :  { %8594 = vmatprep.subr.bf16.mxu0 %v12123_v23  ;;  %8680 = vmatprep.subr.bf16.mxu1 %v12126_v24  ;;  %v12202_v22 = vld [vmem:[#allocation9 + $0xd0] sm:$0xff]  }
 0x55b   :  { %v12203_v23 = vld [vmem:[#allocation9 + $0x10] sm:$0xff]  }
 0x55c   :  { %v12204_v24 = vld [vmem:[#allocation9 + $0x90] sm:$0xff]  }
 0x55d   :  { %8595 = vmatpush1.bf16.msra.mxu0 %v12121_v25  ;;  %8681 = vmatpush1.bf16.msra.mxu1 %v12124_v26  ;;  %v12205_v25 = vld [vmem:[#allocation9 + $0x58] sm:$0xff]  }
 0x55e   :  { %8596 = vmatprep.subr.bf16.mxu0 %v12129_v27  ;;  %8682 = vmatprep.subr.bf16.mxu1 %v12132_v28  ;;  %v12206_v26 = vld [vmem:[#allocation9 + $0xd8] sm:$0xff]   ;;  %v12209_v28 = vld [vmem:[#allocation9 + $0x60] sm:$0xff]  }
 0x55f   :  { %v12207_v27 = vld [vmem:[#allocation9 + $0x18] sm:$0xff]  }
 0x561   :  { %8597 = vmatpush1.bf16.msra.mxu0 %v12127_v29  ;;  %8683 = vmatpush1.bf16.msra.mxu1 %v12130_v30  ;;  %v12210_v29 = vld [vmem:[#allocation9 + $0xe0] sm:$0xff]  }
 0x562   :  { %8598 = vmatprep.subr.bf16.mxu0 %v12135_v31  ;;  %8684 = vmatprep.subr.bf16.mxu1 %v12138_v32  ;;  %v12211_v30 = vld [vmem:[#allocation9 + $0x20] sm:$0xff]   ;;  %v12213_v32 = vld [vmem:[#allocation9 + $0x68] sm:$0xff]  }
 0x563   :  { %v12212_v31 = vld [vmem:[#allocation9 + $0xa0] sm:$0xff]  }
 0x565   :  { %8599 = vmatpush1.bf16.msra.mxu0 %v12133_v33  ;;  %8685 = vmatpush1.bf16.msra.mxu1 %v12136_v34  ;;  %v12214_v33 = vld [vmem:[#allocation9 + $0xe8] sm:$0xff]  }
 0x566   :  { %8600 = vmatprep.subr.bf16.mxu0 %v12141_v38  ;;  %8686 = vmatprep.subr.bf16.mxu1 %v12144_v41  ;;  %v12215_v34 = vld [vmem:[#allocation9 + $0x28] sm:$0xff]   ;;  %v12217_v41 = vld [vmem:[#allocation9 + $0x70] sm:$0xff]  }
 0x567   :  { %v12216_v38 = vld [vmem:[#allocation9 + $0xa8] sm:$0xff]  }
 0x569   :  { %8601 = vmatpush1.bf16.msra.mxu0 %v12139_v42  ;;  %8687 = vmatpush1.bf16.msra.mxu1 %v12142_v43  ;;  %v12218_v42 = vld [vmem:[#allocation9 + $0xf0] sm:$0xff]  }
 0x56a   :  { %8602 = vmatprep.subr.bf16.mxu0 %v12147_v44  ;;  %8688 = vmatprep.subr.bf16.mxu1 %v12150_v45  ;;  %v12219_v43 = vld [vmem:[#allocation9 + $0x30] sm:$0xff]   ;;  %v12221_v45 = vld [vmem:[#allocation9 + $0x78] sm:$0xff]  }
 0x56b   :  { %v12220_v44 = vld [vmem:[#allocation9 + $0xb0] sm:$0xff]  }
 0x56d   :  { %8603 = vmatpush1.bf16.msra.mxu0 %v12145_v46  ;;  %8689 = vmatpush1.bf16.msra.mxu1 %v12148_v47  ;;  %v12222_v46 = vld [vmem:[#allocation9 + $0xf8] sm:$0xff]  }
 0x56e   :  { %8604 = vmatprep.subr.bf16.mxu0 %v12153_v48  ;;  %8690 = vmatprep.subr.bf16.mxu1 %v12156_v49  ;;  %v12223_v47 = vld [vmem:[#allocation9 + $0x38] sm:$0xff]  }
 0x56f   :  { %v12224_v48 = vld [vmem:[#allocation9 + $0xb8] sm:$0xff]  }
 0x570   :  { %v7881_v49 = vld [vmem:[#allocation7] sm:$0xf] }
 0x571   :  { %8605 = vmatpush1.bf16.msra.mxu0 %v12151_v50  ;;  %8691 = vmatpush1.bf16.msra.mxu1 %v12154_v51  ;;  %v7886_v50 = vrot.slane %v7881_v49, %v1227_v36  ;;  %v7894_v51 = vrot.slane %v7881_v49, %v1235_v37 }
 0x572   :  { %8606 = vmatprep.subr.bf16.mxu0 %v12159_v52  ;;  %8692 = vmatprep.subr.bf16.mxu1 %v12162_v53  ;;  %v7890_v52 = vrot.slane %v7881_v49, %v1231_v39  ;;  %v7898_v53 = vrot.slane %v7881_v49, %v1239_v40 }
 0x575   :  { %8607 = vmatpush1.bf16.msra.mxu0 %v12157_v54  ;;  %8693 = vmatpush1.bf16.msra.mxu1 %v12160_v55 }
 0x576   :  { %8608 = vmatprep.subr.bf16.mxu0 %v12165_v56  ;;  %8694 = vmatprep.subr.bf16.mxu1 %v12168_v57 }
 0x579   :  { %8609 = vmatpush1.bf16.msra.mxu0 %v12163_v58  ;;  %8695 = vmatpush1.bf16.msra.mxu1 %v12166_v59 }
 0x57a   :  { %8610 = vmatprep.subr.bf16.mxu0 %v12171_v60  ;;  %8696 = vmatprep.subr.bf16.mxu1 %v12174_v61 }
 0x57d   :  { %8611 = vmatpush1.bf16.msra.mxu0 %v12169_v62  ;;  %8697 = vmatpush1.bf16.msra.mxu1 %v12172_v63 }
 0x57e   :  { %8612 = vmatprep.subr.bf16.mxu0 %v12177_v0  ;;  %8698 = vmatprep.subr.bf16.mxu1 %v12180_v1 }
 0x581   :  { %8613 = vmatpush1.bf16.msra.mxu0 %v12175_v2  ;;  %8699 = vmatpush1.bf16.msra.mxu1 %v12178_v3 }
 0x582   :  { %8614 = vmatprep.subr.bf16.mxu0 %v12183_v4  ;;  %8700 = vmatprep.subr.bf16.mxu1 %v12186_v5 }
 0x585   :  { %8615 = vmatpush1.bf16.msra.mxu0 %v12181_v7  ;;  %8701 = vmatpush1.bf16.msra.mxu1 %v12184_v8 }
 0x586   :  { %8616 = vmatprep.subr.bf16.mxu0 %v12189_v9  ;;  %8702 = vmatprep.subr.bf16.mxu1 %v12192_v10 }
 0x589   :  { %8617 = vmatpush1.bf16.msra.mxu0 %v12187_v11  ;;  %8703 = vmatpush1.bf16.msra.mxu1 %v12190_v12 }
 0x58a   :  { %10267 = vmatprep.subr.bf16.mxu0 %v12193_v13  ;;  %10289 = vmatprep.subr.bf16.mxu1 %v12194_v14 }
 0x58c   :  { %8619 = vmatmul.mubr.bf16.vlgmr.msra.gmra.mrb[4].mxu0 %v12693_v6  ;;  %8705 = vmatmul.mubr.bf16.vlgmr.msra.gmra.mrb[4].mxu1 %v12693_v6  ;;  %v12208_v6 = vld [vmem:[#allocation9 + $0x98] sm:$0xff]  }
 0x58d   :  { %10268 = vmatpush3.bf16.msra.mxu0 %v12195_v15  ;;  %10290 = vmatpush3.bf16.msra.mxu1 %v12196_v16  ;;  %v10234_v16 = vld [vmem:[#allocation10] ss:$0 sm:$0xff] }
 0x58e   :  { %10269 = vmatprep.subr.bf16.mxu0 %v12197_v17  ;;  %10291 = vmatprep.subr.bf16.mxu1 %v12198_v18 }
 0x591   :  { %10270 = vmatpush3.bf16.msra.mxu0 %v12199_v19  ;;  %10292 = vmatpush3.bf16.msra.mxu1 %v12200_v20 }
 0x592   :  { %10271 = vmatprep.subr.bf16.mxu0 %v12201_v21  ;;  %10293 = vmatprep.subr.bf16.mxu1 %v12202_v22 }
 0x595   :  { %10272 = vmatpush3.bf16.msra.mxu0 %v12203_v23  ;;  %10294 = vmatpush3.bf16.msra.mxu1 %v12204_v24 }
 0x596   :  { %10273 = vmatprep.subr.bf16.mxu0 %v12205_v25  ;;  %10295 = vmatprep.subr.bf16.mxu1 %v12206_v26 }
 0x599   :  { %10274 = vmatpush3.bf16.msra.mxu0 %v12207_v27  ;;  %10296 = vmatpush3.bf16.msra.mxu1 %v12208_v6 }
 0x59a   :  { %10275 = vmatprep.subr.bf16.mxu0 %v12209_v28  ;;  %10297 = vmatprep.subr.bf16.mxu1 %v12210_v29 }
 0x59d   :  { %10276 = vmatpush3.bf16.msra.mxu0 %v12211_v30  ;;  %10298 = vmatpush3.bf16.msra.mxu1 %v12212_v31 }
 0x59e   :  { %10277 = vmatprep.subr.bf16.mxu0 %v12213_v32  ;;  %10299 = vmatprep.subr.bf16.mxu1 %v12214_v33 }
 0x5a1   :  { %10278 = vmatpush3.bf16.msra.mxu0 %v12215_v34  ;;  %10300 = vmatpush3.bf16.msra.mxu1 %v12216_v38 }
 0x5a2   :  { %10279 = vmatprep.subr.bf16.mxu0 %v12217_v41  ;;  %10301 = vmatprep.subr.bf16.mxu1 %v12218_v42 }
 0x5a5   :  { %10280 = vmatpush3.bf16.msra.mxu0 %v12219_v43  ;;  %10302 = vmatpush3.bf16.msra.mxu1 %v12220_v44 }
 0x5a6   :  { %10281 = vmatprep.subr.bf16.mxu0 %v12221_v45  ;;  %10303 = vmatprep.subr.bf16.mxu1 %v12222_v46 }
 0x5a9   :  { %10282 = vmatpush3.bf16.msra.mxu0 %v12223_v47  ;;  %10304 = vmatpush3.bf16.msra.mxu1 %v12224_v48 }
 0x65f   :  { %v8620_v54 = vpop.f32.mrb[4].mxu0  ;;  %v8706_v55 = vpop.f32.mrb[4].mxu1 }
 0x660   :  { %v10319_v56 = vadd.f32 %v8620_v54, %v7886_v50  ;;  %v10323_v57 = vadd.f32 %v8706_v55, %v7894_v51  ;;  %v8622_v58 = vpop.f32.mrb[5].mxu0  ;;  %v8708_v59 = vpop.f32.mrb[5].mxu1 }
 0x661   :  { %v10320_v60 = vadd.f32 %v8622_v58, %v7890_v52  ;;  %v10324_v61 = vadd.f32 %v8708_v59, %v7898_v53  ;;  %v8624_v62 = vpop.f32.mrb[6].mxu0  ;;  %v8710_v63 = vpop.f32.mrb[6].mxu1 }
 0x662   :  { %v10321_v36 = vadd.f32 %v8624_v62, %v7886_v50  ;;  %v10325_v0 = vadd.f32 %v8710_v63, %v7894_v51  ;;  %v8626_v1 = vpop.f32.mrb[7].mxu0  ;;  %v8712_v37 = vpop.f32.mrb[7].mxu1  ;;  %v8715_v39 = vmax.f32 %v10319_v56, 0.0  ;;  %v8717_v4 = vmax.f32 %v10323_v57, 0.0 }
 0x663   :  { %v10322_v2 = vadd.f32 %v8626_v1, %v7890_v52  ;;  %v10326_v3 = vadd.f32 %v8712_v37, %v7898_v53  ;;  %v8716_v5 = vmax.f32 %v10320_v60, 0.0  ;;  %v8718_v7 = vmax.f32 %v10324_v61, 0.0 }
 0x664   :  { %v8719_v35 = vmax.f32 %v10321_v36, 0.0  ;;  %v8721_v40 = vmax.f32 %v10325_v0, 0.0 }
 0x665   :  { %v8720_v8 = vmax.f32 %v10322_v2, 0.0  ;;  %v8722_v9 = vmax.f32 %v10326_v3, 0.0 }
 0x666   :  { %v8723_v10 = vpack.c.bf16 %v8719_v35, %v8715_v39  ;;  %v8725_v11 = vpack.c.bf16 %v8721_v40, %v8717_v4 }
 0x667   :  { %v8724_v12 = vpack.c.bf16 %v8720_v8, %v8716_v5  ;;  %v8726_v13 = vpack.c.bf16 %v8722_v9, %v8718_v7 }
 0x669   :  { %9022 = vmatprep.mubr.bf16.mxu0 %v8724_v12  ;;  %9063 = vmatprep.mubr.bf16.mxu1 %v8726_v13 }
 0x66a   :  { %9023 = vmatmul.mubr.bf16.vlgmr.msra.gmra.mrb[8].mxu0 %v8723_v10  ;;  %9064 = vmatmul.mubr.bf16.vlgmr.msra.gmra.mrb[8].mxu1 %v8725_v11 }
 0x73d   :  { %v10283_v14 = vpop.f32.mrb[8].mxu0  ;;  %v10305_v15 = vpop.f32.mrb[8].mxu1 }
 0x73e   :  { %v10284_v17 = vpop.f32.mrb[9].mxu0  ;;  %v10306_v18 = vpop.f32.mrb[9].mxu1 }
 0x73f   :  { %v10285_v19 = vadd.f32 %v10284_v17, %v10283_v14  ;;  %v10307_v20 = vadd.f32 %v10306_v18, %v10305_v15  ;;  %v10286_v21 = vpop.f32.mrb[10].mxu0  ;;  %v10308_v22 = vpop.f32.mrb[10].mxu1 }
 0x740   :  { %v10287_v23 = vpop.f32.mrb[11].mxu0  ;;  %v10309_v24 = vpop.f32.mrb[11].mxu1 }
 0x741   :  { %v9025_v25 = vadd.f32 %v10285_v19, %v10234_v16  ;;  %v10288_v26 = vadd.f32 %v10287_v23, %v10286_v21  ;;  %v10310_v27 = vadd.f32 %v10309_v24, %v10308_v22 }
 0x743   :  { %v9066_v6 = vadd.f32 %v10307_v20, %v9025_v25  ;;  %v9028_v28 = vadd.f32 %v10288_v26, %v10234_v16 }
 0x745   :  { %9072 = vst [vmem:[%s12718_s7] sm:$0xff] %v9066_v6  ;;  %v9069_v29 = vadd.f32 %v10310_v27, %v9028_v28 }
 0x747   :  { %9073 = vst [vmem:[%s12718_s7 + $0x8] sm:$0xff] %v9069_v29 }
 0x748   :  { %9078 = vsyncpa [#allocation3], 1 }
 0x749   :  { %9079 = vsyncpa [#allocation5], 1 }
 0x74a   :  { %9080 = vsyncpa [#allocation8], 1 }
 0x74b   :  { %9081 = vsyncpa [#allocation11], 1 }

// kernel: _forward_impl.1
= control target key start
LH: loop header
LB: loop body
LE: loop exit
PB: predicated region body
PF: predicated region fallthrough
CT: control target
= control target key end

     0   :  { %12 = vsyncpa [#allocation3], 0  ;;  %s12711_s0 = inlined_call_operand.vmem [shape: f32[16,4096], index: 0, kind: input, shape index: {}]   ;;  %s12712_s1 = inlined_call_operand.hbm [shape: bf16[4096,512], index: 1, kind: input, shape index: {}]   ;;  %s12713_s2 = inlined_call_operand.hbm [shape: f32[1,512], index: 2, kind: input, shape index: {}]   ;;  %s12714_s3 = inlined_call_operand.hbm [shape: bf16[512,512], index: 3, kind: input, shape index: {}]   ;;  %s12715_s4 = inlined_call_operand.hbm [shape: f32[1,512], index: 4, kind: input, shape index: {}]   ;;  %s12716_s5 = inlined_call_operand.hbm [shape: bf16[512,128], index: 5, kind: input, shape index: {}]   ;;  %s12717_s6 = inlined_call_operand.hbm [shape: f32[1,128], index: 6, kind: input, shape index: {}]   ;;  %s12718_s7 = inlined_call_operand.vmem [shape: f32[16,128], index: 7, kind: output, shape index: {}]  }
   0x1   :  { %13 = vsyncpa [#allocation5], 0 }
   0x2   :  { %14 = vsyncpa [#allocation8], 0 }
   0x3   :  { %15 = vsyncpa [#allocation11], 0  ;;  %s12365_s24 = smov [#allocation4]   ;;  %s12366_s26 = smov [#allocation7]  }
   0x4   :  { %s36_s25 = sshll.u32 %s12365_s24, 4  ;;  %s58_s27 = sshll.u32 %s12366_s26, 4  ;;  %s37_s25 = int_to_ptr.vmem [resolvable:$true] %s36_s25  ;;  %s59_s27 = int_to_ptr.vmem [resolvable:$true] %s58_s27 }
   0x5   :  { %s12225_s30 = scalar_lea.hbm %s12713_s2, 64 }
   0x6   :  { %p12226_p0 = scmp.ne.s32.totalorder %s12713_s2, %s12225_s30  ;;  %p12229_p1 = scmp.lt.u32.totalorder %s12225_s30, %s12713_s2 }
   0x8   :  { %p12231_p2 = pnand %p12229_p1, %p12226_p0 }
   0xa   :  { %12234 = shalt.err (!%p12231_p2)
}
   0xb   :  { %s12235_s12 = scalar_lea.vmem %s37_s25, 64  ;;  %p12240_p4 = scmp.lt.s32.totalorder %s37_s25, %s37_s25 }
   0xc   :  { %p12236_p3 = scmp.ne.s32.totalorder %s37_s25, %s12235_s12  ;;  %p12241_p5 = scmp.lt.s32.totalorder %s12235_s12, %s12235_s12 }
   0xe   :  { %p12242_p6 = por %p12241_p5, %p12240_p4 }
  0x10   :  { %p12243_p7 = pnand %p12242_p6, %p12236_p3 }
  0x12   :  { %12246 = shalt.err (!%p12243_p7)
}
  0x13   :  { %39 = dma.hbm_to_vmem [thread:$0]  %s12713_s2, 64, %s37_s25, [#allocation5]  }
  0x14   :  { %s12247_s17 = scalar_lea.hbm %s12715_s4, 64 }
  0x15   :  { %p12248_p8 = scmp.ne.s32.totalorder %s12715_s4, %s12247_s17  ;;  %p12251_p9 = scmp.lt.u32.totalorder %s12247_s17, %s12715_s4 }
  0x17   :  { %p12253_p10 = pnand %p12251_p9, %p12248_p8 }
  0x19   :  { %12256 = shalt.err (!%p12253_p10)
}
  0x1a   :  { %s12257_s22 = scalar_lea.vmem %s59_s27, 64  ;;  %p12262_p12 = scmp.lt.s32.totalorder %s59_s27, %s59_s27 }
  0x1b   :  { %p12258_p11 = scmp.ne.s32.totalorder %s59_s27, %s12257_s22  ;;  %p12263_p13 = scmp.lt.s32.totalorder %s12257_s22, %s12257_s22 }
  0x1d   :  { %p12264_p0 = por %p12263_p13, %p12262_p12 }
  0x1f   :  { %p12265_p1 = pnand %p12264_p0, %p12258_p11 }
  0x21   :  { %12268 = shalt.err (!%p12265_p1)
}
  0x22   :  { %61 = dma.hbm_to_vmem [thread:$0]  %s12715_s4, 64, %s59_s27, [#allocation8]  }
  0x23   :  { %s12367_s24 = smov [#allocation2]   ;;  %s12269_s29 = scalar_lea.hbm %s12712_s1, 131072 }
  0x24   :  { %s23_s25 = sshll.u32 %s12367_s24, 4  ;;  %p12270_p2 = scmp.ne.s32.totalorder %s12712_s1, %s12269_s29  ;;  %s24_s25 = int_to_ptr.vmem [resolvable:$true] %s23_s25 }
  0x25   :  { %p12273_p3 = scmp.lt.u32.totalorder %s12269_s29, %s12712_s1 }
  0x27   :  { %p12275_p4 = pnand %p12273_p3, %p12270_p2 }
  0x29   :  { %12278 = shalt.err (!%p12275_p4)
}
  0x2a   :  { %s12279_s11 = scalar_lea.vmem %s24_s25, 131072  ;;  %p12284_p6 = scmp.lt.s32.totalorder %s24_s25, %s24_s25 }
  0x2b   :  { %p12280_p5 = scmp.ne.s32.totalorder %s24_s25, %s12279_s11  ;;  %p12285_p7 = scmp.lt.s32.totalorder %s12279_s11, %s12279_s11 }
  0x2d   :  { %p12286_p8 = por %p12285_p7, %p12284_p6 }
  0x2f   :  { %p12287_p9 = pnand %p12286_p8, %p12280_p5 }
  0x31   :  { %12290 = shalt.err (!%p12287_p9)
}
  0x32   :  { %s12368_s4 = smov 256   ;;  %s12369_s27 = smov 16  }
  0x33   :  { %29 = dma.hbm_to_vmem [thread:$0]  %s12712_s1, 131072, %s24_s25, [#allocation3], %s12368_s4, %s12368_s4, %s12369_s27  }
  0x34   :  { %s12370_s14 = smov [#allocation6]   ;;  %s12371_s16 = smov [#allocation9]  }
  0x35   :  { %s45_s15 = sshll.u32 %s12370_s14, 4  ;;  %s67_s17 = sshll.u32 %s12371_s16, 4  ;;  %s46_s15 = int_to_ptr.vmem [resolvable:$true] %s45_s15  ;;  %s68_s17 = int_to_ptr.vmem [resolvable:$true] %s67_s17 }
  0x36   :  { %s12291_s20 = scalar_lea.hbm %s12714_s3, 16384 }
  0x37   :  { %p12292_p10 = scmp.ne.s32.totalorder %s12714_s3, %s12291_s20  ;;  %p12295_p11 = scmp.lt.u32.totalorder %s12291_s20, %s12714_s3 }
  0x39   :  { %p12297_p12 = pnand %p12295_p11, %p12292_p10 }
  0x3b   :  { %12300 = shalt.err (!%p12297_p12)
}
  0x3c   :  { %s12301_s1 = scalar_lea.vmem %s46_s15, 16384  ;;  %p12306_p0 = scmp.lt.s32.totalorder %s46_s15, %s46_s15 }
  0x3d   :  { %p12302_p13 = scmp.ne.s32.totalorder %s46_s15, %s12301_s1  ;;  %p12307_p1 = scmp.lt.s32.totalorder %s12301_s1, %s12301_s1 }
  0x3f   :  { %p12308_p2 = por %p12307_p1, %p12306_p0 }
  0x41   :  { %p12309_p3 = pnand %p12308_p2, %p12302_p13 }
  0x43   :  { %12312 = shalt.err (!%p12309_p3)
}
  0x44   :  { %51 = dma.hbm_to_vmem [thread:$0]  %s12714_s3, 16384, %s46_s15, [#allocation5], %s12368_s4, %s12368_s4, %s12369_s27  }
  0x45   :  { %s12313_s29 = scalar_lea.hbm %s12716_s5, 4096 }
  0x46   :  { %p12314_p4 = scmp.ne.s32.totalorder %s12716_s5, %s12313_s29  ;;  %p12317_p5 = scmp.lt.u32.totalorder %s12313_s29, %s12716_s5 }
  0x48   :  { %p12319_p6 = pnand %p12317_p5, %p12314_p4 }
  0x4a   :  { %12322 = shalt.err (!%p12319_p6)
}
  0x4b   :  { %s12323_s11 = scalar_lea.vmem %s68_s17, 4096  ;;  %p12328_p8 = scmp.lt.s32.totalorder %s68_s17, %s68_s17 }
  0x4c   :  { %p12324_p7 = scmp.ne.s32.totalorder %s68_s17, %s12323_s11  ;;  %p12329_p9 = scmp.lt.s32.totalorder %s12323_s11, %s12323_s11 }
  0x4e   :  { %p12330_p10 = por %p12329_p9, %p12328_p8 }
  0x50   :  { %p12331_p11 = pnand %p12330_p10, %p12324_p7 }
  0x52   :  { %12334 = shalt.err (!%p12331_p11)
}
  0x53   :  { %s12372_s3 = smov 64   ;;  %s12373_s4 = smov 4  }
  0x54   :  { %73 = dma.hbm_to_vmem [thread:$0]  %s12716_s5, 4096, %s68_s17, [#allocation8], %s12372_s3, %s12372_s3, %s12373_s4  }
  0x55   :  { %s12374_s13 = smov [#allocation10]   ;;  %s12335_s18 = scalar_lea.hbm %s12717_s6, 16 }
  0x56   :  { %s80_s14 = sshll.u32 %s12374_s13, 4  ;;  %p12336_p12 = scmp.ne.s32.totalorder %s12717_s6, %s12335_s18  ;;  %s81_s14 = int_to_ptr.vmem [resolvable:$true] %s80_s14 }
  0x57   :  { %p12339_p13 = scmp.lt.u32.totalorder %s12335_s18, %s12717_s6 }
  0x59   :  { %p12341_p0 = pnand %p12339_p13, %p12336_p12 }
  0x5b   :  { %12344 = shalt.err (!%p12341_p0)
}
  0x5c   :  { %s12345_s2 = scalar_lea.vmem %s81_s14, 16  ;;  %s12349_s5 = scalar_lea.vmem %s81_s14, 32 }
  0x5d   :  { %p12346_p1 = scmp.ne.s32.totalorder %s81_s14, %s12345_s2  ;;  %p12350_p2 = scmp.lt.s32.totalorder %s81_s14, %s81_s14 }
  0x5e   :  { %p12351_p3 = scmp.lt.s32.totalorder %s12349_s5, %s12345_s2 }
  0x60   :  { %p12352_p4 = por %p12351_p3, %p12350_p2 }
  0x62   :  { %p12353_p5 = pnand %p12352_p4, %p12346_p1 }
  0x64   :  { %12356 = shalt.err (!%p12353_p5)
}
  0x65   :  { %83 = dma.hbm_to_vmem [thread:$0]  %s12717_s6, 16, %s81_s14, [#allocation11]  }
  0x66   :  { %12357 = dma.done.wait [#allocation3], 131072  }
  0x67   :  { %12358 = vsyncadd [#allocation3], 4294836224 }
  0x68   :  { %12359 = dma.done.wait [#allocation5], 16448  }
  0x69   :  { %12360 = vsyncadd [#allocation5], 4294950848 }
  0x6a   :  { %12361 = dma.done.wait [#allocation8], 4160  }
  0x6b   :  { %12362 = vsyncadd [#allocation8], 4294963136 }
  0x6c   :  { %12363 = dma.done.wait [#allocation11], 16  }
  0x6d   :  { %12364 = vsyncadd [#allocation11], 4294967280  ;;  %v10465_v0 = vld [vmem:[#allocation2 + $0x4] ss:$16 sps:$4 sm:$0xff]   ;;  %v10467_v1 = vld [vmem:[#allocation2 + $0xc] ss:$16 sps:$4 sm:$0xff]  }
  0x6e   :  { %6365 = vmatprep.subr.bf16.mxu0 %v10465_v0  ;;  %v10469_v2 = vld [vmem:[#allocation2] ss:$16 sps:$4 sm:$0xff]   ;;  %v10470_v3 = vld [vmem:[#allocation2 + $0x8] ss:$16 sps:$4 sm:$0xff]   ;;  %7053 = vmatprep.subr.bf16.mxu1 %v10467_v1  ;;  %v10471_v4 = vld [vmem:[#allocation2 + $0x24] ss:$16 sps:$4 sm:$0xff]  }
  0x6f   :  { %6366 = vmatpush1.bf16.msra.mxu0 %v10469_v2  ;;  %7054 = vmatpush1.bf16.msra.mxu1 %v10470_v3  ;;  %v10473_v5 = vld [vmem:[#allocation2 + $0x2c] ss:$16 sps:$4 sm:$0xff]   ;;  %v10475_v6 = vld [vmem:[#allocation2 + $0x20] ss:$16 sps:$4 sm:$0xff]   ;;  %v10476_v7 = vld [vmem:[#allocation2 + $0x28] ss:$16 sps:$4 sm:$0xff]  }
  0x70   :  { %6367 = vmatprep.subr.bf16.mxu0 %v10471_v4  ;;  %7055 = vmatprep.subr.bf16.mxu1 %v10473_v5  ;;  %v10477_v8 = vld [vmem:[#allocation2 + $0x44] ss:$16 sps:$4 sm:$0xff]   ;;  %v10479_v9 = vld [vmem:[#allocation2 + $0x4c] ss:$16 sps:$4 sm:$0xff]   ;;  %v10481_v10 = vld [vmem:[#allocation2 + $0x40] ss:$16 sps:$4 sm:$0xff]  }
  0x71   :  { %v10482_v11 = vld [vmem:[#allocation2 + $0x48] ss:$16 sps:$4 sm:$0xff]   ;;  %v10483_v12 = vld [vmem:[#allocation2 + $0x64] ss:$16 sps:$4 sm:$0xff]   ;;  %v10485_v13 = vld [vmem:[#allocation2 + $0x6c] ss:$16 sps:$4 sm:$0xff]  }
  0x72   :  { %v10487_v14 = vld [vmem:[#allocation2 + $0x60] ss:$16 sps:$4 sm:$0xff]   ;;  %v10488_v15 = vld [vmem:[#allocation2 + $0x68] ss:$16 sps:$4 sm:$0xff]   ;;  %v10489_v16 = vld [vmem:[#allocation2 + $0x84] ss:$16 sps:$4 sm:$0xff]  }
  0x73   :  { %6368 = vmatpush1.bf16.msra.mxu0 %v10475_v6  ;;  %7056 = vmatpush1.bf16.msra.mxu1 %v10476_v7  ;;  %v10491_v17 = vld [vmem:[#allocation2 + $0x8c] ss:$16 sps:$4 sm:$0xff]   ;;  %v10493_v18 = vld [vmem:[#allocation2 + $0x80] ss:$16 sps:$4 sm:$0xff]   ;;  %v10494_v19 = vld [vmem:[#allocation2 + $0x88] ss:$16 sps:$4 sm:$0xff]  }
  0x74   :  { %6369 = vmatprep.subr.bf16.mxu0 %v10477_v8  ;;  %7057 = vmatprep.subr.bf16.mxu1 %v10479_v9  ;;  %v10495_v20 = vld [vmem:[#allocation2 + $0xa4] ss:$16 sps:$4 sm:$0xff]   ;;  %v10497_v21 = vld [vmem:[#allocation2 + $0xac] ss:$16 sps:$4 sm:$0xff]   ;;  %v10499_v22 = vld [vmem:[#allocation2 + $0xa0] ss:$16 sps:$4 sm:$0xff]  }
  0x75   :  { %v10500_v23 = vld [vmem:[#allocation2 + $0xa8] ss:$16 sps:$4 sm:$0xff]   ;;  %v10501_v24 = vld [vmem:[#allocation2 + $0xc4] ss:$16 sps:$4 sm:$0xff]   ;;  %v10503_v25 = vld [vmem:[#allocation2 + $0xcc] ss:$16 sps:$4 sm:$0xff]  }
  0x76   :  { %v10505_v26 = vld [vmem:[#allocation2 + $0xc0] ss:$16 sps:$4 sm:$0xff]   ;;  %v10506_v27 = vld [vmem:[#allocation2 + $0xc8] ss:$16 sps:$4 sm:$0xff]   ;;  %v10507_v28 = vld [vmem:[#allocation2 + $0xe4] ss:$16 sps:$4 sm:$0xff]  }
  0x77   :  { %6370 = vmatpush1.bf16.msra.mxu0 %v10481_v10  ;;  %7058 = vmatpush1.bf16.msra.mxu1 %v10482_v11  ;;  %v10509_v29 = vld [vmem:[#allocation2 + $0xec] ss:$16 sps:$4 sm:$0xff]   ;;  %v10511_v30 = vld [vmem:[#allocation2 + $0xe0] ss:$16 sps:$4 sm:$0xff]   ;;  %v10512_v31 = vld [vmem:[#allocation2 + $0xe8] ss:$16 sps:$4 sm:$0xff]  }
  0x78   :  { %6371 = vmatprep.subr.bf16.mxu0 %v10483_v12  ;;  %7059 = vmatprep.subr.bf16.mxu1 %v10485_v13  ;;  %v10513_v32 = vld [vmem:[#allocation2 + $0x104] ss:$16 sps:$4 sm:$0xff]   ;;  %v10515_v33 = vld [vmem:[#allocation2 + $0x10c] ss:$16 sps:$4 sm:$0xff]   ;;  %v10517_v34 = vld [vmem:[#allocation2 + $0x100] ss:$16 sps:$4 sm:$0xff]  }
  0x79   :  { %v10518_v35 = vld [vmem:[#allocation2 + $0x108] ss:$16 sps:$4 sm:$0xff]   ;;  %v10519_v36 = vld [vmem:[#allocation2 + $0x124] ss:$16 sps:$4 sm:$0xff]   ;;  %v10521_v37 = vld [vmem:[#allocation2 + $0x12c] ss:$16 sps:$4 sm:$0xff]  }
  0x7a   :  { %v10523_v38 = vld [vmem:[#allocation2 + $0x120] ss:$16 sps:$4 sm:$0xff]   ;;  %v10524_v39 = vld [vmem:[#allocation2 + $0x128] ss:$16 sps:$4 sm:$0xff]   ;;  %v10525_v40 = vld [vmem:[#allocation2 + $0x144] ss:$16 sps:$4 sm:$0xff]  }
  0x7b   :  { %6372 = vmatpush1.bf16.msra.mxu0 %v10487_v14  ;;  %7060 = vmatpush1.bf16.msra.mxu1 %v10488_v15  ;;  %v10527_v41 = vld [vmem:[#allocation2 + $0x14c] ss:$16 sps:$4 sm:$0xff]   ;;  %v10529_v42 = vld [vmem:[#allocation2 + $0x140] ss:$16 sps:$4 sm:$0xff]   ;;  %v10530_v43 = vld [vmem:[#allocation2 + $0x148] ss:$16 sps:$4 sm:$0xff]  }
  0x7c   :  { %6373 = vmatprep.subr.bf16.mxu0 %v10489_v16  ;;  %7061 = vmatprep.subr.bf16.mxu1 %v10491_v17  ;;  %v10531_v44 = vld [vmem:[#allocation2 + $0x164] ss:$16 sps:$4 sm:$0xff]   ;;  %v10533_v45 = vld [vmem:[#allocation2 + $0x16c] ss:$16 sps:$4 sm:$0xff]   ;;  %v10535_v48 = vld [vmem:[#allocation2 + $0x160] ss:$16 sps:$4 sm:$0xff]  }
  0x7d   :  { %v104_v46 = vld [vmem:[%s12711_s0 + $0x8] sm:$0xff]  ;;  %v10537_v51 = vld [vmem:[#allocation2 + $0x184] ss:$16 sps:$4 sm:$0xff]   ;;  %v10541_v53 = vld [vmem:[#allocation2 + $0x180] ss:$16 sps:$4 sm:$0xff]  }
  0x7e   :  { %v136_v47 = vld [vmem:[%s12711_s0 + $0x108] sm:$0xff]  ;;  %v10543_v55 = vld [vmem:[#allocation2 + $0x1a4] ss:$16 sps:$4 sm:$0xff]   ;;  %v10547_v57 = vld [vmem:[#allocation2 + $0x1a0] ss:$16 sps:$4 sm:$0xff]  }
  0x7f   :  { %6374 = vmatpush1.bf16.msra.mxu0 %v10493_v18  ;;  %7062 = vmatpush1.bf16.msra.mxu1 %v10494_v19  ;;  %v10536_v49 = vld [vmem:[#allocation2 + $0x168] ss:$16 sps:$4 sm:$0xff]   ;;  %v168_v50 = vpack.c.bf16 %v136_v47, %v104_v46  ;;  %v10539_v52 = vld [vmem:[#allocation2 + $0x18c] ss:$16 sps:$4 sm:$0xff]   ;;  %v10549_v59 = vld [vmem:[#allocation2 + $0x1c4] ss:$16 sps:$4 sm:$0xff]  }
  0x80   :  { %6375 = vmatprep.subr.bf16.mxu0 %v10495_v20  ;;  %7063 = vmatprep.subr.bf16.mxu1 %v10497_v21  ;;  %v10542_v54 = vld [vmem:[#allocation2 + $0x188] ss:$16 sps:$4 sm:$0xff]   ;;  %v10545_v56 = vld [vmem:[#allocation2 + $0x1ac] ss:$16 sps:$4 sm:$0xff]   ;;  %v10553_v61 = vld [vmem:[#allocation2 + $0x1c0] ss:$16 sps:$4 sm:$0xff]  }
  0x81   :  { %6397 = vmatprep.mubr.bf16.mxu0 %v168_v50  ;;  %7085 = vmatprep.mubr.bf16.mxu1 %v168_v50  ;;  %v10548_v58 = vld [vmem:[#allocation2 + $0x1a8] ss:$16 sps:$4 sm:$0xff]   ;;  %v10551_v60 = vld [vmem:[#allocation2 + $0x1cc] ss:$16 sps:$4 sm:$0xff]   ;;  %v10555_v63 = vld [vmem:[#allocation2 + $0x1e4] ss:$16 sps:$4 sm:$0xff]  }
  0x82   :  { %v10554_v62 = vld [vmem:[#allocation2 + $0x1c8] ss:$16 sps:$4 sm:$0xff]   ;;  %v10557_v0 = vld [vmem:[#allocation2 + $0x1ec] ss:$16 sps:$4 sm:$0xff]   ;;  %v10559_v1 = vld [vmem:[#allocation2 + $0x1e0] ss:$16 sps:$4 sm:$0xff]  }
  0x83   :  { %6376 = vmatpush1.bf16.msra.mxu0 %v10499_v22  ;;  %7064 = vmatpush1.bf16.msra.mxu1 %v10500_v23  ;;  %v10560_v2 = vld [vmem:[#allocation2 + $0x1e8] ss:$16 sps:$4 sm:$0xff]   ;;  %v10563_v3 = vld [vmem:[#allocation2 + $0x204] ss:$16 sps:$4 sm:$0xff]   ;;  %v10566_v6 = vld [vmem:[#allocation2 + $0x20c] ss:$16 sps:$4 sm:$0xff]  }
  0x84   :  { %6377 = vmatprep.subr.bf16.mxu0 %v10501_v24  ;;  %7065 = vmatprep.subr.bf16.mxu1 %v10503_v25  ;;  %v103_v4 = vld [vmem:[%s12711_s0] sm:$0xff]  ;;  %v10564_v8 = vld [vmem:[#allocation2 + $0x208] ss:$16 sps:$4 sm:$0xff]   ;;  %v10572_v11 = vld [vmem:[#allocation2 + $0x22c] ss:$16 sps:$4 sm:$0xff]  }
  0x85   :  { %v135_v5 = vld [vmem:[%s12711_s0 + $0x100] sm:$0xff]  ;;  %v10570_v13 = vld [vmem:[#allocation2 + $0x228] ss:$16 sps:$4 sm:$0xff]   ;;  %v10578_v15 = vld [vmem:[#allocation2 + $0x24c] ss:$16 sps:$4 sm:$0xff]  }
  0x86   :  { %v10561_v7 = vld [vmem:[#allocation2 + $0x200] ss:$16 sps:$4 sm:$0xff]   ;;  %v167_v9 = vpack.c.bf16 %v135_v5, %v103_v4  ;;  %v10569_v10 = vld [vmem:[#allocation2 + $0x224] ss:$16 sps:$4 sm:$0xff]   ;;  %v10576_v17 = vld [vmem:[#allocation2 + $0x248] ss:$16 sps:$4 sm:$0xff]  }
  0x87   :  { %6378 = vmatpush1.bf16.msra.mxu0 %v10505_v26  ;;  %7066 = vmatpush1.bf16.msra.mxu1 %v10506_v27  ;;  %v10567_v12 = vld [vmem:[#allocation2 + $0x220] ss:$16 sps:$4 sm:$0xff]   ;;  %v10575_v14 = vld [vmem:[#allocation2 + $0x244] ss:$16 sps:$4 sm:$0xff]   ;;  %v10584_v19 = vld [vmem:[#allocation2 + $0x26c] ss:$16 sps:$4 sm:$0xff]  }
  0x88   :  { %6379 = vmatprep.subr.bf16.mxu0 %v10507_v28  ;;  %7067 = vmatprep.subr.bf16.mxu1 %v10509_v29  ;;  %v10573_v16 = vld [vmem:[#allocation2 + $0x240] ss:$16 sps:$4 sm:$0xff]   ;;  %v10581_v18 = vld [vmem:[#allocation2 + $0x264] ss:$16 sps:$4 sm:$0xff]   ;;  %v10582_v21 = vld [vmem:[#allocation2 + $0x268] ss:$16 sps:$4 sm:$0xff]  }
  0x89   :  { %v10579_v20 = vld [vmem:[#allocation2 + $0x260] ss:$16 sps:$4 sm:$0xff]   ;;  %v10587_v22 = vld [vmem:[#allocation2 + $0x284] ss:$16 sps:$4 sm:$0xff]   ;;  %v10590_v23 = vld [vmem:[#allocation2 + $0x28c] ss:$16 sps:$4 sm:$0xff]  }
  0x8a   :  { %v10585_v24 = vld [vmem:[#allocation2 + $0x280] ss:$16 sps:$4 sm:$0xff]   ;;  %v10588_v25 = vld [vmem:[#allocation2 + $0x288] ss:$16 sps:$4 sm:$0xff]   ;;  %v10593_v26 = vld [vmem:[#allocation2 + $0x2a4] ss:$16 sps:$4 sm:$0xff]  }
  0x8b   :  { %6380 = vmatpush1.bf16.msra.mxu0 %v10511_v30  ;;  %7068 = vmatpush1.bf16.msra.mxu1 %v10512_v31  ;;  %v10596_v27 = vld [vmem:[#allocation2 + $0x2ac] ss:$16 sps:$4 sm:$0xff]   ;;  %v10591_v28 = vld [vmem:[#allocation2 + $0x2a0] ss:$16 sps:$4 sm:$0xff]   ;;  %v10594_v29 = vld [vmem:[#allocation2 + $0x2a8] ss:$16 sps:$4 sm:$0xff]  }
  0x8c   :  { %6381 = vmatprep.subr.bf16.mxu0 %v10513_v32  ;;  %7069 = vmatprep.subr.bf16.mxu1 %v10515_v33  ;;  %v10599_v30 = vld [vmem:[#allocation2 + $0x2c4] ss:$16 sps:$4 sm:$0xff]   ;;  %v10602_v31 = vld [vmem:[#allocation2 + $0x2cc] ss:$16 sps:$4 sm:$0xff]   ;;  %v10615_v47 = vld [vmem:[#allocation2 + $0x320] ss:$16 sps:$4 sm:$0xff]  }
  0x8d   :  { %v106_v32 = vld [vmem:[%s12711_s0 + $0x18] sm:$0xff]  ;;  %v10653_v5 = vld [vmem:[#allocation2 + $0x3e4] ss:$16 sps:$4 sm:$0xff]  }
  0x8e   :  { %v138_v33 = vld [vmem:[%s12711_s0 + $0x118] sm:$0xff] }
  0x8f   :  { %6382 = vmatpush1.bf16.msra.mxu0 %v10517_v34  ;;  %7070 = vmatpush1.bf16.msra.mxu1 %v10518_v35  ;;  %v10597_v34 = vld [vmem:[#allocation2 + $0x2c0] ss:$16 sps:$4 sm:$0xff]   ;;  %v10600_v35 = vld [vmem:[#allocation2 + $0x2c8] ss:$16 sps:$4 sm:$0xff]   ;;  %v10620_v46 = vld [vmem:[#allocation2 + $0x32c] ss:$16 sps:$4 sm:$0xff]  }
  0x90   :  { %6383 = vmatprep.subr.bf16.mxu0 %v10519_v36  ;;  %7071 = vmatprep.subr.bf16.mxu1 %v10521_v37  ;;  %v170_v36 = vpack.c.bf16 %v138_v33, %v106_v32  ;;  %v10605_v37 = vld [vmem:[#allocation2 + $0x2e4] ss:$16 sps:$4 sm:$0xff]   ;;  %v10626_v50 = vld [vmem:[#allocation2 + $0x34c] ss:$16 sps:$4 sm:$0xff]   ;;  %v10648_v4 = vld [vmem:[#allocation2 + $0x3c8] ss:$16 sps:$4 sm:$0xff]  }
  0x91   :  { %v10686_v32 = vld [vmem:[#allocation2 + $0x48c] ss:$16 sps:$4 sm:$0xff]   ;;  %v10681_v33 = vld [vmem:[#allocation2 + $0x480] ss:$16 sps:$4 sm:$0xff]  }
  0x93   :  { %6384 = vmatpush1.bf16.msra.mxu0 %v10523_v38  ;;  %7072 = vmatpush1.bf16.msra.mxu1 %v10524_v39  ;;  %v10608_v38 = vld [vmem:[#allocation2 + $0x2ec] ss:$16 sps:$4 sm:$0xff]   ;;  %v10603_v39 = vld [vmem:[#allocation2 + $0x2e0] ss:$16 sps:$4 sm:$0xff]  }
  0x94   :  { %6385 = vmatprep.subr.bf16.mxu0 %v10525_v40  ;;  %7073 = vmatprep.subr.bf16.mxu1 %v10527_v41  ;;  %v10606_v40 = vld [vmem:[#allocation2 + $0x2e8] ss:$16 sps:$4 sm:$0xff]   ;;  %v10611_v41 = vld [vmem:[#allocation2 + $0x304] ss:$16 sps:$4 sm:$0xff]  }
  0x97   :  { %6386 = vmatpush1.bf16.msra.mxu0 %v10529_v42  ;;  %7074 = vmatpush1.bf16.msra.mxu1 %v10530_v43  ;;  %v10614_v42 = vld [vmem:[#allocation2 + $0x30c] ss:$16 sps:$4 sm:$0xff]   ;;  %v10609_v43 = vld [vmem:[#allocation2 + $0x300] ss:$16 sps:$4 sm:$0xff]  }
  0x98   :  { %6387 = vmatprep.subr.bf16.mxu0 %v10531_v44  ;;  %7075 = vmatprep.subr.bf16.mxu1 %v10533_v45  ;;  %v10612_v44 = vld [vmem:[#allocation2 + $0x308] ss:$16 sps:$4 sm:$0xff]   ;;  %v10617_v45 = vld [vmem:[#allocation2 + $0x324] ss:$16 sps:$4 sm:$0xff]  }
  0x9b   :  { %6388 = vmatpush1.bf16.msra.mxu0 %v10535_v48  ;;  %7076 = vmatpush1.bf16.msra.mxu1 %v10536_v49  ;;  %v10618_v48 = vld [vmem:[#allocation2 + $0x328] ss:$16 sps:$4 sm:$0xff]   ;;  %v10623_v49 = vld [vmem:[#allocation2 + $0x344] ss:$16 sps:$4 sm:$0xff]  }
  0x9c   :  { %6389 = vmatprep.subr.bf16.mxu0 %v10537_v51  ;;  %7077 = vmatprep.subr.bf16.mxu1 %v10539_v52  ;;  %v10621_v51 = vld [vmem:[#allocation2 + $0x340] ss:$16 sps:$4 sm:$0xff]   ;;  %v10624_v52 = vld [vmem:[#allocation2 + $0x348] ss:$16 sps:$4 sm:$0xff]  }
  0x9f   :  { %6390 = vmatpush1.bf16.msra.mxu0 %v10541_v53  ;;  %7078 = vmatpush1.bf16.msra.mxu1 %v10542_v54  ;;  %v10629_v53 = vld [vmem:[#allocation2 + $0x364] ss:$16 sps:$4 sm:$0xff]   ;;  %v10632_v54 = vld [vmem:[#allocation2 + $0x36c] ss:$16 sps:$4 sm:$0xff]  }
  0xa0   :  { %6391 = vmatprep.subr.bf16.mxu0 %v10543_v55  ;;  %7079 = vmatprep.subr.bf16.mxu1 %v10545_v56  ;;  %v10627_v55 = vld [vmem:[#allocation2 + $0x360] ss:$16 sps:$4 sm:$0xff]   ;;  %v10630_v56 = vld [vmem:[#allocation2 + $0x368] ss:$16 sps:$4 sm:$0xff]  }
  0xa3   :  { %6392 = vmatpush1.bf16.msra.mxu0 %v10547_v57  ;;  %7080 = vmatpush1.bf16.msra.mxu1 %v10548_v58  ;;  %v10635_v57 = vld [vmem:[#allocation2 + $0x384] ss:$16 sps:$4 sm:$0xff]   ;;  %v10638_v58 = vld [vmem:[#allocation2 + $0x38c] ss:$16 sps:$4 sm:$0xff]  }
  0xa4   :  { %6393 = vmatprep.subr.bf16.mxu0 %v10549_v59  ;;  %7081 = vmatprep.subr.bf16.mxu1 %v10551_v60  ;;  %v10633_v59 = vld [vmem:[#allocation2 + $0x380] ss:$16 sps:$4 sm:$0xff]   ;;  %v10636_v60 = vld [vmem:[#allocation2 + $0x388] ss:$16 sps:$4 sm:$0xff]  }
  0xa7   :  { %6394 = vmatpush1.bf16.msra.mxu0 %v10553_v61  ;;  %7082 = vmatpush1.bf16.msra.mxu1 %v10554_v62  ;;  %v10641_v61 = vld [vmem:[#allocation2 + $0x3a4] ss:$16 sps:$4 sm:$0xff]   ;;  %v10644_v62 = vld [vmem:[#allocation2 + $0x3ac] ss:$16 sps:$4 sm:$0xff]  }
  0xa8   :  { %6395 = vmatprep.subr.bf16.mxu0 %v10555_v63  ;;  %7083 = vmatprep.subr.bf16.mxu1 %v10557_v0  ;;  %v10639_v63 = vld [vmem:[#allocation2 + $0x3a0] ss:$16 sps:$4 sm:$0xff]   ;;  %v10642_v0 = vld [vmem:[#allocation2 + $0x3a8] ss:$16 sps:$4 sm:$0xff]  }
  0xab   :  { %6396 = vmatpush1.bf16.msra.mxu0 %v10559_v1  ;;  %7084 = vmatpush1.bf16.msra.mxu1 %v10560_v2  ;;  %v10647_v1 = vld [vmem:[#allocation2 + $0x3c4] ss:$16 sps:$4 sm:$0xff]   ;;  %v10650_v2 = vld [vmem:[#allocation2 + $0x3cc] ss:$16 sps:$4 sm:$0xff]  }
  0xac   :  { %6408 = vmatprep.subr.bf16.mxu0 %v10563_v3  ;;  %7096 = vmatprep.subr.bf16.mxu1 %v10566_v6  ;;  %v10645_v3 = vld [vmem:[#allocation2 + $0x3c0] ss:$16 sps:$4 sm:$0xff]   ;;  %v10656_v6 = vld [vmem:[#allocation2 + $0x3ec] ss:$16 sps:$4 sm:$0xff]  }
  0xae   :  { %6398 = vmatmul.mubr.bf16.vlgmr.msra.gmra.mrb[0].mxu0 %v167_v9  ;;  %7086 = vmatmul.mubr.bf16.vlgmr.msra.gmra.mrb[0].mxu1 %v167_v9  ;;  %v10659_v9 = vld [vmem:[#allocation2 + $0x404] ss:$16 sps:$4 sm:$0xff]  }
  0xaf   :  { %6409 = vmatpush1.bf16.msra.mxu0 %v10561_v7  ;;  %7097 = vmatpush1.bf16.msra.mxu1 %v10564_v8  ;;  %v10651_v7 = vld [vmem:[#allocation2 + $0x3e0] ss:$16 sps:$4 sm:$0xff]   ;;  %v10654_v8 = vld [vmem:[#allocation2 + $0x3e8] ss:$16 sps:$4 sm:$0xff]  }
  0xb0   :  { %6410 = vmatprep.subr.bf16.mxu0 %v10569_v10  ;;  %7098 = vmatprep.subr.bf16.mxu1 %v10572_v11  ;;  %v105_v10 = vld [vmem:[%s12711_s0 + $0x10] sm:$0xff] }
  0xb1   :  { %6440 = vmatprep.mubr.bf16.mxu0 %v170_v36  ;;  %7128 = vmatprep.mubr.bf16.mxu1 %v170_v36  ;;  %v137_v11 = vld [vmem:[%s12711_s0 + $0x110] sm:$0xff]  ;;  %v10692_v36 = vld [vmem:[#allocation2 + $0x4ac] ss:$16 sps:$4 sm:$0xff]  }
  0xb3   :  { %6411 = vmatpush1.bf16.msra.mxu0 %v10567_v12  ;;  %7099 = vmatpush1.bf16.msra.mxu1 %v10570_v13  ;;  %v10662_v12 = vld [vmem:[#allocation2 + $0x40c] ss:$16 sps:$4 sm:$0xff]   ;;  %v10657_v13 = vld [vmem:[#allocation2 + $0x400] ss:$16 sps:$4 sm:$0xff]  }
  0xb4   :  { %6412 = vmatprep.subr.bf16.mxu0 %v10575_v14  ;;  %7100 = vmatprep.subr.bf16.mxu1 %v10578_v15  ;;  %v10660_v14 = vld [vmem:[#allocation2 + $0x408] ss:$16 sps:$4 sm:$0xff]   ;;  %v169_v15 = vpack.c.bf16 %v137_v11, %v105_v10  ;;  %v10749_v11 = vld [vmem:[#allocation2 + $0x5e4] ss:$16 sps:$4 sm:$0xff]  }
  0xb5   :  { %v10744_v10 = vld [vmem:[#allocation2 + $0x5c8] ss:$16 sps:$4 sm:$0xff]  }
  0xb7   :  { %6413 = vmatpush1.bf16.msra.mxu0 %v10573_v16  ;;  %7101 = vmatpush1.bf16.msra.mxu1 %v10576_v17  ;;  %v10665_v16 = vld [vmem:[#allocation2 + $0x424] ss:$16 sps:$4 sm:$0xff]   ;;  %v10668_v17 = vld [vmem:[#allocation2 + $0x42c] ss:$16 sps:$4 sm:$0xff]  }
  0xb8   :  { %6414 = vmatprep.subr.bf16.mxu0 %v10581_v18  ;;  %7102 = vmatprep.subr.bf16.mxu1 %v10584_v19  ;;  %v108_v18 = vld [vmem:[%s12711_s0 + $0x28] sm:$0xff] }
  0xb9   :  { %v140_v19 = vld [vmem:[%s12711_s0 + $0x128] sm:$0xff] }
  0xbb   :  { %6415 = vmatpush1.bf16.msra.mxu0 %v10579_v20  ;;  %7103 = vmatpush1.bf16.msra.mxu1 %v10582_v21  ;;  %v10663_v20 = vld [vmem:[#allocation2 + $0x420] ss:$16 sps:$4 sm:$0xff]   ;;  %v10666_v21 = vld [vmem:[#allocation2 + $0x428] ss:$16 sps:$4 sm:$0xff]  }
  0xbc   :  { %6416 = vmatprep.subr.bf16.mxu0 %v10587_v22  ;;  %7104 = vmatprep.subr.bf16.mxu1 %v10590_v23  ;;  %v172_v22 = vpack.c.bf16 %v140_v19, %v108_v18  ;;  %v10671_v23 = vld [vmem:[#allocation2 + $0x444] ss:$16 sps:$4 sm:$0xff]   ;;  %v10758_v18 = vld [vmem:[#allocation2 + $0x60c] ss:$16 sps:$4 sm:$0xff]   ;;  %v10753_v19 = vld [vmem:[#allocation2 + $0x600] ss:$16 sps:$4 sm:$0xff]  }
  0xbf   :  { %6417 = vmatpush1.bf16.msra.mxu0 %v10585_v24  ;;  %7105 = vmatpush1.bf16.msra.mxu1 %v10588_v25  ;;  %v10674_v24 = vld [vmem:[#allocation2 + $0x44c] ss:$16 sps:$4 sm:$0xff]   ;;  %v10669_v25 = vld [vmem:[#allocation2 + $0x440] ss:$16 sps:$4 sm:$0xff]  }
  0xc0   :  { %6418 = vmatprep.subr.bf16.mxu0 %v10593_v26  ;;  %7106 = vmatprep.subr.bf16.mxu1 %v10596_v27  ;;  %v10672_v26 = vld [vmem:[#allocation2 + $0x448] ss:$16 sps:$4 sm:$0xff]   ;;  %v10677_v27 = vld [vmem:[#allocation2 + $0x464] ss:$16 sps:$4 sm:$0xff]  }
  0xc3   :  { %6419 = vmatpush1.bf16.msra.mxu0 %v10591_v28  ;;  %7107 = vmatpush1.bf16.msra.mxu1 %v10594_v29  ;;  %v10680_v28 = vld [vmem:[#allocation2 + $0x46c] ss:$16 sps:$4 sm:$0xff]   ;;  %v10675_v29 = vld [vmem:[#allocation2 + $0x460] ss:$16 sps:$4 sm:$0xff]  }
  0xc4   :  { %6420 = vmatprep.subr.bf16.mxu0 %v10599_v30  ;;  %7108 = vmatprep.subr.bf16.mxu1 %v10602_v31  ;;  %v10678_v30 = vld [vmem:[#allocation2 + $0x468] ss:$16 sps:$4 sm:$0xff]   ;;  %v10683_v31 = vld [vmem:[#allocation2 + $0x484] ss:$16 sps:$4 sm:$0xff]  }
  0xc7   :  { %6421 = vmatpush1.bf16.msra.mxu0 %v10597_v34  ;;  %7109 = vmatpush1.bf16.msra.mxu1 %v10600_v35  ;;  %v10684_v34 = vld [vmem:[#allocation2 + $0x488] ss:$16 sps:$4 sm:$0xff]   ;;  %v10689_v35 = vld [vmem:[#allocation2 + $0x4a4] ss:$16 sps:$4 sm:$0xff]  }
  0xc8   :  { %6422 = vmatprep.subr.bf16.mxu0 %v10605_v37  ;;  %7110 = vmatprep.subr.bf16.mxu1 %v10608_v38  ;;  %v10687_v37 = vld [vmem:[#allocation2 + $0x4a0] ss:$16 sps:$4 sm:$0xff]   ;;  %v10690_v38 = vld [vmem:[#allocation2 + $0x4a8] ss:$16 sps:$4 sm:$0xff]  }
  0xcb   :  { %6423 = vmatpush1.bf16.msra.mxu0 %v10603_v39  ;;  %7111 = vmatpush1.bf16.msra.mxu1 %v10606_v40  ;;  %v10695_v39 = vld [vmem:[#allocation2 + $0x4c4] ss:$16 sps:$4 sm:$0xff]   ;;  %v10698_v40 = vld [vmem:[#allocation2 + $0x4cc] ss:$16 sps:$4 sm:$0xff]  }
  0xcc   :  { %6424 = vmatprep.subr.bf16.mxu0 %v10611_v41  ;;  %7112 = vmatprep.subr.bf16.mxu1 %v10614_v42  ;;  %v10693_v41 = vld [vmem:[#allocation2 + $0x4c0] ss:$16 sps:$4 sm:$0xff]   ;;  %v10696_v42 = vld [vmem:[#allocation2 + $0x4c8] ss:$16 sps:$4 sm:$0xff]  }
  0xcf   :  { %6425 = vmatpush1.bf16.msra.mxu0 %v10609_v43  ;;  %7113 = vmatpush1.bf16.msra.mxu1 %v10612_v44  ;;  %v10701_v43 = vld [vmem:[#allocation2 + $0x4e4] ss:$16 sps:$4 sm:$0xff]   ;;  %v10704_v44 = vld [vmem:[#allocation2 + $0x4ec] ss:$16 sps:$4 sm:$0xff]  }
  0xd0   :  { %6426 = vmatprep.subr.bf16.mxu0 %v10617_v45  ;;  %7114 = vmatprep.subr.bf16.mxu1 %v10620_v46  ;;  %v10699_v45 = vld [vmem:[#allocation2 + $0x4e0] ss:$16 sps:$4 sm:$0xff]   ;;  %v10702_v46 = vld [vmem:[#allocation2 + $0x4e8] ss:$16 sps:$4 sm:$0xff]  }
  0xd3   :  { %6427 = vmatpush1.bf16.msra.mxu0 %v10615_v47  ;;  %7115 = vmatpush1.bf16.msra.mxu1 %v10618_v48  ;;  %v10707_v47 = vld [vmem:[#allocation2 + $0x504] ss:$16 sps:$4 sm:$0xff]   ;;  %v10710_v48 = vld [vmem:[#allocation2 + $0x50c] ss:$16 sps:$4 sm:$0xff]  }
  0xd4   :  { %6428 = vmatprep.subr.bf16.mxu0 %v10623_v49  ;;  %7116 = vmatprep.subr.bf16.mxu1 %v10626_v50  ;;  %v10705_v49 = vld [vmem:[#allocation2 + $0x500] ss:$16 sps:$4 sm:$0xff]   ;;  %v10708_v50 = vld [vmem:[#allocation2 + $0x508] ss:$16 sps:$4 sm:$0xff]  }
  0xd7   :  { %6429 = vmatpush1.bf16.msra.mxu0 %v10621_v51  ;;  %7117 = vmatpush1.bf16.msra.mxu1 %v10624_v52  ;;  %v10713_v51 = vld [vmem:[#allocation2 + $0x524] ss:$16 sps:$4 sm:$0xff]   ;;  %v10716_v52 = vld [vmem:[#allocation2 + $0x52c] ss:$16 sps:$4 sm:$0xff]  }
  0xd8   :  { %6430 = vmatprep.subr.bf16.mxu0 %v10629_v53  ;;  %7118 = vmatprep.subr.bf16.mxu1 %v10632_v54  ;;  %v10711_v53 = vld [vmem:[#allocation2 + $0x520] ss:$16 sps:$4 sm:$0xff]   ;;  %v10714_v54 = vld [vmem:[#allocation2 + $0x528] ss:$16 sps:$4 sm:$0xff]  }
  0xdb   :  { %6431 = vmatpush1.bf16.msra.mxu0 %v10627_v55  ;;  %7119 = vmatpush1.bf16.msra.mxu1 %v10630_v56  ;;  %v10719_v55 = vld [vmem:[#allocation2 + $0x544] ss:$16 sps:$4 sm:$0xff]   ;;  %v10722_v56 = vld [vmem:[#allocation2 + $0x54c] ss:$16 sps:$4 sm:$0xff]  }
  0xdc   :  { %6432 = vmatprep.subr.bf16.mxu0 %v10635_v57  ;;  %7120 = vmatprep.subr.bf16.mxu1 %v10638_v58  ;;  %v10717_v57 = vld [vmem:[#allocation2 + $0x540] ss:$16 sps:$4 sm:$0xff]   ;;  %v10720_v58 = vld [vmem:[#allocation2 + $0x548] ss:$16 sps:$4 sm:$0xff]  }
  0xdf   :  { %6433 = vmatpush1.bf16.msra.mxu0 %v10633_v59  ;;  %7121 = vmatpush1.bf16.msra.mxu1 %v10636_v60  ;;  %v10725_v59 = vld [vmem:[#allocation2 + $0x564] ss:$16 sps:$4 sm:$0xff]   ;;  %v10728_v60 = vld [vmem:[#allocation2 + $0x56c] ss:$16 sps:$4 sm:$0xff]  }
  0xe0   :  { %6434 = vmatprep.subr.bf16.mxu0 %v10641_v61  ;;  %7122 = vmatprep.subr.bf16.mxu1 %v10644_v62  ;;  %v10723_v61 = vld [vmem:[#allocation2 + $0x560] ss:$16 sps:$4 sm:$0xff]   ;;  %v10726_v62 = vld [vmem:[#allocation2 + $0x568] ss:$16 sps:$4 sm:$0xff]  }
  0xe3   :  { %6435 = vmatpush1.bf16.msra.mxu0 %v10639_v63  ;;  %7123 = vmatpush1.bf16.msra.mxu1 %v10642_v0  ;;  %v10731_v63 = vld [vmem:[#allocation2 + $0x584] ss:$16 sps:$4 sm:$0xff]   ;;  %v10734_v0 = vld [vmem:[#allocation2 + $0x58c] ss:$16 sps:$4 sm:$0xff]  }
  0xe4   :  { %6436 = vmatprep.subr.bf16.mxu0 %v10647_v1  ;;  %7124 = vmatprep.subr.bf16.mxu1 %v10650_v2  ;;  %v10729_v1 = vld [vmem:[#allocation2 + $0x580] ss:$16 sps:$4 sm:$0xff]   ;;  %v10732_v2 = vld [vmem:[#allocation2 + $0x588] ss:$16 sps:$4 sm:$0xff]  }
  0xe7   :  { %6437 = vmatpush1.bf16.msra.mxu0 %v10645_v3  ;;  %7125 = vmatpush1.bf16.msra.mxu1 %v10648_v4  ;;  %v10737_v3 = vld [vmem:[#allocation2 + $0x5a4] ss:$16 sps:$4 sm:$0xff]   ;;  %v10740_v4 = vld [vmem:[#allocation2 + $0x5ac] ss:$16 sps:$4 sm:$0xff]  }
  0xe8   :  { %6438 = vmatprep.subr.bf16.mxu0 %v10653_v5  ;;  %7126 = vmatprep.subr.bf16.mxu1 %v10656_v6  ;;  %v10735_v5 = vld [vmem:[#allocation2 + $0x5a0] ss:$16 sps:$4 sm:$0xff]   ;;  %v10738_v6 = vld [vmem:[#allocation2 + $0x5a8] ss:$16 sps:$4 sm:$0xff]  }
  0xeb   :  { %6439 = vmatpush1.bf16.msra.mxu0 %v10651_v7  ;;  %7127 = vmatpush1.bf16.msra.mxu1 %v10654_v8  ;;  %v10743_v7 = vld [vmem:[#allocation2 + $0x5c4] ss:$16 sps:$4 sm:$0xff]   ;;  %v10746_v8 = vld [vmem:[#allocation2 + $0x5cc] ss:$16 sps:$4 sm:$0xff]  }
  0xec   :  { %6451 = vmatprep.subr.bf16.mxu0 %v10659_v9  ;;  %7139 = vmatprep.subr.bf16.mxu1 %v10662_v12  ;;  %v10741_v9 = vld [vmem:[#allocation2 + $0x5c0] ss:$16 sps:$4 sm:$0xff]   ;;  %v10752_v12 = vld [vmem:[#allocation2 + $0x5ec] ss:$16 sps:$4 sm:$0xff]  }
  0xee   :  { %6441 = vmatmul.mubr.bf16.vlgmr.msra.gmra.mrb[0].mxu0 %v169_v15  ;;  %7129 = vmatmul.mubr.bf16.vlgmr.msra.gmra.mrb[0].mxu1 %v169_v15  ;;  %v10755_v15 = vld [vmem:[#allocation2 + $0x604] ss:$16 sps:$4 sm:$0xff]  }
  0xef   :  { %6452 = vmatpush1.bf16.msra.mxu0 %v10657_v13  ;;  %7140 = vmatpush1.bf16.msra.mxu1 %v10660_v14  ;;  %v10747_v13 = vld [vmem:[#allocation2 + $0x5e0] ss:$16 sps:$4 sm:$0xff]   ;;  %v10750_v14 = vld [vmem:[#allocation2 + $0x5e8] ss:$16 sps:$4 sm:$0xff]  }
  0xf0   :  { %6453 = vmatprep.subr.bf16.mxu0 %v10665_v16  ;;  %7141 = vmatprep.subr.bf16.mxu1 %v10668_v17  ;;  %v107_v16 = vld [vmem:[%s12711_s0 + $0x20] sm:$0xff] }
  0xf1   :  { %6483 = vmatprep.mubr.bf16.mxu0 %v172_v22  ;;  %7171 = vmatprep.mubr.bf16.mxu1 %v172_v22  ;;  %v139_v17 = vld [vmem:[%s12711_s0 + $0x120] sm:$0xff]  ;;  %v110_v22 = vld [vmem:[%s12711_s0 + $0x38] sm:$0xff] }
  0xf3   :  { %6454 = vmatpush1.bf16.msra.mxu0 %v10663_v20  ;;  %7142 = vmatpush1.bf16.msra.mxu1 %v10666_v21  ;;  %v10756_v20 = vld [vmem:[#allocation2 + $0x608] ss:$16 sps:$4 sm:$0xff]   ;;  %v171_v21 = vpack.c.bf16 %v139_v17, %v107_v16  ;;  %v10845_v17 = vld [vmem:[#allocation2 + $0x7e4] ss:$16 sps:$4 sm:$0xff]  }
  0xf4   :  { %6455 = vmatprep.subr.bf16.mxu0 %v10671_v23  ;;  %7143 = vmatprep.subr.bf16.mxu1 %v10674_v24  ;;  %v142_v23 = vld [vmem:[%s12711_s0 + $0x138] sm:$0xff]  ;;  %v10761_v24 = vld [vmem:[#allocation2 + $0x624] ss:$16 sps:$4 sm:$0xff]  }
  0xf5   :  { %v10840_v16 = vld [vmem:[#allocation2 + $0x7c8] ss:$16 sps:$4 sm:$0xff]  }
  0xf7   :  { %6456 = vmatpush1.bf16.msra.mxu0 %v10669_v25  ;;  %7144 = vmatpush1.bf16.msra.mxu1 %v10672_v26  ;;  %v10764_v25 = vld [vmem:[#allocation2 + $0x62c] ss:$16 sps:$4 sm:$0xff]   ;;  %v174_v26 = vpack.c.bf16 %v142_v23, %v110_v22  ;;  %v109_v22 = vld [vmem:[%s12711_s0 + $0x30] sm:$0xff] }
  0xf8   :  { %6457 = vmatprep.subr.bf16.mxu0 %v10677_v27  ;;  %7145 = vmatprep.subr.bf16.mxu1 %v10680_v28  ;;  %v10759_v27 = vld [vmem:[#allocation2 + $0x620] ss:$16 sps:$4 sm:$0xff]   ;;  %v10762_v28 = vld [vmem:[#allocation2 + $0x628] ss:$16 sps:$4 sm:$0xff]  }
  0xf9   :  { %v141_v23 = vld [vmem:[%s12711_s0 + $0x130] sm:$0xff] }
  0xfb   :  { %6458 = vmatpush1.bf16.msra.mxu0 %v10675_v29  ;;  %7146 = vmatpush1.bf16.msra.mxu1 %v10678_v30  ;;  %v10767_v29 = vld [vmem:[#allocation2 + $0x644] ss:$16 sps:$4 sm:$0xff]   ;;  %v10770_v30 = vld [vmem:[#allocation2 + $0x64c] ss:$16 sps:$4 sm:$0xff]  }
  0xfc   :  { %6459 = vmatprep.subr.bf16.mxu0 %v10683_v31  ;;  %7147 = vmatprep.subr.bf16.mxu1 %v10686_v32  ;;  %v10765_v31 = vld [vmem:[#allocation2 + $0x640] ss:$16 sps:$4 sm:$0xff]   ;;  %v10768_v32 = vld [vmem:[#allocation2 + $0x648] ss:$16 sps:$4 sm:$0xff]  }
  0xff   :  { %6460 = vmatpush1.bf16.msra.mxu0 %v10681_v33  ;;  %7148 = vmatpush1.bf16.msra.mxu1 %v10684_v34  ;;  %v10773_v33 = vld [vmem:[#allocation2 + $0x664] ss:$16 sps:$4 sm:$0xff]   ;;  %v10776_v34 = vld [vmem:[#allocation2 + $0x66c] ss:$16 sps:$4 sm:$0xff]  }
 0x100   :  { %6461 = vmatprep.subr.bf16.mxu0 %v10689_v35  ;;  %7149 = vmatprep.subr.bf16.mxu1 %v10692_v36  ;;  %v10771_v35 = vld [vmem:[#allocation2 + $0x660] ss:$16 sps:$4 sm:$0xff]   ;;  %v10774_v36 = vld [vmem:[#allocation2 + $0x668] ss:$16 sps:$4 sm:$0xff]  }
 0x103   :  { %6462 = vmatpush1.bf16.msra.mxu0 %v10687_v37  ;;  %7150 = vmatpush1.bf16.msra.mxu1 %v10690_v38  ;;  %v10779_v37 = vld [vmem:[#allocation2 + $0x684] ss:$16 sps:$4 sm:$0xff]   ;;  %v10782_v38 = vld [vmem:[#allocation2 + $0x68c] ss:$16 sps:$4 sm:$0xff]  }
 0x104   :  { %6463 = vmatprep.subr.bf16.mxu0 %v10695_v39  ;;  %7151 = vmatprep.subr.bf16.mxu1 %v10698_v40  ;;  %v10777_v39 = vld [vmem:[#allocation2 + $0x680] ss:$16 sps:$4 sm:$0xff]   ;;  %v10780_v40 = vld [vmem:[#allocation2 + $0x688] ss:$16 sps:$4 sm:$0xff]  }
 0x107   :  { %6464 = vmatpush1.bf16.msra.mxu0 %v10693_v41  ;;  %7152 = vmatpush1.bf16.msra.mxu1 %v10696_v42  ;;  %v10785_v41 = vld [vmem:[#allocation2 + $0x6a4] ss:$16 sps:$4 sm:$0xff]   ;;  %v10788_v42 = vld [vmem:[#allocation2 + $0x6ac] ss:$16 sps:$4 sm:$0xff]  }
 0x108   :  { %6465 = vmatprep.subr.bf16.mxu0 %v10701_v43  ;;  %7153 = vmatprep.subr.bf16.mxu1 %v10704_v44  ;;  %v10783_v43 = vld [vmem:[#allocation2 + $0x6a0] ss:$16 sps:$4 sm:$0xff]   ;;  %v10786_v44 = vld [vmem:[#allocation2 + $0x6a8] ss:$16 sps:$4 sm:$0xff]  }
 0x10b   :  { %6466 = vmatpush1.bf16.msra.mxu0 %v10699_v45  ;;  %7154 = vmatpush1.bf16.msra.mxu1 %v10702_v46  ;;  %v10791_v45 = vld [vmem:[#allocation2 + $0x6c4] ss:$16 sps:$4 sm:$0xff]   ;;  %v10794_v46 = vld [vmem:[#allocation2 + $0x6cc] ss:$16 sps:$4 sm:$0xff]  }
 0x10c   :  { %6467 = vmatprep.subr.bf16.mxu0 %v10707_v47  ;;  %7155 = vmatprep.subr.bf16.mxu1 %v10710_v48  ;;  %v10789_v47 = vld [vmem:[#allocation2 + $0x6c0] ss:$16 sps:$4 sm:$0xff]   ;;  %v10792_v48 = vld [vmem:[#allocation2 + $0x6c8] ss:$16 sps:$4 sm:$0xff]  }
 0x10f   :  { %6468 = vmatpush1.bf16.msra.mxu0 %v10705_v49  ;;  %7156 = vmatpush1.bf16.msra.mxu1 %v10708_v50  ;;  %v10797_v49 = vld [vmem:[#allocation2 + $0x6e4] ss:$16 sps:$4 sm:$0xff]   ;;  %v10800_v50 = vld [vmem:[#allocation2 + $0x6ec] ss:$16 sps:$4 sm:$0xff]  }
 0x110   :  { %6469 = vmatprep.subr.bf16.mxu0 %v10713_v51  ;;  %7157 = vmatprep.subr.bf16.mxu1 %v10716_v52  ;;  %v10795_v51 = vld [vmem:[#allocation2 + $0x6e0] ss:$16 sps:$4 sm:$0xff]   ;;  %v10798_v52 = vld [vmem:[#allocation2 + $0x6e8] ss:$16 sps:$4 sm:$0xff]  }
 0x113   :  { %6470 = vmatpush1.bf16.msra.mxu0 %v10711_v53  ;;  %7158 = vmatpush1.bf16.msra.mxu1 %v10714_v54  ;;  %v10803_v53 = vld [vmem:[#allocation2 + $0x704] ss:$16 sps:$4 sm:$0xff]   ;;  %v10806_v54 = vld [vmem:[#allocation2 + $0x70c] ss:$16 sps:$4 sm:$0xff]  }
 0x114   :  { %6471 = vmatprep.subr.bf16.mxu0 %v10719_v55  ;;  %7159 = vmatprep.subr.bf16.mxu1 %v10722_v56  ;;  %v10801_v55 = vld [vmem:[#allocation2 + $0x700] ss:$16 sps:$4 sm:$0xff]   ;;  %v10804_v56 = vld [vmem:[#allocation2 + $0x708] ss:$16 sps:$4 sm:$0xff]  }
 0x117   :  { %6472 = vmatpush1.bf16.msra.mxu0 %v10717_v57  ;;  %7160 = vmatpush1.bf16.msra.mxu1 %v10720_v58  ;;  %v10809_v57 = vld [vmem:[#allocation2 + $0x724] ss:$16 sps:$4 sm:$0xff]   ;;  %v10812_v58 = vld [vmem:[#allocation2 + $0x72c] ss:$16 sps:$4 sm:$0xff]  }
 0x118   :  { %6473 = vmatprep.subr.bf16.mxu0 %v10725_v59  ;;  %7161 = vmatprep.subr.bf16.mxu1 %v10728_v60  ;;  %v10807_v59 = vld [vmem:[#allocation2 + $0x720] ss:$16 sps:$4 sm:$0xff]   ;;  %v10810_v60 = vld [vmem:[#allocation2 + $0x728] ss:$16 sps:$4 sm:$0xff]  }
 0x11b   :  { %6474 = vmatpush1.bf16.msra.mxu0 %v10723_v61  ;;  %7162 = vmatpush1.bf16.msra.mxu1 %v10726_v62  ;;  %v10815_v61 = vld [vmem:[#allocation2 + $0x744] ss:$16 sps:$4 sm:$0xff]   ;;  %v10818_v62 = vld [vmem:[#allocation2 + $0x74c] ss:$16 sps:$4 sm:$0xff]  }
 0x11c   :  { %6475 = vmatprep.subr.bf16.mxu0 %v10731_v63  ;;  %7163 = vmatprep.subr.bf16.mxu1 %v10734_v0  ;;  %v10813_v63 = vld [vmem:[#allocation2 + $0x740] ss:$16 sps:$4 sm:$0xff]   ;;  %v10816_v0 = vld [vmem:[#allocation2 + $0x748] ss:$16 sps:$4 sm:$0xff]  }
 0x11f   :  { %6476 = vmatpush1.bf16.msra.mxu0 %v10729_v1  ;;  %7164 = vmatpush1.bf16.msra.mxu1 %v10732_v2  ;;  %v10821_v1 = vld [vmem:[#allocation2 + $0x764] ss:$16 sps:$4 sm:$0xff]   ;;  %v10824_v2 = vld [vmem:[#allocation2 + $0x76c] ss:$16 sps:$4 sm:$0xff]  }
 0x120   :  { %6477 = vmatprep.subr.bf16.mxu0 %v10737_v3  ;;  %7165 = vmatprep.subr.bf16.mxu1 %v10740_v4  ;;  %v10819_v3 = vld [vmem:[#allocation2 + $0x760] ss:$16 sps:$4 sm:$0xff]   ;;  %v10822_v4 = vld [vmem:[#allocation2 + $0x768] ss:$16 sps:$4 sm:$0xff]  }
 0x123   :  { %6478 = vmatpush1.bf16.msra.mxu0 %v10735_v5  ;;  %7166 = vmatpush1.bf16.msra.mxu1 %v10738_v6  ;;  %v10827_v5 = vld [vmem:[#allocation2 + $0x784] ss:$16 sps:$4 sm:$0xff]   ;;  %v10830_v6 = vld [vmem:[#allocation2 + $0x78c] ss:$16 sps:$4 sm:$0xff]  }
 0x124   :  { %6479 = vmatprep.subr.bf16.mxu0 %v10743_v7  ;;  %7167 = vmatprep.subr.bf16.mxu1 %v10746_v8  ;;  %v10825_v7 = vld [vmem:[#allocation2 + $0x780] ss:$16 sps:$4 sm:$0xff]   ;;  %v10828_v8 = vld [vmem:[#allocation2 + $0x788] ss:$16 sps:$4 sm:$0xff]  }
 0x127   :  { %6480 = vmatpush1.bf16.msra.mxu0 %v10741_v9  ;;  %7168 = vmatpush1.bf16.msra.mxu1 %v10744_v10  ;;  %v10833_v9 = vld [vmem:[#allocation2 + $0x7a4] ss:$16 sps:$4 sm:$0xff]   ;;  %v10836_v10 = vld [vmem:[#allocation2 + $0x7ac] ss:$16 sps:$4 sm:$0xff]  }
 0x128   :  { %6481 = vmatprep.subr.bf16.mxu0 %v10749_v11  ;;  %7169 = vmatprep.subr.bf16.mxu1 %v10752_v12  ;;  %v10831_v11 = vld [vmem:[#allocation2 + $0x7a0] ss:$16 sps:$4 sm:$0xff]   ;;  %v10834_v12 = vld [vmem:[#allocation2 + $0x7a8] ss:$16 sps:$4 sm:$0xff]  }
 0x12b   :  { %6482 = vmatpush1.bf16.msra.mxu0 %v10747_v13  ;;  %7170 = vmatpush1.bf16.msra.mxu1 %v10750_v14  ;;  %v10839_v13 = vld [vmem:[#allocation2 + $0x7c4] ss:$16 sps:$4 sm:$0xff]   ;;  %v10842_v14 = vld [vmem:[#allocation2 + $0x7cc] ss:$16 sps:$4 sm:$0xff]  }
 0x12c   :  { %6494 = vmatprep.subr.bf16.mxu0 %v10755_v15  ;;  %7182 = vmatprep.subr.bf16.mxu1 %v10758_v18  ;;  %v10837_v15 = vld [vmem:[#allocation2 + $0x7c0] ss:$16 sps:$4 sm:$0xff]   ;;  %v10848_v18 = vld [vmem:[#allocation2 + $0x7ec] ss:$16 sps:$4 sm:$0xff]  }
 0x12e   :  { %6484 = vmatmul.mubr.bf16.vlgmr.msra.gmra.mrb[0].mxu0 %v171_v21  ;;  %7172 = vmatmul.mubr.bf16.vlgmr.msra.gmra.mrb[0].mxu1 %v171_v21  ;;  %v10851_v21 = vld [vmem:[#allocation2 + $0x804] ss:$16 sps:$4 sm:$0xff]  }
 0x12f   :  { %6495 = vmatpush1.bf16.msra.mxu0 %v10753_v19  ;;  %7183 = vmatpush1.bf16.msra.mxu1 %v10756_v20  ;;  %v10843_v19 = vld [vmem:[#allocation2 + $0x7e0] ss:$16 sps:$4 sm:$0xff]   ;;  %v10846_v20 = vld [vmem:[#allocation2 + $0x7e8] ss:$16 sps:$4 sm:$0xff]  }
 0x130   :  { %6496 = vmatprep.subr.bf16.mxu0 %v10761_v24  ;;  %7184 = vmatprep.subr.bf16.mxu1 %v10764_v25  ;;  %v10854_v24 = vld [vmem:[#allocation2 + $0x80c] ss:$16 sps:$4 sm:$0xff]   ;;  %v10849_v25 = vld [vmem:[#allocation2 + $0x800] ss:$16 sps:$4 sm:$0xff]  }
 0x131   :  { %6526 = vmatprep.mubr.bf16.mxu0 %v174_v26  ;;  %7214 = vmatprep.mubr.bf16.mxu1 %v174_v26  ;;  %v10852_v26 = vld [vmem:[#allocation2 + $0x808] ss:$16 sps:$4 sm:$0xff]  }
 0x133   :  { %6497 = vmatpush1.bf16.msra.mxu0 %v10759_v27  ;;  %7185 = vmatpush1.bf16.msra.mxu1 %v10762_v28  ;;  %v173_v27 = vpack.c.bf16 %v141_v23, %v109_v22  ;;  %v112_v28 = vld [vmem:[%s12711_s0 + $0x48] sm:$0xff]  ;;  %v10941_v23 = vld [vmem:[#allocation2 + $0x9e4] ss:$16 sps:$4 sm:$0xff]  }
 0x134   :  { %6498 = vmatprep.subr.bf16.mxu0 %v10767_v29  ;;  %7186 = vmatprep.subr.bf16.mxu1 %v10770_v30  ;;  %v144_v29 = vld [vmem:[%s12711_s0 + $0x148] sm:$0xff]  ;;  %v10857_v30 = vld [vmem:[#allocation2 + $0x824] ss:$16 sps:$4 sm:$0xff]  }
 0x135   :  { %v10936_v22 = vld [vmem:[#allocation2 + $0x9c8] ss:$16 sps:$4 sm:$0xff]  }
 0x137   :  { %6499 = vmatpush1.bf16.msra.mxu0 %v10765_v31  ;;  %7187 = vmatpush1.bf16.msra.mxu1 %v10768_v32  ;;  %v10860_v31 = vld [vmem:[#allocation2 + $0x82c] ss:$16 sps:$4 sm:$0xff]   ;;  %v176_v32 = vpack.c.bf16 %v144_v29, %v112_v28  ;;  %v111_v29 = vld [vmem:[%s12711_s0 + $0x40] sm:$0xff] }
 0x138   :  { %6500 = vmatprep.subr.bf16.mxu0 %v10773_v33  ;;  %7188 = vmatprep.subr.bf16.mxu1 %v10776_v34  ;;  %v10855_v33 = vld [vmem:[#allocation2 + $0x820] ss:$16 sps:$4 sm:$0xff]   ;;  %v10858_v34 = vld [vmem:[#allocation2 + $0x828] ss:$16 sps:$4 sm:$0xff]   ;;  %v10950_v28 = vld [vmem:[#allocation2 + $0xa0c] ss:$16 sps:$4 sm:$0xff]  }
 0x13b   :  { %6501 = vmatpush1.bf16.msra.mxu0 %v10771_v35  ;;  %7189 = vmatpush1.bf16.msra.mxu1 %v10774_v36  ;;  %v10863_v35 = vld [vmem:[#allocation2 + $0x844] ss:$16 sps:$4 sm:$0xff]   ;;  %v10866_v36 = vld [vmem:[#allocation2 + $0x84c] ss:$16 sps:$4 sm:$0xff]  }
 0x13c   :  { %6502 = vmatprep.subr.bf16.mxu0 %v10779_v37  ;;  %7190 = vmatprep.subr.bf16.mxu1 %v10782_v38  ;;  %v10861_v37 = vld [vmem:[#allocation2 + $0x840] ss:$16 sps:$4 sm:$0xff]   ;;  %v10864_v38 = vld [vmem:[#allocation2 + $0x848] ss:$16 sps:$4 sm:$0xff]  }
 0x13f   :  { %6503 = vmatpush1.bf16.msra.mxu0 %v10777_v39  ;;  %7191 = vmatpush1.bf16.msra.mxu1 %v10780_v40  ;;  %v10869_v39 = vld [vmem:[#allocation2 + $0x864] ss:$16 sps:$4 sm:$0xff]   ;;  %v10872_v40 = vld [vmem:[#allocation2 + $0x86c] ss:$16 sps:$4 sm:$0xff]  }
 0x140   :  { %6504 = vmatprep.subr.bf16.mxu0 %v10785_v41  ;;  %7192 = vmatprep.subr.bf16.mxu1 %v10788_v42  ;;  %v10867_v41 = vld [vmem:[#allocation2 + $0x860] ss:$16 sps:$4 sm:$0xff]   ;;  %v10870_v42 = vld [vmem:[#allocation2 + $0x868] ss:$16 sps:$4 sm:$0xff]  }
 0x143   :  { %6505 = vmatpush1.bf16.msra.mxu0 %v10783_v43  ;;  %7193 = vmatpush1.bf16.msra.mxu1 %v10786_v44  ;;  %v10875_v43 = vld [vmem:[#allocation2 + $0x884] ss:$16 sps:$4 sm:$0xff]   ;;  %v10878_v44 = vld [vmem:[#allocation2 + $0x88c] ss:$16 sps:$4 sm:$0xff]  }
 0x144   :  { %6506 = vmatprep.subr.bf16.mxu0 %v10791_v45  ;;  %7194 = vmatprep.subr.bf16.mxu1 %v10794_v46  ;;  %v10873_v45 = vld [vmem:[#allocation2 + $0x880] ss:$16 sps:$4 sm:$0xff]   ;;  %v10876_v46 = vld [vmem:[#allocation2 + $0x888] ss:$16 sps:$4 sm:$0xff]  }
 0x147   :  { %6507 = vmatpush1.bf16.msra.mxu0 %v10789_v47  ;;  %7195 = vmatpush1.bf16.msra.mxu1 %v10792_v48  ;;  %v10881_v47 = vld [vmem:[#allocation2 + $0x8a4] ss:$16 sps:$4 sm:$0xff]   ;;  %v10884_v48 = vld [vmem:[#allocation2 + $0x8ac] ss:$16 sps:$4 sm:$0xff]  }
 0x148   :  { %6508 = vmatprep.subr.bf16.mxu0 %v10797_v49  ;;  %7196 = vmatprep.subr.bf16.mxu1 %v10800_v50  ;;  %v10879_v49 = vld [vmem:[#allocation2 + $0x8a0] ss:$16 sps:$4 sm:$0xff]   ;;  %v10882_v50 = vld [vmem:[#allocation2 + $0x8a8] ss:$16 sps:$4 sm:$0xff]  }
 0x14b   :  { %6509 = vmatpush1.bf16.msra.mxu0 %v10795_v51  ;;  %7197 = vmatpush1.bf16.msra.mxu1 %v10798_v52  ;;  %v10887_v51 = vld [vmem:[#allocation2 + $0x8c4] ss:$16 sps:$4 sm:$0xff]   ;;  %v10890_v52 = vld [vmem:[#allocation2 + $0x8cc] ss:$16 sps:$4 sm:$0xff]  }
 0x14c   :  { %6510 = vmatprep.subr.bf16.mxu0 %v10803_v53  ;;  %7198 = vmatprep.subr.bf16.mxu1 %v10806_v54  ;;  %v10885_v53 = vld [vmem:[#allocation2 + $0x8c0] ss:$16 sps:$4 sm:$0xff]   ;;  %v10888_v54 = vld [vmem:[#allocation2 + $0x8c8] ss:$16 sps:$4 sm:$0xff]  }
 0x14f   :  { %6511 = vmatpush1.bf16.msra.mxu0 %v10801_v55  ;;  %7199 = vmatpush1.bf16.msra.mxu1 %v10804_v56  ;;  %v10893_v55 = vld [vmem:[#allocation2 + $0x8e4] ss:$16 sps:$4 sm:$0xff]   ;;  %v10896_v56 = vld [vmem:[#allocation2 + $0x8ec] ss:$16 sps:$4 sm:$0xff]  }
 0x150   :  { %6512 = vmatprep.subr.bf16.mxu0 %v10809_v57  ;;  %7200 = vmatprep.subr.bf16.mxu1 %v10812_v58  ;;  %v10891_v57 = vld [vmem:[#allocation2 + $0x8e0] ss:$16 sps:$4 sm:$0xff]   ;;  %v10894_v58 = vld [vmem:[#allocation2 + $0x8e8] ss:$16 sps:$4 sm:$0xff]  }
 0x153   :  { %6513 = vmatpush1.bf16.msra.mxu0 %v10807_v59  ;;  %7201 = vmatpush1.bf16.msra.mxu1 %v10810_v60  ;;  %v10899_v59 = vld [vmem:[#allocation2 + $0x904] ss:$16 sps:$4 sm:$0xff]   ;;  %v10902_v60 = vld [vmem:[#allocation2 + $0x90c] ss:$16 sps:$4 sm:$0xff]  }
 0x154   :  { %6514 = vmatprep.subr.bf16.mxu0 %v10815_v61  ;;  %7202 = vmatprep.subr.bf16.mxu1 %v10818_v62  ;;  %v10897_v61 = vld [vmem:[#allocation2 + $0x900] ss:$16 sps:$4 sm:$0xff]   ;;  %v10900_v62 = vld [vmem:[#allocation2 + $0x908] ss:$16 sps:$4 sm:$0xff]  }
 0x157   :  { %6515 = vmatpush1.bf16.msra.mxu0 %v10813_v63  ;;  %7203 = vmatpush1.bf16.msra.mxu1 %v10816_v0  ;;  %v10905_v63 = vld [vmem:[#allocation2 + $0x924] ss:$16 sps:$4 sm:$0xff]   ;;  %v10908_v0 = vld [vmem:[#allocation2 + $0x92c] ss:$16 sps:$4 sm:$0xff]  }
 0x158   :  { %6516 = vmatprep.subr.bf16.mxu0 %v10821_v1  ;;  %7204 = vmatprep.subr.bf16.mxu1 %v10824_v2  ;;  %v10903_v1 = vld [vmem:[#allocation2 + $0x920] ss:$16 sps:$4 sm:$0xff]   ;;  %v10906_v2 = vld [vmem:[#allocation2 + $0x928] ss:$16 sps:$4 sm:$0xff]  }
 0x15b   :  { %6517 = vmatpush1.bf16.msra.mxu0 %v10819_v3  ;;  %7205 = vmatpush1.bf16.msra.mxu1 %v10822_v4  ;;  %v10911_v3 = vld [vmem:[#allocation2 + $0x944] ss:$16 sps:$4 sm:$0xff]   ;;  %v10914_v4 = vld [vmem:[#allocation2 + $0x94c] ss:$16 sps:$4 sm:$0xff]  }
 0x15c   :  { %6518 = vmatprep.subr.bf16.mxu0 %v10827_v5  ;;  %7206 = vmatprep.subr.bf16.mxu1 %v10830_v6  ;;  %v10909_v5 = vld [vmem:[#allocation2 + $0x940] ss:$16 sps:$4 sm:$0xff]   ;;  %v10912_v6 = vld [vmem:[#allocation2 + $0x948] ss:$16 sps:$4 sm:$0xff]  }
 0x15f   :  { %6519 = vmatpush1.bf16.msra.mxu0 %v10825_v7  ;;  %7207 = vmatpush1.bf16.msra.mxu1 %v10828_v8  ;;  %v10917_v7 = vld [vmem:[#allocation2 + $0x964] ss:$16 sps:$4 sm:$0xff]   ;;  %v10920_v8 = vld [vmem:[#allocation2 + $0x96c] ss:$16 sps:$4 sm:$0xff]  }
 0x160   :  { %6520 = vmatprep.subr.bf16.mxu0 %v10833_v9  ;;  %7208 = vmatprep.subr.bf16.mxu1 %v10836_v10  ;;  %v10915_v9 = vld [vmem:[#allocation2 + $0x960] ss:$16 sps:$4 sm:$0xff]   ;;  %v10918_v10 = vld [vmem:[#allocation2 + $0x968] ss:$16 sps:$4 sm:$0xff]  }
 0x163   :  { %6521 = vmatpush1.bf16.msra.mxu0 %v10831_v11  ;;  %7209 = vmatpush1.bf16.msra.mxu1 %v10834_v12  ;;  %v10923_v11 = vld [vmem:[#allocation2 + $0x984] ss:$16 sps:$4 sm:$0xff]   ;;  %v10926_v12 = vld [vmem:[#allocation2 + $0x98c] ss:$16 sps:$4 sm:$0xff]  }
 0x164   :  { %6522 = vmatprep.subr.bf16.mxu0 %v10839_v13  ;;  %7210 = vmatprep.subr.bf16.mxu1 %v10842_v14  ;;  %v10921_v13 = vld [vmem:[#allocation2 + $0x980] ss:$16 sps:$4 sm:$0xff]   ;;  %v10924_v14 = vld [vmem:[#allocation2 + $0x988] ss:$16 sps:$4 sm:$0xff]  }
 0x167   :  { %6523 = vmatpush1.bf16.msra.mxu0 %v10837_v15  ;;  %7211 = vmatpush1.bf16.msra.mxu1 %v10840_v16  ;;  %v10929_v15 = vld [vmem:[#allocation2 + $0x9a4] ss:$16 sps:$4 sm:$0xff]   ;;  %v10932_v16 = vld [vmem:[#allocation2 + $0x9ac] ss:$16 sps:$4 sm:$0xff]  }
 0x168   :  { %6524 = vmatprep.subr.bf16.mxu0 %v10845_v17  ;;  %7212 = vmatprep.subr.bf16.mxu1 %v10848_v18  ;;  %v10927_v17 = vld [vmem:[#allocation2 + $0x9a0] ss:$16 sps:$4 sm:$0xff]   ;;  %v10930_v18 = vld [vmem:[#allocation2 + $0x9a8] ss:$16 sps:$4 sm:$0xff]  }
 0x16b   :  { %6525 = vmatpush1.bf16.msra.mxu0 %v10843_v19  ;;  %7213 = vmatpush1.bf16.msra.mxu1 %v10846_v20  ;;  %v10935_v19 = vld [vmem:[#allocation2 + $0x9c4] ss:$16 sps:$4 sm:$0xff]   ;;  %v10938_v20 = vld [vmem:[#allocation2 + $0x9cc] ss:$16 sps:$4 sm:$0xff]  }
 0x16c   :  { %6537 = vmatprep.subr.bf16.mxu0 %v10851_v21  ;;  %7225 = vmatprep.subr.bf16.mxu1 %v10854_v24  ;;  %v10933_v21 = vld [vmem:[#allocation2 + $0x9c0] ss:$16 sps:$4 sm:$0xff]   ;;  %v10944_v24 = vld [vmem:[#allocation2 + $0x9ec] ss:$16 sps:$4 sm:$0xff]  }
 0x16e   :  { %6527 = vmatmul.mubr.bf16.vlgmr.msra.gmra.mrb[0].mxu0 %v173_v27  ;;  %7215 = vmatmul.mubr.bf16.vlgmr.msra.gmra.mrb[0].mxu1 %v173_v27  ;;  %v10947_v27 = vld [vmem:[#allocation2 + $0xa04] ss:$16 sps:$4 sm:$0xff]  }
 0x16f   :  { %6538 = vmatpush1.bf16.msra.mxu0 %v10849_v25  ;;  %7226 = vmatpush1.bf16.msra.mxu1 %v10852_v26  ;;  %v10939_v25 = vld [vmem:[#allocation2 + $0x9e0] ss:$16 sps:$4 sm:$0xff]   ;;  %v10942_v26 = vld [vmem:[#allocation2 + $0x9e8] ss:$16 sps:$4 sm:$0xff]  }
 0x170   :  { %6539 = vmatprep.subr.bf16.mxu0 %v10857_v30  ;;  %7227 = vmatprep.subr.bf16.mxu1 %v10860_v31  ;;  %v143_v30 = vld [vmem:[%s12711_s0 + $0x140] sm:$0xff]  ;;  %v114_v31 = vld [vmem:[%s12711_s0 + $0x58] sm:$0xff] }
 0x171   :  { %6569 = vmatprep.mubr.bf16.mxu0 %v176_v32  ;;  %7257 = vmatprep.mubr.bf16.mxu1 %v176_v32  ;;  %v146_v32 = vld [vmem:[%s12711_s0 + $0x158] sm:$0xff] }
 0x173   :  { %6540 = vmatpush1.bf16.msra.mxu0 %v10855_v33  ;;  %7228 = vmatpush1.bf16.msra.mxu1 %v10858_v34  ;;  %v175_v33 = vpack.c.bf16 %v143_v30, %v111_v29  ;;  %v10945_v34 = vld [vmem:[#allocation2 + $0xa00] ss:$16 sps:$4 sm:$0xff]   ;;  %v11037_v29 = vld [vmem:[#allocation2 + $0xbe4] ss:$16 sps:$4 sm:$0xff]   ;;  %v11040_v30 = vld [vmem:[#allocation2 + $0xbec] ss:$16 sps:$4 sm:$0xff]  }
 0x174   :  { %6541 = vmatprep.subr.bf16.mxu0 %v10863_v35  ;;  %7229 = vmatprep.subr.bf16.mxu1 %v10866_v36  ;;  %v10948_v35 = vld [vmem:[#allocation2 + $0xa08] ss:$16 sps:$4 sm:$0xff]   ;;  %v10953_v36 = vld [vmem:[#allocation2 + $0xa24] ss:$16 sps:$4 sm:$0xff]  }
 0x177   :  { %6542 = vmatpush1.bf16.msra.mxu0 %v10861_v37  ;;  %7230 = vmatpush1.bf16.msra.mxu1 %v10864_v38  ;;  %v10956_v37 = vld [vmem:[#allocation2 + $0xa2c] ss:$16 sps:$4 sm:$0xff]   ;;  %v178_v38 = vpack.c.bf16 %v146_v32, %v114_v31  ;;  %v11035_v31 = vld [vmem:[#allocation2 + $0xbe0] ss:$16 sps:$4 sm:$0xff]   ;;  %v11038_v32 = vld [vmem:[#allocation2 + $0xbe8] ss:$16 sps:$4 sm:$0xff]  }
 0x178   :  { %6543 = vmatprep.subr.bf16.mxu0 %v10869_v39  ;;  %7231 = vmatprep.subr.bf16.mxu1 %v10872_v40  ;;  %v10951_v39 = vld [vmem:[#allocation2 + $0xa20] ss:$16 sps:$4 sm:$0xff]   ;;  %v10954_v40 = vld [vmem:[#allocation2 + $0xa28] ss:$16 sps:$4 sm:$0xff]  }
 0x17b   :  { %6544 = vmatpush1.bf16.msra.mxu0 %v10867_v41  ;;  %7232 = vmatpush1.bf16.msra.mxu1 %v10870_v42  ;;  %v10959_v41 = vld [vmem:[#allocation2 + $0xa44] ss:$16 sps:$4 sm:$0xff]   ;;  %v10962_v42 = vld [vmem:[#allocation2 + $0xa4c] ss:$16 sps:$4 sm:$0xff]  }
 0x17c   :  { %6545 = vmatprep.subr.bf16.mxu0 %v10875_v43  ;;  %7233 = vmatprep.subr.bf16.mxu1 %v10878_v44  ;;  %v10957_v43 = vld [vmem:[#allocation2 + $0xa40] ss:$16 sps:$4 sm:$0xff]   ;;  %v10960_v44 = vld [vmem:[#allocation2 + $0xa48] ss:$16 sps:$4 sm:$0xff]  }
 0x17f   :  { %6546 = vmatpush1.bf16.msra.mxu0 %v10873_v45  ;;  %7234 = vmatpush1.bf16.msra.mxu1 %v10876_v46  ;;  %v10965_v45 = vld [vmem:[#allocation2 + $0xa64] ss:$16 sps:$4 sm:$0xff]   ;;  %v10968_v46 = vld [vmem:[#allocation2 + $0xa6c] ss:$16 sps:$4 sm:$0xff]  }
 0x180   :  { %6547 = vmatprep.subr.bf16.mxu0 %v10881_v47  ;;  %7235 = vmatprep.subr.bf16.mxu1 %v10884_v48  ;;  %v10963_v47 = vld [vmem:[#allocation2 + $0xa60] ss:$16 sps:$4 sm:$0xff]   ;;  %v10966_v48 = vld [vmem:[#allocation2 + $0xa68] ss:$16 sps:$4 sm:$0xff]  }
 0x183   :  { %6548 = vmatpush1.bf16.msra.mxu0 %v10879_v49  ;;  %7236 = vmatpush1.bf16.msra.mxu1 %v10882_v50  ;;  %v10971_v49 = vld [vmem:[#allocation2 + $0xa84] ss:$16 sps:$4 sm:$0xff]   ;;  %v10974_v50 = vld [vmem:[#allocation2 + $0xa8c] ss:$16 sps:$4 sm:$0xff]  }
 0x184   :  { %6549 = vmatprep.subr.bf16.mxu0 %v10887_v51  ;;  %7237 = vmatprep.subr.bf16.mxu1 %v10890_v52  ;;  %v10969_v51 = vld [vmem:[#allocation2 + $0xa80] ss:$16 sps:$4 sm:$0xff]   ;;  %v10972_v52 = vld [vmem:[#allocation2 + $0xa88] ss:$16 sps:$4 sm:$0xff]  }
 0x187   :  { %6550 = vmatpush1.bf16.msra.mxu0 %v10885_v53  ;;  %7238 = vmatpush1.bf16.msra.mxu1 %v10888_v54  ;;  %v10977_v53 = vld [vmem:[#allocation2 + $0xaa4] ss:$16 sps:$4 sm:$0xff]   ;;  %v10980_v54 = vld [vmem:[#allocation2 + $0xaac] ss:$16 sps:$4 sm:$0xff]  }
 0x188   :  { %6551 = vmatprep.subr.bf16.mxu0 %v10893_v55  ;;  %7239 = vmatprep.subr.bf16.mxu1 %v10896_v56  ;;  %v10975_v55 = vld [vmem:[#allocation2 + $0xaa0] ss:$16 sps:$4 sm:$0xff]   ;;  %v10978_v56 = vld [vmem:[#allocation2 + $0xaa8] ss:$16 sps:$4 sm:$0xff]  }
 0x18b   :  { %6552 = vmatpush1.bf16.msra.mxu0 %v10891_v57  ;;  %7240 = vmatpush1.bf16.msra.mxu1 %v10894_v58  ;;  %v10983_v57 = vld [vmem:[#allocation2 + $0xac4] ss:$16 sps:$4 sm:$0xff]   ;;  %v10986_v58 = vld [vmem:[#allocation2 + $0xacc] ss:$16 sps:$4 sm:$0xff]  }
 0x18c   :  { %6553 = vmatprep.subr.bf16.mxu0 %v10899_v59  ;;  %7241 = vmatprep.subr.bf16.mxu1 %v10902_v60  ;;  %v10981_v59 = vld [vmem:[#allocation2 + $0xac0] ss:$16 sps:$4 sm:$0xff]   ;;  %v10984_v60 = vld [vmem:[#allocation2 + $0xac8] ss:$16 sps:$4 sm:$0xff]  }
 0x18f   :  { %6554 = vmatpush1.bf16.msra.mxu0 %v10897_v61  ;;  %7242 = vmatpush1.bf16.msra.mxu1 %v10900_v62  ;;  %v10989_v61 = vld [vmem:[#allocation2 + $0xae4] ss:$16 sps:$4 sm:$0xff]   ;;  %v10992_v62 = vld [vmem:[#allocation2 + $0xaec] ss:$16 sps:$4 sm:$0xff]  }
 0x190   :  { %6555 = vmatprep.subr.bf16.mxu0 %v10905_v63  ;;  %7243 = vmatprep.subr.bf16.mxu1 %v10908_v0  ;;  %v10987_v63 = vld [vmem:[#allocation2 + $0xae0] ss:$16 sps:$4 sm:$0xff]   ;;  %v10990_v0 = vld [vmem:[#allocation2 + $0xae8] ss:$16 sps:$4 sm:$0xff]  }
 0x193   :  { %6556 = vmatpush1.bf16.msra.mxu0 %v10903_v1  ;;  %7244 = vmatpush1.bf16.msra.mxu1 %v10906_v2  ;;  %v10995_v1 = vld [vmem:[#allocation2 + $0xb04] ss:$16 sps:$4 sm:$0xff]   ;;  %v10998_v2 = vld [vmem:[#allocation2 + $0xb0c] ss:$16 sps:$4 sm:$0xff]  }
 0x194   :  { %6557 = vmatprep.subr.bf16.mxu0 %v10911_v3  ;;  %7245 = vmatprep.subr.bf16.mxu1 %v10914_v4  ;;  %v10993_v3 = vld [vmem:[#allocation2 + $0xb00] ss:$16 sps:$4 sm:$0xff]   ;;  %v10996_v4 = vld [vmem:[#allocation2 + $0xb08] ss:$16 sps:$4 sm:$0xff]  }
 0x197   :  { %6558 = vmatpush1.bf16.msra.mxu0 %v10909_v5  ;;  %7246 = vmatpush1.bf16.msra.mxu1 %v10912_v6  ;;  %v11001_v5 = vld [vmem:[#allocation2 + $0xb24] ss:$16 sps:$4 sm:$0xff]   ;;  %v11004_v6 = vld [vmem:[#allocation2 + $0xb2c] ss:$16 sps:$4 sm:$0xff]  }
 0x198   :  { %6559 = vmatprep.subr.bf16.mxu0 %v10917_v7  ;;  %7247 = vmatprep.subr.bf16.mxu1 %v10920_v8  ;;  %v10999_v7 = vld [vmem:[#allocation2 + $0xb20] ss:$16 sps:$4 sm:$0xff]   ;;  %v11002_v8 = vld [vmem:[#allocation2 + $0xb28] ss:$16 sps:$4 sm:$0xff]  }
 0x19b   :  { %6560 = vmatpush1.bf16.msra.mxu0 %v10915_v9  ;;  %7248 = vmatpush1.bf16.msra.mxu1 %v10918_v10  ;;  %v11007_v9 = vld [vmem:[#allocation2 + $0xb44] ss:$16 sps:$4 sm:$0xff]   ;;  %v11010_v10 = vld [vmem:[#allocation2 + $0xb4c] ss:$16 sps:$4 sm:$0xff]  }
 0x19c   :  { %6561 = vmatprep.subr.bf16.mxu0 %v10923_v11  ;;  %7249 = vmatprep.subr.bf16.mxu1 %v10926_v12  ;;  %v11005_v11 = vld [vmem:[#allocation2 + $0xb40] ss:$16 sps:$4 sm:$0xff]   ;;  %v11008_v12 = vld [vmem:[#allocation2 + $0xb48] ss:$16 sps:$4 sm:$0xff]  }
 0x19f   :  { %6562 = vmatpush1.bf16.msra.mxu0 %v10921_v13  ;;  %7250 = vmatpush1.bf16.msra.mxu1 %v10924_v14  ;;  %v11013_v13 = vld [vmem:[#allocation2 + $0xb64] ss:$16 sps:$4 sm:$0xff]   ;;  %v11016_v14 = vld [vmem:[#allocation2 + $0xb6c] ss:$16 sps:$4 sm:$0xff]  }
 0x1a0   :  { %6563 = vmatprep.subr.bf16.mxu0 %v10929_v15  ;;  %7251 = vmatprep.subr.bf16.mxu1 %v10932_v16  ;;  %v11011_v15 = vld [vmem:[#allocation2 + $0xb60] ss:$16 sps:$4 sm:$0xff]   ;;  %v11014_v16 = vld [vmem:[#allocation2 + $0xb68] ss:$16 sps:$4 sm:$0xff]  }
 0x1a3   :  { %6564 = vmatpush1.bf16.msra.mxu0 %v10927_v17  ;;  %7252 = vmatpush1.bf16.msra.mxu1 %v10930_v18  ;;  %v11019_v17 = vld [vmem:[#allocation2 + $0xb84] ss:$16 sps:$4 sm:$0xff]   ;;  %v11022_v18 = vld [vmem:[#allocation2 + $0xb8c] ss:$16 sps:$4 sm:$0xff]  }
 0x1a4   :  { %6565 = vmatprep.subr.bf16.mxu0 %v10935_v19  ;;  %7253 = vmatprep.subr.bf16.mxu1 %v10938_v20  ;;  %v11017_v19 = vld [vmem:[#allocation2 + $0xb80] ss:$16 sps:$4 sm:$0xff]   ;;  %v11020_v20 = vld [vmem:[#allocation2 + $0xb88] ss:$16 sps:$4 sm:$0xff]  }
 0x1a7   :  { %6566 = vmatpush1.bf16.msra.mxu0 %v10933_v21  ;;  %7254 = vmatpush1.bf16.msra.mxu1 %v10936_v22  ;;  %v11025_v21 = vld [vmem:[#allocation2 + $0xba4] ss:$16 sps:$4 sm:$0xff]   ;;  %v11028_v22 = vld [vmem:[#allocation2 + $0xbac] ss:$16 sps:$4 sm:$0xff]  }
 0x1a8   :  { %6567 = vmatprep.subr.bf16.mxu0 %v10941_v23  ;;  %7255 = vmatprep.subr.bf16.mxu1 %v10944_v24  ;;  %v11023_v23 = vld [vmem:[#allocation2 + $0xba0] ss:$16 sps:$4 sm:$0xff]   ;;  %v11026_v24 = vld [vmem:[#allocation2 + $0xba8] ss:$16 sps:$4 sm:$0xff]  }
 0x1ab   :  { %6568 = vmatpush1.bf16.msra.mxu0 %v10939_v25  ;;  %7256 = vmatpush1.bf16.msra.mxu1 %v10942_v26  ;;  %v11031_v25 = vld [vmem:[#allocation2 + $0xbc4] ss:$16 sps:$4 sm:$0xff]   ;;  %v11034_v26 = vld [vmem:[#allocation2 + $0xbcc] ss:$16 sps:$4 sm:$0xff]  }
 0x1ac   :  { %6580 = vmatprep.subr.bf16.mxu0 %v10947_v27  ;;  %7268 = vmatprep.subr.bf16.mxu1 %v10950_v28  ;;  %v11029_v27 = vld [vmem:[#allocation2 + $0xbc0] ss:$16 sps:$4 sm:$0xff]   ;;  %v11032_v28 = vld [vmem:[#allocation2 + $0xbc8] ss:$16 sps:$4 sm:$0xff]  }
 0x1ae   :  { %6570 = vmatmul.mubr.bf16.vlgmr.msra.gmra.mrb[0].mxu0 %v175_v33  ;;  %7258 = vmatmul.mubr.bf16.vlgmr.msra.gmra.mrb[0].mxu1 %v175_v33  ;;  %v11043_v33 = vld [vmem:[#allocation2 + $0xc04] ss:$16 sps:$4 sm:$0xff]  }
 0x1af   :  { %6581 = vmatpush1.bf16.msra.mxu0 %v10945_v34  ;;  %7269 = vmatpush1.bf16.msra.mxu1 %v10948_v35  ;;  %v11046_v34 = vld [vmem:[#allocation2 + $0xc0c] ss:$16 sps:$4 sm:$0xff]   ;;  %v113_v35 = vld [vmem:[%s12711_s0 + $0x50] sm:$0xff] }
 0x1b0   :  { %6582 = vmatprep.subr.bf16.mxu0 %v10953_v36  ;;  %7270 = vmatprep.subr.bf16.mxu1 %v10956_v37  ;;  %v145_v36 = vld [vmem:[%s12711_s0 + $0x150] sm:$0xff]  ;;  %v116_v37 = vld [vmem:[%s12711_s0 + $0x68] sm:$0xff] }
 0x1b1   :  { %6612 = vmatprep.mubr.bf16.mxu0 %v178_v38  ;;  %7300 = vmatprep.mubr.bf16.mxu1 %v178_v38  ;;  %v148_v38 = vld [vmem:[%s12711_s0 + $0x168] sm:$0xff] }
 0x1b3   :  { %6583 = vmatpush1.bf16.msra.mxu0 %v10951_v39  ;;  %7271 = vmatpush1.bf16.msra.mxu1 %v10954_v40  ;;  %v177_v39 = vpack.c.bf16 %v145_v36, %v113_v35  ;;  %v11041_v40 = vld [vmem:[#allocation2 + $0xc00] ss:$16 sps:$4 sm:$0xff]   ;;  %v11133_v35 = vld [vmem:[#allocation2 + $0xde4] ss:$16 sps:$4 sm:$0xff]   ;;  %v11136_v36 = vld [vmem:[#allocation2 + $0xdec] ss:$16 sps:$4 sm:$0xff]  }
 0x1b4   :  { %6584 = vmatprep.subr.bf16.mxu0 %v10959_v41  ;;  %7272 = vmatprep.subr.bf16.mxu1 %v10962_v42  ;;  %v11044_v41 = vld [vmem:[#allocation2 + $0xc08] ss:$16 sps:$4 sm:$0xff]   ;;  %v11049_v42 = vld [vmem:[#allocation2 + $0xc24] ss:$16 sps:$4 sm:$0xff]  }
 0x1b7   :  { %6585 = vmatpush1.bf16.msra.mxu0 %v10957_v43  ;;  %7273 = vmatpush1.bf16.msra.mxu1 %v10960_v44  ;;  %v11052_v43 = vld [vmem:[#allocation2 + $0xc2c] ss:$16 sps:$4 sm:$0xff]   ;;  %v180_v44 = vpack.c.bf16 %v148_v38, %v116_v37  ;;  %v11131_v37 = vld [vmem:[#allocation2 + $0xde0] ss:$16 sps:$4 sm:$0xff]   ;;  %v11134_v38 = vld [vmem:[#allocation2 + $0xde8] ss:$16 sps:$4 sm:$0xff]  }
 0x1b8   :  { %6586 = vmatprep.subr.bf16.mxu0 %v10965_v45  ;;  %7274 = vmatprep.subr.bf16.mxu1 %v10968_v46  ;;  %v11047_v45 = vld [vmem:[#allocation2 + $0xc20] ss:$16 sps:$4 sm:$0xff]   ;;  %v11050_v46 = vld [vmem:[#allocation2 + $0xc28] ss:$16 sps:$4 sm:$0xff]  }
 0x1bb   :  { %6587 = vmatpush1.bf16.msra.mxu0 %v10963_v47  ;;  %7275 = vmatpush1.bf16.msra.mxu1 %v10966_v48  ;;  %v11055_v47 = vld [vmem:[#allocation2 + $0xc44] ss:$16 sps:$4 sm:$0xff]   ;;  %v11058_v48 = vld [vmem:[#allocation2 + $0xc4c] ss:$16 sps:$4 sm:$0xff]  }
 0x1bc   :  { %6588 = vmatprep.subr.bf16.mxu0 %v10971_v49  ;;  %7276 = vmatprep.subr.bf16.mxu1 %v10974_v50  ;;  %v11053_v49 = vld [vmem:[#allocation2 + $0xc40] ss:$16 sps:$4 sm:$0xff]   ;;  %v11056_v50 = vld [vmem:[#allocation2 + $0xc48] ss:$16 sps:$4 sm:$0xff]  }
 0x1bf   :  { %6589 = vmatpush1.bf16.msra.mxu0 %v10969_v51  ;;  %7277 = vmatpush1.bf16.msra.mxu1 %v10972_v52  ;;  %v11061_v51 = vld [vmem:[#allocation2 + $0xc64] ss:$16 sps:$4 sm:$0xff]   ;;  %v11064_v52 = vld [vmem:[#allocation2 + $0xc6c] ss:$16 sps:$4 sm:$0xff]  }
 0x1c0   :  { %6590 = vmatprep.subr.bf16.mxu0 %v10977_v53  ;;  %7278 = vmatprep.subr.bf16.mxu1 %v10980_v54  ;;  %v11059_v53 = vld [vmem:[#allocation2 + $0xc60] ss:$16 sps:$4 sm:$0xff]   ;;  %v11062_v54 = vld [vmem:[#allocation2 + $0xc68] ss:$16 sps:$4 sm:$0xff]  }
 0x1c3   :  { %6591 = vmatpush1.bf16.msra.mxu0 %v10975_v55  ;;  %7279 = vmatpush1.bf16.msra.mxu1 %v10978_v56  ;;  %v11067_v55 = vld [vmem:[#allocation2 + $0xc84] ss:$16 sps:$4 sm:$0xff]   ;;  %v11070_v56 = vld [vmem:[#allocation2 + $0xc8c] ss:$16 sps:$4 sm:$0xff]  }
 0x1c4   :  { %6592 = vmatprep.subr.bf16.mxu0 %v10983_v57  ;;  %7280 = vmatprep.subr.bf16.mxu1 %v10986_v58  ;;  %v11065_v57 = vld [vmem:[#allocation2 + $0xc80] ss:$16 sps:$4 sm:$0xff]   ;;  %v11068_v58 = vld [vmem:[#allocation2 + $0xc88] ss:$16 sps:$4 sm:$0xff]  }
 0x1c7   :  { %6593 = vmatpush1.bf16.msra.mxu0 %v10981_v59  ;;  %7281 = vmatpush1.bf16.msra.mxu1 %v10984_v60  ;;  %v11073_v59 = vld [vmem:[#allocation2 + $0xca4] ss:$16 sps:$4 sm:$0xff]   ;;  %v11076_v60 = vld [vmem:[#allocation2 + $0xcac] ss:$16 sps:$4 sm:$0xff]  }
 0x1c8   :  { %6594 = vmatprep.subr.bf16.mxu0 %v10989_v61  ;;  %7282 = vmatprep.subr.bf16.mxu1 %v10992_v62  ;;  %v11071_v61 = vld [vmem:[#allocation2 + $0xca0] ss:$16 sps:$4 sm:$0xff]   ;;  %v11074_v62 = vld [vmem:[#allocation2 + $0xca8] ss:$16 sps:$4 sm:$0xff]  }
 0x1cb   :  { %6595 = vmatpush1.bf16.msra.mxu0 %v10987_v63  ;;  %7283 = vmatpush1.bf16.msra.mxu1 %v10990_v0  ;;  %v11079_v63 = vld [vmem:[#allocation2 + $0xcc4] ss:$16 sps:$4 sm:$0xff]   ;;  %v11082_v0 = vld [vmem:[#allocation2 + $0xccc] ss:$16 sps:$4 sm:$0xff]  }
 0x1cc   :  { %6596 = vmatprep.subr.bf16.mxu0 %v10995_v1  ;;  %7284 = vmatprep.subr.bf16.mxu1 %v10998_v2  ;;  %v11077_v1 = vld [vmem:[#allocation2 + $0xcc0] ss:$16 sps:$4 sm:$0xff]   ;;  %v11080_v2 = vld [vmem:[#allocation2 + $0xcc8] ss:$16 sps:$4 sm:$0xff]  }
 0x1cf   :  { %6597 = vmatpush1.bf16.msra.mxu0 %v10993_v3  ;;  %7285 = vmatpush1.bf16.msra.mxu1 %v10996_v4  ;;  %v11085_v3 = vld [vmem:[#allocation2 + $0xce4] ss:$16 sps:$4 sm:$0xff]   ;;  %v11088_v4 = vld [vmem:[#allocation2 + $0xcec] ss:$16 sps:$4 sm:$0xff]  }
 0x1d0   :  { %6598 = vmatprep.subr.bf16.mxu0 %v11001_v5  ;;  %7286 = vmatprep.subr.bf16.mxu1 %v11004_v6  ;;  %v11083_v5 = vld [vmem:[#allocation2 + $0xce0] ss:$16 sps:$4 sm:$0xff]   ;;  %v11086_v6 = vld [vmem:[#allocation2 + $0xce8] ss:$16 sps:$4 sm:$0xff]  }
 0x1d3   :  { %6599 = vmatpush1.bf16.msra.mxu0 %v10999_v7  ;;  %7287 = vmatpush1.bf16.msra.mxu1 %v11002_v8  ;;  %v11091_v7 = vld [vmem:[#allocation2 + $0xd04] ss:$16 sps:$4 sm:$0xff]   ;;  %v11094_v8 = vld [vmem:[#allocation2 + $0xd0c] ss:$16 sps:$4 sm:$0xff]  }
 0x1d4   :  { %6600 = vmatprep.subr.bf16.mxu0 %v11007_v9  ;;  %7288 = vmatprep.subr.bf16.mxu1 %v11010_v10  ;;  %v11089_v9 = vld [vmem:[#allocation2 + $0xd00] ss:$16 sps:$4 sm:$0xff]   ;;  %v11092_v10 = vld [vmem:[#allocation2 + $0xd08] ss:$16 sps:$4 sm:$0xff]  }
 0x1d7   :  { %6601 = vmatpush1.bf16.msra.mxu0 %v11005_v11  ;;  %7289 = vmatpush1.bf16.msra.mxu1 %v11008_v12  ;;  %v11097_v11 = vld [vmem:[#allocation2 + $0xd24] ss:$16 sps:$4 sm:$0xff]   ;;  %v11100_v12 = vld [vmem:[#allocation2 + $0xd2c] ss:$16 sps:$4 sm:$0xff]  }
 0x1d8   :  { %6602 = vmatprep.subr.bf16.mxu0 %v11013_v13  ;;  %7290 = vmatprep.subr.bf16.mxu1 %v11016_v14  ;;  %v11095_v13 = vld [vmem:[#allocation2 + $0xd20] ss:$16 sps:$4 sm:$0xff]   ;;  %v11098_v14 = vld [vmem:[#allocation2 + $0xd28] ss:$16 sps:$4 sm:$0xff]  }
 0x1db   :  { %6603 = vmatpush1.bf16.msra.mxu0 %v11011_v15  ;;  %7291 = vmatpush1.bf16.msra.mxu1 %v11014_v16  ;;  %v11103_v15 = vld [vmem:[#allocation2 + $0xd44] ss:$16 sps:$4 sm:$0xff]   ;;  %v11106_v16 = vld [vmem:[#allocation2 + $0xd4c] ss:$16 sps:$4 sm:$0xff]  }
 0x1dc   :  { %6604 = vmatprep.subr.bf16.mxu0 %v11019_v17  ;;  %7292 = vmatprep.subr.bf16.mxu1 %v11022_v18  ;;  %v11101_v17 = vld [vmem:[#allocation2 + $0xd40] ss:$16 sps:$4 sm:$0xff]   ;;  %v11104_v18 = vld [vmem:[#allocation2 + $0xd48] ss:$16 sps:$4 sm:$0xff]  }
 0x1df   :  { %6605 = vmatpush1.bf16.msra.mxu0 %v11017_v19  ;;  %7293 = vmatpush1.bf16.msra.mxu1 %v11020_v20  ;;  %v11109_v19 = vld [vmem:[#allocation2 + $0xd64] ss:$16 sps:$4 sm:$0xff]   ;;  %v11112_v20 = vld [vmem:[#allocation2 + $0xd6c] ss:$16 sps:$4 sm:$0xff]  }
 0x1e0   :  { %6606 = vmatprep.subr.bf16.mxu0 %v11025_v21  ;;  %7294 = vmatprep.subr.bf16.mxu1 %v11028_v22  ;;  %v11107_v21 = vld [vmem:[#allocation2 + $0xd60] ss:$16 sps:$4 sm:$0xff]   ;;  %v11110_v22 = vld [vmem:[#allocation2 + $0xd68] ss:$16 sps:$4 sm:$0xff]  }
 0x1e3   :  { %6607 = vmatpush1.bf16.msra.mxu0 %v11023_v23  ;;  %7295 = vmatpush1.bf16.msra.mxu1 %v11026_v24  ;;  %v11115_v23 = vld [vmem:[#allocation2 + $0xd84] ss:$16 sps:$4 sm:$0xff]   ;;  %v11118_v24 = vld [vmem:[#allocation2 + $0xd8c] ss:$16 sps:$4 sm:$0xff]  }
 0x1e4   :  { %6608 = vmatprep.subr.bf16.mxu0 %v11031_v25  ;;  %7296 = vmatprep.subr.bf16.mxu1 %v11034_v26  ;;  %v11113_v25 = vld [vmem:[#allocation2 + $0xd80] ss:$16 sps:$4 sm:$0xff]   ;;  %v11116_v26 = vld [vmem:[#allocation2 + $0xd88] ss:$16 sps:$4 sm:$0xff]  }
 0x1e7   :  { %6609 = vmatpush1.bf16.msra.mxu0 %v11029_v27  ;;  %7297 = vmatpush1.bf16.msra.mxu1 %v11032_v28  ;;  %v11121_v27 = vld [vmem:[#allocation2 + $0xda4] ss:$16 sps:$4 sm:$0xff]   ;;  %v11124_v28 = vld [vmem:[#allocation2 + $0xdac] ss:$16 sps:$4 sm:$0xff]  }
 0x1e8   :  { %6610 = vmatprep.subr.bf16.mxu0 %v11037_v29  ;;  %7298 = vmatprep.subr.bf16.mxu1 %v11040_v30  ;;  %v11119_v29 = vld [vmem:[#allocation2 + $0xda0] ss:$16 sps:$4 sm:$0xff]   ;;  %v11122_v30 = vld [vmem:[#allocation2 + $0xda8] ss:$16 sps:$4 sm:$0xff]  }
 0x1eb   :  { %6611 = vmatpush1.bf16.msra.mxu0 %v11035_v31  ;;  %7299 = vmatpush1.bf16.msra.mxu1 %v11038_v32  ;;  %v11127_v31 = vld [vmem:[#allocation2 + $0xdc4] ss:$16 sps:$4 sm:$0xff]   ;;  %v11130_v32 = vld [vmem:[#allocation2 + $0xdcc] ss:$16 sps:$4 sm:$0xff]  }
 0x1ec   :  { %6623 = vmatprep.subr.bf16.mxu0 %v11043_v33  ;;  %7311 = vmatprep.subr.bf16.mxu1 %v11046_v34  ;;  %v11125_v33 = vld [vmem:[#allocation2 + $0xdc0] ss:$16 sps:$4 sm:$0xff]   ;;  %v11128_v34 = vld [vmem:[#allocation2 + $0xdc8] ss:$16 sps:$4 sm:$0xff]  }
 0x1ee   :  { %6613 = vmatmul.mubr.bf16.vlgmr.msra.gmra.mrb[0].mxu0 %v177_v39  ;;  %7301 = vmatmul.mubr.bf16.vlgmr.msra.gmra.mrb[0].mxu1 %v177_v39  ;;  %v11139_v39 = vld [vmem:[#allocation2 + $0xe04] ss:$16 sps:$4 sm:$0xff]  }
 0x1ef   :  { %6624 = vmatpush1.bf16.msra.mxu0 %v11041_v40  ;;  %7312 = vmatpush1.bf16.msra.mxu1 %v11044_v41  ;;  %v11142_v40 = vld [vmem:[#allocation2 + $0xe0c] ss:$16 sps:$4 sm:$0xff]   ;;  %v115_v41 = vld [vmem:[%s12711_s0 + $0x60] sm:$0xff] }
 0x1f0   :  { %6625 = vmatprep.subr.bf16.mxu0 %v11049_v42  ;;  %7313 = vmatprep.subr.bf16.mxu1 %v11052_v43  ;;  %v147_v42 = vld [vmem:[%s12711_s0 + $0x160] sm:$0xff]  ;;  %v118_v43 = vld [vmem:[%s12711_s0 + $0x78] sm:$0xff] }
 0x1f1   :  { %6655 = vmatprep.mubr.bf16.mxu0 %v180_v44  ;;  %7343 = vmatprep.mubr.bf16.mxu1 %v180_v44  ;;  %v150_v44 = vld [vmem:[%s12711_s0 + $0x178] sm:$0xff] }
 0x1f3   :  { %6626 = vmatpush1.bf16.msra.mxu0 %v11047_v45  ;;  %7314 = vmatpush1.bf16.msra.mxu1 %v11050_v46  ;;  %v179_v45 = vpack.c.bf16 %v147_v42, %v115_v41  ;;  %v11137_v46 = vld [vmem:[#allocation2 + $0xe00] ss:$16 sps:$4 sm:$0xff]   ;;  %v11229_v41 = vld [vmem:[#allocation2 + $0xfe4] ss:$16 sps:$4 sm:$0xff]   ;;  %v11232_v42 = vld [vmem:[#allocation2 + $0xfec] ss:$16 sps:$4 sm:$0xff]  }
 0x1f4   :  { %6627 = vmatprep.subr.bf16.mxu0 %v11055_v47  ;;  %7315 = vmatprep.subr.bf16.mxu1 %v11058_v48  ;;  %v11140_v47 = vld [vmem:[#allocation2 + $0xe08] ss:$16 sps:$4 sm:$0xff]   ;;  %v11145_v48 = vld [vmem:[#allocation2 + $0xe24] ss:$16 sps:$4 sm:$0xff]  }
 0x1f7   :  { %6628 = vmatpush1.bf16.msra.mxu0 %v11053_v49  ;;  %7316 = vmatpush1.bf16.msra.mxu1 %v11056_v50  ;;  %v11148_v49 = vld [vmem:[#allocation2 + $0xe2c] ss:$16 sps:$4 sm:$0xff]   ;;  %v182_v50 = vpack.c.bf16 %v150_v44, %v118_v43  ;;  %v11227_v43 = vld [vmem:[#allocation2 + $0xfe0] ss:$16 sps:$4 sm:$0xff]   ;;  %v11230_v44 = vld [vmem:[#allocation2 + $0xfe8] ss:$16 sps:$4 sm:$0xff]  }
 0x1f8   :  { %6629 = vmatprep.subr.bf16.mxu0 %v11061_v51  ;;  %7317 = vmatprep.subr.bf16.mxu1 %v11064_v52  ;;  %v11143_v51 = vld [vmem:[#allocation2 + $0xe20] ss:$16 sps:$4 sm:$0xff]   ;;  %v11146_v52 = vld [vmem:[#allocation2 + $0xe28] ss:$16 sps:$4 sm:$0xff]  }
 0x1fb   :  { %6630 = vmatpush1.bf16.msra.mxu0 %v11059_v53  ;;  %7318 = vmatpush1.bf16.msra.mxu1 %v11062_v54  ;;  %v11151_v53 = vld [vmem:[#allocation2 + $0xe44] ss:$16 sps:$4 sm:$0xff]   ;;  %v11154_v54 = vld [vmem:[#allocation2 + $0xe4c] ss:$16 sps:$4 sm:$0xff]  }
 0x1fc   :  { %6631 = vmatprep.subr.bf16.mxu0 %v11067_v55  ;;  %7319 = vmatprep.subr.bf16.mxu1 %v11070_v56  ;;  %v11149_v55 = vld [vmem:[#allocation2 + $0xe40] ss:$16 sps:$4 sm:$0xff]   ;;  %v11152_v56 = vld [vmem:[#allocation2 + $0xe48] ss:$16 sps:$4 sm:$0xff]  }
 0x1ff   :  { %6632 = vmatpush1.bf16.msra.mxu0 %v11065_v57  ;;  %7320 = vmatpush1.bf16.msra.mxu1 %v11068_v58  ;;  %v11157_v57 = vld [vmem:[#allocation2 + $0xe64] ss:$16 sps:$4 sm:$0xff]   ;;  %v11160_v58 = vld [vmem:[#allocation2 + $0xe6c] ss:$16 sps:$4 sm:$0xff]  }
 0x200   :  { %6633 = vmatprep.subr.bf16.mxu0 %v11073_v59  ;;  %7321 = vmatprep.subr.bf16.mxu1 %v11076_v60  ;;  %v11155_v59 = vld [vmem:[#allocation2 + $0xe60] ss:$16 sps:$4 sm:$0xff]   ;;  %v11158_v60 = vld [vmem:[#allocation2 + $0xe68] ss:$16 sps:$4 sm:$0xff]  }
 0x203   :  { %6634 = vmatpush1.bf16.msra.mxu0 %v11071_v61  ;;  %7322 = vmatpush1.bf16.msra.mxu1 %v11074_v62  ;;  %v11163_v61 = vld [vmem:[#allocation2 + $0xe84] ss:$16 sps:$4 sm:$0xff]   ;;  %v11166_v62 = vld [vmem:[#allocation2 + $0xe8c] ss:$16 sps:$4 sm:$0xff]  }
 0x204   :  { %6635 = vmatprep.subr.bf16.mxu0 %v11079_v63  ;;  %7323 = vmatprep.subr.bf16.mxu1 %v11082_v0  ;;  %v11161_v63 = vld [vmem:[#allocation2 + $0xe80] ss:$16 sps:$4 sm:$0xff]   ;;  %v11164_v0 = vld [vmem:[#allocation2 + $0xe88] ss:$16 sps:$4 sm:$0xff]  }
 0x207   :  { %6636 = vmatpush1.bf16.msra.mxu0 %v11077_v1  ;;  %7324 = vmatpush1.bf16.msra.mxu1 %v11080_v2  ;;  %v11169_v1 = vld [vmem:[#allocation2 + $0xea4] ss:$16 sps:$4 sm:$0xff]   ;;  %v11172_v2 = vld [vmem:[#allocation2 + $0xeac] ss:$16 sps:$4 sm:$0xff]  }
 0x208   :  { %6637 = vmatprep.subr.bf16.mxu0 %v11085_v3  ;;  %7325 = vmatprep.subr.bf16.mxu1 %v11088_v4  ;;  %v11167_v3 = vld [vmem:[#allocation2 + $0xea0] ss:$16 sps:$4 sm:$0xff]   ;;  %v11170_v4 = vld [vmem:[#allocation2 + $0xea8] ss:$16 sps:$4 sm:$0xff]  }
 0x20b   :  { %6638 = vmatpush1.bf16.msra.mxu0 %v11083_v5  ;;  %7326 = vmatpush1.bf16.msra.mxu1 %v11086_v6  ;;  %v11175_v5 = vld [vmem:[#allocation2 + $0xec4] ss:$16 sps:$4 sm:$0xff]   ;;  %v11178_v6 = vld [vmem:[#allocation2 + $0xecc] ss:$16 sps:$4 sm:$0xff]  }
 0x20c   :  { %6639 = vmatprep.subr.bf16.mxu0 %v11091_v7  ;;  %7327 = vmatprep.subr.bf16.mxu1 %v11094_v8  ;;  %v11173_v7 = vld [vmem:[#allocation2 + $0xec0] ss:$16 sps:$4 sm:$0xff]   ;;  %v11176_v8 = vld [vmem:[#allocation2 + $0xec8] ss:$16 sps:$4 sm:$0xff]  }
 0x20f   :  { %6640 = vmatpush1.bf16.msra.mxu0 %v11089_v9  ;;  %7328 = vmatpush1.bf16.msra.mxu1 %v11092_v10  ;;  %v11181_v9 = vld [vmem:[#allocation2 + $0xee4] ss:$16 sps:$4 sm:$0xff]   ;;  %v11184_v10 = vld [vmem:[#allocation2 + $0xeec] ss:$16 sps:$4 sm:$0xff]  }
 0x210   :  { %6641 = vmatprep.subr.bf16.mxu0 %v11097_v11  ;;  %7329 = vmatprep.subr.bf16.mxu1 %v11100_v12  ;;  %v11179_v11 = vld [vmem:[#allocation2 + $0xee0] ss:$16 sps:$4 sm:$0xff]   ;;  %v11182_v12 = vld [vmem:[#allocation2 + $0xee8] ss:$16 sps:$4 sm:$0xff]  }
 0x213   :  { %6642 = vmatpush1.bf16.msra.mxu0 %v11095_v13  ;;  %7330 = vmatpush1.bf16.msra.mxu1 %v11098_v14  ;;  %v11187_v13 = vld [vmem:[#allocation2 + $0xf04] ss:$16 sps:$4 sm:$0xff]   ;;  %v11190_v14 = vld [vmem:[#allocation2 + $0xf0c] ss:$16 sps:$4 sm:$0xff]  }
 0x214   :  { %6643 = vmatprep.subr.bf16.mxu0 %v11103_v15  ;;  %7331 = vmatprep.subr.bf16.mxu1 %v11106_v16  ;;  %v11185_v15 = vld [vmem:[#allocation2 + $0xf00] ss:$16 sps:$4 sm:$0xff]   ;;  %v11188_v16 = vld [vmem:[#allocation2 + $0xf08] ss:$16 sps:$4 sm:$0xff]  }
 0x217   :  { %6644 = vmatpush1.bf16.msra.mxu0 %v11101_v17  ;;  %7332 = vmatpush1.bf16.msra.mxu1 %v11104_v18  ;;  %v11193_v17 = vld [vmem:[#allocation2 + $0xf24] ss:$16 sps:$4 sm:$0xff]   ;;  %v11196_v18 = vld [vmem:[#allocation2 + $0xf2c] ss:$16 sps:$4 sm:$0xff]  }
 0x218   :  { %6645 = vmatprep.subr.bf16.mxu0 %v11109_v19  ;;  %7333 = vmatprep.subr.bf16.mxu1 %v11112_v20  ;;  %v11191_v19 = vld [vmem:[#allocation2 + $0xf20] ss:$16 sps:$4 sm:$0xff]   ;;  %v11194_v20 = vld [vmem:[#allocation2 + $0xf28] ss:$16 sps:$4 sm:$0xff]  }
 0x21b   :  { %6646 = vmatpush1.bf16.msra.mxu0 %v11107_v21  ;;  %7334 = vmatpush1.bf16.msra.mxu1 %v11110_v22  ;;  %v11199_v21 = vld [vmem:[#allocation2 + $0xf44] ss:$16 sps:$4 sm:$0xff]   ;;  %v11202_v22 = vld [vmem:[#allocation2 + $0xf4c] ss:$16 sps:$4 sm:$0xff]  }
 0x21c   :  { %6647 = vmatprep.subr.bf16.mxu0 %v11115_v23  ;;  %7335 = vmatprep.subr.bf16.mxu1 %v11118_v24  ;;  %v11197_v23 = vld [vmem:[#allocation2 + $0xf40] ss:$16 sps:$4 sm:$0xff]   ;;  %v11200_v24 = vld [vmem:[#allocation2 + $0xf48] ss:$16 sps:$4 sm:$0xff]  }
 0x21f   :  { %6648 = vmatpush1.bf16.msra.mxu0 %v11113_v25  ;;  %7336 = vmatpush1.bf16.msra.mxu1 %v11116_v26  ;;  %v11205_v25 = vld [vmem:[#allocation2 + $0xf64] ss:$16 sps:$4 sm:$0xff]   ;;  %v11208_v26 = vld [vmem:[#allocation2 + $0xf6c] ss:$16 sps:$4 sm:$0xff]  }
 0x220   :  { %6649 = vmatprep.subr.bf16.mxu0 %v11121_v27  ;;  %7337 = vmatprep.subr.bf16.mxu1 %v11124_v28  ;;  %v11203_v27 = vld [vmem:[#allocation2 + $0xf60] ss:$16 sps:$4 sm:$0xff]   ;;  %v11206_v28 = vld [vmem:[#allocation2 + $0xf68] ss:$16 sps:$4 sm:$0xff]  }
 0x223   :  { %6650 = vmatpush1.bf16.msra.mxu0 %v11119_v29  ;;  %7338 = vmatpush1.bf16.msra.mxu1 %v11122_v30  ;;  %v11211_v29 = vld [vmem:[#allocation2 + $0xf84] ss:$16 sps:$4 sm:$0xff]   ;;  %v11214_v30 = vld [vmem:[#allocation2 + $0xf8c] ss:$16 sps:$4 sm:$0xff]  }
 0x224   :  { %6651 = vmatprep.subr.bf16.mxu0 %v11127_v31  ;;  %7339 = vmatprep.subr.bf16.mxu1 %v11130_v32  ;;  %v11209_v31 = vld [vmem:[#allocation2 + $0xf80] ss:$16 sps:$4 sm:$0xff]   ;;  %v11212_v32 = vld [vmem:[#allocation2 + $0xf88] ss:$16 sps:$4 sm:$0xff]  }
 0x227   :  { %6652 = vmatpush1.bf16.msra.mxu0 %v11125_v33  ;;  %7340 = vmatpush1.bf16.msra.mxu1 %v11128_v34  ;;  %v11217_v33 = vld [vmem:[#allocation2 + $0xfa4] ss:$16 sps:$4 sm:$0xff]   ;;  %v11220_v34 = vld [vmem:[#allocation2 + $0xfac] ss:$16 sps:$4 sm:$0xff]  }
 0x228   :  { %6653 = vmatprep.subr.bf16.mxu0 %v11133_v35  ;;  %7341 = vmatprep.subr.bf16.mxu1 %v11136_v36  ;;  %v11215_v35 = vld [vmem:[#allocation2 + $0xfa0] ss:$16 sps:$4 sm:$0xff]   ;;  %v11218_v36 = vld [vmem:[#allocation2 + $0xfa8] ss:$16 sps:$4 sm:$0xff]  }
 0x22b   :  { %6654 = vmatpush1.bf16.msra.mxu0 %v11131_v37  ;;  %7342 = vmatpush1.bf16.msra.mxu1 %v11134_v38  ;;  %v11223_v37 = vld [vmem:[#allocation2 + $0xfc4] ss:$16 sps:$4 sm:$0xff]   ;;  %v11226_v38 = vld [vmem:[#allocation2 + $0xfcc] ss:$16 sps:$4 sm:$0xff]  }
 0x22c   :  { %6666 = vmatprep.subr.bf16.mxu0 %v11139_v39  ;;  %7354 = vmatprep.subr.bf16.mxu1 %v11142_v40  ;;  %v11221_v39 = vld [vmem:[#allocation2 + $0xfc0] ss:$16 sps:$4 sm:$0xff]   ;;  %v11224_v40 = vld [vmem:[#allocation2 + $0xfc8] ss:$16 sps:$4 sm:$0xff]  }
 0x22e   :  { %6656 = vmatmul.mubr.bf16.vlgmr.msra.gmra.mrb[0].mxu0 %v179_v45  ;;  %7344 = vmatmul.mubr.bf16.vlgmr.msra.gmra.mrb[0].mxu1 %v179_v45  ;;  %v11235_v45 = vld [vmem:[#allocation2 + $0x1004] ss:$16 sps:$4 sm:$0xff]  }
 0x22f   :  { %6667 = vmatpush1.bf16.msra.mxu0 %v11137_v46  ;;  %7355 = vmatpush1.bf16.msra.mxu1 %v11140_v47  ;;  %v11238_v46 = vld [vmem:[#allocation2 + $0x100c] ss:$16 sps:$4 sm:$0xff]   ;;  %v117_v47 = vld [vmem:[%s12711_s0 + $0x70] sm:$0xff] }
 0x230   :  { %6668 = vmatprep.subr.bf16.mxu0 %v11145_v48  ;;  %7356 = vmatprep.subr.bf16.mxu1 %v11148_v49  ;;  %v149_v48 = vld [vmem:[%s12711_s0 + $0x170] sm:$0xff]  ;;  %v120_v49 = vld [vmem:[%s12711_s0 + $0x88] sm:$0xff] }
 0x231   :  { %6698 = vmatprep.mubr.bf16.mxu0 %v182_v50  ;;  %7386 = vmatprep.mubr.bf16.mxu1 %v182_v50  ;;  %v152_v50 = vld [vmem:[%s12711_s0 + $0x188] sm:$0xff] }
 0x233   :  { %6669 = vmatpush1.bf16.msra.mxu0 %v11143_v51  ;;  %7357 = vmatpush1.bf16.msra.mxu1 %v11146_v52  ;;  %v181_v51 = vpack.c.bf16 %v149_v48, %v117_v47  ;;  %v11233_v52 = vld [vmem:[#allocation2 + $0x1000] ss:$16 sps:$4 sm:$0xff]   ;;  %v11325_v47 = vld [vmem:[#allocation2 + $0x11e4] ss:$16 sps:$4 sm:$0xff]   ;;  %v11328_v48 = vld [vmem:[#allocation2 + $0x11ec] ss:$16 sps:$4 sm:$0xff]  }
 0x234   :  { %6670 = vmatprep.subr.bf16.mxu0 %v11151_v53  ;;  %7358 = vmatprep.subr.bf16.mxu1 %v11154_v54  ;;  %v11236_v53 = vld [vmem:[#allocation2 + $0x1008] ss:$16 sps:$4 sm:$0xff]   ;;  %v11241_v54 = vld [vmem:[#allocation2 + $0x1024] ss:$16 sps:$4 sm:$0xff]  }
 0x237   :  { %6671 = vmatpush1.bf16.msra.mxu0 %v11149_v55  ;;  %7359 = vmatpush1.bf16.msra.mxu1 %v11152_v56  ;;  %v11244_v55 = vld [vmem:[#allocation2 + $0x102c] ss:$16 sps:$4 sm:$0xff]   ;;  %v184_v56 = vpack.c.bf16 %v152_v50, %v120_v49  ;;  %v11323_v49 = vld [vmem:[#allocation2 + $0x11e0] ss:$16 sps:$4 sm:$0xff]   ;;  %v11326_v50 = vld [vmem:[#allocation2 + $0x11e8] ss:$16 sps:$4 sm:$0xff]  }
 0x238   :  { %6672 = vmatprep.subr.bf16.mxu0 %v11157_v57  ;;  %7360 = vmatprep.subr.bf16.mxu1 %v11160_v58  ;;  %v11239_v57 = vld [vmem:[#allocation2 + $0x1020] ss:$16 sps:$4 sm:$0xff]   ;;  %v11242_v58 = vld [vmem:[#allocation2 + $0x1028] ss:$16 sps:$4 sm:$0xff]  }
 0x23b   :  { %6673 = vmatpush1.bf16.msra.mxu0 %v11155_v59  ;;  %7361 = vmatpush1.bf16.msra.mxu1 %v11158_v60  ;;  %v11247_v59 = vld [vmem:[#allocation2 + $0x1044] ss:$16 sps:$4 sm:$0xff]   ;;  %v11250_v60 = vld [vmem:[#allocation2 + $0x104c] ss:$16 sps:$4 sm:$0xff]  }
 0x23c   :  { %6674 = vmatprep.subr.bf16.mxu0 %v11163_v61  ;;  %7362 = vmatprep.subr.bf16.mxu1 %v11166_v62  ;;  %v11245_v61 = vld [vmem:[#allocation2 + $0x1040] ss:$16 sps:$4 sm:$0xff]   ;;  %v11248_v62 = vld [vmem:[#allocation2 + $0x1048] ss:$16 sps:$4 sm:$0xff]  }
 0x23f   :  { %6675 = vmatpush1.bf16.msra.mxu0 %v11161_v63  ;;  %7363 = vmatpush1.bf16.msra.mxu1 %v11164_v0  ;;  %v11253_v63 = vld [vmem:[#allocation2 + $0x1064] ss:$16 sps:$4 sm:$0xff]   ;;  %v11256_v0 = vld [vmem:[#allocation2 + $0x106c] ss:$16 sps:$4 sm:$0xff]  }
 0x240   :  { %6676 = vmatprep.subr.bf16.mxu0 %v11169_v1  ;;  %7364 = vmatprep.subr.bf16.mxu1 %v11172_v2  ;;  %v11251_v1 = vld [vmem:[#allocation2 + $0x1060] ss:$16 sps:$4 sm:$0xff]   ;;  %v11254_v2 = vld [vmem:[#allocation2 + $0x1068] ss:$16 sps:$4 sm:$0xff]  }
 0x243   :  { %6677 = vmatpush1.bf16.msra.mxu0 %v11167_v3  ;;  %7365 = vmatpush1.bf16.msra.mxu1 %v11170_v4  ;;  %v11259_v3 = vld [vmem:[#allocation2 + $0x1084] ss:$16 sps:$4 sm:$0xff]   ;;  %v11262_v4 = vld [vmem:[#allocation2 + $0x108c] ss:$16 sps:$4 sm:$0xff]  }
 0x244   :  { %6678 = vmatprep.subr.bf16.mxu0 %v11175_v5  ;;  %7366 = vmatprep.subr.bf16.mxu1 %v11178_v6  ;;  %v11257_v5 = vld [vmem:[#allocation2 + $0x1080] ss:$16 sps:$4 sm:$0xff]   ;;  %v11260_v6 = vld [vmem:[#allocation2 + $0x1088] ss:$16 sps:$4 sm:$0xff]  }
 0x247   :  { %6679 = vmatpush1.bf16.msra.mxu0 %v11173_v7  ;;  %7367 = vmatpush1.bf16.msra.mxu1 %v11176_v8  ;;  %v11265_v7 = vld [vmem:[#allocation2 + $0x10a4] ss:$16 sps:$4 sm:$0xff]   ;;  %v11268_v8 = vld [vmem:[#allocation2 + $0x10ac] ss:$16 sps:$4 sm:$0xff]  }
 0x248   :  { %6680 = vmatprep.subr.bf16.mxu0 %v11181_v9  ;;  %7368 = vmatprep.subr.bf16.mxu1 %v11184_v10  ;;  %v11263_v9 = vld [vmem:[#allocation2 + $0x10a0] ss:$16 sps:$4 sm:$0xff]   ;;  %v11266_v10 = vld [vmem:[#allocation2 + $0x10a8] ss:$16 sps:$4 sm:$0xff]  }
 0x24b   :  { %6681 = vmatpush1.bf16.msra.mxu0 %v11179_v11  ;;  %7369 = vmatpush1.bf16.msra.mxu1 %v11182_v12  ;;  %v11271_v11 = vld [vmem:[#allocation2 + $0x10c4] ss:$16 sps:$4 sm:$0xff]   ;;  %v11274_v12 = vld [vmem:[#allocation2 + $0x10cc] ss:$16 sps:$4 sm:$0xff]  }
 0x24c   :  { %6682 = vmatprep.subr.bf16.mxu0 %v11187_v13  ;;  %7370 = vmatprep.subr.bf16.mxu1 %v11190_v14  ;;  %v11269_v13 = vld [vmem:[#allocation2 + $0x10c0] ss:$16 sps:$4 sm:$0xff]   ;;  %v11272_v14 = vld [vmem:[#allocation2 + $0x10c8] ss:$16 sps:$4 sm:$0xff]  }
 0x24f   :  { %6683 = vmatpush1.bf16.msra.mxu0 %v11185_v15  ;;  %7371 = vmatpush1.bf16.msra.mxu1 %v11188_v16  ;;  %v11277_v15 = vld [vmem:[#allocation2 + $0x10e4] ss:$16 sps:$4 sm:$0xff]   ;;  %v11280_v16 = vld [vmem:[#allocation2 + $0x10ec] ss:$16 sps:$4 sm:$0xff]  }
 0x250   :  { %6684 = vmatprep.subr.bf16.mxu0 %v11193_v17  ;;  %7372 = vmatprep.subr.bf16.mxu1 %v11196_v18  ;;  %v11275_v17 = vld [vmem:[#allocation2 + $0x10e0] ss:$16 sps:$4 sm:$0xff]   ;;  %v11278_v18 = vld [vmem:[#allocation2 + $0x10e8] ss:$16 sps:$4 sm:$0xff]  }
 0x253   :  { %6685 = vmatpush1.bf16.msra.mxu0 %v11191_v19  ;;  %7373 = vmatpush1.bf16.msra.mxu1 %v11194_v20  ;;  %v11283_v19 = vld [vmem:[#allocation2 + $0x1104] ss:$16 sps:$4 sm:$0xff]   ;;  %v11286_v20 = vld [vmem:[#allocation2 + $0x110c] ss:$16 sps:$4 sm:$0xff]  }
 0x254   :  { %6686 = vmatprep.subr.bf16.mxu0 %v11199_v21  ;;  %7374 = vmatprep.subr.bf16.mxu1 %v11202_v22  ;;  %v11281_v21 = vld [vmem:[#allocation2 + $0x1100] ss:$16 sps:$4 sm:$0xff]   ;;  %v11284_v22 = vld [vmem:[#allocation2 + $0x1108] ss:$16 sps:$4 sm:$0xff]  }
 0x257   :  { %6687 = vmatpush1.bf16.msra.mxu0 %v11197_v23  ;;  %7375 = vmatpush1.bf16.msra.mxu1 %v11200_v24  ;;  %v11289_v23 = vld [vmem:[#allocation2 + $0x1124] ss:$16 sps:$4 sm:$0xff]   ;;  %v11292_v24 = vld [vmem:[#allocation2 + $0x112c] ss:$16 sps:$4 sm:$0xff]  }
 0x258   :  { %6688 = vmatprep.subr.bf16.mxu0 %v11205_v25  ;;  %7376 = vmatprep.subr.bf16.mxu1 %v11208_v26  ;;  %v11287_v25 = vld [vmem:[#allocation2 + $0x1120] ss:$16 sps:$4 sm:$0xff]   ;;  %v11290_v26 = vld [vmem:[#allocation2 + $0x1128] ss:$16 sps:$4 sm:$0xff]  }
 0x25b   :  { %6689 = vmatpush1.bf16.msra.mxu0 %v11203_v27  ;;  %7377 = vmatpush1.bf16.msra.mxu1 %v11206_v28  ;;  %v11295_v27 = vld [vmem:[#allocation2 + $0x1144] ss:$16 sps:$4 sm:$0xff]   ;;  %v11298_v28 = vld [vmem:[#allocation2 + $0x114c] ss:$16 sps:$4 sm:$0xff]  }
 0x25c   :  { %6690 = vmatprep.subr.bf16.mxu0 %v11211_v29  ;;  %7378 = vmatprep.subr.bf16.mxu1 %v11214_v30  ;;  %v11293_v29 = vld [vmem:[#allocation2 + $0x1140] ss:$16 sps:$4 sm:$0xff]   ;;  %v11296_v30 = vld [vmem:[#allocation2 + $0x1148] ss:$16 sps:$4 sm:$0xff]  }
 0x25f   :  { %6691 = vmatpush1.bf16.msra.mxu0 %v11209_v31  ;;  %7379 = vmatpush1.bf16.msra.mxu1 %v11212_v32  ;;  %v11301_v31 = vld [vmem:[#allocation2 + $0x1164] ss:$16 sps:$4 sm:$0xff]   ;;  %v11304_v32 = vld [vmem:[#allocation2 + $0x116c] ss:$16 sps:$4 sm:$0xff]  }
 0x260   :  { %6692 = vmatprep.subr.bf16.mxu0 %v11217_v33  ;;  %7380 = vmatprep.subr.bf16.mxu1 %v11220_v34  ;;  %v11299_v33 = vld [vmem:[#allocation2 + $0x1160] ss:$16 sps:$4 sm:$0xff]   ;;  %v11302_v34 = vld [vmem:[#allocation2 + $0x1168] ss:$16 sps:$4 sm:$0xff]  }
 0x263   :  { %6693 = vmatpush1.bf16.msra.mxu0 %v11215_v35  ;;  %7381 = vmatpush1.bf16.msra.mxu1 %v11218_v36  ;;  %v11307_v35 = vld [vmem:[#allocation2 + $0x1184] ss:$16 sps:$4 sm:$0xff]   ;;  %v11310_v36 = vld [vmem:[#allocation2 + $0x118c] ss:$16 sps:$4 sm:$0xff]  }
 0x264   :  { %6694 = vmatprep.subr.bf16.mxu0 %v11223_v37  ;;  %7382 = vmatprep.subr.bf16.mxu1 %v11226_v38  ;;  %v11305_v37 = vld [vmem:[#allocation2 + $0x1180] ss:$16 sps:$4 sm:$0xff]   ;;  %v11308_v38 = vld [vmem:[#allocation2 + $0x1188] ss:$16 sps:$4 sm:$0xff]  }
 0x267   :  { %6695 = vmatpush1.bf16.msra.mxu0 %v11221_v39  ;;  %7383 = vmatpush1.bf16.msra.mxu1 %v11224_v40  ;;  %v11313_v39 = vld [vmem:[#allocation2 + $0x11a4] ss:$16 sps:$4 sm:$0xff]   ;;  %v11316_v40 = vld [vmem:[#allocation2 + $0x11ac] ss:$16 sps:$4 sm:$0xff]  }
 0x268   :  { %6696 = vmatprep.subr.bf16.mxu0 %v11229_v41  ;;  %7384 = vmatprep.subr.bf16.mxu1 %v11232_v42  ;;  %v11311_v41 = vld [vmem:[#allocation2 + $0x11a0] ss:$16 sps:$4 sm:$0xff]   ;;  %v11314_v42 = vld [vmem:[#allocation2 + $0x11a8] ss:$16 sps:$4 sm:$0xff]  }
 0x26b   :  { %6697 = vmatpush1.bf16.msra.mxu0 %v11227_v43  ;;  %7385 = vmatpush1.bf16.msra.mxu1 %v11230_v44  ;;  %v11319_v43 = vld [vmem:[#allocation2 + $0x11c4] ss:$16 sps:$4 sm:$0xff]   ;;  %v11322_v44 = vld [vmem:[#allocation2 + $0x11cc] ss:$16 sps:$4 sm:$0xff]  }
 0x26c   :  { %6709 = vmatprep.subr.bf16.mxu0 %v11235_v45  ;;  %7397 = vmatprep.subr.bf16.mxu1 %v11238_v46  ;;  %v11317_v45 = vld [vmem:[#allocation2 + $0x11c0] ss:$16 sps:$4 sm:$0xff]   ;;  %v11320_v46 = vld [vmem:[#allocation2 + $0x11c8] ss:$16 sps:$4 sm:$0xff]  }
 0x26e   :  { %6699 = vmatmul.mubr.bf16.vlgmr.msra.gmra.mrb[0].mxu0 %v181_v51  ;;  %7387 = vmatmul.mubr.bf16.vlgmr.msra.gmra.mrb[0].mxu1 %v181_v51  ;;  %v11331_v51 = vld [vmem:[#allocation2 + $0x1204] ss:$16 sps:$4 sm:$0xff]  }
 0x26f   :  { %6710 = vmatpush1.bf16.msra.mxu0 %v11233_v52  ;;  %7398 = vmatpush1.bf16.msra.mxu1 %v11236_v53  ;;  %v11334_v52 = vld [vmem:[#allocation2 + $0x120c] ss:$16 sps:$4 sm:$0xff]   ;;  %v119_v53 = vld [vmem:[%s12711_s0 + $0x80] sm:$0xff] }
 0x270   :  { %6711 = vmatprep.subr.bf16.mxu0 %v11241_v54  ;;  %7399 = vmatprep.subr.bf16.mxu1 %v11244_v55  ;;  %v151_v54 = vld [vmem:[%s12711_s0 + $0x180] sm:$0xff]  ;;  %v122_v55 = vld [vmem:[%s12711_s0 + $0x98] sm:$0xff] }
 0x271   :  { %6741 = vmatprep.mubr.bf16.mxu0 %v184_v56  ;;  %7429 = vmatprep.mubr.bf16.mxu1 %v184_v56  ;;  %v154_v56 = vld [vmem:[%s12711_s0 + $0x198] sm:$0xff] }
 0x273   :  { %6712 = vmatpush1.bf16.msra.mxu0 %v11239_v57  ;;  %7400 = vmatpush1.bf16.msra.mxu1 %v11242_v58  ;;  %v183_v57 = vpack.c.bf16 %v151_v54, %v119_v53  ;;  %v11329_v58 = vld [vmem:[#allocation2 + $0x1200] ss:$16 sps:$4 sm:$0xff]   ;;  %v11421_v53 = vld [vmem:[#allocation2 + $0x13e4] ss:$16 sps:$4 sm:$0xff]   ;;  %v11424_v54 = vld [vmem:[#allocation2 + $0x13ec] ss:$16 sps:$4 sm:$0xff]  }
 0x274   :  { %6713 = vmatprep.subr.bf16.mxu0 %v11247_v59  ;;  %7401 = vmatprep.subr.bf16.mxu1 %v11250_v60  ;;  %v11332_v59 = vld [vmem:[#allocation2 + $0x1208] ss:$16 sps:$4 sm:$0xff]   ;;  %v11337_v60 = vld [vmem:[#allocation2 + $0x1224] ss:$16 sps:$4 sm:$0xff]  }
 0x277   :  { %6714 = vmatpush1.bf16.msra.mxu0 %v11245_v61  ;;  %7402 = vmatpush1.bf16.msra.mxu1 %v11248_v62  ;;  %v11340_v61 = vld [vmem:[#allocation2 + $0x122c] ss:$16 sps:$4 sm:$0xff]   ;;  %v186_v62 = vpack.c.bf16 %v154_v56, %v122_v55  ;;  %v11419_v55 = vld [vmem:[#allocation2 + $0x13e0] ss:$16 sps:$4 sm:$0xff]   ;;  %v11422_v56 = vld [vmem:[#allocation2 + $0x13e8] ss:$16 sps:$4 sm:$0xff]  }
 0x278   :  { %6715 = vmatprep.subr.bf16.mxu0 %v11253_v63  ;;  %7403 = vmatprep.subr.bf16.mxu1 %v11256_v0  ;;  %v11335_v63 = vld [vmem:[#allocation2 + $0x1220] ss:$16 sps:$4 sm:$0xff]   ;;  %v11338_v0 = vld [vmem:[#allocation2 + $0x1228] ss:$16 sps:$4 sm:$0xff]  }
 0x27b   :  { %6716 = vmatpush1.bf16.msra.mxu0 %v11251_v1  ;;  %7404 = vmatpush1.bf16.msra.mxu1 %v11254_v2  ;;  %v11343_v1 = vld [vmem:[#allocation2 + $0x1244] ss:$16 sps:$4 sm:$0xff]   ;;  %v11346_v2 = vld [vmem:[#allocation2 + $0x124c] ss:$16 sps:$4 sm:$0xff]  }
 0x27c   :  { %6717 = vmatprep.subr.bf16.mxu0 %v11259_v3  ;;  %7405 = vmatprep.subr.bf16.mxu1 %v11262_v4  ;;  %v11341_v3 = vld [vmem:[#allocation2 + $0x1240] ss:$16 sps:$4 sm:$0xff]   ;;  %v11344_v4 = vld [vmem:[#allocation2 + $0x1248] ss:$16 sps:$4 sm:$0xff]  }
 0x27f   :  { %6718 = vmatpush1.bf16.msra.mxu0 %v11257_v5  ;;  %7406 = vmatpush1.bf16.msra.mxu1 %v11260_v6  ;;  %v11349_v5 = vld [vmem:[#allocation2 + $0x1264] ss:$16 sps:$4 sm:$0xff]   ;;  %v11352_v6 = vld [vmem:[#allocation2 + $0x126c] ss:$16 sps:$4 sm:$0xff]  }
 0x280   :  { %6719 = vmatprep.subr.bf16.mxu0 %v11265_v7  ;;  %7407 = vmatprep.subr.bf16.mxu1 %v11268_v8  ;;  %v11347_v7 = vld [vmem:[#allocation2 + $0x1260] ss:$16 sps:$4 sm:$0xff]   ;;  %v11350_v8 = vld [vmem:[#allocation2 + $0x1268] ss:$16 sps:$4 sm:$0xff]  }
 0x283   :  { %6720 = vmatpush1.bf16.msra.mxu0 %v11263_v9  ;;  %7408 = vmatpush1.bf16.msra.mxu1 %v11266_v10  ;;  %v11355_v9 = vld [vmem:[#allocation2 + $0x1284] ss:$16 sps:$4 sm:$0xff]   ;;  %v11358_v10 = vld [vmem:[#allocation2 + $0x128c] ss:$16 sps:$4 sm:$0xff]  }
 0x284   :  { %6721 = vmatprep.subr.bf16.mxu0 %v11271_v11  ;;  %7409 = vmatprep.subr.bf16.mxu1 %v11274_v12  ;;  %v11353_v11 = vld [vmem:[#allocation2 + $0x1280] ss:$16 sps:$4 sm:$0xff]   ;;  %v11356_v12 = vld [vmem:[#allocation2 + $0x1288] ss:$16 sps:$4 sm:$0xff]  }
 0x287   :  { %6722 = vmatpush1.bf16.msra.mxu0 %v11269_v13  ;;  %7410 = vmatpush1.bf16.msra.mxu1 %v11272_v14  ;;  %v11361_v13 = vld [vmem:[#allocation2 + $0x12a4] ss:$16 sps:$4 sm:$0xff]   ;;  %v11364_v14 = vld [vmem:[#allocation2 + $0x12ac] ss:$16 sps:$4 sm:$0xff]  }
 0x288   :  { %6723 = vmatprep.subr.bf16.mxu0 %v11277_v15  ;;  %7411 = vmatprep.subr.bf16.mxu1 %v11280_v16  ;;  %v11359_v15 = vld [vmem:[#allocation2 + $0x12a0] ss:$16 sps:$4 sm:$0xff]   ;;  %v11362_v16 = vld [vmem:[#allocation2 + $0x12a8] ss:$16 sps:$4 sm:$0xff]  }
 0x28b   :  { %6724 = vmatpush1.bf16.msra.mxu0 %v11275_v17  ;;  %7412 = vmatpush1.bf16.msra.mxu1 %v11278_v18  ;;  %v11367_v17 = vld [vmem:[#allocation2 + $0x12c4] ss:$16 sps:$4 sm:$0xff]   ;;  %v11370_v18 = vld [vmem:[#allocation2 + $0x12cc] ss:$16 sps:$4 sm:$0xff]  }
 0x28c   :  { %6725 = vmatprep.subr.bf16.mxu0 %v11283_v19  ;;  %7413 = vmatprep.subr.bf16.mxu1 %v11286_v20  ;;  %v11365_v19 = vld [vmem:[#allocation2 + $0x12c0] ss:$16 sps:$4 sm:$0xff]   ;;  %v11368_v20 = vld [vmem:[#allocation2 + $0x12c8] ss:$16 sps:$4 sm:$0xff]  }
 0x28f   :  { %6726 = vmatpush1.bf16.msra.mxu0 %v11281_v21  ;;  %7414 = vmatpush1.bf16.msra.mxu1 %v11284_v22  ;;  %v11373_v21 = vld [vmem:[#allocation2 + $0x12e4] ss:$16 sps:$4 sm:$0xff]   ;;  %v11376_v22 = vld [vmem:[#allocation2 + $0x12ec] ss:$16 sps:$4 sm:$0xff]  }
 0x290   :  { %6727 = vmatprep.subr.bf16.mxu0 %v11289_v23  ;;  %7415 = vmatprep.subr.bf16.mxu1 %v11292_v24  ;;  %v11371_v23 = vld [vmem:[#allocation2 + $0x12e0] ss:$16 sps:$4 sm:$0xff]   ;;  %v11374_v24 = vld [vmem:[#allocation2 + $0x12e8] ss:$16 sps:$4 sm:$0xff]  }
 0x293   :  { %6728 = vmatpush1.bf16.msra.mxu0 %v11287_v25  ;;  %7416 = vmatpush1.bf16.msra.mxu1 %v11290_v26  ;;  %v11379_v25 = vld [vmem:[#allocation2 + $0x1304] ss:$16 sps:$4 sm:$0xff]   ;;  %v11382_v26 = vld [vmem:[#allocation2 + $0x130c] ss:$16 sps:$4 sm:$0xff]  }
 0x294   :  { %6729 = vmatprep.subr.bf16.mxu0 %v11295_v27  ;;  %7417 = vmatprep.subr.bf16.mxu1 %v11298_v28  ;;  %v11377_v27 = vld [vmem:[#allocation2 + $0x1300] ss:$16 sps:$4 sm:$0xff]   ;;  %v11380_v28 = vld [vmem:[#allocation2 + $0x1308] ss:$16 sps:$4 sm:$0xff]  }
 0x297   :  { %6730 = vmatpush1.bf16.msra.mxu0 %v11293_v29  ;;  %7418 = vmatpush1.bf16.msra.mxu1 %v11296_v30  ;;  %v11385_v29 = vld [vmem:[#allocation2 + $0x1324] ss:$16 sps:$4 sm:$0xff]   ;;  %v11388_v30 = vld [vmem:[#allocation2 + $0x132c] ss:$16 sps:$4 sm:$0xff]  }
 0x298   :  { %6731 = vmatprep.subr.bf16.mxu0 %v11301_v31  ;;  %7419 = vmatprep.subr.bf16.mxu1 %v11304_v32  ;;  %v11383_v31 = vld [vmem:[#allocation2 + $0x1320] ss:$16 sps:$4 sm:$0xff]   ;;  %v11386_v32 = vld [vmem:[#allocation2 + $0x1328] ss:$16 sps:$4 sm:$0xff]  }
 0x29b   :  { %6732 = vmatpush1.bf16.msra.mxu0 %v11299_v33  ;;  %7420 = vmatpush1.bf16.msra.mxu1 %v11302_v34  ;;  %v11391_v33 = vld [vmem:[#allocation2 + $0x1344] ss:$16 sps:$4 sm:$0xff]   ;;  %v11394_v34 = vld [vmem:[#allocation2 + $0x134c] ss:$16 sps:$4 sm:$0xff]  }
 0x29c   :  { %6733 = vmatprep.subr.bf16.mxu0 %v11307_v35  ;;  %7421 = vmatprep.subr.bf16.mxu1 %v11310_v36  ;;  %v11389_v35 = vld [vmem:[#allocation2 + $0x1340] ss:$16 sps:$4 sm:$0xff]   ;;  %v11392_v36 = vld [vmem:[#allocation2 + $0x1348] ss:$16 sps:$4 sm:$0xff]  }
 0x29f   :  { %6734 = vmatpush1.bf16.msra.mxu0 %v11305_v37  ;;  %7422 = vmatpush1.bf16.msra.mxu1 %v11308_v38  ;;  %v11397_v37 = vld [vmem:[#allocation2 + $0x1364] ss:$16 sps:$4 sm:$0xff]   ;;  %v11400_v38 = vld [vmem:[#allocation2 + $0x136c] ss:$16 sps:$4 sm:$0xff]  }
 0x2a0   :  { %6735 = vmatprep.subr.bf16.mxu0 %v11313_v39  ;;  %7423 = vmatprep.subr.bf16.mxu1 %v11316_v40  ;;  %v11395_v39 = vld [vmem:[#allocation2 + $0x1360] ss:$16 sps:$4 sm:$0xff]   ;;  %v11398_v40 = vld [vmem:[#allocation2 + $0x1368] ss:$16 sps:$4 sm:$0xff]  }
 0x2a3   :  { %6736 = vmatpush1.bf16.msra.mxu0 %v11311_v41  ;;  %7424 = vmatpush1.bf16.msra.mxu1 %v11314_v42  ;;  %v11403_v41 = vld [vmem:[#allocation2 + $0x1384] ss:$16 sps:$4 sm:$0xff]   ;;  %v11406_v42 = vld [vmem:[#allocation2 + $0x138c] ss:$16 sps:$4 sm:$0xff]  }
 0x2a4   :  { %6737 = vmatprep.subr.bf16.mxu0 %v11319_v43  ;;  %7425 = vmatprep.subr.bf16.mxu1 %v11322_v44  ;;  %v11401_v43 = vld [vmem:[#allocation2 + $0x1380] ss:$16 sps:$4 sm:$0xff]   ;;  %v11404_v44 = vld [vmem:[#allocation2 + $0x1388] ss:$16 sps:$4 sm:$0xff]  }
 0x2a7   :  { %6738 = vmatpush1.bf16.msra.mxu0 %v11317_v45  ;;  %7426 = vmatpush1.bf16.msra.mxu1 %v11320_v46  ;;  %v11409_v45 = vld [vmem:[#allocation2 + $0x13a4] ss:$16 sps:$4 sm:$0xff]   ;;  %v11412_v46 = vld [vmem:[#allocation2 + $0x13ac] ss:$16 sps:$4 sm:$0xff]  }
 0x2a8   :  { %6739 = vmatprep.subr.bf16.mxu0 %v11325_v47  ;;  %7427 = vmatprep.subr.bf16.mxu1 %v11328_v48  ;;  %v11407_v47 = vld [vmem:[#allocation2 + $0x13a0] ss:$16 sps:$4 sm:$0xff]   ;;  %v11410_v48 = vld [vmem:[#allocation2 + $0x13a8] ss:$16 sps:$4 sm:$0xff]  }
 0x2ab   :  { %6740 = vmatpush1.bf16.msra.mxu0 %v11323_v49  ;;  %7428 = vmatpush1.bf16.msra.mxu1 %v11326_v50  ;;  %v11415_v49 = vld [vmem:[#allocation2 + $0x13c4] ss:$16 sps:$4 sm:$0xff]   ;;  %v11418_v50 = vld [vmem:[#allocation2 + $0x13cc] ss:$16 sps:$4 sm:$0xff]  }
 0x2ac   :  { %6752 = vmatprep.subr.bf16.mxu0 %v11331_v51  ;;  %7440 = vmatprep.subr.bf16.mxu1 %v11334_v52  ;;  %v11413_v51 = vld [vmem:[#allocation2 + $0x13c0] ss:$16 sps:$4 sm:$0xff]   ;;  %v11416_v52 = vld [vmem:[#allocation2 + $0x13c8] ss:$16 sps:$4 sm:$0xff]  }
 0x2ae   :  { %6742 = vmatmul.mubr.bf16.vlgmr.msra.gmra.mrb[0].mxu0 %v183_v57  ;;  %7430 = vmatmul.mubr.bf16.vlgmr.msra.gmra.mrb[0].mxu1 %v183_v57  ;;  %v11427_v57 = vld [vmem:[#allocation2 + $0x1404] ss:$16 sps:$4 sm:$0xff]  }
 0x2af   :  { %6753 = vmatpush1.bf16.msra.mxu0 %v11329_v58  ;;  %7441 = vmatpush1.bf16.msra.mxu1 %v11332_v59  ;;  %v11430_v58 = vld [vmem:[#allocation2 + $0x140c] ss:$16 sps:$4 sm:$0xff]   ;;  %v121_v59 = vld [vmem:[%s12711_s0 + $0x90] sm:$0xff] }
 0x2b0   :  { %6754 = vmatprep.subr.bf16.mxu0 %v11337_v60  ;;  %7442 = vmatprep.subr.bf16.mxu1 %v11340_v61  ;;  %v153_v60 = vld [vmem:[%s12711_s0 + $0x190] sm:$0xff]  ;;  %v124_v61 = vld [vmem:[%s12711_s0 + $0xa8] sm:$0xff] }
 0x2b1   :  { %6784 = vmatprep.mubr.bf16.mxu0 %v186_v62  ;;  %7472 = vmatprep.mubr.bf16.mxu1 %v186_v62  ;;  %v156_v62 = vld [vmem:[%s12711_s0 + $0x1a8] sm:$0xff] }
 0x2b3   :  { %6755 = vmatpush1.bf16.msra.mxu0 %v11335_v63  ;;  %7443 = vmatpush1.bf16.msra.mxu1 %v11338_v0  ;;  %v185_v63 = vpack.c.bf16 %v153_v60, %v121_v59  ;;  %v11425_v0 = vld [vmem:[#allocation2 + $0x1400] ss:$16 sps:$4 sm:$0xff]   ;;  %v11517_v59 = vld [vmem:[#allocation2 + $0x15e4] ss:$16 sps:$4 sm:$0xff]   ;;  %v11520_v60 = vld [vmem:[#allocation2 + $0x15ec] ss:$16 sps:$4 sm:$0xff]  }
 0x2b4   :  { %6756 = vmatprep.subr.bf16.mxu0 %v11343_v1  ;;  %7444 = vmatprep.subr.bf16.mxu1 %v11346_v2  ;;  %v11428_v1 = vld [vmem:[#allocation2 + $0x1408] ss:$16 sps:$4 sm:$0xff]   ;;  %v11433_v2 = vld [vmem:[#allocation2 + $0x1424] ss:$16 sps:$4 sm:$0xff]  }
 0x2b7   :  { %6757 = vmatpush1.bf16.msra.mxu0 %v11341_v3  ;;  %7445 = vmatpush1.bf16.msra.mxu1 %v11344_v4  ;;  %v11436_v3 = vld [vmem:[#allocation2 + $0x142c] ss:$16 sps:$4 sm:$0xff]   ;;  %v188_v4 = vpack.c.bf16 %v156_v62, %v124_v61  ;;  %v11515_v61 = vld [vmem:[#allocation2 + $0x15e0] ss:$16 sps:$4 sm:$0xff]   ;;  %v11518_v62 = vld [vmem:[#allocation2 + $0x15e8] ss:$16 sps:$4 sm:$0xff]  }
 0x2b8   :  { %6758 = vmatprep.subr.bf16.mxu0 %v11349_v5  ;;  %7446 = vmatprep.subr.bf16.mxu1 %v11352_v6  ;;  %v11431_v5 = vld [vmem:[#allocation2 + $0x1420] ss:$16 sps:$4 sm:$0xff]   ;;  %v11434_v6 = vld [vmem:[#allocation2 + $0x1428] ss:$16 sps:$4 sm:$0xff]  }
 0x2bb   :  { %6759 = vmatpush1.bf16.msra.mxu0 %v11347_v7  ;;  %7447 = vmatpush1.bf16.msra.mxu1 %v11350_v8  ;;  %v11439_v7 = vld [vmem:[#allocation2 + $0x1444] ss:$16 sps:$4 sm:$0xff]   ;;  %v11442_v8 = vld [vmem:[#allocation2 + $0x144c] ss:$16 sps:$4 sm:$0xff]  }
 0x2bc   :  { %6760 = vmatprep.subr.bf16.mxu0 %v11355_v9  ;;  %7448 = vmatprep.subr.bf16.mxu1 %v11358_v10  ;;  %v11437_v9 = vld [vmem:[#allocation2 + $0x1440] ss:$16 sps:$4 sm:$0xff]   ;;  %v11440_v10 = vld [vmem:[#allocation2 + $0x1448] ss:$16 sps:$4 sm:$0xff]  }
 0x2bf   :  { %6761 = vmatpush1.bf16.msra.mxu0 %v11353_v11  ;;  %7449 = vmatpush1.bf16.msra.mxu1 %v11356_v12  ;;  %v11445_v11 = vld [vmem:[#allocation2 + $0x1464] ss:$16 sps:$4 sm:$0xff]   ;;  %v11448_v12 = vld [vmem:[#allocation2 + $0x146c] ss:$16 sps:$4 sm:$0xff]  }
 0x2c0   :  { %6762 = vmatprep.subr.bf16.mxu0 %v11361_v13  ;;  %7450 = vmatprep.subr.bf16.mxu1 %v11364_v14  ;;  %v11443_v13 = vld [vmem:[#allocation2 + $0x1460] ss:$16 sps:$4 sm:$0xff]   ;;  %v11446_v14 = vld [vmem:[#allocation2 + $0x1468] ss:$16 sps:$4 sm:$0xff]  }
 0x2c3   :  { %6763 = vmatpush1.bf16.msra.mxu0 %v11359_v15  ;;  %7451 = vmatpush1.bf16.msra.mxu1 %v11362_v16  ;;  %v11451_v15 = vld [vmem:[#allocation2 + $0x1484] ss:$16 sps:$4 sm:$0xff]   ;;  %v11454_v16 = vld [vmem:[#allocation2 + $0x148c] ss:$16 sps:$4 sm:$0xff]  }
 0x2c4   :  { %6764 = vmatprep.subr.bf16.mxu0 %v11367_v17  ;;  %7452 = vmatprep.subr.bf16.mxu1 %v11370_v18  ;;  %v11449_v17 = vld [vmem:[#allocation2 + $0x1480] ss:$16 sps:$4 sm:$0xff]   ;;  %v11452_v18 = vld [vmem:[#allocation2 + $0x1488] ss:$16 sps:$4 sm:$0xff]  }
 0x2c7   :  { %6765 = vmatpush1.bf16.msra.mxu0 %v11365_v19  ;;  %7453 = vmatpush1.bf16.msra.mxu1 %v11368_v20  ;;  %v11457_v19 = vld [vmem:[#allocation2 + $0x14a4] ss:$16 sps:$4 sm:$0xff]   ;;  %v11460_v20 = vld [vmem:[#allocation2 + $0x14ac] ss:$16 sps:$4 sm:$0xff]  }
 0x2c8   :  { %6766 = vmatprep.subr.bf16.mxu0 %v11373_v21  ;;  %7454 = vmatprep.subr.bf16.mxu1 %v11376_v22  ;;  %v11455_v21 = vld [vmem:[#allocation2 + $0x14a0] ss:$16 sps:$4 sm:$0xff]   ;;  %v11458_v22 = vld [vmem:[#allocation2 + $0x14a8] ss:$16 sps:$4 sm:$0xff]  }
 0x2cb   :  { %6767 = vmatpush1.bf16.msra.mxu0 %v11371_v23  ;;  %7455 = vmatpush1.bf16.msra.mxu1 %v11374_v24  ;;  %v11463_v23 = vld [vmem:[#allocation2 + $0x14c4] ss:$16 sps:$4 sm:$0xff]   ;;  %v11466_v24 = vld [vmem:[#allocation2 + $0x14cc] ss:$16 sps:$4 sm:$0xff]  }
 0x2cc   :  { %6768 = vmatprep.subr.bf16.mxu0 %v11379_v25  ;;  %7456 = vmatprep.subr.bf16.mxu1 %v11382_v26  ;;  %v11461_v25 = vld [vmem:[#allocation2 + $0x14c0] ss:$16 sps:$4 sm:$0xff]   ;;  %v11464_v26 = vld [vmem:[#allocation2 + $0x14c8] ss:$16 sps:$4 sm:$0xff]  }
 0x2cf   :  { %6769 = vmatpush1.bf16.msra.mxu0 %v11377_v27  ;;  %7457 = vmatpush1.bf16.msra.mxu1 %v11380_v28  ;;  %v11469_v27 = vld [vmem:[#allocation2 + $0x14e4] ss:$16 sps:$4 sm:$0xff]   ;;  %v11472_v28 = vld [vmem:[#allocation2 + $0x14ec] ss:$16 sps:$4 sm:$0xff]  }
 0x2d0   :  { %6770 = vmatprep.subr.bf16.mxu0 %v11385_v29  ;;  %7458 = vmatprep.subr.bf16.mxu1 %v11388_v30  ;;  %v11467_v29 = vld [vmem:[#allocation2 + $0x14e0] ss:$16 sps:$4 sm:$0xff]   ;;  %v11470_v30 = vld [vmem:[#allocation2 + $0x14e8] ss:$16 sps:$4 sm:$0xff]  }
 0x2d3   :  { %6771 = vmatpush1.bf16.msra.mxu0 %v11383_v31  ;;  %7459 = vmatpush1.bf16.msra.mxu1 %v11386_v32  ;;  %v11475_v31 = vld [vmem:[#allocation2 + $0x1504] ss:$16 sps:$4 sm:$0xff]   ;;  %v11478_v32 = vld [vmem:[#allocation2 + $0x150c] ss:$16 sps:$4 sm:$0xff]  }
 0x2d4   :  { %6772 = vmatprep.subr.bf16.mxu0 %v11391_v33  ;;  %7460 = vmatprep.subr.bf16.mxu1 %v11394_v34  ;;  %v11473_v33 = vld [vmem:[#allocation2 + $0x1500] ss:$16 sps:$4 sm:$0xff]   ;;  %v11476_v34 = vld [vmem:[#allocation2 + $0x1508] ss:$16 sps:$4 sm:$0xff]  }
 0x2d7   :  { %6773 = vmatpush1.bf16.msra.mxu0 %v11389_v35  ;;  %7461 = vmatpush1.bf16.msra.mxu1 %v11392_v36  ;;  %v11481_v35 = vld [vmem:[#allocation2 + $0x1524] ss:$16 sps:$4 sm:$0xff]   ;;  %v11484_v36 = vld [vmem:[#allocation2 + $0x152c] ss:$16 sps:$4 sm:$0xff]  }
 0x2d8   :  { %6774 = vmatprep.subr.bf16.mxu0 %v11397_v37  ;;  %7462 = vmatprep.subr.bf16.mxu1 %v11400_v38  ;;  %v11479_v37 = vld [vmem:[#allocation2 + $0x1520] ss:$16 sps:$4 sm:$0xff]   ;;  %v11482_v38 = vld [vmem:[#allocation2 + $0x1528] ss:$16 sps:$4 sm:$0xff]  }
 0x2db   :  { %6775 = vmatpush1.bf16.msra.mxu0 %v11395_v39  ;;  %7463 = vmatpush1.bf16.msra.mxu1 %v11398_v40  ;;  %v11487_v39 = vld [vmem:[#allocation2 + $0x1544] ss:$16 sps:$4 sm:$0xff]   ;;  %v11490_v40 = vld [vmem:[#allocation2 + $0x154c] ss:$16 sps:$4 sm:$0xff]  }
 0x2dc   :  { %6776 = vmatprep.subr.bf16.mxu0 %v11403_v41  ;;  %7464 = vmatprep.subr.bf16.mxu1 %v11406_v42  ;;  %v11485_v41 = vld [vmem:[#allocation2 + $0x1540] ss:$16 sps:$4 sm:$0xff]   ;;  %v11488_v42 = vld [vmem:[#allocation2 + $0x1548] ss:$16 sps:$4 sm:$0xff]  }
 0x2df   :  { %6777 = vmatpush1.bf16.msra.mxu0 %v11401_v43  ;;  %7465 = vmatpush1.bf16.msra.mxu1 %v11404_v44  ;;  %v11493_v43 = vld [vmem:[#allocation2 + $0x1564] ss:$16 sps:$4 sm:$0xff]   ;;  %v11496_v44 = vld [vmem:[#allocation2 + $0x156c] ss:$16 sps:$4 sm:$0xff]  }
 0x2e0   :  { %6778 = vmatprep.subr.bf16.mxu0 %v11409_v45  ;;  %7466 = vmatprep.subr.bf16.mxu1 %v11412_v46  ;;  %v11491_v45 = vld [vmem:[#allocation2 + $0x1560] ss:$16 sps:$4 sm:$0xff]   ;;  %v11494_v46 = vld [vmem:[#allocation2 + $0x1568] ss:$16 sps:$4 sm:$0xff]  }
 0x2e3   :  { %6779 = vmatpush1.bf16.msra.mxu0 %v11407_v47  ;;  %7467 = vmatpush1.bf16.msra.mxu1 %v11410_v48  ;;  %v11499_v47 = vld [vmem:[#allocation2 + $0x1584] ss:$16 sps:$4 sm:$0xff]   ;;  %v11502_v48 = vld [vmem:[#allocation2 + $0x158c] ss:$16 sps:$4 sm:$0xff]  }
 0x2e4   :  { %6780 = vmatprep.subr.bf16.mxu0 %v11415_v49  ;;  %7468 = vmatprep.subr.bf16.mxu1 %v11418_v50  ;;  %v11497_v49 = vld [vmem:[#allocation2 + $0x1580] ss:$16 sps:$4 sm:$0xff]   ;;  %v11500_v50 = vld [vmem:[#allocation2 + $0x1588] ss:$16 sps:$4 sm:$0xff]  }
 0x2e7   :  { %6781 = vmatpush1.bf16.msra.mxu0 %v11413_v51  ;;  %7469 = vmatpush1.bf16.msra.mxu1 %v11416_v52  ;;  %v11505_v51 = vld [vmem:[#allocation2 + $0x15a4] ss:$16 sps:$4 sm:$0xff]   ;;  %v11508_v52 = vld [vmem:[#allocation2 + $0x15ac] ss:$16 sps:$4 sm:$0xff]  }
 0x2e8   :  { %6782 = vmatprep.subr.bf16.mxu0 %v11421_v53  ;;  %7470 = vmatprep.subr.bf16.mxu1 %v11424_v54  ;;  %v11503_v53 = vld [vmem:[#allocation2 + $0x15a0] ss:$16 sps:$4 sm:$0xff]   ;;  %v11506_v54 = vld [vmem:[#allocation2 + $0x15a8] ss:$16 sps:$4 sm:$0xff]  }
 0x2eb   :  { %6783 = vmatpush1.bf16.msra.mxu0 %v11419_v55  ;;  %7471 = vmatpush1.bf16.msra.mxu1 %v11422_v56  ;;  %v11511_v55 = vld [vmem:[#allocation2 + $0x15c4] ss:$16 sps:$4 sm:$0xff]   ;;  %v11514_v56 = vld [vmem:[#allocation2 + $0x15cc] ss:$16 sps:$4 sm:$0xff]  }
 0x2ec   :  { %6795 = vmatprep.subr.bf16.mxu0 %v11427_v57  ;;  %7483 = vmatprep.subr.bf16.mxu1 %v11430_v58  ;;  %v11509_v57 = vld [vmem:[#allocation2 + $0x15c0] ss:$16 sps:$4 sm:$0xff]   ;;  %v11512_v58 = vld [vmem:[#allocation2 + $0x15c8] ss:$16 sps:$4 sm:$0xff]  }
 0x2ee   :  { %6785 = vmatmul.mubr.bf16.vlgmr.msra.gmra.mrb[0].mxu0 %v185_v63  ;;  %7473 = vmatmul.mubr.bf16.vlgmr.msra.gmra.mrb[0].mxu1 %v185_v63  ;;  %v123_v63 = vld [vmem:[%s12711_s0 + $0xa0] sm:$0xff] }
 0x2ef   :  { %6796 = vmatpush1.bf16.msra.mxu0 %v11425_v0  ;;  %7484 = vmatpush1.bf16.msra.mxu1 %v11428_v1  ;;  %v155_v0 = vld [vmem:[%s12711_s0 + $0x1a0] sm:$0xff] }
 0x2f0   :  { %6797 = vmatprep.subr.bf16.mxu0 %v11433_v2  ;;  %7485 = vmatprep.subr.bf16.mxu1 %v11436_v3  ;;  %v11523_v1 = vld [vmem:[#allocation2 + $0x1604] ss:$16 sps:$4 sm:$0xff]   ;;  %v11526_v2 = vld [vmem:[#allocation2 + $0x160c] ss:$16 sps:$4 sm:$0xff]   ;;  %v187_v3 = vpack.c.bf16 %v155_v0, %v123_v63  ;;  %v11605_v63 = vld [vmem:[#allocation2 + $0x17c0] ss:$16 sps:$4 sm:$0xff]  }
 0x2f1   :  { %6827 = vmatprep.mubr.bf16.mxu0 %v188_v4  ;;  %7515 = vmatprep.mubr.bf16.mxu1 %v188_v4  ;;  %v126_v4 = vld [vmem:[%s12711_s0 + $0xb8] sm:$0xff] }
 0x2f2   :  { %v11608_v0 = vld [vmem:[#allocation2 + $0x17c8] ss:$16 sps:$4 sm:$0xff]  }
 0x2f3   :  { %6798 = vmatpush1.bf16.msra.mxu0 %v11431_v5  ;;  %7486 = vmatpush1.bf16.msra.mxu1 %v11434_v6  ;;  %v158_v5 = vld [vmem:[%s12711_s0 + $0x1b8] sm:$0xff]  ;;  %v11521_v6 = vld [vmem:[#allocation2 + $0x1600] ss:$16 sps:$4 sm:$0xff]  }
 0x2f4   :  { %6799 = vmatprep.subr.bf16.mxu0 %v11439_v7  ;;  %7487 = vmatprep.subr.bf16.mxu1 %v11442_v8  ;;  %v11524_v7 = vld [vmem:[#allocation2 + $0x1608] ss:$16 sps:$4 sm:$0xff]   ;;  %v11529_v8 = vld [vmem:[#allocation2 + $0x1624] ss:$16 sps:$4 sm:$0xff]  }
 0x2f7   :  { %6800 = vmatpush1.bf16.msra.mxu0 %v11437_v9  ;;  %7488 = vmatpush1.bf16.msra.mxu1 %v11440_v10  ;;  %v11532_v9 = vld [vmem:[#allocation2 + $0x162c] ss:$16 sps:$4 sm:$0xff]   ;;  %v190_v10 = vpack.c.bf16 %v158_v5, %v126_v4  ;;  %v11614_v4 = vld [vmem:[#allocation2 + $0x17e8] ss:$16 sps:$4 sm:$0xff]   ;;  %v125_v5 = vld [vmem:[%s12711_s0 + $0xb0] sm:$0xff] }
 0x2f8   :  { %6801 = vmatprep.subr.bf16.mxu0 %v11445_v11  ;;  %7489 = vmatprep.subr.bf16.mxu1 %v11448_v12  ;;  %v11527_v11 = vld [vmem:[#allocation2 + $0x1620] ss:$16 sps:$4 sm:$0xff]   ;;  %v11530_v12 = vld [vmem:[#allocation2 + $0x1628] ss:$16 sps:$4 sm:$0xff]  }
 0x2fb   :  { %6802 = vmatpush1.bf16.msra.mxu0 %v11443_v13  ;;  %7490 = vmatpush1.bf16.msra.mxu1 %v11446_v14  ;;  %v11535_v13 = vld [vmem:[#allocation2 + $0x1644] ss:$16 sps:$4 sm:$0xff]   ;;  %v11538_v14 = vld [vmem:[#allocation2 + $0x164c] ss:$16 sps:$4 sm:$0xff]  }
 0x2fc   :  { %6803 = vmatprep.subr.bf16.mxu0 %v11451_v15  ;;  %7491 = vmatprep.subr.bf16.mxu1 %v11454_v16  ;;  %v11533_v15 = vld [vmem:[#allocation2 + $0x1640] ss:$16 sps:$4 sm:$0xff]   ;;  %v11536_v16 = vld [vmem:[#allocation2 + $0x1648] ss:$16 sps:$4 sm:$0xff]  }
 0x2ff   :  { %6804 = vmatpush1.bf16.msra.mxu0 %v11449_v17  ;;  %7492 = vmatpush1.bf16.msra.mxu1 %v11452_v18  ;;  %v11541_v17 = vld [vmem:[#allocation2 + $0x1664] ss:$16 sps:$4 sm:$0xff]   ;;  %v11544_v18 = vld [vmem:[#allocation2 + $0x166c] ss:$16 sps:$4 sm:$0xff]  }
 0x300   :  { %6805 = vmatprep.subr.bf16.mxu0 %v11457_v19  ;;  %7493 = vmatprep.subr.bf16.mxu1 %v11460_v20  ;;  %v11539_v19 = vld [vmem:[#allocation2 + $0x1660] ss:$16 sps:$4 sm:$0xff]   ;;  %v11542_v20 = vld [vmem:[#allocation2 + $0x1668] ss:$16 sps:$4 sm:$0xff]  }
 0x303   :  { %6806 = vmatpush1.bf16.msra.mxu0 %v11455_v21  ;;  %7494 = vmatpush1.bf16.msra.mxu1 %v11458_v22  ;;  %v11547_v21 = vld [vmem:[#allocation2 + $0x1684] ss:$16 sps:$4 sm:$0xff]   ;;  %v11550_v22 = vld [vmem:[#allocation2 + $0x168c] ss:$16 sps:$4 sm:$0xff]  }
 0x304   :  { %6807 = vmatprep.subr.bf16.mxu0 %v11463_v23  ;;  %7495 = vmatprep.subr.bf16.mxu1 %v11466_v24  ;;  %v11545_v23 = vld [vmem:[#allocation2 + $0x1680] ss:$16 sps:$4 sm:$0xff]   ;;  %v11548_v24 = vld [vmem:[#allocation2 + $0x1688] ss:$16 sps:$4 sm:$0xff]  }
 0x307   :  { %6808 = vmatpush1.bf16.msra.mxu0 %v11461_v25  ;;  %7496 = vmatpush1.bf16.msra.mxu1 %v11464_v26  ;;  %v11553_v25 = vld [vmem:[#allocation2 + $0x16a4] ss:$16 sps:$4 sm:$0xff]   ;;  %v11556_v26 = vld [vmem:[#allocation2 + $0x16ac] ss:$16 sps:$4 sm:$0xff]  }
 0x308   :  { %6809 = vmatprep.subr.bf16.mxu0 %v11469_v27  ;;  %7497 = vmatprep.subr.bf16.mxu1 %v11472_v28  ;;  %v11551_v27 = vld [vmem:[#allocation2 + $0x16a0] ss:$16 sps:$4 sm:$0xff]   ;;  %v11554_v28 = vld [vmem:[#allocation2 + $0x16a8] ss:$16 sps:$4 sm:$0xff]  }
 0x30b   :  { %6810 = vmatpush1.bf16.msra.mxu0 %v11467_v29  ;;  %7498 = vmatpush1.bf16.msra.mxu1 %v11470_v30  ;;  %v11559_v29 = vld [vmem:[#allocation2 + $0x16c4] ss:$16 sps:$4 sm:$0xff]   ;;  %v11562_v30 = vld [vmem:[#allocation2 + $0x16cc] ss:$16 sps:$4 sm:$0xff]  }
 0x30c   :  { %6811 = vmatprep.subr.bf16.mxu0 %v11475_v31  ;;  %7499 = vmatprep.subr.bf16.mxu1 %v11478_v32  ;;  %v11557_v31 = vld [vmem:[#allocation2 + $0x16c0] ss:$16 sps:$4 sm:$0xff]   ;;  %v11560_v32 = vld [vmem:[#allocation2 + $0x16c8] ss:$16 sps:$4 sm:$0xff]  }
 0x30f   :  { %6812 = vmatpush1.bf16.msra.mxu0 %v11473_v33  ;;  %7500 = vmatpush1.bf16.msra.mxu1 %v11476_v34  ;;  %v11565_v33 = vld [vmem:[#allocation2 + $0x16e4] ss:$16 sps:$4 sm:$0xff]   ;;  %v11568_v34 = vld [vmem:[#allocation2 + $0x16ec] ss:$16 sps:$4 sm:$0xff]  }
 0x310   :  { %6813 = vmatprep.subr.bf16.mxu0 %v11481_v35  ;;  %7501 = vmatprep.subr.bf16.mxu1 %v11484_v36  ;;  %v11563_v35 = vld [vmem:[#allocation2 + $0x16e0] ss:$16 sps:$4 sm:$0xff]   ;;  %v11566_v36 = vld [vmem:[#allocation2 + $0x16e8] ss:$16 sps:$4 sm:$0xff]  }
 0x313   :  { %6814 = vmatpush1.bf16.msra.mxu0 %v11479_v37  ;;  %7502 = vmatpush1.bf16.msra.mxu1 %v11482_v38  ;;  %v11571_v37 = vld [vmem:[#allocation2 + $0x1704] ss:$16 sps:$4 sm:$0xff]   ;;  %v11574_v38 = vld [vmem:[#allocation2 + $0x170c] ss:$16 sps:$4 sm:$0xff]  }
 0x314   :  { %6815 = vmatprep.subr.bf16.mxu0 %v11487_v39  ;;  %7503 = vmatprep.subr.bf16.mxu1 %v11490_v40  ;;  %v11569_v39 = vld [vmem:[#allocation2 + $0x1700] ss:$16 sps:$4 sm:$0xff]   ;;  %v11572_v40 = vld [vmem:[#allocation2 + $0x1708] ss:$16 sps:$4 sm:$0xff]  }
 0x317   :  { %6816 = vmatpush1.bf16.msra.mxu0 %v11485_v41  ;;  %7504 = vmatpush1.bf16.msra.mxu1 %v11488_v42  ;;  %v11577_v41 = vld [vmem:[#allocation2 + $0x1724] ss:$16 sps:$4 sm:$0xff]   ;;  %v11580_v42 = vld [vmem:[#allocation2 + $0x172c] ss:$16 sps:$4 sm:$0xff]  }
 0x318   :  { %6817 = vmatprep.subr.bf16.mxu0 %v11493_v43  ;;  %7505 = vmatprep.subr.bf16.mxu1 %v11496_v44  ;;  %v11575_v43 = vld [vmem:[#allocation2 + $0x1720] ss:$16 sps:$4 sm:$0xff]   ;;  %v11578_v44 = vld [vmem:[#allocation2 + $0x1728] ss:$16 sps:$4 sm:$0xff]  }
 0x31b   :  { %6818 = vmatpush1.bf16.msra.mxu0 %v11491_v45  ;;  %7506 = vmatpush1.bf16.msra.mxu1 %v11494_v46  ;;  %v11583_v45 = vld [vmem:[#allocation2 + $0x1744] ss:$16 sps:$4 sm:$0xff]   ;;  %v11586_v46 = vld [vmem:[#allocation2 + $0x174c] ss:$16 sps:$4 sm:$0xff]  }
 0x31c   :  { %6819 = vmatprep.subr.bf16.mxu0 %v11499_v47  ;;  %7507 = vmatprep.subr.bf16.mxu1 %v11502_v48  ;;  %v11581_v47 = vld [vmem:[#allocation2 + $0x1740] ss:$16 sps:$4 sm:$0xff]   ;;  %v11584_v48 = vld [vmem:[#allocation2 + $0x1748] ss:$16 sps:$4 sm:$0xff]  }
 0x31f   :  { %6820 = vmatpush1.bf16.msra.mxu0 %v11497_v49  ;;  %7508 = vmatpush1.bf16.msra.mxu1 %v11500_v50  ;;  %v11589_v49 = vld [vmem:[#allocation2 + $0x1764] ss:$16 sps:$4 sm:$0xff]   ;;  %v11592_v50 = vld [vmem:[#allocation2 + $0x176c] ss:$16 sps:$4 sm:$0xff]  }
 0x320   :  { %6821 = vmatprep.subr.bf16.mxu0 %v11505_v51  ;;  %7509 = vmatprep.subr.bf16.mxu1 %v11508_v52  ;;  %v11587_v51 = vld [vmem:[#allocation2 + $0x1760] ss:$16 sps:$4 sm:$0xff]   ;;  %v11590_v52 = vld [vmem:[#allocation2 + $0x1768] ss:$16 sps:$4 sm:$0xff]  }
 0x323   :  { %6822 = vmatpush1.bf16.msra.mxu0 %v11503_v53  ;;  %7510 = vmatpush1.bf16.msra.mxu1 %v11506_v54  ;;  %v11595_v53 = vld [vmem:[#allocation2 + $0x1784] ss:$16 sps:$4 sm:$0xff]   ;;  %v11598_v54 = vld [vmem:[#allocation2 + $0x178c] ss:$16 sps:$4 sm:$0xff]  }
 0x324   :  { %6823 = vmatprep.subr.bf16.mxu0 %v11511_v55  ;;  %7511 = vmatprep.subr.bf16.mxu1 %v11514_v56  ;;  %v11593_v55 = vld [vmem:[#allocation2 + $0x1780] ss:$16 sps:$4 sm:$0xff]   ;;  %v11596_v56 = vld [vmem:[#allocation2 + $0x1788] ss:$16 sps:$4 sm:$0xff]  }
 0x327   :  { %6824 = vmatpush1.bf16.msra.mxu0 %v11509_v57  ;;  %7512 = vmatpush1.bf16.msra.mxu1 %v11512_v58  ;;  %v11601_v57 = vld [vmem:[#allocation2 + $0x17a4] ss:$16 sps:$4 sm:$0xff]   ;;  %v11604_v58 = vld [vmem:[#allocation2 + $0x17ac] ss:$16 sps:$4 sm:$0xff]  }
 0x328   :  { %6825 = vmatprep.subr.bf16.mxu0 %v11517_v59  ;;  %7513 = vmatprep.subr.bf16.mxu1 %v11520_v60  ;;  %v11599_v59 = vld [vmem:[#allocation2 + $0x17a0] ss:$16 sps:$4 sm:$0xff]   ;;  %v11602_v60 = vld [vmem:[#allocation2 + $0x17a8] ss:$16 sps:$4 sm:$0xff]  }
 0x32b   :  { %6826 = vmatpush1.bf16.msra.mxu0 %v11515_v61  ;;  %7514 = vmatpush1.bf16.msra.mxu1 %v11518_v62  ;;  %v11607_v61 = vld [vmem:[#allocation2 + $0x17c4] ss:$16 sps:$4 sm:$0xff]   ;;  %v11610_v62 = vld [vmem:[#allocation2 + $0x17cc] ss:$16 sps:$4 sm:$0xff]  }
 0x32c   :  { %6838 = vmatprep.subr.bf16.mxu0 %v11523_v1  ;;  %7526 = vmatprep.subr.bf16.mxu1 %v11526_v2  ;;  %v11613_v1 = vld [vmem:[#allocation2 + $0x17e4] ss:$16 sps:$4 sm:$0xff]   ;;  %v11616_v2 = vld [vmem:[#allocation2 + $0x17ec] ss:$16 sps:$4 sm:$0xff]  }
 0x32e   :  { %6828 = vmatmul.mubr.bf16.vlgmr.msra.gmra.mrb[0].mxu0 %v187_v3  ;;  %7516 = vmatmul.mubr.bf16.vlgmr.msra.gmra.mrb[0].mxu1 %v187_v3  ;;  %v11611_v3 = vld [vmem:[#allocation2 + $0x17e0] ss:$16 sps:$4 sm:$0xff]  }
 0x32f   :  { %6839 = vmatpush1.bf16.msra.mxu0 %v11521_v6  ;;  %7527 = vmatpush1.bf16.msra.mxu1 %v11524_v7  ;;  %v157_v6 = vld [vmem:[%s12711_s0 + $0x1b0] sm:$0xff] }
 0x330   :  { %6840 = vmatprep.subr.bf16.mxu0 %v11529_v8  ;;  %7528 = vmatprep.subr.bf16.mxu1 %v11532_v9  ;;  %v11619_v7 = vld [vmem:[#allocation2 + $0x1804] ss:$16 sps:$4 sm:$0xff]   ;;  %v11622_v8 = vld [vmem:[#allocation2 + $0x180c] ss:$16 sps:$4 sm:$0xff]   ;;  %v189_v9 = vpack.c.bf16 %v157_v6, %v125_v5  ;;  %v11701_v5 = vld [vmem:[#allocation2 + $0x19c0] ss:$16 sps:$4 sm:$0xff]  }
 0x331   :  { %6870 = vmatprep.mubr.bf16.mxu0 %v190_v10  ;;  %7558 = vmatprep.mubr.bf16.mxu1 %v190_v10  ;;  %v128_v10 = vld [vmem:[%s12711_s0 + $0xc8] sm:$0xff] }
 0x332   :  { %v11704_v6 = vld [vmem:[#allocation2 + $0x19c8] ss:$16 sps:$4 sm:$0xff]  }
 0x333   :  { %6841 = vmatpush1.bf16.msra.mxu0 %v11527_v11  ;;  %7529 = vmatpush1.bf16.msra.mxu1 %v11530_v12  ;;  %v160_v11 = vld [vmem:[%s12711_s0 + $0x1c8] sm:$0xff]  ;;  %v11617_v12 = vld [vmem:[#allocation2 + $0x1800] ss:$16 sps:$4 sm:$0xff]  }
 0x334   :  { %6842 = vmatprep.subr.bf16.mxu0 %v11535_v13  ;;  %7530 = vmatprep.subr.bf16.mxu1 %v11538_v14  ;;  %v11620_v13 = vld [vmem:[#allocation2 + $0x1808] ss:$16 sps:$4 sm:$0xff]   ;;  %v11625_v14 = vld [vmem:[#allocation2 + $0x1824] ss:$16 sps:$4 sm:$0xff]  }
 0x337   :  { %6843 = vmatpush1.bf16.msra.mxu0 %v11533_v15  ;;  %7531 = vmatpush1.bf16.msra.mxu1 %v11536_v16  ;;  %v11628_v15 = vld [vmem:[#allocation2 + $0x182c] ss:$16 sps:$4 sm:$0xff]   ;;  %v192_v16 = vpack.c.bf16 %v160_v11, %v128_v10  ;;  %v11710_v10 = vld [vmem:[#allocation2 + $0x19e8] ss:$16 sps:$4 sm:$0xff]   ;;  %v127_v11 = vld [vmem:[%s12711_s0 + $0xc0] sm:$0xff] }
 0x338   :  { %6844 = vmatprep.subr.bf16.mxu0 %v11541_v17  ;;  %7532 = vmatprep.subr.bf16.mxu1 %v11544_v18  ;;  %v11623_v17 = vld [vmem:[#allocation2 + $0x1820] ss:$16 sps:$4 sm:$0xff]   ;;  %v11626_v18 = vld [vmem:[#allocation2 + $0x1828] ss:$16 sps:$4 sm:$0xff]  }
 0x33b   :  { %6845 = vmatpush1.bf16.msra.mxu0 %v11539_v19  ;;  %7533 = vmatpush1.bf16.msra.mxu1 %v11542_v20  ;;  %v11631_v19 = vld [vmem:[#allocation2 + $0x1844] ss:$16 sps:$4 sm:$0xff]   ;;  %v11634_v20 = vld [vmem:[#allocation2 + $0x184c] ss:$16 sps:$4 sm:$0xff]  }
 0x33c   :  { %6846 = vmatprep.subr.bf16.mxu0 %v11547_v21  ;;  %7534 = vmatprep.subr.bf16.mxu1 %v11550_v22  ;;  %v11629_v21 = vld [vmem:[#allocation2 + $0x1840] ss:$16 sps:$4 sm:$0xff]   ;;  %v11632_v22 = vld [vmem:[#allocation2 + $0x1848] ss:$16 sps:$4 sm:$0xff]  }
 0x33f   :  { %6847 = vmatpush1.bf16.msra.mxu0 %v11545_v23  ;;  %7535 = vmatpush1.bf16.msra.mxu1 %v11548_v24  ;;  %v11637_v23 = vld [vmem:[#allocation2 + $0x1864] ss:$16 sps:$4 sm:$0xff]   ;;  %v11640_v24 = vld [vmem:[#allocation2 + $0x186c] ss:$16 sps:$4 sm:$0xff]  }
 0x340   :  { %6848 = vmatprep.subr.bf16.mxu0 %v11553_v25  ;;  %7536 = vmatprep.subr.bf16.mxu1 %v11556_v26  ;;  %v11635_v25 = vld [vmem:[#allocation2 + $0x1860] ss:$16 sps:$4 sm:$0xff]   ;;  %v11638_v26 = vld [vmem:[#allocation2 + $0x1868] ss:$16 sps:$4 sm:$0xff]  }
 0x343   :  { %6849 = vmatpush1.bf16.msra.mxu0 %v11551_v27  ;;  %7537 = vmatpush1.bf16.msra.mxu1 %v11554_v28  ;;  %v11643_v27 = vld [vmem:[#allocation2 + $0x1884] ss:$16 sps:$4 sm:$0xff]   ;;  %v11646_v28 = vld [vmem:[#allocation2 + $0x188c] ss:$16 sps:$4 sm:$0xff]  }
 0x344   :  { %6850 = vmatprep.subr.bf16.mxu0 %v11559_v29  ;;  %7538 = vmatprep.subr.bf16.mxu1 %v11562_v30  ;;  %v11641_v29 = vld [vmem:[#allocation2 + $0x1880] ss:$16 sps:$4 sm:$0xff]   ;;  %v11644_v30 = vld [vmem:[#allocation2 + $0x1888] ss:$16 sps:$4 sm:$0xff]  }
 0x347   :  { %6851 = vmatpush1.bf16.msra.mxu0 %v11557_v31  ;;  %7539 = vmatpush1.bf16.msra.mxu1 %v11560_v32  ;;  %v11649_v31 = vld [vmem:[#allocation2 + $0x18a4] ss:$16 sps:$4 sm:$0xff]   ;;  %v11652_v32 = vld [vmem:[#allocation2 + $0x18ac] ss:$16 sps:$4 sm:$0xff]  }
 0x348   :  { %6852 = vmatprep.subr.bf16.mxu0 %v11565_v33  ;;  %7540 = vmatprep.subr.bf16.mxu1 %v11568_v34  ;;  %v11647_v33 = vld [vmem:[#allocation2 + $0x18a0] ss:$16 sps:$4 sm:$0xff]   ;;  %v11650_v34 = vld [vmem:[#allocation2 + $0x18a8] ss:$16 sps:$4 sm:$0xff]  }
 0x34b   :  { %6853 = vmatpush1.bf16.msra.mxu0 %v11563_v35  ;;  %7541 = vmatpush1.bf16.msra.mxu1 %v11566_v36  ;;  %v11655_v35 = vld [vmem:[#allocation2 + $0x18c4] ss:$16 sps:$4 sm:$0xff]   ;;  %v11658_v36 = vld [vmem:[#allocation2 + $0x18cc] ss:$16 sps:$4 sm:$0xff]  }
 0x34c   :  { %6854 = vmatprep.subr.bf16.mxu0 %v11571_v37  ;;  %7542 = vmatprep.subr.bf16.mxu1 %v11574_v38  ;;  %v11653_v37 = vld [vmem:[#allocation2 + $0x18c0] ss:$16 sps:$4 sm:$0xff]   ;;  %v11656_v38 = vld [vmem:[#allocation2 + $0x18c8] ss:$16 sps:$4 sm:$0xff]  }
 0x34f   :  { %6855 = vmatpush1.bf16.msra.mxu0 %v11569_v39  ;;  %7543 = vmatpush1.bf16.msra.mxu1 %v11572_v40  ;;  %v11661_v39 = vld [vmem:[#allocation2 + $0x18e4] ss:$16 sps:$4 sm:$0xff]   ;;  %v11664_v40 = vld [vmem:[#allocation2 + $0x18ec] ss:$16 sps:$4 sm:$0xff]  }
 0x350   :  { %6856 = vmatprep.subr.bf16.mxu0 %v11577_v41  ;;  %7544 = vmatprep.subr.bf16.mxu1 %v11580_v42  ;;  %v11659_v41 = vld [vmem:[#allocation2 + $0x18e0] ss:$16 sps:$4 sm:$0xff]   ;;  %v11662_v42 = vld [vmem:[#allocation2 + $0x18e8] ss:$16 sps:$4 sm:$0xff]  }
 0x353   :  { %6857 = vmatpush1.bf16.msra.mxu0 %v11575_v43  ;;  %7545 = vmatpush1.bf16.msra.mxu1 %v11578_v44  ;;  %v11667_v43 = vld [vmem:[#allocation2 + $0x1904] ss:$16 sps:$4 sm:$0xff]   ;;  %v11670_v44 = vld [vmem:[#allocation2 + $0x190c] ss:$16 sps:$4 sm:$0xff]  }
 0x354   :  { %6858 = vmatprep.subr.bf16.mxu0 %v11583_v45  ;;  %7546 = vmatprep.subr.bf16.mxu1 %v11586_v46  ;;  %v11665_v45 = vld [vmem:[#allocation2 + $0x1900] ss:$16 sps:$4 sm:$0xff]   ;;  %v11668_v46 = vld [vmem:[#allocation2 + $0x1908] ss:$16 sps:$4 sm:$0xff]  }
 0x357   :  { %6859 = vmatpush1.bf16.msra.mxu0 %v11581_v47  ;;  %7547 = vmatpush1.bf16.msra.mxu1 %v11584_v48  ;;  %v11673_v47 = vld [vmem:[#allocation2 + $0x1924] ss:$16 sps:$4 sm:$0xff]   ;;  %v11676_v48 = vld [vmem:[#allocation2 + $0x192c] ss:$16 sps:$4 sm:$0xff]  }
 0x358   :  { %6860 = vmatprep.subr.bf16.mxu0 %v11589_v49  ;;  %7548 = vmatprep.subr.bf16.mxu1 %v11592_v50  ;;  %v11671_v49 = vld [vmem:[#allocation2 + $0x1920] ss:$16 sps:$4 sm:$0xff]   ;;  %v11674_v50 = vld [vmem:[#allocation2 + $0x1928] ss:$16 sps:$4 sm:$0xff]  }
 0x35b   :  { %6861 = vmatpush1.bf16.msra.mxu0 %v11587_v51  ;;  %7549 = vmatpush1.bf16.msra.mxu1 %v11590_v52  ;;  %v11679_v51 = vld [vmem:[#allocation2 + $0x1944] ss:$16 sps:$4 sm:$0xff]   ;;  %v11682_v52 = vld [vmem:[#allocation2 + $0x194c] ss:$16 sps:$4 sm:$0xff]  }
 0x35c   :  { %6862 = vmatprep.subr.bf16.mxu0 %v11595_v53  ;;  %7550 = vmatprep.subr.bf16.mxu1 %v11598_v54  ;;  %v11677_v53 = vld [vmem:[#allocation2 + $0x1940] ss:$16 sps:$4 sm:$0xff]   ;;  %v11680_v54 = vld [vmem:[#allocation2 + $0x1948] ss:$16 sps:$4 sm:$0xff]  }
 0x35f   :  { %6863 = vmatpush1.bf16.msra.mxu0 %v11593_v55  ;;  %7551 = vmatpush1.bf16.msra.mxu1 %v11596_v56  ;;  %v11685_v55 = vld [vmem:[#allocation2 + $0x1964] ss:$16 sps:$4 sm:$0xff]   ;;  %v11688_v56 = vld [vmem:[#allocation2 + $0x196c] ss:$16 sps:$4 sm:$0xff]  }
 0x360   :  { %6864 = vmatprep.subr.bf16.mxu0 %v11601_v57  ;;  %7552 = vmatprep.subr.bf16.mxu1 %v11604_v58  ;;  %v11683_v57 = vld [vmem:[#allocation2 + $0x1960] ss:$16 sps:$4 sm:$0xff]   ;;  %v11686_v58 = vld [vmem:[#allocation2 + $0x1968] ss:$16 sps:$4 sm:$0xff]  }
 0x363   :  { %6865 = vmatpush1.bf16.msra.mxu0 %v11599_v59  ;;  %7553 = vmatpush1.bf16.msra.mxu1 %v11602_v60  ;;  %v11691_v59 = vld [vmem:[#allocation2 + $0x1984] ss:$16 sps:$4 sm:$0xff]   ;;  %v11694_v60 = vld [vmem:[#allocation2 + $0x198c] ss:$16 sps:$4 sm:$0xff]  }
 0x364   :  { %6866 = vmatprep.subr.bf16.mxu0 %v11607_v61  ;;  %7554 = vmatprep.subr.bf16.mxu1 %v11610_v62  ;;  %v11689_v61 = vld [vmem:[#allocation2 + $0x1980] ss:$16 sps:$4 sm:$0xff]   ;;  %v11692_v62 = vld [vmem:[#allocation2 + $0x1988] ss:$16 sps:$4 sm:$0xff]  }
 0x367   :  { %6867 = vmatpush1.bf16.msra.mxu0 %v11605_v63  ;;  %7555 = vmatpush1.bf16.msra.mxu1 %v11608_v0  ;;  %v11697_v63 = vld [vmem:[#allocation2 + $0x19a4] ss:$16 sps:$4 sm:$0xff]   ;;  %v11700_v0 = vld [vmem:[#allocation2 + $0x19ac] ss:$16 sps:$4 sm:$0xff]  }
 0x368   :  { %6868 = vmatprep.subr.bf16.mxu0 %v11613_v1  ;;  %7556 = vmatprep.subr.bf16.mxu1 %v11616_v2  ;;  %v11695_v1 = vld [vmem:[#allocation2 + $0x19a0] ss:$16 sps:$4 sm:$0xff]   ;;  %v11698_v2 = vld [vmem:[#allocation2 + $0x19a8] ss:$16 sps:$4 sm:$0xff]  }
 0x36b   :  { %6869 = vmatpush1.bf16.msra.mxu0 %v11611_v3  ;;  %7557 = vmatpush1.bf16.msra.mxu1 %v11614_v4  ;;  %v11703_v3 = vld [vmem:[#allocation2 + $0x19c4] ss:$16 sps:$4 sm:$0xff]   ;;  %v11706_v4 = vld [vmem:[#allocation2 + $0x19cc] ss:$16 sps:$4 sm:$0xff]  }
 0x36c   :  { %6881 = vmatprep.subr.bf16.mxu0 %v11619_v7  ;;  %7569 = vmatprep.subr.bf16.mxu1 %v11622_v8  ;;  %v11709_v7 = vld [vmem:[#allocation2 + $0x19e4] ss:$16 sps:$4 sm:$0xff]   ;;  %v11712_v8 = vld [vmem:[#allocation2 + $0x19ec] ss:$16 sps:$4 sm:$0xff]  }
 0x36e   :  { %6871 = vmatmul.mubr.bf16.vlgmr.msra.gmra.mrb[0].mxu0 %v189_v9  ;;  %7559 = vmatmul.mubr.bf16.vlgmr.msra.gmra.mrb[0].mxu1 %v189_v9  ;;  %v11707_v9 = vld [vmem:[#allocation2 + $0x19e0] ss:$16 sps:$4 sm:$0xff]  }
 0x36f   :  { %6882 = vmatpush1.bf16.msra.mxu0 %v11617_v12  ;;  %7570 = vmatpush1.bf16.msra.mxu1 %v11620_v13  ;;  %v159_v12 = vld [vmem:[%s12711_s0 + $0x1c0] sm:$0xff] }
 0x370   :  { %6883 = vmatprep.subr.bf16.mxu0 %v11625_v14  ;;  %7571 = vmatprep.subr.bf16.mxu1 %v11628_v15  ;;  %v11715_v13 = vld [vmem:[#allocation2 + $0x1a04] ss:$16 sps:$4 sm:$0xff]   ;;  %v11718_v14 = vld [vmem:[#allocation2 + $0x1a0c] ss:$16 sps:$4 sm:$0xff]   ;;  %v191_v15 = vpack.c.bf16 %v159_v12, %v127_v11  ;;  %v11797_v11 = vld [vmem:[#allocation2 + $0x1bc0] ss:$16 sps:$4 sm:$0xff]  }
 0x371   :  { %6913 = vmatprep.mubr.bf16.mxu0 %v192_v16  ;;  %7601 = vmatprep.mubr.bf16.mxu1 %v192_v16  ;;  %v130_v16 = vld [vmem:[%s12711_s0 + $0xd8] sm:$0xff] }
 0x372   :  { %v11800_v12 = vld [vmem:[#allocation2 + $0x1bc8] ss:$16 sps:$4 sm:$0xff]  }
 0x373   :  { %6884 = vmatpush1.bf16.msra.mxu0 %v11623_v17  ;;  %7572 = vmatpush1.bf16.msra.mxu1 %v11626_v18  ;;  %v162_v17 = vld [vmem:[%s12711_s0 + $0x1d8] sm:$0xff]  ;;  %v11713_v18 = vld [vmem:[#allocation2 + $0x1a00] ss:$16 sps:$4 sm:$0xff]  }
 0x374   :  { %6885 = vmatprep.subr.bf16.mxu0 %v11631_v19  ;;  %7573 = vmatprep.subr.bf16.mxu1 %v11634_v20  ;;  %v11716_v19 = vld [vmem:[#allocation2 + $0x1a08] ss:$16 sps:$4 sm:$0xff]   ;;  %v11721_v20 = vld [vmem:[#allocation2 + $0x1a24] ss:$16 sps:$4 sm:$0xff]  }
 0x377   :  { %6886 = vmatpush1.bf16.msra.mxu0 %v11629_v21  ;;  %7574 = vmatpush1.bf16.msra.mxu1 %v11632_v22  ;;  %v11724_v21 = vld [vmem:[#allocation2 + $0x1a2c] ss:$16 sps:$4 sm:$0xff]   ;;  %v194_v22 = vpack.c.bf16 %v162_v17, %v130_v16  ;;  %v11806_v16 = vld [vmem:[#allocation2 + $0x1be8] ss:$16 sps:$4 sm:$0xff]   ;;  %v129_v17 = vld [vmem:[%s12711_s0 + $0xd0] sm:$0xff] }
 0x378   :  { %6887 = vmatprep.subr.bf16.mxu0 %v11637_v23  ;;  %7575 = vmatprep.subr.bf16.mxu1 %v11640_v24  ;;  %v11719_v23 = vld [vmem:[#allocation2 + $0x1a20] ss:$16 sps:$4 sm:$0xff]   ;;  %v11722_v24 = vld [vmem:[#allocation2 + $0x1a28] ss:$16 sps:$4 sm:$0xff]  }
 0x37b   :  { %6888 = vmatpush1.bf16.msra.mxu0 %v11635_v25  ;;  %7576 = vmatpush1.bf16.msra.mxu1 %v11638_v26  ;;  %v11727_v25 = vld [vmem:[#allocation2 + $0x1a44] ss:$16 sps:$4 sm:$0xff]   ;;  %v11730_v26 = vld [vmem:[#allocation2 + $0x1a4c] ss:$16 sps:$4 sm:$0xff]  }
 0x37c   :  { %6889 = vmatprep.subr.bf16.mxu0 %v11643_v27  ;;  %7577 = vmatprep.subr.bf16.mxu1 %v11646_v28  ;;  %v11725_v27 = vld [vmem:[#allocation2 + $0x1a40] ss:$16 sps:$4 sm:$0xff]   ;;  %v11728_v28 = vld [vmem:[#allocation2 + $0x1a48] ss:$16 sps:$4 sm:$0xff]  }
 0x37f   :  { %6890 = vmatpush1.bf16.msra.mxu0 %v11641_v29  ;;  %7578 = vmatpush1.bf16.msra.mxu1 %v11644_v30  ;;  %v11733_v29 = vld [vmem:[#allocation2 + $0x1a64] ss:$16 sps:$4 sm:$0xff]   ;;  %v11736_v30 = vld [vmem:[#allocation2 + $0x1a6c] ss:$16 sps:$4 sm:$0xff]  }
 0x380   :  { %6891 = vmatprep.subr.bf16.mxu0 %v11649_v31  ;;  %7579 = vmatprep.subr.bf16.mxu1 %v11652_v32  ;;  %v11731_v31 = vld [vmem:[#allocation2 + $0x1a60] ss:$16 sps:$4 sm:$0xff]   ;;  %v11734_v32 = vld [vmem:[#allocation2 + $0x1a68] ss:$16 sps:$4 sm:$0xff]  }
 0x383   :  { %6892 = vmatpush1.bf16.msra.mxu0 %v11647_v33  ;;  %7580 = vmatpush1.bf16.msra.mxu1 %v11650_v34  ;;  %v11739_v33 = vld [vmem:[#allocation2 + $0x1a84] ss:$16 sps:$4 sm:$0xff]   ;;  %v11742_v34 = vld [vmem:[#allocation2 + $0x1a8c] ss:$16 sps:$4 sm:$0xff]  }
 0x384   :  { %6893 = vmatprep.subr.bf16.mxu0 %v11655_v35  ;;  %7581 = vmatprep.subr.bf16.mxu1 %v11658_v36  ;;  %v11737_v35 = vld [vmem:[#allocation2 + $0x1a80] ss:$16 sps:$4 sm:$0xff]   ;;  %v11740_v36 = vld [vmem:[#allocation2 + $0x1a88] ss:$16 sps:$4 sm:$0xff]  }
 0x387   :  { %6894 = vmatpush1.bf16.msra.mxu0 %v11653_v37  ;;  %7582 = vmatpush1.bf16.msra.mxu1 %v11656_v38  ;;  %v11745_v37 = vld [vmem:[#allocation2 + $0x1aa4] ss:$16 sps:$4 sm:$0xff]   ;;  %v11748_v38 = vld [vmem:[#allocation2 + $0x1aac] ss:$16 sps:$4 sm:$0xff]  }
 0x388   :  { %6895 = vmatprep.subr.bf16.mxu0 %v11661_v39  ;;  %7583 = vmatprep.subr.bf16.mxu1 %v11664_v40  ;;  %v11743_v39 = vld [vmem:[#allocation2 + $0x1aa0] ss:$16 sps:$4 sm:$0xff]   ;;  %v11746_v40 = vld [vmem:[#allocation2 + $0x1aa8] ss:$16 sps:$4 sm:$0xff]  }
 0x38b   :  { %6896 = vmatpush1.bf16.msra.mxu0 %v11659_v41  ;;  %7584 = vmatpush1.bf16.msra.mxu1 %v11662_v42  ;;  %v11751_v41 = vld [vmem:[#allocation2 + $0x1ac4] ss:$16 sps:$4 sm:$0xff]   ;;  %v11754_v42 = vld [vmem:[#allocation2 + $0x1acc] ss:$16 sps:$4 sm:$0xff]  }
 0x38c   :  { %6897 = vmatprep.subr.bf16.mxu0 %v11667_v43  ;;  %7585 = vmatprep.subr.bf16.mxu1 %v11670_v44  ;;  %v11749_v43 = vld [vmem:[#allocation2 + $0x1ac0] ss:$16 sps:$4 sm:$0xff]   ;;  %v11752_v44 = vld [vmem:[#allocation2 + $0x1ac8] ss:$16 sps:$4 sm:$0xff]  }
 0x38f   :  { %6898 = vmatpush1.bf16.msra.mxu0 %v11665_v45  ;;  %7586 = vmatpush1.bf16.msra.mxu1 %v11668_v46  ;;  %v11757_v45 = vld [vmem:[#allocation2 + $0x1ae4] ss:$16 sps:$4 sm:$0xff]   ;;  %v11760_v46 = vld [vmem:[#allocation2 + $0x1aec] ss:$16 sps:$4 sm:$0xff]  }
 0x390   :  { %6899 = vmatprep.subr.bf16.mxu0 %v11673_v47  ;;  %7587 = vmatprep.subr.bf16.mxu1 %v11676_v48  ;;  %v11755_v47 = vld [vmem:[#allocation2 + $0x1ae0] ss:$16 sps:$4 sm:$0xff]   ;;  %v11758_v48 = vld [vmem:[#allocation2 + $0x1ae8] ss:$16 sps:$4 sm:$0xff]  }
 0x393   :  { %6900 = vmatpush1.bf16.msra.mxu0 %v11671_v49  ;;  %7588 = vmatpush1.bf16.msra.mxu1 %v11674_v50  ;;  %v11763_v49 = vld [vmem:[#allocation2 + $0x1b04] ss:$16 sps:$4 sm:$0xff]   ;;  %v11766_v50 = vld [vmem:[#allocation2 + $0x1b0c] ss:$16 sps:$4 sm:$0xff]  }
 0x394   :  { %6901 = vmatprep.subr.bf16.mxu0 %v11679_v51  ;;  %7589 = vmatprep.subr.bf16.mxu1 %v11682_v52  ;;  %v11761_v51 = vld [vmem:[#allocation2 + $0x1b00] ss:$16 sps:$4 sm:$0xff]   ;;  %v11764_v52 = vld [vmem:[#allocation2 + $0x1b08] ss:$16 sps:$4 sm:$0xff]  }
 0x397   :  { %6902 = vmatpush1.bf16.msra.mxu0 %v11677_v53  ;;  %7590 = vmatpush1.bf16.msra.mxu1 %v11680_v54  ;;  %v11769_v53 = vld [vmem:[#allocation2 + $0x1b24] ss:$16 sps:$4 sm:$0xff]   ;;  %v11772_v54 = vld [vmem:[#allocation2 + $0x1b2c] ss:$16 sps:$4 sm:$0xff]  }
 0x398   :  { %6903 = vmatprep.subr.bf16.mxu0 %v11685_v55  ;;  %7591 = vmatprep.subr.bf16.mxu1 %v11688_v56  ;;  %v11767_v55 = vld [vmem:[#allocation2 + $0x1b20] ss:$16 sps:$4 sm:$0xff]   ;;  %v11770_v56 = vld [vmem:[#allocation2 + $0x1b28] ss:$16 sps:$4 sm:$0xff]  }
 0x39b   :  { %6904 = vmatpush1.bf16.msra.mxu0 %v11683_v57  ;;  %7592 = vmatpush1.bf16.msra.mxu1 %v11686_v58  ;;  %v11775_v57 = vld [vmem:[#allocation2 + $0x1b44] ss:$16 sps:$4 sm:$0xff]   ;;  %v11778_v58 = vld [vmem:[#allocation2 + $0x1b4c] ss:$16 sps:$4 sm:$0xff]  }
 0x39c   :  { %6905 = vmatprep.subr.bf16.mxu0 %v11691_v59  ;;  %7593 = vmatprep.subr.bf16.mxu1 %v11694_v60  ;;  %v11773_v59 = vld [vmem:[#allocation2 + $0x1b40] ss:$16 sps:$4 sm:$0xff]   ;;  %v11776_v60 = vld [vmem:[#allocation2 + $0x1b48] ss:$16 sps:$4 sm:$0xff]  }
 0x39f   :  { %6906 = vmatpush1.bf16.msra.mxu0 %v11689_v61  ;;  %7594 = vmatpush1.bf16.msra.mxu1 %v11692_v62  ;;  %v11781_v61 = vld [vmem:[#allocation2 + $0x1b64] ss:$16 sps:$4 sm:$0xff]   ;;  %v11784_v62 = vld [vmem:[#allocation2 + $0x1b6c] ss:$16 sps:$4 sm:$0xff]  }
 0x3a0   :  { %6907 = vmatprep.subr.bf16.mxu0 %v11697_v63  ;;  %7595 = vmatprep.subr.bf16.mxu1 %v11700_v0  ;;  %v11779_v63 = vld [vmem:[#allocation2 + $0x1b60] ss:$16 sps:$4 sm:$0xff]   ;;  %v11782_v0 = vld [vmem:[#allocation2 + $0x1b68] ss:$16 sps:$4 sm:$0xff]  }
 0x3a3   :  { %6908 = vmatpush1.bf16.msra.mxu0 %v11695_v1  ;;  %7596 = vmatpush1.bf16.msra.mxu1 %v11698_v2  ;;  %v11787_v1 = vld [vmem:[#allocation2 + $0x1b84] ss:$16 sps:$4 sm:$0xff]   ;;  %v11790_v2 = vld [vmem:[#allocation2 + $0x1b8c] ss:$16 sps:$4 sm:$0xff]  }
 0x3a4   :  { %6909 = vmatprep.subr.bf16.mxu0 %v11703_v3  ;;  %7597 = vmatprep.subr.bf16.mxu1 %v11706_v4  ;;  %v11785_v3 = vld [vmem:[#allocation2 + $0x1b80] ss:$16 sps:$4 sm:$0xff]   ;;  %v11788_v4 = vld [vmem:[#allocation2 + $0x1b88] ss:$16 sps:$4 sm:$0xff]  }
 0x3a7   :  { %6910 = vmatpush1.bf16.msra.mxu0 %v11701_v5  ;;  %7598 = vmatpush1.bf16.msra.mxu1 %v11704_v6  ;;  %v11793_v5 = vld [vmem:[#allocation2 + $0x1ba4] ss:$16 sps:$4 sm:$0xff]   ;;  %v11796_v6 = vld [vmem:[#allocation2 + $0x1bac] ss:$16 sps:$4 sm:$0xff]  }
 0x3a8   :  { %6911 = vmatprep.subr.bf16.mxu0 %v11709_v7  ;;  %7599 = vmatprep.subr.bf16.mxu1 %v11712_v8  ;;  %v11791_v7 = vld [vmem:[#allocation2 + $0x1ba0] ss:$16 sps:$4 sm:$0xff]   ;;  %v11794_v8 = vld [vmem:[#allocation2 + $0x1ba8] ss:$16 sps:$4 sm:$0xff]  }
 0x3ab   :  { %6912 = vmatpush1.bf16.msra.mxu0 %v11707_v9  ;;  %7600 = vmatpush1.bf16.msra.mxu1 %v11710_v10  ;;  %v11799_v9 = vld [vmem:[#allocation2 + $0x1bc4] ss:$16 sps:$4 sm:$0xff]   ;;  %v11802_v10 = vld [vmem:[#allocation2 + $0x1bcc] ss:$16 sps:$4 sm:$0xff]  }
 0x3ac   :  { %6924 = vmatprep.subr.bf16.mxu0 %v11715_v13  ;;  %7612 = vmatprep.subr.bf16.mxu1 %v11718_v14  ;;  %v11805_v13 = vld [vmem:[#allocation2 + $0x1be4] ss:$16 sps:$4 sm:$0xff]   ;;  %v11808_v14 = vld [vmem:[#allocation2 + $0x1bec] ss:$16 sps:$4 sm:$0xff]  }
 0x3ae   :  { %6914 = vmatmul.mubr.bf16.vlgmr.msra.gmra.mrb[0].mxu0 %v191_v15  ;;  %7602 = vmatmul.mubr.bf16.vlgmr.msra.gmra.mrb[0].mxu1 %v191_v15  ;;  %v11803_v15 = vld [vmem:[#allocation2 + $0x1be0] ss:$16 sps:$4 sm:$0xff]  }
 0x3af   :  { %6925 = vmatpush1.bf16.msra.mxu0 %v11713_v18  ;;  %7613 = vmatpush1.bf16.msra.mxu1 %v11716_v19  ;;  %v161_v18 = vld [vmem:[%s12711_s0 + $0x1d0] sm:$0xff] }
 0x3b0   :  { %6926 = vmatprep.subr.bf16.mxu0 %v11721_v20  ;;  %7614 = vmatprep.subr.bf16.mxu1 %v11724_v21  ;;  %v11811_v19 = vld [vmem:[#allocation2 + $0x1c04] ss:$16 sps:$4 sm:$0xff]   ;;  %v11814_v20 = vld [vmem:[#allocation2 + $0x1c0c] ss:$16 sps:$4 sm:$0xff]   ;;  %v193_v21 = vpack.c.bf16 %v161_v18, %v129_v17  ;;  %v11893_v17 = vld [vmem:[#allocation2 + $0x1dc0] ss:$16 sps:$4 sm:$0xff]  }
 0x3b1   :  { %6956 = vmatprep.mubr.bf16.mxu0 %v194_v22  ;;  %7644 = vmatprep.mubr.bf16.mxu1 %v194_v22  ;;  %v132_v22 = vld [vmem:[%s12711_s0 + $0xe8] sm:$0xff] }
 0x3b2   :  { %v11896_v18 = vld [vmem:[#allocation2 + $0x1dc8] ss:$16 sps:$4 sm:$0xff]  }
 0x3b3   :  { %6927 = vmatpush1.bf16.msra.mxu0 %v11719_v23  ;;  %7615 = vmatpush1.bf16.msra.mxu1 %v11722_v24  ;;  %v164_v23 = vld [vmem:[%s12711_s0 + $0x1e8] sm:$0xff]  ;;  %v11809_v24 = vld [vmem:[#allocation2 + $0x1c00] ss:$16 sps:$4 sm:$0xff]  }
 0x3b4   :  { %6928 = vmatprep.subr.bf16.mxu0 %v11727_v25  ;;  %7616 = vmatprep.subr.bf16.mxu1 %v11730_v26  ;;  %v11812_v25 = vld [vmem:[#allocation2 + $0x1c08] ss:$16 sps:$4 sm:$0xff]   ;;  %v11817_v26 = vld [vmem:[#allocation2 + $0x1c24] ss:$16 sps:$4 sm:$0xff]  }
 0x3b7   :  { %6929 = vmatpush1.bf16.msra.mxu0 %v11725_v27  ;;  %7617 = vmatpush1.bf16.msra.mxu1 %v11728_v28  ;;  %v11820_v27 = vld [vmem:[#allocation2 + $0x1c2c] ss:$16 sps:$4 sm:$0xff]   ;;  %v196_v28 = vpack.c.bf16 %v164_v23, %v132_v22  ;;  %v11902_v22 = vld [vmem:[#allocation2 + $0x1de8] ss:$16 sps:$4 sm:$0xff]   ;;  %v131_v23 = vld [vmem:[%s12711_s0 + $0xe0] sm:$0xff] }
 0x3b8   :  { %6930 = vmatprep.subr.bf16.mxu0 %v11733_v29  ;;  %7618 = vmatprep.subr.bf16.mxu1 %v11736_v30  ;;  %v11815_v29 = vld [vmem:[#allocation2 + $0x1c20] ss:$16 sps:$4 sm:$0xff]   ;;  %v11818_v30 = vld [vmem:[#allocation2 + $0x1c28] ss:$16 sps:$4 sm:$0xff]  }
 0x3bb   :  { %6931 = vmatpush1.bf16.msra.mxu0 %v11731_v31  ;;  %7619 = vmatpush1.bf16.msra.mxu1 %v11734_v32  ;;  %v11823_v31 = vld [vmem:[#allocation2 + $0x1c44] ss:$16 sps:$4 sm:$0xff]   ;;  %v11826_v32 = vld [vmem:[#allocation2 + $0x1c4c] ss:$16 sps:$4 sm:$0xff]  }
 0x3bc   :  { %6932 = vmatprep.subr.bf16.mxu0 %v11739_v33  ;;  %7620 = vmatprep.subr.bf16.mxu1 %v11742_v34  ;;  %v11821_v33 = vld [vmem:[#allocation2 + $0x1c40] ss:$16 sps:$4 sm:$0xff]   ;;  %v11824_v34 = vld [vmem:[#allocation2 + $0x1c48] ss:$16 sps:$4 sm:$0xff]  }
 0x3bf   :  { %6933 = vmatpush1.bf16.msra.mxu0 %v11737_v35  ;;  %7621 = vmatpush1.bf16.msra.mxu1 %v11740_v36  ;;  %v11829_v35 = vld [vmem:[#allocation2 + $0x1c64] ss:$16 sps:$4 sm:$0xff]   ;;  %v11832_v36 = vld [vmem:[#allocation2 + $0x1c6c] ss:$16 sps:$4 sm:$0xff]  }
 0x3c0   :  { %6934 = vmatprep.subr.bf16.mxu0 %v11745_v37  ;;  %7622 = vmatprep.subr.bf16.mxu1 %v11748_v38  ;;  %v11827_v37 = vld [vmem:[#allocation2 + $0x1c60] ss:$16 sps:$4 sm:$0xff]   ;;  %v11830_v38 = vld [vmem:[#allocation2 + $0x1c68] ss:$16 sps:$4 sm:$0xff]  }
 0x3c3   :  { %6935 = vmatpush1.bf16.msra.mxu0 %v11743_v39  ;;  %7623 = vmatpush1.bf16.msra.mxu1 %v11746_v40  ;;  %v11835_v39 = vld [vmem:[#allocation2 + $0x1c84] ss:$16 sps:$4 sm:$0xff]   ;;  %v11838_v40 = vld [vmem:[#allocation2 + $0x1c8c] ss:$16 sps:$4 sm:$0xff]  }
 0x3c4   :  { %6936 = vmatprep.subr.bf16.mxu0 %v11751_v41  ;;  %7624 = vmatprep.subr.bf16.mxu1 %v11754_v42  ;;  %v11833_v41 = vld [vmem:[#allocation2 + $0x1c80] ss:$16 sps:$4 sm:$0xff]   ;;  %v11836_v42 = vld [vmem:[#allocation2 + $0x1c88] ss:$16 sps:$4 sm:$0xff]  }
 0x3c7   :  { %6937 = vmatpush1.bf16.msra.mxu0 %v11749_v43  ;;  %7625 = vmatpush1.bf16.msra.mxu1 %v11752_v44  ;;  %v11841_v43 = vld [vmem:[#allocation2 + $0x1ca4] ss:$16 sps:$4 sm:$0xff]   ;;  %v11844_v44 = vld [vmem:[#allocation2 + $0x1cac] ss:$16 sps:$4 sm:$0xff]  }
 0x3c8   :  { %6938 = vmatprep.subr.bf16.mxu0 %v11757_v45  ;;  %7626 = vmatprep.subr.bf16.mxu1 %v11760_v46  ;;  %v11839_v45 = vld [vmem:[#allocation2 + $0x1ca0] ss:$16 sps:$4 sm:$0xff]   ;;  %v11842_v46 = vld [vmem:[#allocation2 + $0x1ca8] ss:$16 sps:$4 sm:$0xff]  }
 0x3cb   :  { %6939 = vmatpush1.bf16.msra.mxu0 %v11755_v47  ;;  %7627 = vmatpush1.bf16.msra.mxu1 %v11758_v48  ;;  %v11847_v47 = vld [vmem:[#allocation2 + $0x1cc4] ss:$16 sps:$4 sm:$0xff]   ;;  %v11850_v48 = vld [vmem:[#allocation2 + $0x1ccc] ss:$16 sps:$4 sm:$0xff]  }
 0x3cc   :  { %6940 = vmatprep.subr.bf16.mxu0 %v11763_v49  ;;  %7628 = vmatprep.subr.bf16.mxu1 %v11766_v50  ;;  %v11845_v49 = vld [vmem:[#allocation2 + $0x1cc0] ss:$16 sps:$4 sm:$0xff]   ;;  %v11848_v50 = vld [vmem:[#allocation2 + $0x1cc8] ss:$16 sps:$4 sm:$0xff]  }
 0x3cf   :  { %6941 = vmatpush1.bf16.msra.mxu0 %v11761_v51  ;;  %7629 = vmatpush1.bf16.msra.mxu1 %v11764_v52  ;;  %v11853_v51 = vld [vmem:[#allocation2 + $0x1ce4] ss:$16 sps:$4 sm:$0xff]   ;;  %v11856_v52 = vld [vmem:[#allocation2 + $0x1cec] ss:$16 sps:$4 sm:$0xff]  }
 0x3d0   :  { %6942 = vmatprep.subr.bf16.mxu0 %v11769_v53  ;;  %7630 = vmatprep.subr.bf16.mxu1 %v11772_v54  ;;  %v11851_v53 = vld [vmem:[#allocation2 + $0x1ce0] ss:$16 sps:$4 sm:$0xff]   ;;  %v11854_v54 = vld [vmem:[#allocation2 + $0x1ce8] ss:$16 sps:$4 sm:$0xff]  }
 0x3d3   :  { %6943 = vmatpush1.bf16.msra.mxu0 %v11767_v55  ;;  %7631 = vmatpush1.bf16.msra.mxu1 %v11770_v56  ;;  %v11859_v55 = vld [vmem:[#allocation2 + $0x1d04] ss:$16 sps:$4 sm:$0xff]   ;;  %v11862_v56 = vld [vmem:[#allocation2 + $0x1d0c] ss:$16 sps:$4 sm:$0xff]  }
 0x3d4   :  { %6944 = vmatprep.subr.bf16.mxu0 %v11775_v57  ;;  %7632 = vmatprep.subr.bf16.mxu1 %v11778_v58  ;;  %v11857_v57 = vld [vmem:[#allocation2 + $0x1d00] ss:$16 sps:$4 sm:$0xff]   ;;  %v11860_v58 = vld [vmem:[#allocation2 + $0x1d08] ss:$16 sps:$4 sm:$0xff]  }
 0x3d7   :  { %6945 = vmatpush1.bf16.msra.mxu0 %v11773_v59  ;;  %7633 = vmatpush1.bf16.msra.mxu1 %v11776_v60  ;;  %v11865_v59 = vld [vmem:[#allocation2 + $0x1d24] ss:$16 sps:$4 sm:$0xff]   ;;  %v11868_v60 = vld [vmem:[#allocation2 + $0x1d2c] ss:$16 sps:$4 sm:$0xff]  }
 0x3d8   :  { %6946 = vmatprep.subr.bf16.mxu0 %v11781_v61  ;;  %7634 = vmatprep.subr.bf16.mxu1 %v11784_v62  ;;  %v11863_v61 = vld [vmem:[#allocation2 + $0x1d20] ss:$16 sps:$4 sm:$0xff]   ;;  %v11866_v62 = vld [vmem:[#allocation2 + $0x1d28] ss:$16 sps:$4 sm:$0xff]  }
 0x3db   :  { %6947 = vmatpush1.bf16.msra.mxu0 %v11779_v63  ;;  %7635 = vmatpush1.bf16.msra.mxu1 %v11782_v0  ;;  %v11871_v63 = vld [vmem:[#allocation2 + $0x1d44] ss:$16 sps:$4 sm:$0xff]   ;;  %v11874_v0 = vld [vmem:[#allocation2 + $0x1d4c] ss:$16 sps:$4 sm:$0xff]  }
 0x3dc   :  { %6948 = vmatprep.subr.bf16.mxu0 %v11787_v1  ;;  %7636 = vmatprep.subr.bf16.mxu1 %v11790_v2  ;;  %v11869_v1 = vld [vmem:[#allocation2 + $0x1d40] ss:$16 sps:$4 sm:$0xff]   ;;  %v11872_v2 = vld [vmem:[#allocation2 + $0x1d48] ss:$16 sps:$4 sm:$0xff]  }
 0x3df   :  { %6949 = vmatpush1.bf16.msra.mxu0 %v11785_v3  ;;  %7637 = vmatpush1.bf16.msra.mxu1 %v11788_v4  ;;  %v11877_v3 = vld [vmem:[#allocation2 + $0x1d64] ss:$16 sps:$4 sm:$0xff]   ;;  %v11880_v4 = vld [vmem:[#allocation2 + $0x1d6c] ss:$16 sps:$4 sm:$0xff]  }
 0x3e0   :  { %6950 = vmatprep.subr.bf16.mxu0 %v11793_v5  ;;  %7638 = vmatprep.subr.bf16.mxu1 %v11796_v6  ;;  %v11875_v5 = vld [vmem:[#allocation2 + $0x1d60] ss:$16 sps:$4 sm:$0xff]   ;;  %v11878_v6 = vld [vmem:[#allocation2 + $0x1d68] ss:$16 sps:$4 sm:$0xff]  }
 0x3e3   :  { %6951 = vmatpush1.bf16.msra.mxu0 %v11791_v7  ;;  %7639 = vmatpush1.bf16.msra.mxu1 %v11794_v8  ;;  %v11883_v7 = vld [vmem:[#allocation2 + $0x1d84] ss:$16 sps:$4 sm:$0xff]   ;;  %v11886_v8 = vld [vmem:[#allocation2 + $0x1d8c] ss:$16 sps:$4 sm:$0xff]  }
 0x3e4   :  { %6952 = vmatprep.subr.bf16.mxu0 %v11799_v9  ;;  %7640 = vmatprep.subr.bf16.mxu1 %v11802_v10  ;;  %v11881_v9 = vld [vmem:[#allocation2 + $0x1d80] ss:$16 sps:$4 sm:$0xff]   ;;  %v11884_v10 = vld [vmem:[#allocation2 + $0x1d88] ss:$16 sps:$4 sm:$0xff]  }
 0x3e7   :  { %6953 = vmatpush1.bf16.msra.mxu0 %v11797_v11  ;;  %7641 = vmatpush1.bf16.msra.mxu1 %v11800_v12  ;;  %v11889_v11 = vld [vmem:[#allocation2 + $0x1da4] ss:$16 sps:$4 sm:$0xff]   ;;  %v11892_v12 = vld [vmem:[#allocation2 + $0x1dac] ss:$16 sps:$4 sm:$0xff]  }
 0x3e8   :  { %6954 = vmatprep.subr.bf16.mxu0 %v11805_v13  ;;  %7642 = vmatprep.subr.bf16.mxu1 %v11808_v14  ;;  %v11887_v13 = vld [vmem:[#allocation2 + $0x1da0] ss:$16 sps:$4 sm:$0xff]   ;;  %v11890_v14 = vld [vmem:[#allocation2 + $0x1da8] ss:$16 sps:$4 sm:$0xff]  }
 0x3eb   :  { %6955 = vmatpush1.bf16.msra.mxu0 %v11803_v15  ;;  %7643 = vmatpush1.bf16.msra.mxu1 %v11806_v16  ;;  %v11895_v15 = vld [vmem:[#allocation2 + $0x1dc4] ss:$16 sps:$4 sm:$0xff]   ;;  %v11898_v16 = vld [vmem:[#allocation2 + $0x1dcc] ss:$16 sps:$4 sm:$0xff]  }
 0x3ec   :  { %6967 = vmatprep.subr.bf16.mxu0 %v11811_v19  ;;  %7655 = vmatprep.subr.bf16.mxu1 %v11814_v20  ;;  %v11901_v19 = vld [vmem:[#allocation2 + $0x1de4] ss:$16 sps:$4 sm:$0xff]   ;;  %v11904_v20 = vld [vmem:[#allocation2 + $0x1dec] ss:$16 sps:$4 sm:$0xff]  }
 0x3ee   :  { %6957 = vmatmul.mubr.bf16.vlgmr.msra.gmra.mrb[0].mxu0 %v193_v21  ;;  %7645 = vmatmul.mubr.bf16.vlgmr.msra.gmra.mrb[0].mxu1 %v193_v21  ;;  %v11899_v21 = vld [vmem:[#allocation2 + $0x1de0] ss:$16 sps:$4 sm:$0xff]  }
 0x3ef   :  { %6968 = vmatpush1.bf16.msra.mxu0 %v11809_v24  ;;  %7656 = vmatpush1.bf16.msra.mxu1 %v11812_v25  ;;  %v163_v24 = vld [vmem:[%s12711_s0 + $0x1e0] sm:$0xff] }
 0x3f0   :  { %6969 = vmatprep.subr.bf16.mxu0 %v11817_v26  ;;  %7657 = vmatprep.subr.bf16.mxu1 %v11820_v27  ;;  %v11907_v25 = vld [vmem:[#allocation2 + $0x1e04] ss:$16 sps:$4 sm:$0xff]   ;;  %v11910_v26 = vld [vmem:[#allocation2 + $0x1e0c] ss:$16 sps:$4 sm:$0xff]   ;;  %v195_v27 = vpack.c.bf16 %v163_v24, %v131_v23  ;;  %v11989_v23 = vld [vmem:[#allocation2 + $0x1fc0] ss:$16 sps:$4 sm:$0xff]  }
 0x3f1   :  { %6999 = vmatprep.mubr.bf16.mxu0 %v196_v28  ;;  %7687 = vmatprep.mubr.bf16.mxu1 %v196_v28  ;;  %v134_v28 = vld [vmem:[%s12711_s0 + $0xf8] sm:$0xff] }
 0x3f2   :  { %v11992_v24 = vld [vmem:[#allocation2 + $0x1fc8] ss:$16 sps:$4 sm:$0xff]  }
 0x3f3   :  { %6970 = vmatpush1.bf16.msra.mxu0 %v11815_v29  ;;  %7658 = vmatpush1.bf16.msra.mxu1 %v11818_v30  ;;  %v166_v29 = vld [vmem:[%s12711_s0 + $0x1f8] sm:$0xff]  ;;  %v11905_v30 = vld [vmem:[#allocation2 + $0x1e00] ss:$16 sps:$4 sm:$0xff]  }
 0x3f4   :  { %6971 = vmatprep.subr.bf16.mxu0 %v11823_v31  ;;  %7659 = vmatprep.subr.bf16.mxu1 %v11826_v32  ;;  %v11908_v31 = vld [vmem:[#allocation2 + $0x1e08] ss:$16 sps:$4 sm:$0xff]   ;;  %v11913_v32 = vld [vmem:[#allocation2 + $0x1e24] ss:$16 sps:$4 sm:$0xff]  }
 0x3f7   :  { %6972 = vmatpush1.bf16.msra.mxu0 %v11821_v33  ;;  %7660 = vmatpush1.bf16.msra.mxu1 %v11824_v34  ;;  %v11916_v33 = vld [vmem:[#allocation2 + $0x1e2c] ss:$16 sps:$4 sm:$0xff]   ;;  %v198_v34 = vpack.c.bf16 %v166_v29, %v134_v28  ;;  %v11998_v28 = vld [vmem:[#allocation2 + $0x1fe8] ss:$16 sps:$4 sm:$0xff]   ;;  %v133_v29 = vld [vmem:[%s12711_s0 + $0xf0] sm:$0xff] }
 0x3f8   :  { %6973 = vmatprep.subr.bf16.mxu0 %v11829_v35  ;;  %7661 = vmatprep.subr.bf16.mxu1 %v11832_v36  ;;  %v11911_v35 = vld [vmem:[#allocation2 + $0x1e20] ss:$16 sps:$4 sm:$0xff]   ;;  %v11914_v36 = vld [vmem:[#allocation2 + $0x1e28] ss:$16 sps:$4 sm:$0xff]  }
 0x3fb   :  { %6974 = vmatpush1.bf16.msra.mxu0 %v11827_v37  ;;  %7662 = vmatpush1.bf16.msra.mxu1 %v11830_v38  ;;  %v11919_v37 = vld [vmem:[#allocation2 + $0x1e44] ss:$16 sps:$4 sm:$0xff]   ;;  %v11922_v38 = vld [vmem:[#allocation2 + $0x1e4c] ss:$16 sps:$4 sm:$0xff]  }
 0x3fc   :  { %6975 = vmatprep.subr.bf16.mxu0 %v11835_v39  ;;  %7663 = vmatprep.subr.bf16.mxu1 %v11838_v40  ;;  %v11917_v39 = vld [vmem:[#allocation2 + $0x1e40] ss:$16 sps:$4 sm:$0xff]   ;;  %v11920_v40 = vld [vmem:[#allocation2 + $0x1e48] ss:$16 sps:$4 sm:$0xff]  }
 0x3ff   :  { %6976 = vmatpush1.bf16.msra.mxu0 %v11833_v41  ;;  %7664 = vmatpush1.bf16.msra.mxu1 %v11836_v42  ;;  %v11925_v41 = vld [vmem:[#allocation2 + $0x1e64] ss:$16 sps:$4 sm:$0xff]   ;;  %v11928_v42 = vld [vmem:[#allocation2 + $0x1e6c] ss:$16 sps:$4 sm:$0xff]  }
 0x400   :  { %6977 = vmatprep.subr.bf16.mxu0 %v11841_v43  ;;  %7665 = vmatprep.subr.bf16.mxu1 %v11844_v44  ;;  %v11923_v43 = vld [vmem:[#allocation2 + $0x1e60] ss:$16 sps:$4 sm:$0xff]   ;;  %v11926_v44 = vld [vmem:[#allocation2 + $0x1e68] ss:$16 sps:$4 sm:$0xff]  }
 0x403   :  { %6978 = vmatpush1.bf16.msra.mxu0 %v11839_v45  ;;  %7666 = vmatpush1.bf16.msra.mxu1 %v11842_v46  ;;  %v11931_v45 = vld [vmem:[#allocation2 + $0x1e84] ss:$16 sps:$4 sm:$0xff]   ;;  %v11934_v46 = vld [vmem:[#allocation2 + $0x1e8c] ss:$16 sps:$4 sm:$0xff]  }
 0x404   :  { %6979 = vmatprep.subr.bf16.mxu0 %v11847_v47  ;;  %7667 = vmatprep.subr.bf16.mxu1 %v11850_v48  ;;  %v11929_v47 = vld [vmem:[#allocation2 + $0x1e80] ss:$16 sps:$4 sm:$0xff]   ;;  %v11932_v48 = vld [vmem:[#allocation2 + $0x1e88] ss:$16 sps:$4 sm:$0xff]  }
 0x407   :  { %6980 = vmatpush1.bf16.msra.mxu0 %v11845_v49  ;;  %7668 = vmatpush1.bf16.msra.mxu1 %v11848_v50  ;;  %v11937_v49 = vld [vmem:[#allocation2 + $0x1ea4] ss:$16 sps:$4 sm:$0xff]   ;;  %v11940_v50 = vld [vmem:[#allocation2 + $0x1eac] ss:$16 sps:$4 sm:$0xff]  }
 0x408   :  { %6981 = vmatprep.subr.bf16.mxu0 %v11853_v51  ;;  %7669 = vmatprep.subr.bf16.mxu1 %v11856_v52  ;;  %v11935_v51 = vld [vmem:[#allocation2 + $0x1ea0] ss:$16 sps:$4 sm:$0xff]   ;;  %v11938_v52 = vld [vmem:[#allocation2 + $0x1ea8] ss:$16 sps:$4 sm:$0xff]  }
 0x40b   :  { %6982 = vmatpush1.bf16.msra.mxu0 %v11851_v53  ;;  %7670 = vmatpush1.bf16.msra.mxu1 %v11854_v54  ;;  %v11943_v53 = vld [vmem:[#allocation2 + $0x1ec4] ss:$16 sps:$4 sm:$0xff]   ;;  %v11946_v54 = vld [vmem:[#allocation2 + $0x1ecc] ss:$16 sps:$4 sm:$0xff]  }
 0x40c   :  { %6983 = vmatprep.subr.bf16.mxu0 %v11859_v55  ;;  %7671 = vmatprep.subr.bf16.mxu1 %v11862_v56  ;;  %v11941_v55 = vld [vmem:[#allocation2 + $0x1ec0] ss:$16 sps:$4 sm:$0xff]   ;;  %v11944_v56 = vld [vmem:[#allocation2 + $0x1ec8] ss:$16 sps:$4 sm:$0xff]  }
 0x40f   :  { %6984 = vmatpush1.bf16.msra.mxu0 %v11857_v57  ;;  %7672 = vmatpush1.bf16.msra.mxu1 %v11860_v58  ;;  %v11949_v57 = vld [vmem:[#allocation2 + $0x1ee4] ss:$16 sps:$4 sm:$0xff]   ;;  %v11952_v58 = vld [vmem:[#allocation2 + $0x1eec] ss:$16 sps:$4 sm:$0xff]  }
 0x410   :  { %6985 = vmatprep.subr.bf16.mxu0 %v11865_v59  ;;  %7673 = vmatprep.subr.bf16.mxu1 %v11868_v60  ;;  %v11947_v59 = vld [vmem:[#allocation2 + $0x1ee0] ss:$16 sps:$4 sm:$0xff]   ;;  %v11950_v60 = vld [vmem:[#allocation2 + $0x1ee8] ss:$16 sps:$4 sm:$0xff]  }
 0x413   :  { %6986 = vmatpush1.bf16.msra.mxu0 %v11863_v61  ;;  %7674 = vmatpush1.bf16.msra.mxu1 %v11866_v62  ;;  %v11955_v61 = vld [vmem:[#allocation2 + $0x1f04] ss:$16 sps:$4 sm:$0xff]   ;;  %v11958_v62 = vld [vmem:[#allocation2 + $0x1f0c] ss:$16 sps:$4 sm:$0xff]  }
 0x414   :  { %6987 = vmatprep.subr.bf16.mxu0 %v11871_v63  ;;  %7675 = vmatprep.subr.bf16.mxu1 %v11874_v0  ;;  %v11953_v63 = vld [vmem:[#allocation2 + $0x1f00] ss:$16 sps:$4 sm:$0xff]   ;;  %v11956_v0 = vld [vmem:[#allocation2 + $0x1f08] ss:$16 sps:$4 sm:$0xff]  }
 0x417   :  { %6988 = vmatpush1.bf16.msra.mxu0 %v11869_v1  ;;  %7676 = vmatpush1.bf16.msra.mxu1 %v11872_v2  ;;  %v11961_v1 = vld [vmem:[#allocation2 + $0x1f24] ss:$16 sps:$4 sm:$0xff]   ;;  %v11964_v2 = vld [vmem:[#allocation2 + $0x1f2c] ss:$16 sps:$4 sm:$0xff]  }
 0x418   :  { %6989 = vmatprep.subr.bf16.mxu0 %v11877_v3  ;;  %7677 = vmatprep.subr.bf16.mxu1 %v11880_v4  ;;  %v11959_v3 = vld [vmem:[#allocation2 + $0x1f20] ss:$16 sps:$4 sm:$0xff]   ;;  %v11962_v4 = vld [vmem:[#allocation2 + $0x1f28] ss:$16 sps:$4 sm:$0xff]  }
 0x41b   :  { %6990 = vmatpush1.bf16.msra.mxu0 %v11875_v5  ;;  %7678 = vmatpush1.bf16.msra.mxu1 %v11878_v6  ;;  %v11967_v5 = vld [vmem:[#allocation2 + $0x1f44] ss:$16 sps:$4 sm:$0xff]   ;;  %v11970_v6 = vld [vmem:[#allocation2 + $0x1f4c] ss:$16 sps:$4 sm:$0xff]  }
 0x41c   :  { %6991 = vmatprep.subr.bf16.mxu0 %v11883_v7  ;;  %7679 = vmatprep.subr.bf16.mxu1 %v11886_v8  ;;  %v11965_v7 = vld [vmem:[#allocation2 + $0x1f40] ss:$16 sps:$4 sm:$0xff]   ;;  %v11968_v8 = vld [vmem:[#allocation2 + $0x1f48] ss:$16 sps:$4 sm:$0xff]  }
 0x41f   :  { %6992 = vmatpush1.bf16.msra.mxu0 %v11881_v9  ;;  %7680 = vmatpush1.bf16.msra.mxu1 %v11884_v10  ;;  %v11973_v9 = vld [vmem:[#allocation2 + $0x1f64] ss:$16 sps:$4 sm:$0xff]   ;;  %v11976_v10 = vld [vmem:[#allocation2 + $0x1f6c] ss:$16 sps:$4 sm:$0xff]  }
 0x420   :  { %6993 = vmatprep.subr.bf16.mxu0 %v11889_v11  ;;  %7681 = vmatprep.subr.bf16.mxu1 %v11892_v12  ;;  %v11971_v11 = vld [vmem:[#allocation2 + $0x1f60] ss:$16 sps:$4 sm:$0xff]   ;;  %v11974_v12 = vld [vmem:[#allocation2 + $0x1f68] ss:$16 sps:$4 sm:$0xff]  }
 0x423   :  { %6994 = vmatpush1.bf16.msra.mxu0 %v11887_v13  ;;  %7682 = vmatpush1.bf16.msra.mxu1 %v11890_v14  ;;  %v11979_v13 = vld [vmem:[#allocation2 + $0x1f84] ss:$16 sps:$4 sm:$0xff]   ;;  %v11982_v14 = vld [vmem:[#allocation2 + $0x1f8c] ss:$16 sps:$4 sm:$0xff]  }
 0x424   :  { %6995 = vmatprep.subr.bf16.mxu0 %v11895_v15  ;;  %7683 = vmatprep.subr.bf16.mxu1 %v11898_v16  ;;  %v11977_v15 = vld [vmem:[#allocation2 + $0x1f80] ss:$16 sps:$4 sm:$0xff]   ;;  %v11980_v16 = vld [vmem:[#allocation2 + $0x1f88] ss:$16 sps:$4 sm:$0xff]  }
 0x427   :  { %6996 = vmatpush1.bf16.msra.mxu0 %v11893_v17  ;;  %7684 = vmatpush1.bf16.msra.mxu1 %v11896_v18  ;;  %v11985_v17 = vld [vmem:[#allocation2 + $0x1fa4] ss:$16 sps:$4 sm:$0xff]   ;;  %v11988_v18 = vld [vmem:[#allocation2 + $0x1fac] ss:$16 sps:$4 sm:$0xff]  }
 0x428   :  { %6997 = vmatprep.subr.bf16.mxu0 %v11901_v19  ;;  %7685 = vmatprep.subr.bf16.mxu1 %v11904_v20  ;;  %v11983_v19 = vld [vmem:[#allocation2 + $0x1fa0] ss:$16 sps:$4 sm:$0xff]   ;;  %v11986_v20 = vld [vmem:[#allocation2 + $0x1fa8] ss:$16 sps:$4 sm:$0xff]  }
 0x42b   :  { %6998 = vmatpush1.bf16.msra.mxu0 %v11899_v21  ;;  %7686 = vmatpush1.bf16.msra.mxu1 %v11902_v22  ;;  %v11991_v21 = vld [vmem:[#allocation2 + $0x1fc4] ss:$16 sps:$4 sm:$0xff]   ;;  %v11994_v22 = vld [vmem:[#allocation2 + $0x1fcc] ss:$16 sps:$4 sm:$0xff]  }
 0x42c   :  { %7010 = vmatprep.subr.bf16.mxu0 %v11907_v25  ;;  %7698 = vmatprep.subr.bf16.mxu1 %v11910_v26  ;;  %v11997_v25 = vld [vmem:[#allocation2 + $0x1fe4] ss:$16 sps:$4 sm:$0xff]   ;;  %v12000_v26 = vld [vmem:[#allocation2 + $0x1fec] ss:$16 sps:$4 sm:$0xff]  }
 0x42e   :  { %7000 = vmatmul.mubr.bf16.vlgmr.msra.gmra.mrb[0].mxu0 %v195_v27  ;;  %7688 = vmatmul.mubr.bf16.vlgmr.msra.gmra.mrb[0].mxu1 %v195_v27  ;;  %v11995_v27 = vld [vmem:[#allocation2 + $0x1fe0] ss:$16 sps:$4 sm:$0xff]  }
 0x42f   :  { %7011 = vmatpush1.bf16.msra.mxu0 %v11905_v30  ;;  %7699 = vmatpush1.bf16.msra.mxu1 %v11908_v31  ;;  %v165_v30 = vld [vmem:[%s12711_s0 + $0x1f0] sm:$0xff]  ;;  %v12003_v31 = vld [vmem:[#allocation6 + $0x4] ss:$16 sps:$4 sm:$0xff]  }
 0x430   :  { %7012 = vmatprep.subr.bf16.mxu0 %v11913_v32  ;;  %7700 = vmatprep.subr.bf16.mxu1 %v11916_v33  ;;  %v12006_v32 = vld [vmem:[#allocation6 + $0xc] ss:$16 sps:$4 sm:$0xff]   ;;  %v197_v33 = vpack.c.bf16 %v165_v30, %v133_v29  ;;  %v12091_v30 = vld [vmem:[#allocation6 + $0x1e0] ss:$16 sps:$4 sm:$0xff]  }
 0x431   :  { %7042 = vmatprep.mubr.bf16.mxu0 %v198_v34  ;;  %7730 = vmatprep.mubr.bf16.mxu1 %v198_v34  ;;  %v12001_v34 = vld [vmem:[#allocation6] ss:$16 sps:$4 sm:$0xff]   ;;  %v12096_v29 = vld [vmem:[#allocation6 + $0x1ec] ss:$16 sps:$4 sm:$0xff]  }
 0x433   :  { %7013 = vmatpush1.bf16.msra.mxu0 %v11911_v35  ;;  %7701 = vmatpush1.bf16.msra.mxu1 %v11914_v36  ;;  %v12004_v35 = vld [vmem:[#allocation6 + $0x8] ss:$16 sps:$4 sm:$0xff]   ;;  %v12009_v36 = vld [vmem:[#allocation6 + $0x24] ss:$16 sps:$4 sm:$0xff]  }
 0x434   :  { %7014 = vmatprep.subr.bf16.mxu0 %v11919_v37  ;;  %7702 = vmatprep.subr.bf16.mxu1 %v11922_v38  ;;  %v12012_v37 = vld [vmem:[#allocation6 + $0x2c] ss:$16 sps:$4 sm:$0xff]   ;;  %v12007_v38 = vld [vmem:[#allocation6 + $0x20] ss:$16 sps:$4 sm:$0xff]  }
 0x437   :  { %7015 = vmatpush1.bf16.msra.mxu0 %v11917_v39  ;;  %7703 = vmatpush1.bf16.msra.mxu1 %v11920_v40  ;;  %v12010_v39 = vld [vmem:[#allocation6 + $0x28] ss:$16 sps:$4 sm:$0xff]   ;;  %v12015_v40 = vld [vmem:[#allocation6 + $0x44] ss:$16 sps:$4 sm:$0xff]  }
 0x438   :  { %7016 = vmatprep.subr.bf16.mxu0 %v11925_v41  ;;  %7704 = vmatprep.subr.bf16.mxu1 %v11928_v42  ;;  %v12018_v41 = vld [vmem:[#allocation6 + $0x4c] ss:$16 sps:$4 sm:$0xff]   ;;  %v12013_v42 = vld [vmem:[#allocation6 + $0x40] ss:$16 sps:$4 sm:$0xff]  }
 0x43b   :  { %7017 = vmatpush1.bf16.msra.mxu0 %v11923_v43  ;;  %7705 = vmatpush1.bf16.msra.mxu1 %v11926_v44  ;;  %v12016_v43 = vld [vmem:[#allocation6 + $0x48] ss:$16 sps:$4 sm:$0xff]   ;;  %v12021_v44 = vld [vmem:[#allocation6 + $0x64] ss:$16 sps:$4 sm:$0xff]  }
 0x43c   :  { %7018 = vmatprep.subr.bf16.mxu0 %v11931_v45  ;;  %7706 = vmatprep.subr.bf16.mxu1 %v11934_v46  ;;  %v12024_v45 = vld [vmem:[#allocation6 + $0x6c] ss:$16 sps:$4 sm:$0xff]   ;;  %v12019_v46 = vld [vmem:[#allocation6 + $0x60] ss:$16 sps:$4 sm:$0xff]  }
 0x43f   :  { %7019 = vmatpush1.bf16.msra.mxu0 %v11929_v47  ;;  %7707 = vmatpush1.bf16.msra.mxu1 %v11932_v48  ;;  %v12022_v47 = vld [vmem:[#allocation6 + $0x68] ss:$16 sps:$4 sm:$0xff]   ;;  %v12027_v48 = vld [vmem:[#allocation6 + $0x84] ss:$16 sps:$4 sm:$0xff]  }
 0x440   :  { %7020 = vmatprep.subr.bf16.mxu0 %v11937_v49  ;;  %7708 = vmatprep.subr.bf16.mxu1 %v11940_v50  ;;  %v12030_v49 = vld [vmem:[#allocation6 + $0x8c] ss:$16 sps:$4 sm:$0xff]   ;;  %v12025_v50 = vld [vmem:[#allocation6 + $0x80] ss:$16 sps:$4 sm:$0xff]  }
 0x443   :  { %7021 = vmatpush1.bf16.msra.mxu0 %v11935_v51  ;;  %7709 = vmatpush1.bf16.msra.mxu1 %v11938_v52  ;;  %v12028_v51 = vld [vmem:[#allocation6 + $0x88] ss:$16 sps:$4 sm:$0xff]   ;;  %v12033_v52 = vld [vmem:[#allocation6 + $0xa4] ss:$16 sps:$4 sm:$0xff]  }
 0x444   :  { %7022 = vmatprep.subr.bf16.mxu0 %v11943_v53  ;;  %7710 = vmatprep.subr.bf16.mxu1 %v11946_v54  ;;  %v12036_v53 = vld [vmem:[#allocation6 + $0xac] ss:$16 sps:$4 sm:$0xff]   ;;  %v12031_v54 = vld [vmem:[#allocation6 + $0xa0] ss:$16 sps:$4 sm:$0xff]  }
 0x447   :  { %7023 = vmatpush1.bf16.msra.mxu0 %v11941_v55  ;;  %7711 = vmatpush1.bf16.msra.mxu1 %v11944_v56  ;;  %v12034_v55 = vld [vmem:[#allocation6 + $0xa8] ss:$16 sps:$4 sm:$0xff]   ;;  %v12039_v56 = vld [vmem:[#allocation6 + $0xc4] ss:$16 sps:$4 sm:$0xff]  }
 0x448   :  { %7024 = vmatprep.subr.bf16.mxu0 %v11949_v57  ;;  %7712 = vmatprep.subr.bf16.mxu1 %v11952_v58  ;;  %v12042_v57 = vld [vmem:[#allocation6 + $0xcc] ss:$16 sps:$4 sm:$0xff]   ;;  %v12037_v58 = vld [vmem:[#allocation6 + $0xc0] ss:$16 sps:$4 sm:$0xff]  }
 0x44b   :  { %7025 = vmatpush1.bf16.msra.mxu0 %v11947_v59  ;;  %7713 = vmatpush1.bf16.msra.mxu1 %v11950_v60  ;;  %v12040_v59 = vld [vmem:[#allocation6 + $0xc8] ss:$16 sps:$4 sm:$0xff]   ;;  %v12045_v60 = vld [vmem:[#allocation6 + $0xe4] ss:$16 sps:$4 sm:$0xff]  }
 0x44c   :  { %7026 = vmatprep.subr.bf16.mxu0 %v11955_v61  ;;  %7714 = vmatprep.subr.bf16.mxu1 %v11958_v62  ;;  %v12048_v61 = vld [vmem:[#allocation6 + $0xec] ss:$16 sps:$4 sm:$0xff]   ;;  %v12043_v62 = vld [vmem:[#allocation6 + $0xe0] ss:$16 sps:$4 sm:$0xff]  }
 0x44f   :  { %7027 = vmatpush1.bf16.msra.mxu0 %v11953_v63  ;;  %7715 = vmatpush1.bf16.msra.mxu1 %v11956_v0  ;;  %v12046_v63 = vld [vmem:[#allocation6 + $0xe8] ss:$16 sps:$4 sm:$0xff]   ;;  %v12051_v0 = vld [vmem:[#allocation6 + $0x104] ss:$16 sps:$4 sm:$0xff]  }
 0x450   :  { %7028 = vmatprep.subr.bf16.mxu0 %v11961_v1  ;;  %7716 = vmatprep.subr.bf16.mxu1 %v11964_v2  ;;  %v12054_v1 = vld [vmem:[#allocation6 + $0x10c] ss:$16 sps:$4 sm:$0xff]   ;;  %v12049_v2 = vld [vmem:[#allocation6 + $0x100] ss:$16 sps:$4 sm:$0xff]  }
 0x453   :  { %7029 = vmatpush1.bf16.msra.mxu0 %v11959_v3  ;;  %7717 = vmatpush1.bf16.msra.mxu1 %v11962_v4  ;;  %v12052_v3 = vld [vmem:[#allocation6 + $0x108] ss:$16 sps:$4 sm:$0xff]   ;;  %v12057_v4 = vld [vmem:[#allocation6 + $0x124] ss:$16 sps:$4 sm:$0xff]  }
 0x454   :  { %7030 = vmatprep.subr.bf16.mxu0 %v11967_v5  ;;  %7718 = vmatprep.subr.bf16.mxu1 %v11970_v6  ;;  %v12060_v5 = vld [vmem:[#allocation6 + $0x12c] ss:$16 sps:$4 sm:$0xff]   ;;  %v12055_v6 = vld [vmem:[#allocation6 + $0x120] ss:$16 sps:$4 sm:$0xff]  }
 0x457   :  { %7031 = vmatpush1.bf16.msra.mxu0 %v11965_v7  ;;  %7719 = vmatpush1.bf16.msra.mxu1 %v11968_v8  ;;  %v12058_v7 = vld [vmem:[#allocation6 + $0x128] ss:$16 sps:$4 sm:$0xff]   ;;  %v12063_v8 = vld [vmem:[#allocation6 + $0x144] ss:$16 sps:$4 sm:$0xff]  }
 0x458   :  { %7032 = vmatprep.subr.bf16.mxu0 %v11973_v9  ;;  %7720 = vmatprep.subr.bf16.mxu1 %v11976_v10  ;;  %v12066_v9 = vld [vmem:[#allocation6 + $0x14c] ss:$16 sps:$4 sm:$0xff]   ;;  %v12061_v10 = vld [vmem:[#allocation6 + $0x140] ss:$16 sps:$4 sm:$0xff]  }
 0x45b   :  { %7033 = vmatpush1.bf16.msra.mxu0 %v11971_v11  ;;  %7721 = vmatpush1.bf16.msra.mxu1 %v11974_v12  ;;  %v12064_v11 = vld [vmem:[#allocation6 + $0x148] ss:$16 sps:$4 sm:$0xff]   ;;  %v12069_v12 = vld [vmem:[#allocation6 + $0x164] ss:$16 sps:$4 sm:$0xff]  }
 0x45c   :  { %7034 = vmatprep.subr.bf16.mxu0 %v11979_v13  ;;  %7722 = vmatprep.subr.bf16.mxu1 %v11982_v14  ;;  %v12072_v13 = vld [vmem:[#allocation6 + $0x16c] ss:$16 sps:$4 sm:$0xff]   ;;  %v12067_v14 = vld [vmem:[#allocation6 + $0x160] ss:$16 sps:$4 sm:$0xff]  }
 0x45f   :  { %7035 = vmatpush1.bf16.msra.mxu0 %v11977_v15  ;;  %7723 = vmatpush1.bf16.msra.mxu1 %v11980_v16  ;;  %v12070_v15 = vld [vmem:[#allocation6 + $0x168] ss:$16 sps:$4 sm:$0xff]   ;;  %v12075_v16 = vld [vmem:[#allocation6 + $0x184] ss:$16 sps:$4 sm:$0xff]  }
 0x460   :  { %7036 = vmatprep.subr.bf16.mxu0 %v11985_v17  ;;  %7724 = vmatprep.subr.bf16.mxu1 %v11988_v18  ;;  %v12078_v17 = vld [vmem:[#allocation6 + $0x18c] ss:$16 sps:$4 sm:$0xff]   ;;  %v12073_v18 = vld [vmem:[#allocation6 + $0x180] ss:$16 sps:$4 sm:$0xff]  }
 0x463   :  { %7037 = vmatpush1.bf16.msra.mxu0 %v11983_v19  ;;  %7725 = vmatpush1.bf16.msra.mxu1 %v11986_v20  ;;  %v12076_v19 = vld [vmem:[#allocation6 + $0x188] ss:$16 sps:$4 sm:$0xff]   ;;  %v12081_v20 = vld [vmem:[#allocation6 + $0x1a4] ss:$16 sps:$4 sm:$0xff]  }
 0x464   :  { %7038 = vmatprep.subr.bf16.mxu0 %v11991_v21  ;;  %7726 = vmatprep.subr.bf16.mxu1 %v11994_v22  ;;  %v12084_v21 = vld [vmem:[#allocation6 + $0x1ac] ss:$16 sps:$4 sm:$0xff]   ;;  %v12079_v22 = vld [vmem:[#allocation6 + $0x1a0] ss:$16 sps:$4 sm:$0xff]  }
 0x467   :  { %7039 = vmatpush1.bf16.msra.mxu0 %v11989_v23  ;;  %7727 = vmatpush1.bf16.msra.mxu1 %v11992_v24  ;;  %v12082_v23 = vld [vmem:[#allocation6 + $0x1a8] ss:$16 sps:$4 sm:$0xff]   ;;  %v12087_v24 = vld [vmem:[#allocation6 + $0x1c4] ss:$16 sps:$4 sm:$0xff]  }
 0x468   :  { %7040 = vmatprep.subr.bf16.mxu0 %v11997_v25  ;;  %7728 = vmatprep.subr.bf16.mxu1 %v12000_v26  ;;  %v12090_v25 = vld [vmem:[#allocation6 + $0x1cc] ss:$16 sps:$4 sm:$0xff]   ;;  %v12085_v26 = vld [vmem:[#allocation6 + $0x1c0] ss:$16 sps:$4 sm:$0xff]  }
 0x46b   :  { %7041 = vmatpush1.bf16.msra.mxu0 %v11995_v27  ;;  %7729 = vmatpush1.bf16.msra.mxu1 %v11998_v28  ;;  %v12088_v27 = vld [vmem:[#allocation6 + $0x1c8] ss:$16 sps:$4 sm:$0xff]   ;;  %v12093_v28 = vld [vmem:[#allocation6 + $0x1e4] ss:$16 sps:$4 sm:$0xff]  }
 0x46c   :  { %8543 = vmatprep.subr.bf16.mxu0 %v12003_v31  ;;  %8629 = vmatprep.subr.bf16.mxu1 %v12006_v32  ;;  %v12094_v31 = vld [vmem:[#allocation6 + $0x1e8] ss:$16 sps:$4 sm:$0xff]   ;;  %v12099_v32 = vld [vmem:[#allocation6 + $0x204] ss:$16 sps:$4 sm:$0xff]  }
 0x46e   :  { %7043 = vmatmul.mubr.bf16.vlgmr.msra.gmra.mrb[0].mxu0 %v197_v33  ;;  %7731 = vmatmul.mubr.bf16.vlgmr.msra.gmra.mrb[0].mxu1 %v197_v33  ;;  %v12102_v33 = vld [vmem:[#allocation6 + $0x20c] ss:$16 sps:$4 sm:$0xff]  }
 0x46f   :  { %8544 = vmatpush1.bf16.msra.mxu0 %v12001_v34  ;;  %8630 = vmatpush1.bf16.msra.mxu1 %v12004_v35  ;;  %v1225_v34 = vlaneseq }
 0x470   :  { %8545 = vmatprep.subr.bf16.mxu0 %v12009_v36  ;;  %8631 = vmatprep.subr.bf16.mxu1 %v12012_v37 }
 0x471   :  { %v12679_v35 = vshrl.u32 %v1225_v34, 7  ;;  %v12136_v34 = vld [vmem:[#allocation6 + $0x2c8] ss:$16 sps:$4 sm:$0xff]  }
 0x473   :  { %8546 = vmatpush1.bf16.msra.mxu0 %v12007_v38  ;;  %8632 = vmatpush1.bf16.msra.mxu1 %v12010_v39  ;;  %v1227_v36 = vsub.s32 0, %v12679_v35  ;;  %v1235_v37 = vsub.s32 2, %v12679_v35  ;;  %v1223_v38 = vld [vmem:[#allocation4] sm:$0xf]  ;;  %v1231_v39 = vsub.s32 1, %v12679_v35 }
 0x474   :  { %8547 = vmatprep.subr.bf16.mxu0 %v12015_v40  ;;  %8633 = vmatprep.subr.bf16.mxu1 %v12018_v41  ;;  %v1239_v40 = vsub.s32 3, %v12679_v35 }
 0x475   :  { %v1228_v41 = vrot.slane %v1223_v38, %v1227_v36 }
 0x477   :  { %8548 = vmatpush1.bf16.msra.mxu0 %v12013_v42  ;;  %8634 = vmatpush1.bf16.msra.mxu1 %v12016_v43  ;;  %v1236_v42 = vrot.slane %v1223_v38, %v1235_v37  ;;  %v1232_v43 = vrot.slane %v1223_v38, %v1231_v39 }
 0x478   :  { %8549 = vmatprep.subr.bf16.mxu0 %v12021_v44  ;;  %8635 = vmatprep.subr.bf16.mxu1 %v12024_v45  ;;  %v1240_v44 = vrot.slane %v1223_v38, %v1239_v40  ;;  %v12141_v38 = vld [vmem:[#allocation6 + $0x2e4] ss:$16 sps:$4 sm:$0xff]  }
 0x47b   :  { %8550 = vmatpush1.bf16.msra.mxu0 %v12019_v46  ;;  %8636 = vmatpush1.bf16.msra.mxu1 %v12022_v47 }
 0x47c   :  { %8551 = vmatprep.subr.bf16.mxu0 %v12027_v48  ;;  %8637 = vmatprep.subr.bf16.mxu1 %v12030_v49 }
 0x47f   :  { %8552 = vmatpush1.bf16.msra.mxu0 %v12025_v50  ;;  %8638 = vmatpush1.bf16.msra.mxu1 %v12028_v51 }
 0x480   :  { %8553 = vmatprep.subr.bf16.mxu0 %v12033_v52  ;;  %8639 = vmatprep.subr.bf16.mxu1 %v12036_v53 }
 0x483   :  { %8554 = vmatpush1.bf16.msra.mxu0 %v12031_v54  ;;  %8640 = vmatpush1.bf16.msra.mxu1 %v12034_v55 }
 0x484   :  { %8555 = vmatprep.subr.bf16.mxu0 %v12039_v56  ;;  %8641 = vmatprep.subr.bf16.mxu1 %v12042_v57 }
 0x487   :  { %8556 = vmatpush1.bf16.msra.mxu0 %v12037_v58  ;;  %8642 = vmatpush1.bf16.msra.mxu1 %v12040_v59 }
 0x488   :  { %8557 = vmatprep.subr.bf16.mxu0 %v12045_v60  ;;  %8643 = vmatprep.subr.bf16.mxu1 %v12048_v61 }
 0x48b   :  { %8558 = vmatpush1.bf16.msra.mxu0 %v12043_v62  ;;  %8644 = vmatpush1.bf16.msra.mxu1 %v12046_v63 }
 0x48c   :  { %8559 = vmatprep.subr.bf16.mxu0 %v12051_v0  ;;  %8645 = vmatprep.subr.bf16.mxu1 %v12054_v1 }
 0x48f   :  { %8560 = vmatpush1.bf16.msra.mxu0 %v12049_v2  ;;  %8646 = vmatpush1.bf16.msra.mxu1 %v12052_v3 }
 0x490   :  { %8561 = vmatprep.subr.bf16.mxu0 %v12057_v4  ;;  %8647 = vmatprep.subr.bf16.mxu1 %v12060_v5 }
 0x493   :  { %8562 = vmatpush1.bf16.msra.mxu0 %v12055_v6  ;;  %8648 = vmatpush1.bf16.msra.mxu1 %v12058_v7 }
 0x494   :  { %8563 = vmatprep.subr.bf16.mxu0 %v12063_v8  ;;  %8649 = vmatprep.subr.bf16.mxu1 %v12066_v9  ;;  %v12097_v9 = vld [vmem:[#allocation6 + $0x200] ss:$16 sps:$4 sm:$0xff]  }
 0x497   :  { %8564 = vmatpush1.bf16.msra.mxu0 %v12061_v10  ;;  %8650 = vmatpush1.bf16.msra.mxu1 %v12064_v11  ;;  %v12100_v10 = vld [vmem:[#allocation6 + $0x208] ss:$16 sps:$4 sm:$0xff]   ;;  %v12105_v11 = vld [vmem:[#allocation6 + $0x224] ss:$16 sps:$4 sm:$0xff]  }
 0x498   :  { %8565 = vmatprep.subr.bf16.mxu0 %v12069_v12  ;;  %8651 = vmatprep.subr.bf16.mxu1 %v12072_v13  ;;  %v12108_v12 = vld [vmem:[#allocation6 + $0x22c] ss:$16 sps:$4 sm:$0xff]   ;;  %v12103_v13 = vld [vmem:[#allocation6 + $0x220] ss:$16 sps:$4 sm:$0xff]  }
 0x49b   :  { %8566 = vmatpush1.bf16.msra.mxu0 %v12067_v14  ;;  %8652 = vmatpush1.bf16.msra.mxu1 %v12070_v15  ;;  %v12106_v14 = vld [vmem:[#allocation6 + $0x228] ss:$16 sps:$4 sm:$0xff]   ;;  %v12111_v15 = vld [vmem:[#allocation6 + $0x244] ss:$16 sps:$4 sm:$0xff]  }
 0x49c   :  { %8567 = vmatprep.subr.bf16.mxu0 %v12075_v16  ;;  %8653 = vmatprep.subr.bf16.mxu1 %v12078_v17  ;;  %v12114_v16 = vld [vmem:[#allocation6 + $0x24c] ss:$16 sps:$4 sm:$0xff]   ;;  %v12109_v17 = vld [vmem:[#allocation6 + $0x240] ss:$16 sps:$4 sm:$0xff]  }
 0x49f   :  { %8568 = vmatpush1.bf16.msra.mxu0 %v12073_v18  ;;  %8654 = vmatpush1.bf16.msra.mxu1 %v12076_v19  ;;  %v12112_v18 = vld [vmem:[#allocation6 + $0x248] ss:$16 sps:$4 sm:$0xff]   ;;  %v12117_v19 = vld [vmem:[#allocation6 + $0x264] ss:$16 sps:$4 sm:$0xff]  }
 0x4a0   :  { %8569 = vmatprep.subr.bf16.mxu0 %v12081_v20  ;;  %8655 = vmatprep.subr.bf16.mxu1 %v12084_v21  ;;  %v12120_v20 = vld [vmem:[#allocation6 + $0x26c] ss:$16 sps:$4 sm:$0xff]   ;;  %v12115_v21 = vld [vmem:[#allocation6 + $0x260] ss:$16 sps:$4 sm:$0xff]  }
 0x4a3   :  { %8570 = vmatpush1.bf16.msra.mxu0 %v12079_v22  ;;  %8656 = vmatpush1.bf16.msra.mxu1 %v12082_v23  ;;  %v12118_v22 = vld [vmem:[#allocation6 + $0x268] ss:$16 sps:$4 sm:$0xff]   ;;  %v12123_v23 = vld [vmem:[#allocation6 + $0x284] ss:$16 sps:$4 sm:$0xff]  }
 0x4a4   :  { %8571 = vmatprep.subr.bf16.mxu0 %v12087_v24  ;;  %8657 = vmatprep.subr.bf16.mxu1 %v12090_v25  ;;  %v12126_v24 = vld [vmem:[#allocation6 + $0x28c] ss:$16 sps:$4 sm:$0xff]   ;;  %v12121_v25 = vld [vmem:[#allocation6 + $0x280] ss:$16 sps:$4 sm:$0xff]  }
 0x4a7   :  { %8572 = vmatpush1.bf16.msra.mxu0 %v12085_v26  ;;  %8658 = vmatpush1.bf16.msra.mxu1 %v12088_v27  ;;  %v12124_v26 = vld [vmem:[#allocation6 + $0x288] ss:$16 sps:$4 sm:$0xff]   ;;  %v12129_v27 = vld [vmem:[#allocation6 + $0x2a4] ss:$16 sps:$4 sm:$0xff]  }
 0x4a8   :  { %8573 = vmatprep.subr.bf16.mxu0 %v12093_v28  ;;  %8659 = vmatprep.subr.bf16.mxu1 %v12096_v29  ;;  %v12132_v28 = vld [vmem:[#allocation6 + $0x2ac] ss:$16 sps:$4 sm:$0xff]   ;;  %v12127_v29 = vld [vmem:[#allocation6 + $0x2a0] ss:$16 sps:$4 sm:$0xff]  }
 0x4ab   :  { %8574 = vmatpush1.bf16.msra.mxu0 %v12091_v30  ;;  %8660 = vmatpush1.bf16.msra.mxu1 %v12094_v31  ;;  %v12130_v30 = vld [vmem:[#allocation6 + $0x2a8] ss:$16 sps:$4 sm:$0xff]   ;;  %v12135_v31 = vld [vmem:[#allocation6 + $0x2c4] ss:$16 sps:$4 sm:$0xff]  }
 0x4ac   :  { %8586 = vmatprep.subr.bf16.mxu0 %v12099_v32  ;;  %8672 = vmatprep.subr.bf16.mxu1 %v12102_v33  ;;  %v12138_v32 = vld [vmem:[#allocation6 + $0x2cc] ss:$16 sps:$4 sm:$0xff]   ;;  %v12133_v33 = vld [vmem:[#allocation6 + $0x2c0] ss:$16 sps:$4 sm:$0xff]  }
 0x541   :  { %v7044_v45 = vpop.f32.mrb[0].mxu0  ;;  %v7732_v46 = vpop.f32.mrb[0].mxu1 }
 0x542   :  { %v10311_v47 = vadd.f32 %v7044_v45, %v1228_v41  ;;  %v10315_v48 = vadd.f32 %v7732_v46, %v1236_v42  ;;  %v7046_v49 = vpop.f32.mrb[1].mxu0  ;;  %v7734_v50 = vpop.f32.mrb[1].mxu1  ;;  %v12150_v45 = vld [vmem:[#allocation6 + $0x30c] ss:$16 sps:$4 sm:$0xff]   ;;  %v12145_v46 = vld [vmem:[#allocation6 + $0x300] ss:$16 sps:$4 sm:$0xff]  }
 0x543   :  { %v10312_v51 = vadd.f32 %v7046_v49, %v1232_v43  ;;  %v10316_v52 = vadd.f32 %v7734_v50, %v1240_v44  ;;  %v7048_v53 = vpop.f32.mrb[2].mxu0  ;;  %v7736_v54 = vpop.f32.mrb[2].mxu1  ;;  %v12156_v49 = vld [vmem:[#allocation6 + $0x32c] ss:$16 sps:$4 sm:$0xff]   ;;  %v12151_v50 = vld [vmem:[#allocation6 + $0x320] ss:$16 sps:$4 sm:$0xff]  }
 0x544   :  { %v10313_v55 = vadd.f32 %v7048_v53, %v1228_v41  ;;  %v10317_v56 = vadd.f32 %v7736_v54, %v1236_v42  ;;  %v7050_v57 = vpop.f32.mrb[3].mxu0  ;;  %v7738_v58 = vpop.f32.mrb[3].mxu1  ;;  %v7741_v61 = vmax.f32 %v10311_v47, 0.0  ;;  %v7743_v62 = vmax.f32 %v10315_v48, 0.0  ;;  %v12144_v41 = vld [vmem:[#allocation6 + $0x2ec] ss:$16 sps:$4 sm:$0xff]  }
 0x545   :  { %v10314_v59 = vadd.f32 %v7050_v57, %v1232_v43  ;;  %v10318_v60 = vadd.f32 %v7738_v58, %v1240_v44  ;;  %v7742_v1 = vmax.f32 %v10312_v51, 0.0  ;;  %v7744_v2 = vmax.f32 %v10316_v52, 0.0  ;;  %v12139_v42 = vld [vmem:[#allocation6 + $0x2e0] ss:$16 sps:$4 sm:$0xff]   ;;  %v12142_v43 = vld [vmem:[#allocation6 + $0x2e8] ss:$16 sps:$4 sm:$0xff]  }
 0x546   :  { %v7745_v63 = vmax.f32 %v10313_v55, 0.0  ;;  %v7747_v0 = vmax.f32 %v10317_v56, 0.0  ;;  %v12147_v44 = vld [vmem:[#allocation6 + $0x304] ss:$16 sps:$4 sm:$0xff]   ;;  %v12148_v47 = vld [vmem:[#allocation6 + $0x308] ss:$16 sps:$4 sm:$0xff]  }
 0x547   :  { %v7746_v3 = vmax.f32 %v10314_v59, 0.0  ;;  %v7748_v4 = vmax.f32 %v10318_v60, 0.0  ;;  %v12153_v48 = vld [vmem:[#allocation6 + $0x324] ss:$16 sps:$4 sm:$0xff]   ;;  %v12154_v51 = vld [vmem:[#allocation6 + $0x328] ss:$16 sps:$4 sm:$0xff]  }
 0x548   :  { %v7749_v5 = vpack.c.bf16 %v7745_v63, %v7741_v61  ;;  %v12693_v6 = vpack.c.bf16 %v7747_v0, %v7743_v62  ;;  %v12159_v52 = vld [vmem:[#allocation6 + $0x344] ss:$16 sps:$4 sm:$0xff]   ;;  %v12162_v53 = vld [vmem:[#allocation6 + $0x34c] ss:$16 sps:$4 sm:$0xff]   ;;  %v12157_v54 = vld [vmem:[#allocation6 + $0x340] ss:$16 sps:$4 sm:$0xff]  }
 0x549   :  { %v7750_v7 = vpack.c.bf16 %v7746_v3, %v7742_v1  ;;  %v7752_v8 = vpack.c.bf16 %v7748_v4, %v7744_v2  ;;  %v12160_v55 = vld [vmem:[#allocation6 + $0x348] ss:$16 sps:$4 sm:$0xff]   ;;  %v12165_v56 = vld [vmem:[#allocation6 + $0x364] ss:$16 sps:$4 sm:$0xff]   ;;  %v12168_v57 = vld [vmem:[#allocation6 + $0x36c] ss:$16 sps:$4 sm:$0xff]  }
 0x54a   :  { %v12163_v58 = vld [vmem:[#allocation6 + $0x360] ss:$16 sps:$4 sm:$0xff]   ;;  %v12166_v59 = vld [vmem:[#allocation6 + $0x368] ss:$16 sps:$4 sm:$0xff]   ;;  %v12171_v60 = vld [vmem:[#allocation6 + $0x384] ss:$16 sps:$4 sm:$0xff]  }
 0x54b   :  { %8575 = vmatprep.mubr.bf16.mxu0 %v7750_v7  ;;  %8661 = vmatprep.mubr.bf16.mxu1 %v7750_v7  ;;  %v12174_v61 = vld [vmem:[#allocation6 + $0x38c] ss:$16 sps:$4 sm:$0xff]   ;;  %v12169_v62 = vld [vmem:[#allocation6 + $0x380] ss:$16 sps:$4 sm:$0xff]   ;;  %v12172_v63 = vld [vmem:[#allocation6 + $0x388] ss:$16 sps:$4 sm:$0xff]  }
 0x54c   :  { %8576 = vmatmul.mubr.bf16.vlgmr.msra.gmra.mrb[4].mxu0 %v7749_v5  ;;  %8662 = vmatmul.mubr.bf16.vlgmr.msra.gmra.mrb[4].mxu1 %v7749_v5  ;;  %v12177_v0 = vld [vmem:[#allocation6 + $0x3a4] ss:$16 sps:$4 sm:$0xff]   ;;  %v12180_v1 = vld [vmem:[#allocation6 + $0x3ac] ss:$16 sps:$4 sm:$0xff]   ;;  %v12175_v2 = vld [vmem:[#allocation6 + $0x3a0] ss:$16 sps:$4 sm:$0xff]  }
 0x54d   :  { %8587 = vmatpush1.bf16.msra.mxu0 %v12097_v9  ;;  %8673 = vmatpush1.bf16.msra.mxu1 %v12100_v10  ;;  %v12178_v3 = vld [vmem:[#allocation6 + $0x3a8] ss:$16 sps:$4 sm:$0xff]   ;;  %v12183_v4 = vld [vmem:[#allocation6 + $0x3c4] ss:$16 sps:$4 sm:$0xff]   ;;  %v12186_v5 = vld [vmem:[#allocation6 + $0x3cc] ss:$16 sps:$4 sm:$0xff]  }
 0x54e   :  { %8618 = vmatprep.mubr.bf16.mxu0 %v7752_v8  ;;  %8704 = vmatprep.mubr.bf16.mxu1 %v7752_v8  ;;  %v12181_v7 = vld [vmem:[#allocation6 + $0x3c0] ss:$16 sps:$4 sm:$0xff]   ;;  %v12184_v8 = vld [vmem:[#allocation6 + $0x3c8] ss:$16 sps:$4 sm:$0xff]   ;;  %v12189_v9 = vld [vmem:[#allocation6 + $0x3e4] ss:$16 sps:$4 sm:$0xff]  }
 0x54f   :  { %8588 = vmatprep.subr.bf16.mxu0 %v12105_v11  ;;  %8674 = vmatprep.subr.bf16.mxu1 %v12108_v12  ;;  %v12192_v10 = vld [vmem:[#allocation6 + $0x3ec] ss:$16 sps:$4 sm:$0xff]   ;;  %v12187_v11 = vld [vmem:[#allocation6 + $0x3e0] ss:$16 sps:$4 sm:$0xff]   ;;  %v12190_v12 = vld [vmem:[#allocation6 + $0x3e8] ss:$16 sps:$4 sm:$0xff]  }
 0x551   :  { %8589 = vmatpush1.bf16.msra.mxu0 %v12103_v13  ;;  %8675 = vmatpush1.bf16.msra.mxu1 %v12106_v14  ;;  %v12193_v13 = vld [vmem:[#allocation9 + $0x40] sm:$0xff]  }
 0x552   :  { %8590 = vmatprep.subr.bf16.mxu0 %v12111_v15  ;;  %8676 = vmatprep.subr.bf16.mxu1 %v12114_v16  ;;  %v12194_v14 = vld [vmem:[#allocation9 + $0xc0] sm:$0xff]  }
 0x553   :  { %v12195_v15 = vld [vmem:[#allocation9] sm:$0xff]  }
 0x554   :  { %v12196_v16 = vld [vmem:[#allocation9 + $0x80] sm:$0xff]  }
 0x555   :  { %8591 = vmatpush1.bf16.msra.mxu0 %v12109_v17  ;;  %8677 = vmatpush1.bf16.msra.mxu1 %v12112_v18  ;;  %v12197_v17 = vld [vmem:[#allocation9 + $0x48] sm:$0xff]  }
 0x556   :  { %8592 = vmatprep.subr.bf16.mxu0 %v12117_v19  ;;  %8678 = vmatprep.subr.bf16.mxu1 %v12120_v20  ;;  %v12198_v18 = vld [vmem:[#allocation9 + $0xc8] sm:$0xff]  }
 0x557   :  { %v12199_v19 = vld [vmem:[#allocation9 + $0x8] sm:$0xff]  }
 0x558   :  { %v12200_v20 = vld [vmem:[#allocation9 + $0x88] sm:$0xff]  }
 0x559   :  { %8593 = vmatpush1.bf16.msra.mxu0 %v12115_v21  ;;  %8679 = vmatpush1.bf16.msra.mxu1 %v12118_v22  ;;  %v12201_v21 = vld [vmem:[#allocation9 + $0x50] sm:$0xff]  }
 0x55a   :  { %8594 = vmatprep.subr.bf16.mxu0 %v12123_v23  ;;  %8680 = vmatprep.subr.bf16.mxu1 %v12126_v24  ;;  %v12202_v22 = vld [vmem:[#allocation9 + $0xd0] sm:$0xff]  }
 0x55b   :  { %v12203_v23 = vld [vmem:[#allocation9 + $0x10] sm:$0xff]  }
 0x55c   :  { %v12204_v24 = vld [vmem:[#allocation9 + $0x90] sm:$0xff]  }
 0x55d   :  { %8595 = vmatpush1.bf16.msra.mxu0 %v12121_v25  ;;  %8681 = vmatpush1.bf16.msra.mxu1 %v12124_v26  ;;  %v12205_v25 = vld [vmem:[#allocation9 + $0x58] sm:$0xff]  }
 0x55e   :  { %8596 = vmatprep.subr.bf16.mxu0 %v12129_v27  ;;  %8682 = vmatprep.subr.bf16.mxu1 %v12132_v28  ;;  %v12206_v26 = vld [vmem:[#allocation9 + $0xd8] sm:$0xff]   ;;  %v12209_v28 = vld [vmem:[#allocation9 + $0x60] sm:$0xff]  }
 0x55f   :  { %v12207_v27 = vld [vmem:[#allocation9 + $0x18] sm:$0xff]  }
 0x561   :  { %8597 = vmatpush1.bf16.msra.mxu0 %v12127_v29  ;;  %8683 = vmatpush1.bf16.msra.mxu1 %v12130_v30  ;;  %v12210_v29 = vld [vmem:[#allocation9 + $0xe0] sm:$0xff]  }
 0x562   :  { %8598 = vmatprep.subr.bf16.mxu0 %v12135_v31  ;;  %8684 = vmatprep.subr.bf16.mxu1 %v12138_v32  ;;  %v12211_v30 = vld [vmem:[#allocation9 + $0x20] sm:$0xff]   ;;  %v12213_v32 = vld [vmem:[#allocation9 + $0x68] sm:$0xff]  }
 0x563   :  { %v12212_v31 = vld [vmem:[#allocation9 + $0xa0] sm:$0xff]  }
 0x565   :  { %8599 = vmatpush1.bf16.msra.mxu0 %v12133_v33  ;;  %8685 = vmatpush1.bf16.msra.mxu1 %v12136_v34  ;;  %v12214_v33 = vld [vmem:[#allocation9 + $0xe8] sm:$0xff]  }
 0x566   :  { %8600 = vmatprep.subr.bf16.mxu0 %v12141_v38  ;;  %8686 = vmatprep.subr.bf16.mxu1 %v12144_v41  ;;  %v12215_v34 = vld [vmem:[#allocation9 + $0x28] sm:$0xff]   ;;  %v12217_v41 = vld [vmem:[#allocation9 + $0x70] sm:$0xff]  }
 0x567   :  { %v12216_v38 = vld [vmem:[#allocation9 + $0xa8] sm:$0xff]  }
 0x569   :  { %8601 = vmatpush1.bf16.msra.mxu0 %v12139_v42  ;;  %8687 = vmatpush1.bf16.msra.mxu1 %v12142_v43  ;;  %v12218_v42 = vld [vmem:[#allocation9 + $0xf0] sm:$0xff]  }
 0x56a   :  { %8602 = vmatprep.subr.bf16.mxu0 %v12147_v44  ;;  %8688 = vmatprep.subr.bf16.mxu1 %v12150_v45  ;;  %v12219_v43 = vld [vmem:[#allocation9 + $0x30] sm:$0xff]   ;;  %v12221_v45 = vld [vmem:[#allocation9 + $0x78] sm:$0xff]  }
 0x56b   :  { %v12220_v44 = vld [vmem:[#allocation9 + $0xb0] sm:$0xff]  }
 0x56d   :  { %8603 = vmatpush1.bf16.msra.mxu0 %v12145_v46  ;;  %8689 = vmatpush1.bf16.msra.mxu1 %v12148_v47  ;;  %v12222_v46 = vld [vmem:[#allocation9 + $0xf8] sm:$0xff]  }
 0x56e   :  { %8604 = vmatprep.subr.bf16.mxu0 %v12153_v48  ;;  %8690 = vmatprep.subr.bf16.mxu1 %v12156_v49  ;;  %v12223_v47 = vld [vmem:[#allocation9 + $0x38] sm:$0xff]  }
 0x56f   :  { %v12224_v48 = vld [vmem:[#allocation9 + $0xb8] sm:$0xff]  }
 0x570   :  { %v7881_v49 = vld [vmem:[#allocation7] sm:$0xf] }
 0x571   :  { %8605 = vmatpush1.bf16.msra.mxu0 %v12151_v50  ;;  %8691 = vmatpush1.bf16.msra.mxu1 %v12154_v51  ;;  %v7886_v50 = vrot.slane %v7881_v49, %v1227_v36  ;;  %v7894_v51 = vrot.slane %v7881_v49, %v1235_v37 }
 0x572   :  { %8606 = vmatprep.subr.bf16.mxu0 %v12159_v52  ;;  %8692 = vmatprep.subr.bf16.mxu1 %v12162_v53  ;;  %v7890_v52 = vrot.slane %v7881_v49, %v1231_v39  ;;  %v7898_v53 = vrot.slane %v7881_v49, %v1239_v40 }
 0x575   :  { %8607 = vmatpush1.bf16.msra.mxu0 %v12157_v54  ;;  %8693 = vmatpush1.bf16.msra.mxu1 %v12160_v55 }
 0x576   :  { %8608 = vmatprep.subr.bf16.mxu0 %v12165_v56  ;;  %8694 = vmatprep.subr.bf16.mxu1 %v12168_v57 }
 0x579   :  { %8609 = vmatpush1.bf16.msra.mxu0 %v12163_v58  ;;  %8695 = vmatpush1.bf16.msra.mxu1 %v12166_v59 }
 0x57a   :  { %8610 = vmatprep.subr.bf16.mxu0 %v12171_v60  ;;  %8696 = vmatprep.subr.bf16.mxu1 %v12174_v61 }
 0x57d   :  { %8611 = vmatpush1.bf16.msra.mxu0 %v12169_v62  ;;  %8697 = vmatpush1.bf16.msra.mxu1 %v12172_v63 }
 0x57e   :  { %8612 = vmatprep.subr.bf16.mxu0 %v12177_v0  ;;  %8698 = vmatprep.subr.bf16.mxu1 %v12180_v1 }
 0x581   :  { %8613 = vmatpush1.bf16.msra.mxu0 %v12175_v2  ;;  %8699 = vmatpush1.bf16.msra.mxu1 %v12178_v3 }
 0x582   :  { %8614 = vmatprep.subr.bf16.mxu0 %v12183_v4  ;;  %8700 = vmatprep.subr.bf16.mxu1 %v12186_v5 }
 0x585   :  { %8615 = vmatpush1.bf16.msra.mxu0 %v12181_v7  ;;  %8701 = vmatpush1.bf16.msra.mxu1 %v12184_v8 }
 0x586   :  { %8616 = vmatprep.subr.bf16.mxu0 %v12189_v9  ;;  %8702 = vmatprep.subr.bf16.mxu1 %v12192_v10 }
 0x589   :  { %8617 = vmatpush1.bf16.msra.mxu0 %v12187_v11  ;;  %8703 = vmatpush1.bf16.msra.mxu1 %v12190_v12 }
 0x58a   :  { %10267 = vmatprep.subr.bf16.mxu0 %v12193_v13  ;;  %10289 = vmatprep.subr.bf16.mxu1 %v12194_v14 }
 0x58c   :  { %8619 = vmatmul.mubr.bf16.vlgmr.msra.gmra.mrb[4].mxu0 %v12693_v6  ;;  %8705 = vmatmul.mubr.bf16.vlgmr.msra.gmra.mrb[4].mxu1 %v12693_v6  ;;  %v12208_v6 = vld [vmem:[#allocation9 + $0x98] sm:$0xff]  }
 0x58d   :  { %10268 = vmatpush3.bf16.msra.mxu0 %v12195_v15  ;;  %10290 = vmatpush3.bf16.msra.mxu1 %v12196_v16  ;;  %v10234_v16 = vld [vmem:[#allocation10] ss:$0 sm:$0xff] }
 0x58e   :  { %10269 = vmatprep.subr.bf16.mxu0 %v12197_v17  ;;  %10291 = vmatprep.subr.bf16.mxu1 %v12198_v18 }
 0x591   :  { %10270 = vmatpush3.bf16.msra.mxu0 %v12199_v19  ;;  %10292 = vmatpush3.bf16.msra.mxu1 %v12200_v20 }
 0x592   :  { %10271 = vmatprep.subr.bf16.mxu0 %v12201_v21  ;;  %10293 = vmatprep.subr.bf16.mxu1 %v12202_v22 }
 0x595   :  { %10272 = vmatpush3.bf16.msra.mxu0 %v12203_v23  ;;  %10294 = vmatpush3.bf16.msra.mxu1 %v12204_v24 }
 0x596   :  { %10273 = vmatprep.subr.bf16.mxu0 %v12205_v25  ;;  %10295 = vmatprep.subr.bf16.mxu1 %v12206_v26 }
 0x599   :  { %10274 = vmatpush3.bf16.msra.mxu0 %v12207_v27  ;;  %10296 = vmatpush3.bf16.msra.mxu1 %v12208_v6 }
 0x59a   :  { %10275 = vmatprep.subr.bf16.mxu0 %v12209_v28  ;;  %10297 = vmatprep.subr.bf16.mxu1 %v12210_v29 }
 0x59d   :  { %10276 = vmatpush3.bf16.msra.mxu0 %v12211_v30  ;;  %10298 = vmatpush3.bf16.msra.mxu1 %v12212_v31 }
 0x59e   :  { %10277 = vmatprep.subr.bf16.mxu0 %v12213_v32  ;;  %10299 = vmatprep.subr.bf16.mxu1 %v12214_v33 }
 0x5a1   :  { %10278 = vmatpush3.bf16.msra.mxu0 %v12215_v34  ;;  %10300 = vmatpush3.bf16.msra.mxu1 %v12216_v38 }
 0x5a2   :  { %10279 = vmatprep.subr.bf16.mxu0 %v12217_v41  ;;  %10301 = vmatprep.subr.bf16.mxu1 %v12218_v42 }
 0x5a5   :  { %10280 = vmatpush3.bf16.msra.mxu0 %v12219_v43  ;;  %10302 = vmatpush3.bf16.msra.mxu1 %v12220_v44 }
 0x5a6   :  { %10281 = vmatprep.subr.bf16.mxu0 %v12221_v45  ;;  %10303 = vmatprep.subr.bf16.mxu1 %v12222_v46 }
 0x5a9   :  { %10282 = vmatpush3.bf16.msra.mxu0 %v12223_v47  ;;  %10304 = vmatpush3.bf16.msra.mxu1 %v12224_v48 }
 0x65f   :  { %v8620_v54 = vpop.f32.mrb[4].mxu0  ;;  %v8706_v55 = vpop.f32.mrb[4].mxu1 }
 0x660   :  { %v10319_v56 = vadd.f32 %v8620_v54, %v7886_v50  ;;  %v10323_v57 = vadd.f32 %v8706_v55, %v7894_v51  ;;  %v8622_v58 = vpop.f32.mrb[5].mxu0  ;;  %v8708_v59 = vpop.f32.mrb[5].mxu1 }
 0x661   :  { %v10320_v60 = vadd.f32 %v8622_v58, %v7890_v52  ;;  %v10324_v61 = vadd.f32 %v8708_v59, %v7898_v53  ;;  %v8624_v62 = vpop.f32.mrb[6].mxu0  ;;  %v8710_v63 = vpop.f32.mrb[6].mxu1 }
 0x662   :  { %v10321_v36 = vadd.f32 %v8624_v62, %v7886_v50  ;;  %v10325_v0 = vadd.f32 %v8710_v63, %v7894_v51  ;;  %v8626_v1 = vpop.f32.mrb[7].mxu0  ;;  %v8712_v37 = vpop.f32.mrb[7].mxu1  ;;  %v8715_v39 = vmax.f32 %v10319_v56, 0.0  ;;  %v8717_v4 = vmax.f32 %v10323_v57, 0.0 }
 0x663   :  { %v10322_v2 = vadd.f32 %v8626_v1, %v7890_v52  ;;  %v10326_v3 = vadd.f32 %v8712_v37, %v7898_v53  ;;  %v8716_v5 = vmax.f32 %v10320_v60, 0.0  ;;  %v8718_v7 = vmax.f32 %v10324_v61, 0.0 }
 0x664   :  { %v8719_v35 = vmax.f32 %v10321_v36, 0.0  ;;  %v8721_v40 = vmax.f32 %v10325_v0, 0.0 }
 0x665   :  { %v8720_v8 = vmax.f32 %v10322_v2, 0.0  ;;  %v8722_v9 = vmax.f32 %v10326_v3, 0.0 }
 0x666   :  { %v8723_v10 = vpack.c.bf16 %v8719_v35, %v8715_v39  ;;  %v8725_v11 = vpack.c.bf16 %v8721_v40, %v8717_v4 }
 0x667   :  { %v8724_v12 = vpack.c.bf16 %v8720_v8, %v8716_v5  ;;  %v8726_v13 = vpack.c.bf16 %v8722_v9, %v8718_v7 }
 0x669   :  { %9022 = vmatprep.mubr.bf16.mxu0 %v8724_v12  ;;  %9063 = vmatprep.mubr.bf16.mxu1 %v8726_v13 }
 0x66a   :  { %9023 = vmatmul.mubr.bf16.vlgmr.msra.gmra.mrb[8].mxu0 %v8723_v10  ;;  %9064 = vmatmul.mubr.bf16.vlgmr.msra.gmra.mrb[8].mxu1 %v8725_v11 }
 0x73d   :  { %v10283_v14 = vpop.f32.mrb[8].mxu0  ;;  %v10305_v15 = vpop.f32.mrb[8].mxu1 }
 0x73e   :  { %v10284_v17 = vpop.f32.mrb[9].mxu0  ;;  %v10306_v18 = vpop.f32.mrb[9].mxu1 }
 0x73f   :  { %v10285_v19 = vadd.f32 %v10284_v17, %v10283_v14  ;;  %v10307_v20 = vadd.f32 %v10306_v18, %v10305_v15  ;;  %v10286_v21 = vpop.f32.mrb[10].mxu0  ;;  %v10308_v22 = vpop.f32.mrb[10].mxu1 }
 0x740   :  { %v10287_v23 = vpop.f32.mrb[11].mxu0  ;;  %v10309_v24 = vpop.f32.mrb[11].mxu1 }
 0x741   :  { %v9025_v25 = vadd.f32 %v10285_v19, %v10234_v16  ;;  %v10288_v26 = vadd.f32 %v10287_v23, %v10286_v21  ;;  %v10310_v27 = vadd.f32 %v10309_v24, %v10308_v22 }
 0x743   :  { %v9066_v6 = vadd.f32 %v10307_v20, %v9025_v25  ;;  %v9028_v28 = vadd.f32 %v10288_v26, %v10234_v16 }
 0x745   :  { %9072 = vst [vmem:[%s12718_s7] sm:$0xff] %v9066_v6  ;;  %v9069_v29 = vadd.f32 %v10310_v27, %v9028_v28 }
 0x747   :  { %9073 = vst [vmem:[%s12718_s7 + $0x8] sm:$0xff] %v9069_v29 }
 0x748   :  { %9078 = vsyncpa [#allocation3], 1 }
 0x749   :  { %9079 = vsyncpa [#allocation5], 1 }
 0x74a   :  { %9080 = vsyncpa [#allocation8], 1 }
 0x74b   :  { %9081 = vsyncpa [#allocation11], 1 }

</bundles_post_ra>
